<compile_context>
chip_gen: v6e
topology: v6e:2x2x1
jax: 0.10.0
libtpu: 0.0.40
codegen_flags: <defaults>
</compile_context>

<pallas_src>
import functools

import jax
import jax.numpy as jnp
from jax.experimental import pallas as pl
from jax.experimental.pallas import tpu as pltpu


BN_EPS = 1e-5
TK = 256      # contraction (K) tile for the fused GEMM; K is padded to this
LANE = 128    # lane padding for the classifier output

CONV_CFG = [
    # (cin, cout, kernel, pad)
    (3, 64, 5, 2),
    (64, 128, 5, 2),
    (128, 256, 3, 1),
    (256, 512, 3, 1),
    (512, 1024, 3, 1),
]


# ----------------------------------------------------------------------------
# small helpers
# ----------------------------------------------------------------------------
def _round_up(x, m):
    return ((x + m - 1) // m) * m


def _pick_block(total, target, aligns=(16, 8)):
    """Largest divisor of `total` that is <= target and a multiple of one of
    `aligns` (TPU second-minor tiling).  Falls back to the full extent."""
    if total <= target:
        return total
    for a in aligns:
        d = (target // a) * a
        while d >= a:
            if total % d == 0:
                return d
            d -= a
    return total


# ----------------------------------------------------------------------------
# fused GEMM: out = [relu]((x @ w) * scale + shift)
# ----------------------------------------------------------------------------
def _fused_gemm_kernel(x_ref, w_ref, scale_ref, shift_ref, o_ref, acc_ref, *, relu):
    @pl.when(pl.program_id(2) == 0)
    def _():
        acc_ref[...] = jnp.zeros_like(acc_ref)

    acc_ref[...] += jnp.dot(x_ref[...], w_ref[...],
                            preferred_element_type=jnp.float32)

    @pl.when(pl.program_id(2) == pl.num_programs(2) - 1)
    def _():
        y = acc_ref[...] * scale_ref[...] + shift_ref[...]
        if relu:
            y = jnp.maximum(y, 0.0)
        o_ref[...] = y.astype(o_ref.dtype)


def fused_gemm(x, w, scale, shift, *, relu=True, out_dtype=jnp.bfloat16,
               tm_target=512, tn_target=256, tk=TK):
    """x: (M, K) bf16 (K multiple of tk), w: (K, N) bf16, scale/shift: (N,) f32."""
    M, K = x.shape
    K2, N = w.shape
    assert K == K2 and K % tk == 0
    tm = _pick_block(M, tm_target)
    tn = _pick_block(N, tn_target, aligns=(128,))
    assert M % tm == 0 and N % tn == 0
    grid = (M // tm, N // tn, K // tk)

    scale2 = scale.reshape(1, N).astype(jnp.float32)
    shift2 = shift.reshape(1, N).astype(jnp.float32)

    cost = pl.CostEstimate(
        flops=2 * M * K * N,
        transcendentals=0,
        bytes_accessed=int(M * K * x.dtype.itemsize + K * N * w.dtype.itemsize
                           + M * N * jnp.dtype(out_dtype).itemsize + 8 * N),
    )

    return pl.pallas_call(
        functools.partial(_fused_gemm_kernel, relu=relu),
        out_shape=jax.ShapeDtypeStruct((M, N), out_dtype),
        grid=grid,
        in_specs=[
            pl.BlockSpec((tm, tk), lambda i, j, k: (i, k)),   # activations
            pl.BlockSpec((tk, tn), lambda i, j, k: (k, j)),   # weights
            pl.BlockSpec((1, tn), lambda i, j, k: (0, j)),    # BN scale
            pl.BlockSpec((1, tn), lambda i, j, k: (0, j)),    # BN shift (+bias)
        ],
        out_specs=pl.BlockSpec((tm, tn), lambda i, j, k: (i, j)),
        scratch_shapes=[pltpu.VMEM((tm, tn), jnp.float32)],
        compiler_params=pltpu.CompilerParams(
            dimension_semantics=("parallel", "parallel", "arbitrary")),
        cost_estimate=cost,
    )(x, w, scale2, shift2)


# ----------------------------------------------------------------------------
# MaxPool2d(2): two tiled "pair max over lane halves" passes on reshape views
# ----------------------------------------------------------------------------
def _pair_max_kernel(x_ref, o_ref):
    l = o_ref.shape[1]
    o_ref[...] = jnp.maximum(x_ref[:, :l], x_ref[:, l:])


def _pair_max(x2d, budget=2 << 20):
    """x2d: (R, 2L) -> (R, L); out[r, i] = max(x[r, i], x[r, L + i])."""
    r, twol = x2d.shape
    l = twol // 2
    row_bytes = twol * x2d.dtype.itemsize
    tr = _pick_block(r, max(8, budget // max(1, row_bytes)))
    return pl.pallas_call(
        _pair_max_kernel,
        out_shape=jax.ShapeDtypeStruct((r, l), x2d.dtype),
        grid=(r // tr,),
        in_specs=[pl.BlockSpec((tr, twol), lambda i: (i, 0))],
        out_specs=pl.BlockSpec((tr, l), lambda i: (i, 0)),
        compiler_params=pltpu.CompilerParams(dimension_semantics=("parallel",)),
    )(x2d)


def maxpool2x2(x):
    """NHWC (N, H, W, C) -> (N, H//2, W//2, C), 2x2 / stride-2 max pool."""
    n, h, w, c = x.shape
    ho, wo = h // 2, w // 2
    # vertical (row-pair) max: pure reshape view, lane dim stays a 128-multiple
    yv = _pair_max(x.reshape(n * ho, 2 * w * c))
    # horizontal (column-pair) max: pure reshape view, C stays the lane dim
    yh = _pair_max(yv.reshape(n * ho * wo, 2 * c))
    return yh.reshape(n, ho, wo, c)


# ----------------------------------------------------------------------------
# final Linear + Softmax (lane-padded classes)
# ----------------------------------------------------------------------------
def _fc_softmax_kernel(x_ref, w_ref, b_ref, o_ref):
    logits = jnp.dot(x_ref[...], w_ref[...],
                     preferred_element_type=jnp.float32) + b_ref[...]
    m = jnp.max(logits, axis=-1, keepdims=True)
    e = jnp.exp(logits - m)
    o_ref[...] = (e / jnp.sum(e, axis=-1, keepdims=True)).astype(o_ref.dtype)


def fc_softmax(x, w, b, num_classes):
    """x: (M, K) bf16, w: (K, Np) bf16, b: (1, Np) f32 (pad lanes biased to -inf)."""
    m, k = x.shape
    _, npad = w.shape
    tm = _pick_block(m, 512)
    out = pl.pallas_call(
        _fc_softmax_kernel,
        out_shape=jax.ShapeDtypeStruct((m, npad), jnp.float32),
        grid=(m // tm,),
        in_specs=[
            pl.BlockSpec((tm, k), lambda i: (i, 0)),
            pl.BlockSpec((k, npad), lambda i: (0, 0)),
            pl.BlockSpec((1, npad), lambda i: (0, 0)),
        ],
        out_specs=pl.BlockSpec((tm, npad), lambda i: (i, 0)),
        compiler_params=pltpu.CompilerParams(dimension_semantics=("parallel",)),
    )(x, w, b)
    return out[:, :num_classes]


# ----------------------------------------------------------------------------
# JAX glue: im2col (bf16, K padded) and one conv block
# ----------------------------------------------------------------------------
def im2col(x, k, pad, k_padded):
    """x: (N, H, W, C) -> (N*H*W, k_padded); patch order (kh, kw, cin)."""
    n, h, w, c = x.shape
    xp = jnp.pad(x, ((0, 0), (pad, pad), (pad, pad), (0, 0)))
    cols = [xp[:, kh:kh + h, kw:kw + w, :] for kh in range(k) for kw in range(k)]
    patches = jnp.stack(cols, axis=3).reshape(n * h * w, k * k * c)
    if k_padded > k * k * c:
        patches = jnp.pad(patches, ((0, 0), (0, k_padded - k * k * c)))
    return patches


def conv_bn_relu_pool(x, wmat, scale, shift, k, pad):
    """Conv2d(k, padding=pad) -> BN (running stats) -> ReLU -> MaxPool(2) -> Dropout(id)."""
    n, h, w, _cin = x.shape
    kp, cout = wmat.shape
    # TODO(synk): im2col is still materialized in HBM (k^2 duplication); it is
    # kept in bf16 to halve the traffic.  A tap-accumulating in-kernel gather
    # would remove this round trip entirely.
    patches = im2col(x, k, pad, kp)
    y = fused_gemm(patches, wmat, scale, shift, relu=True)
    y = y.reshape(n, h, w, cout)
    return maxpool2x2(y)   # Dropout(p=0.2) is identity in eval mode


# ----------------------------------------------------------------------------
# parameters
# ----------------------------------------------------------------------------
def init_params(key, img_size, num_classes):
    """PyTorch-layout parameters (as CNNModel would hold them)."""
    params = {"conv": [], "fc": []}
    for (cin, cout, k, _pad) in CONV_CFG:
        key, k1, k2 = jax.random.split(key, 3)
        wconv = jax.random.normal(k1, (cout, cin, k, k), jnp.float32) * 0.05
        bconv = jax.random.normal(k2, (cout,), jnp.float32) * 0.01
        gamma = jnp.ones((cout,), jnp.float32)
        beta = jnp.zeros((cout,), jnp.float32)
        mean = jnp.zeros((cout,), jnp.float32)
        var = jnp.ones((cout,), jnp.float32)
        params["conv"].append((wconv, bconv, gamma, beta, mean, var))

    conv_out = img_size // 32
    fc1_in = conv_out * conv_out * 1024
    key, k1, k2, k3, k4 = jax.random.split(key, 5)
    lim1 = (6.0 / (fc1_in + 512)) ** 0.5
    w1 = jax.random.uniform(k1, (512, fc1_in), jnp.float32, -lim1, lim1)
    b1 = jax.random.normal(k2, (512,), jnp.float32) * 0.01
    lim2 = (6.0 / (512 + num_classes)) ** 0.5
    w2 = jax.random.uniform(k3, (num_classes, 512), jnp.float32, -lim2, lim2)
    b2 = jax.random.normal(k4, (num_classes,), jnp.float32) * 0.01
    params["fc"] = [(w1, b1), (w2, b2)]
    return params


def prepare_params(params, img_size, num_classes):
    """One-time conversion to kernel-ready tensors: BN folded into (scale, shift),
    weights as bf16 GEMM matrices with K zero-padded to a multiple of TK, FC1 rows
    pre-permuted to the NHWC flatten order, classifier padded to 128 lanes."""
    prep = {"conv": []}
    for (cin, cout, k, _pad), (wconv, bconv, gamma, beta, mean, var) in zip(
            CONV_CFG, params["conv"]):
        kdim = k * k * cin
        kp = _round_up(kdim, TK)
        # PyTorch conv weight (Cout, Cin, kh, kw) -> (kh, kw, Cin, Cout) flat
        wmat = jnp.transpose(wconv, (2, 3, 1, 0)).reshape(kdim, cout)
        wmat = jnp.pad(wmat, ((0, kp - kdim), (0, 0))).astype(jnp.bfloat16)
        inv = gamma / jnp.sqrt(var + BN_EPS)
        scale = inv.astype(jnp.float32)
        shift = (beta + (bconv - mean) * inv).astype(jnp.float32)
        prep["conv"].append((wmat, scale, shift))

    conv_out = img_size // 32
    (w1, b1), (w2, b2) = params["fc"]
    # PyTorch Flatten sees (C, H, W); activations here are NHWC, so permute the
    # (static) weight rows once instead of transposing activations at runtime.
    w1_nhwc = (w1.reshape(512, 1024, conv_out, conv_out)
                 .transpose(2, 3, 1, 0)                      # (H, W, C, out)
                 .reshape(conv_out * conv_out * 1024, 512))
    prep["fc1"] = (w1_nhwc.astype(jnp.bfloat16),
                   jnp.ones((512,), jnp.float32),
                   b1.astype(jnp.float32))

    npad = _round_up(num_classes, LANE)
    w2p = jnp.zeros((512, npad), jnp.float32).at[:, :num_classes].set(w2.T)
    b2p = jnp.full((npad,), -1e30, jnp.float32).at[:num_classes].set(b2)
    prep["fc2"] = (w2p.astype(jnp.bfloat16), b2p.reshape(1, npad))
    return prep


# ----------------------------------------------------------------------------
# forward pass
# ----------------------------------------------------------------------------
def cnn_model_forward(x_nchw, prep, num_classes):
    """x_nchw: (N, 3, H, W) float32 -> (N, num_classes) softmax probabilities."""
    x = jnp.transpose(x_nchw, (0, 2, 3, 1)).astype(jnp.bfloat16)   # NCHW -> NHWC
    for (_cin, _cout, k, pad), (wmat, scale, shift) in zip(CONV_CFG, prep["conv"]):
        x = conv_bn_relu_pool(x, wmat, scale, shift, k, pad)
    n = x.shape[0]
    flat = x.reshape(n, -1)                      # NHWC flatten (FC1 rows pre-permuted)
    w1, s1, b1 = prep["fc1"]
    h = fused_gemm(flat, w1, s1, b1, relu=True)  # Linear + ReLU
    w2, b2 = prep["fc2"]
    return fc_softmax(h, w2, b2, num_classes)    # Linear + Softmax(dim=1)


if __name__ == "__main__":
    img_size = 32          # must be a multiple of 32 (five 2x2 max-pool halvings)
    num_classes = 6
    batch = 2

    key = jax.random.PRNGKey(0)
    key, xkey = jax.random.split(key)
    x = jax.random.normal(xkey, (batch, 3, img_size, img_size), jnp.float32)

    params = init_params(key, img_size, num_classes)
    prep = prepare_params(params, img_size, num_classes)

    fwd = jax.jit(cnn_model_forward, static_argnums=2)
    out = jax.block_until_ready(fwd(x, prep, num_classes))

    assert out.shape == (batch, num_classes)
    # softmax rows should sum to ~1
    assert jnp.allclose(jnp.sum(out, axis=1), 1.0, atol=1e-3)
    print("KERNEL_OK")
</pallas_src>

<mosaic_0001>
module attributes {stable_mosaic.version = 11 : i64} {
  func.func @_fused_gemm_kernel(%arg0: i32, %arg1: i32, %arg2: i32, %arg3: memref<512x256xbf16, #tpu.memory_space<vmem>>, %arg4: memref<256x64xbf16, #tpu.memory_space<vmem>>, %arg5: memref<1x64xf32, #tpu.memory_space<vmem>>, %arg6: memref<1x64xf32, #tpu.memory_space<vmem>>, %arg7: memref<512x64xbf16, #tpu.memory_space<vmem>>, %arg8: memref<512x64xf32, #tpu.memory_space<vmem>>) attributes {dimension_semantics = [#tpu.dimension_semantics<parallel>, #tpu.dimension_semantics<parallel>, #tpu.dimension_semantics<arbitrary>], iteration_bounds = array<i64: 4, 1, 1>, scalar_prefetch = 0 : i64, scratch_operands = 1 : i64, tpu.core_type = #tpu.core_type<tc>, window_params = [{transform_indices = @transform_0, window_bounds = array<i64: 512, 256>}, {transform_indices = @transform_1, window_bounds = array<i64: 256, 64>}, {transform_indices = @transform_2, window_bounds = array<i64: 1, 64>}, {transform_indices = @transform_3, window_bounds = array<i64: 1, 64>}, {transform_indices = @transform_4, window_bounds = array<i64: 512, 64>}]} {
    %c0_i32 = arith.constant 0 : i32
    %0 = arith.cmpi eq, %arg2, %c0_i32 : i32
    %1 = arith.extui %0 : i1 to i32
    %c0_i32_0 = arith.constant 0 : i32
    %2 = arith.cmpi ne, %1, %c0_i32_0 : i32
    scf.if %2 {
      %cst_10 = arith.constant 0.000000e+00 : f32
      %12 = vector.broadcast %cst_10 : f32 to vector<512x64xf32>
      %c0_11 = arith.constant 0 : index
      %c0_12 = arith.constant 0 : index
      %13 = vector.load %arg8[%c0_11, %c0_12] : memref<512x64xf32, #tpu.memory_space<vmem>>, vector<512x64xf32>
      tpu.vector_store %arg8[%c0_11, %c0_12], %12 {strides = array<i32>} : memref<512x64xf32, #tpu.memory_space<vmem>>, vector<512x64xf32>,
    } else {
    }
    %c0 = arith.constant 0 : index
    %c0_1 = arith.constant 0 : index
    %3 = vector.load %arg8[%c0, %c0_1] : memref<512x64xf32, #tpu.memory_space<vmem>>, vector<512x64xf32>
    %c0_2 = arith.constant 0 : index
    %c0_3 = arith.constant 0 : index
    %4 = vector.load %arg3[%c0_2, %c0_3] : memref<512x256xbf16, #tpu.memory_space<vmem>>, vector<512x256xbf16>
    %c0_4 = arith.constant 0 : index
    %c0_5 = arith.constant 0 : index
    %5 = vector.load %arg4[%c0_4, %c0_5] : memref<256x64xbf16, #tpu.memory_space<vmem>>, vector<256x64xbf16>
    %cst = arith.constant dense<0.000000e+00> : vector<512x64xf32>
    %6 = tpu.matmul %4, %5, %cst {dimension_numbers = #tpu.dot_dimension_numbers<[1], [0], [0], [1], [0, 0, 1, 1], [], []>} : vector<512x256xbf16>, vector<256x64xbf16>, vector<512x64xf32> -> vector<512x64xf32>
    %7 = arith.addf %3, %6 : vector<512x64xf32>
    %c0_6 = arith.constant 0 : index
    %c0_7 = arith.constant 0 : index
    %8 = vector.load %arg8[%c0_6, %c0_7] : memref<512x64xf32, #tpu.memory_space<vmem>>, vector<512x64xf32>
    tpu.vector_store %arg8[%c0_6, %c0_7], %7 {strides = array<i32>} : memref<512x64xf32, #tpu.memory_space<vmem>>, vector<512x64xf32>,
    %c0_i32_8 = arith.constant 0 : i32
    %9 = arith.cmpi eq, %arg2, %c0_i32_8 : i32
    %10 = arith.extui %9 : i1 to i32
    %c0_i32_9 = arith.constant 0 : i32
    %11 = arith.cmpi ne, %10, %c0_i32_9 : i32
    scf.if %11 {
      %c0_10 = arith.constant 0 : index
      %c0_11 = arith.constant 0 : index
      %12 = vector.load %arg8[%c0_10, %c0_11] : memref<512x64xf32, #tpu.memory_space<vmem>>, vector<512x64xf32>
      %c0_12 = arith.constant 0 : index
      %c0_13 = arith.constant 0 : index
      %13 = vector.load %arg5[%c0_12, %c0_13] : memref<1x64xf32, #tpu.memory_space<vmem>>, vector<1x64xf32>
      %14 = vector.broadcast %13 : vector<1x64xf32> to vector<512x64xf32>
      %15 = arith.mulf %12, %14 : vector<512x64xf32>
      %c0_14 = arith.constant 0 : index
      %c0_15 = arith.constant 0 : index
      %16 = vector.load %arg6[%c0_14, %c0_15] : memref<1x64xf32, #tpu.memory_space<vmem>>, vector<1x64xf32>
      %17 = vector.broadcast %16 : vector<1x64xf32> to vector<512x64xf32>
      %18 = arith.addf %15, %17 : vector<512x64xf32>
      %cst_16 = arith.constant 0.000000e+00 : f32
      %19 = vector.broadcast %cst_16 : f32 to vector<512x64xf32>
      %20 = arith.maximumf %18, %19 : vector<512x64xf32>
      %21 = arith.truncf %20 : vector<512x64xf32> to vector<512x64xbf16>
      %c0_17 = arith.constant 0 : index
      %c0_18 = arith.constant 0 : index
      %22 = vector.load %arg7[%c0_17, %c0_18] : memref<512x64xbf16, #tpu.memory_space<vmem>>, vector<512x64xbf16>
      tpu.vector_store %arg7[%c0_17, %c0_18], %21 {strides = array<i32>} : memref<512x64xbf16, #tpu.memory_space<vmem>>, vector<512x64xbf16>,
    } else {
    }
    return
  }
  func.func @transform_0(%arg0: i32, %arg1: i32, %arg2: i32) -> (i32, i32) {
    %c0_i32 = arith.constant 0 : i32
    return %arg0, %arg2 : i32, i32
  }
  func.func @transform_1(%arg0: i32, %arg1: i32, %arg2: i32) -> (i32, i32) {
    %c0_i32 = arith.constant 0 : i32
    return %arg2, %arg1 : i32, i32
  }
  func.func @transform_2(%arg0: i32, %arg1: i32, %arg2: i32) -> (i32, i32) {
    %c0_i32 = arith.constant 0 : i32
    %c0_i32_0 = arith.constant 0 : i32
    return %c0_i32, %arg1 : i32, i32
  }
  func.func @transform_3(%arg0: i32, %arg1: i32, %arg2: i32) -> (i32, i32) {
    %c0_i32 = arith.constant 0 : i32
    %c0_i32_0 = arith.constant 0 : i32
    return %c0_i32, %arg1 : i32, i32
  }
  func.func @transform_4(%arg0: i32, %arg1: i32, %arg2: i32) -> (i32, i32) {
    %c0_i32 = arith.constant 0 : i32
    return %arg0, %arg1 : i32, i32
  }
}

module attributes {stable_mosaic.version = 11 : i64} {
  func.func @_pair_max_kernel(%arg0: i32, %arg1: memref<32x4096xbf16, #tpu.memory_space<vmem>>, %arg2: memref<32x2048xbf16, #tpu.memory_space<vmem>>) attributes {dimension_semantics = [#tpu.dimension_semantics<parallel>], iteration_bounds = array<i64: 1>, scalar_prefetch = 0 : i64, scratch_operands = 0 : i64, tpu.core_type = #tpu.core_type<tc>, window_params = [{transform_indices = @transform_0, window_bounds = array<i64: 32, 4096>}, {transform_indices = @transform_1, window_bounds = array<i64: 32, 2048>}]} {
    %c0 = arith.constant 0 : index
    %c0_0 = arith.constant 0 : index
    %0 = vector.load %arg1[%c0, %c0_0] : memref<32x4096xbf16, #tpu.memory_space<vmem>>, vector<32x2048xbf16>
    %c0_1 = arith.constant 0 : index
    %c2048 = arith.constant 2048 : index
    %1 = vector.load %arg1[%c0_1, %c2048] : memref<32x4096xbf16, #tpu.memory_space<vmem>>, vector<32x2048xbf16>
    %2 = arith.maximumf %0, %1 : vector<32x2048xbf16>
    %c0_2 = arith.constant 0 : index
    %c0_3 = arith.constant 0 : index
    %3 = vector.load %arg2[%c0_2, %c0_3] : memref<32x2048xbf16, #tpu.memory_space<vmem>>, vector<32x2048xbf16>
    tpu.vector_store %arg2[%c0_2, %c0_3], %2 {strides = array<i32>} : memref<32x2048xbf16, #tpu.memory_space<vmem>>, vector<32x2048xbf16>,
    return
  }
  func.func @transform_0(%arg0: i32) -> (i32, i32) {
    %c0_i32 = arith.constant 0 : i32
    %c0_i32_0 = arith.constant 0 : i32
    return %arg0, %c0_i32 : i32, i32
  }
  func.func @transform_1(%arg0: i32) -> (i32, i32) {
    %c0_i32 = arith.constant 0 : i32
    %c0_i32_0 = arith.constant 0 : i32
    return %arg0, %c0_i32 : i32, i32
  }
}

module attributes {stable_mosaic.version = 11 : i64} {
  func.func @_pair_max_kernel(%arg0: i32, %arg1: memref<512x128xbf16, #tpu.memory_space<vmem>>, %arg2: memref<512x64xbf16, #tpu.memory_space<vmem>>) attributes {dimension_semantics = [#tpu.dimension_semantics<parallel>], iteration_bounds = array<i64: 1>, scalar_prefetch = 0 : i64, scratch_operands = 0 : i64, tpu.core_type = #tpu.core_type<tc>, window_params = [{transform_indices = @transform_0, window_bounds = array<i64: 512, 128>}, {transform_indices = @transform_1, window_bounds = array<i64: 512, 64>}]} {
    %c0 = arith.constant 0 : index
    %c0_0 = arith.constant 0 : index
    %0 = vector.load %arg1[%c0, %c0_0] : memref<512x128xbf16, #tpu.memory_space<vmem>>, vector<512x64xbf16>
    %c0_1 = arith.constant 0 : index
    %c64 = arith.constant 64 : index
    %1 = vector.load %arg1[%c0_1, %c64] : memref<512x128xbf16, #tpu.memory_space<vmem>>, vector<512x64xbf16>
    %2 = arith.maximumf %0, %1 : vector<512x64xbf16>
    %c0_2 = arith.constant 0 : index
    %c0_3 = arith.constant 0 : index
    %3 = vector.load %arg2[%c0_2, %c0_3] : memref<512x64xbf16, #tpu.memory_space<vmem>>, vector<512x64xbf16>
    tpu.vector_store %arg2[%c0_2, %c0_3], %2 {strides = array<i32>} : memref<512x64xbf16, #tpu.memory_space<vmem>>, vector<512x64xbf16>,
    return
  }
  func.func @transform_0(%arg0: i32) -> (i32, i32) {
    %c0_i32 = arith.constant 0 : i32
    %c0_i32_0 = arith.constant 0 : i32
    return %arg0, %c0_i32 : i32, i32
  }
  func.func @transform_1(%arg0: i32) -> (i32, i32) {
    %c0_i32 = arith.constant 0 : i32
    %c0_i32_0 = arith.constant 0 : i32
    return %arg0, %c0_i32 : i32, i32
  }
}

module attributes {stable_mosaic.version = 11 : i64} {
  func.func @_fused_gemm_kernel(%arg0: i32, %arg1: i32, %arg2: i32, %arg3: memref<512x256xbf16, #tpu.memory_space<vmem>>, %arg4: memref<256x128xbf16, #tpu.memory_space<vmem>>, %arg5: memref<1x128xf32, #tpu.memory_space<vmem>>, %arg6: memref<1x128xf32, #tpu.memory_space<vmem>>, %arg7: memref<512x128xbf16, #tpu.memory_space<vmem>>, %arg8: memref<512x128xf32, #tpu.memory_space<vmem>>) attributes {dimension_semantics = [#tpu.dimension_semantics<parallel>, #tpu.dimension_semantics<parallel>, #tpu.dimension_semantics<arbitrary>], iteration_bounds = array<i64: 1, 1, 7>, scalar_prefetch = 0 : i64, scratch_operands = 1 : i64, tpu.core_type = #tpu.core_type<tc>, window_params = [{transform_indices = @transform_0, window_bounds = array<i64: 512, 256>}, {transform_indices = @transform_1, window_bounds = array<i64: 256, 128>}, {transform_indices = @transform_2, window_bounds = array<i64: 1, 128>}, {transform_indices = @transform_3, window_bounds = array<i64: 1, 128>}, {transform_indices = @transform_4, window_bounds = array<i64: 512, 128>}]} {
    %c0_i32 = arith.constant 0 : i32
    %0 = arith.cmpi eq, %arg2, %c0_i32 : i32
    %1 = arith.extui %0 : i1 to i32
    %c0_i32_0 = arith.constant 0 : i32
    %2 = arith.cmpi ne, %1, %c0_i32_0 : i32
    scf.if %2 {
      %cst_9 = arith.constant 0.000000e+00 : f32
      %12 = vector.broadcast %cst_9 : f32 to vector<512x128xf32>
      %c0_10 = arith.constant 0 : index
      %c0_11 = arith.constant 0 : index
      %13 = vector.load %arg8[%c0_10, %c0_11] : memref<512x128xf32, #tpu.memory_space<vmem>>, vector<512x128xf32>
      tpu.vector_store %arg8[%c0_10, %c0_11], %12 {strides = array<i32>} : memref<512x128xf32, #tpu.memory_space<vmem>>, vector<512x128xf32>,
    } else {
    }
    %c0 = arith.constant 0 : index
    %c0_1 = arith.constant 0 : index
    %3 = vector.load %arg8[%c0, %c0_1] : memref<512x128xf32, #tpu.memory_space<vmem>>, vector<512x128xf32>
    %c0_2 = arith.constant 0 : index
    %c0_3 = arith.constant 0 : index
    %4 = vector.load %arg3[%c0_2, %c0_3] : memref<512x256xbf16, #tpu.memory_space<vmem>>, vector<512x256xbf16>
    %c0_4 = arith.constant 0 : index
    %c0_5 = arith.constant 0 : index
    %5 = vector.load %arg4[%c0_4, %c0_5] : memref<256x128xbf16, #tpu.memory_space<vmem>>, vector<256x128xbf16>
    %cst = arith.constant dense<0.000000e+00> : vector<512x128xf32>
    %6 = tpu.matmul %4, %5, %cst {dimension_numbers = #tpu.dot_dimension_numbers<[1], [0], [0], [1], [0, 0, 1, 1], [], []>} : vector<512x256xbf16>, vector<256x128xbf16>, vector<512x128xf32> -> vector<512x128xf32>
    %7 = arith.addf %3, %6 : vector<512x128xf32>
    %c0_6 = arith.constant 0 : index
    %c0_7 = arith.constant 0 : index
    %8 = vector.load %arg8[%c0_6, %c0_7] : memref<512x128xf32, #tpu.memory_space<vmem>>, vector<512x128xf32>
    tpu.vector_store %arg8[%c0_6, %c0_7], %7 {strides = array<i32>} : memref<512x128xf32, #tpu.memory_space<vmem>>, vector<512x128xf32>,
    %c6_i32 = arith.constant 6 : i32
    %9 = arith.cmpi eq, %arg2, %c6_i32 : i32
    %10 = arith.extui %9 : i1 to i32
    %c0_i32_8 = arith.constant 0 : i32
    %11 = arith.cmpi ne, %10, %c0_i32_8 : i32
    scf.if %11 {
      %c0_9 = arith.constant 0 : index
      %c0_10 = arith.constant 0 : index
      %12 = vector.load %arg8[%c0_9, %c0_10] : memref<512x128xf32, #tpu.memory_space<vmem>>, vector<512x128xf32>
      %c0_11 = arith.constant 0 : index
      %c0_12 = arith.constant 0 : index
      %13 = vector.load %arg5[%c0_11, %c0_12] : memref<1x128xf32, #tpu.memory_space<vmem>>, vector<1x128xf32>
      %14 = vector.broadcast %13 : vector<1x128xf32> to vector<512x128xf32>
      %15 = arith.mulf %12, %14 : vector<512x128xf32>
      %c0_13 = arith.constant 0 : index
      %c0_14 = arith.constant 0 : index
      %16 = vector.load %arg6[%c0_13, %c0_14] : memref<1x128xf32, #tpu.memory_space<vmem>>, vector<1x128xf32>
      %17 = vector.broadcast %16 : vector<1x128xf32> to vector<512x128xf32>
      %18 = arith.addf %15, %17 : vector<512x128xf32>
      %cst_15 = arith.constant 0.000000e+00 : f32
      %19 = vector.broadcast %cst_15 : f32 to vector<512x128xf32>
      %20 = arith.maximumf %18, %19 : vector<512x128xf32>
      %21 = arith.truncf %20 : vector<512x128xf32> to vector<512x128xbf16>
      %c0_16 = arith.constant 0 : index
      %c0_17 = arith.constant 0 : index
      %22 = vector.load %arg7[%c0_16, %c0_17] : memref<512x128xbf16, #tpu.memory_space<vmem>>, vector<512x128xbf16>
      tpu.vector_store %arg7[%c0_16, %c0_17], %21 {strides = array<i32>} : memref<512x128xbf16, #tpu.memory_space<vmem>>, vector<512x128xbf16>,
    } else {
    }
    return
  }
  func.func @transform_0(%arg0: i32, %arg1: i32, %arg2: i32) -> (i32, i32) {
    %c0_i32 = arith.constant 0 : i32
    return %arg0, %arg2 : i32, i32
  }
  func.func @transform_1(%arg0: i32, %arg1: i32, %arg2: i32) -> (i32, i32) {
    %c0_i32 = arith.constant 0 : i32
    return %arg2, %arg1 : i32, i32
  }
  func.func @transform_2(%arg0: i32, %arg1: i32, %arg2: i32) -> (i32, i32) {
    %c0_i32 = arith.constant 0 : i32
    %c0_i32_0 = arith.constant 0 : i32
    return %c0_i32, %arg1 : i32, i32
  }
  func.func @transform_3(%arg0: i32, %arg1: i32, %arg2: i32) -> (i32, i32) {
    %c0_i32 = arith.constant 0 : i32
    %c0_i32_0 = arith.constant 0 : i32
    return %c0_i32, %arg1 : i32, i32
  }
  func.func @transform_4(%arg0: i32, %arg1: i32, %arg2: i32) -> (i32, i32) {
    %c0_i32 = arith.constant 0 : i32
    return %arg0, %arg1 : i32, i32
  }
}

module attributes {stable_mosaic.version = 11 : i64} {
  func.func @_pair_max_kernel(%arg0: i32, %arg1: memref<16x4096xbf16, #tpu.memory_space<vmem>>, %arg2: memref<16x2048xbf16, #tpu.memory_space<vmem>>) attributes {dimension_semantics = [#tpu.dimension_semantics<parallel>], iteration_bounds = array<i64: 1>, scalar_prefetch = 0 : i64, scratch_operands = 0 : i64, tpu.core_type = #tpu.core_type<tc>, window_params = [{transform_indices = @transform_0, window_bounds = array<i64: 16, 4096>}, {transform_indices = @transform_1, window_bounds = array<i64: 16, 2048>}]} {
    %c0 = arith.constant 0 : index
    %c0_0 = arith.constant 0 : index
    %0 = vector.load %arg1[%c0, %c0_0] : memref<16x4096xbf16, #tpu.memory_space<vmem>>, vector<16x2048xbf16>
    %c0_1 = arith.constant 0 : index
    %c2048 = arith.constant 2048 : index
    %1 = vector.load %arg1[%c0_1, %c2048] : memref<16x4096xbf16, #tpu.memory_space<vmem>>, vector<16x2048xbf16>
    %2 = arith.maximumf %0, %1 : vector<16x2048xbf16>
    %c0_2 = arith.constant 0 : index
    %c0_3 = arith.constant 0 : index
    %3 = vector.load %arg2[%c0_2, %c0_3] : memref<16x2048xbf16, #tpu.memory_space<vmem>>, vector<16x2048xbf16>
    tpu.vector_store %arg2[%c0_2, %c0_3], %2 {strides = array<i32>} : memref<16x2048xbf16, #tpu.memory_space<vmem>>, vector<16x2048xbf16>,
    return
  }
  func.func @transform_0(%arg0: i32) -> (i32, i32) {
    %c0_i32 = arith.constant 0 : i32
    %c0_i32_0 = arith.constant 0 : i32
    return %arg0, %c0_i32 : i32, i32
  }
  func.func @transform_1(%arg0: i32) -> (i32, i32) {
    %c0_i32 = arith.constant 0 : i32
    %c0_i32_0 = arith.constant 0 : i32
    return %arg0, %c0_i32 : i32, i32
  }
}

module attributes {stable_mosaic.version = 11 : i64} {
  func.func @_pair_max_kernel(%arg0: i32, %arg1: memref<128x256xbf16, #tpu.memory_space<vmem>>, %arg2: memref<128x128xbf16, #tpu.memory_space<vmem>>) attributes {dimension_semantics = [#tpu.dimension_semantics<parallel>], iteration_bounds = array<i64: 1>, scalar_prefetch = 0 : i64, scratch_operands = 0 : i64, tpu.core_type = #tpu.core_type<tc>, window_params = [{transform_indices = @transform_0, window_bounds = array<i64: 128, 256>}, {transform_indices = @transform_1, window_bounds = array<i64: 128, 128>}]} {
    %c0 = arith.constant 0 : index
    %c0_0 = arith.constant 0 : index
    %0 = vector.load %arg1[%c0, %c0_0] : memref<128x256xbf16, #tpu.memory_space<vmem>>, vector<128x128xbf16>
    %c0_1 = arith.constant 0 : index
    %c128 = arith.constant 128 : index
    %1 = vector.load %arg1[%c0_1, %c128] : memref<128x256xbf16, #tpu.memory_space<vmem>>, vector<128x128xbf16>
    %2 = arith.maximumf %0, %1 : vector<128x128xbf16>
    %c0_2 = arith.constant 0 : index
    %c0_3 = arith.constant 0 : index
    %3 = vector.load %arg2[%c0_2, %c0_3] : memref<128x128xbf16, #tpu.memory_space<vmem>>, vector<128x128xbf16>
    tpu.vector_store %arg2[%c0_2, %c0_3], %2 {strides = array<i32>} : memref<128x128xbf16, #tpu.memory_space<vmem>>, vector<128x128xbf16>,
    return
  }
  func.func @transform_0(%arg0: i32) -> (i32, i32) {
    %c0_i32 = arith.constant 0 : i32
    %c0_i32_0 = arith.constant 0 : i32
    return %arg0, %c0_i32 : i32, i32
  }
  func.func @transform_1(%arg0: i32) -> (i32, i32) {
    %c0_i32 = arith.constant 0 : i32
    %c0_i32_0 = arith.constant 0 : i32
    return %arg0, %c0_i32 : i32, i32
  }
}

module attributes {stable_mosaic.version = 11 : i64} {
  func.func @_fused_gemm_kernel(%arg0: i32, %arg1: i32, %arg2: i32, %arg3: memref<128x256xbf16, #tpu.memory_space<vmem>>, %arg4: memref<256x256xbf16, #tpu.memory_space<vmem>>, %arg5: memref<1x256xf32, #tpu.memory_space<vmem>>, %arg6: memref<1x256xf32, #tpu.memory_space<vmem>>, %arg7: memref<128x256xbf16, #tpu.memory_space<vmem>>, %arg8: memref<128x256xf32, #tpu.memory_space<vmem>>) attributes {dimension_semantics = [#tpu.dimension_semantics<parallel>, #tpu.dimension_semantics<parallel>, #tpu.dimension_semantics<arbitrary>], iteration_bounds = array<i64: 1, 1, 5>, scalar_prefetch = 0 : i64, scratch_operands = 1 : i64, tpu.core_type = #tpu.core_type<tc>, window_params = [{transform_indices = @transform_0, window_bounds = array<i64: 128, 256>}, {transform_indices = @transform_1, window_bounds = array<i64: 256, 256>}, {transform_indices = @transform_2, window_bounds = array<i64: 1, 256>}, {transform_indices = @transform_3, window_bounds = array<i64: 1, 256>}, {transform_indices = @transform_4, window_bounds = array<i64: 128, 256>}]} {
    %c0_i32 = arith.constant 0 : i32
    %0 = arith.cmpi eq, %arg2, %c0_i32 : i32
    %1 = arith.extui %0 : i1 to i32
    %c0_i32_0 = arith.constant 0 : i32
    %2 = arith.cmpi ne, %1, %c0_i32_0 : i32
    scf.if %2 {
      %cst_9 = arith.constant 0.000000e+00 : f32
      %12 = vector.broadcast %cst_9 : f32 to vector<128x256xf32>
      %c0_10 = arith.constant 0 : index
      %c0_11 = arith.constant 0 : index
      %13 = vector.load %arg8[%c0_10, %c0_11] : memref<128x256xf32, #tpu.memory_space<vmem>>, vector<128x256xf32>
      tpu.vector_store %arg8[%c0_10, %c0_11], %12 {strides = array<i32>} : memref<128x256xf32, #tpu.memory_space<vmem>>, vector<128x256xf32>,
    } else {
    }
    %c0 = arith.constant 0 : index
    %c0_1 = arith.constant 0 : index
    %3 = vector.load %arg8[%c0, %c0_1] : memref<128x256xf32, #tpu.memory_space<vmem>>, vector<128x256xf32>
    %c0_2 = arith.constant 0 : index
    %c0_3 = arith.constant 0 : index
    %4 = vector.load %arg3[%c0_2, %c0_3] : memref<128x256xbf16, #tpu.memory_space<vmem>>, vector<128x256xbf16>
    %c0_4 = arith.constant 0 : index
    %c0_5 = arith.constant 0 : index
    %5 = vector.load %arg4[%c0_4, %c0_5] : memref<256x256xbf16, #tpu.memory_space<vmem>>, vector<256x256xbf16>
    %cst = arith.constant dense<0.000000e+00> : vector<128x256xf32>
    %6 = tpu.matmul %4, %5, %cst {dimension_numbers = #tpu.dot_dimension_numbers<[1], [0], [0], [1], [0, 0, 1, 1], [], []>} : vector<128x256xbf16>, vector<256x256xbf16>, vector<128x256xf32> -> vector<128x256xf32>
    %7 = arith.addf %3, %6 : vector<128x256xf32>
    %c0_6 = arith.constant 0 : index
    %c0_7 = arith.constant 0 : index
    %8 = vector.load %arg8[%c0_6, %c0_7] : memref<128x256xf32, #tpu.memory_space<vmem>>, vector<128x256xf32>
    tpu.vector_store %arg8[%c0_6, %c0_7], %7 {strides = array<i32>} : memref<128x256xf32, #tpu.memory_space<vmem>>, vector<128x256xf32>,
    %c4_i32 = arith.constant 4 : i32
    %9 = arith.cmpi eq, %arg2, %c4_i32 : i32
    %10 = arith.extui %9 : i1 to i32
    %c0_i32_8 = arith.constant 0 : i32
    %11 = arith.cmpi ne, %10, %c0_i32_8 : i32
    scf.if %11 {
      %c0_9 = arith.constant 0 : index
      %c0_10 = arith.constant 0 : index
      %12 = vector.load %arg8[%c0_9, %c0_10] : memref<128x256xf32, #tpu.memory_space<vmem>>, vector<128x256xf32>
      %c0_11 = arith.constant 0 : index
      %c0_12 = arith.constant 0 : index
      %13 = vector.load %arg5[%c0_11, %c0_12] : memref<1x256xf32, #tpu.memory_space<vmem>>, vector<1x256xf32>
      %14 = vector.broadcast %13 : vector<1x256xf32> to vector<128x256xf32>
      %15 = arith.mulf %12, %14 : vector<128x256xf32>
      %c0_13 = arith.constant 0 : index
      %c0_14 = arith.constant 0 : index
      %16 = vector.load %arg6[%c0_13, %c0_14] : memref<1x256xf32, #tpu.memory_space<vmem>>, vector<1x256xf32>
      %17 = vector.broadcast %16 : vector<1x256xf32> to vector<128x256xf32>
      %18 = arith.addf %15, %17 : vector<128x256xf32>
      %cst_15 = arith.constant 0.000000e+00 : f32
      %19 = vector.broadcast %cst_15 : f32 to vector<128x256xf32>
      %20 = arith.maximumf %18, %19 : vector<128x256xf32>
      %21 = arith.truncf %20 : vector<128x256xf32> to vector<128x256xbf16>
      %c0_16 = arith.constant 0 : index
      %c0_17 = arith.constant 0 : index
      %22 = vector.load %arg7[%c0_16, %c0_17] : memref<128x256xbf16, #tpu.memory_space<vmem>>, vector<128x256xbf16>
      tpu.vector_store %arg7[%c0_16, %c0_17], %21 {strides = array<i32>} : memref<128x256xbf16, #tpu.memory_space<vmem>>, vector<128x256xbf16>,
    } else {
    }
    return
  }
  func.func @transform_0(%arg0: i32, %arg1: i32, %arg2: i32) -> (i32, i32) {
    %c0_i32 = arith.constant 0 : i32
    return %arg0, %arg2 : i32, i32
  }
  func.func @transform_1(%arg0: i32, %arg1: i32, %arg2: i32) -> (i32, i32) {
    %c0_i32 = arith.constant 0 : i32
    return %arg2, %arg1 : i32, i32
  }
  func.func @transform_2(%arg0: i32, %arg1: i32, %arg2: i32) -> (i32, i32) {
    %c0_i32 = arith.constant 0 : i32
    %c0_i32_0 = arith.constant 0 : i32
    return %c0_i32, %arg1 : i32, i32
  }
  func.func @transform_3(%arg0: i32, %arg1: i32, %arg2: i32) -> (i32, i32) {
    %c0_i32 = arith.constant 0 : i32
    %c0_i32_0 = arith.constant 0 : i32
    return %c0_i32, %arg1 : i32, i32
  }
  func.func @transform_4(%arg0: i32, %arg1: i32, %arg2: i32) -> (i32, i32) {
    %c0_i32 = arith.constant 0 : i32
    return %arg0, %arg1 : i32, i32
  }
}

module attributes {stable_mosaic.version = 11 : i64} {
  func.func @_pair_max_kernel(%arg0: i32, %arg1: memref<8x4096xbf16, #tpu.memory_space<vmem>>, %arg2: memref<8x2048xbf16, #tpu.memory_space<vmem>>) attributes {dimension_semantics = [#tpu.dimension_semantics<parallel>], iteration_bounds = array<i64: 1>, scalar_prefetch = 0 : i64, scratch_operands = 0 : i64, tpu.core_type = #tpu.core_type<tc>, window_params = [{transform_indices = @transform_0, window_bounds = array<i64: 8, 4096>}, {transform_indices = @transform_1, window_bounds = array<i64: 8, 2048>}]} {
    %c0 = arith.constant 0 : index
    %c0_0 = arith.constant 0 : index
    %0 = vector.load %arg1[%c0, %c0_0] : memref<8x4096xbf16, #tpu.memory_space<vmem>>, vector<8x2048xbf16>
    %c0_1 = arith.constant 0 : index
    %c2048 = arith.constant 2048 : index
    %1 = vector.load %arg1[%c0_1, %c2048] : memref<8x4096xbf16, #tpu.memory_space<vmem>>, vector<8x2048xbf16>
    %2 = arith.maximumf %0, %1 : vector<8x2048xbf16>
    %c0_2 = arith.constant 0 : index
    %c0_3 = arith.constant 0 : index
    %3 = vector.load %arg2[%c0_2, %c0_3] : memref<8x2048xbf16, #tpu.memory_space<vmem>>, vector<8x2048xbf16>
    tpu.vector_store %arg2[%c0_2, %c0_3], %2 {strides = array<i32>} : memref<8x2048xbf16, #tpu.memory_space<vmem>>, vector<8x2048xbf16>,
    return
  }
  func.func @transform_0(%arg0: i32) -> (i32, i32) {
    %c0_i32 = arith.constant 0 : i32
    %c0_i32_0 = arith.constant 0 : i32
    return %arg0, %c0_i32 : i32, i32
  }
  func.func @transform_1(%arg0: i32) -> (i32, i32) {
    %c0_i32 = arith.constant 0 : i32
    %c0_i32_0 = arith.constant 0 : i32
    return %arg0, %c0_i32 : i32, i32
  }
}

module attributes {stable_mosaic.version = 11 : i64} {
  func.func @_pair_max_kernel(%arg0: i32, %arg1: memref<32x512xbf16, #tpu.memory_space<vmem>>, %arg2: memref<32x256xbf16, #tpu.memory_space<vmem>>) attributes {dimension_semantics = [#tpu.dimension_semantics<parallel>], iteration_bounds = array<i64: 1>, scalar_prefetch = 0 : i64, scratch_operands = 0 : i64, tpu.core_type = #tpu.core_type<tc>, window_params = [{transform_indices = @transform_0, window_bounds = array<i64: 32, 512>}, {transform_indices = @transform_1, window_bounds = array<i64: 32, 256>}]} {
    %c0 = arith.constant 0 : index
    %c0_0 = arith.constant 0 : index
    %0 = vector.load %arg1[%c0, %c0_0] : memref<32x512xbf16, #tpu.memory_space<vmem>>, vector<32x256xbf16>
    %c0_1 = arith.constant 0 : index
    %c256 = arith.constant 256 : index
    %1 = vector.load %arg1[%c0_1, %c256] : memref<32x512xbf16, #tpu.memory_space<vmem>>, vector<32x256xbf16>
    %2 = arith.maximumf %0, %1 : vector<32x256xbf16>
    %c0_2 = arith.constant 0 : index
    %c0_3 = arith.constant 0 : index
    %3 = vector.load %arg2[%c0_2, %c0_3] : memref<32x256xbf16, #tpu.memory_space<vmem>>, vector<32x256xbf16>
    tpu.vector_store %arg2[%c0_2, %c0_3], %2 {strides = array<i32>} : memref<32x256xbf16, #tpu.memory_space<vmem>>, vector<32x256xbf16>,
    return
  }
  func.func @transform_0(%arg0: i32) -> (i32, i32) {
    %c0_i32 = arith.constant 0 : i32
    %c0_i32_0 = arith.constant 0 : i32
    return %arg0, %c0_i32 : i32, i32
  }
  func.func @transform_1(%arg0: i32) -> (i32, i32) {
    %c0_i32 = arith.constant 0 : i32
    %c0_i32_0 = arith.constant 0 : i32
    return %arg0, %c0_i32 : i32, i32
  }
}

module attributes {stable_mosaic.version = 11 : i64} {
  func.func @_fused_gemm_kernel(%arg0: i32, %arg1: i32, %arg2: i32, %arg3: memref<32x256xbf16, #tpu.memory_space<vmem>>, %arg4: memref<256x256xbf16, #tpu.memory_space<vmem>>, %arg5: memref<1x256xf32, #tpu.memory_space<vmem>>, %arg6: memref<1x256xf32, #tpu.memory_space<vmem>>, %arg7: memref<32x256xbf16, #tpu.memory_space<vmem>>, %arg8: memref<32x256xf32, #tpu.memory_space<vmem>>) attributes {dimension_semantics = [#tpu.dimension_semantics<parallel>, #tpu.dimension_semantics<parallel>, #tpu.dimension_semantics<arbitrary>], iteration_bounds = array<i64: 1, 2, 9>, scalar_prefetch = 0 : i64, scratch_operands = 1 : i64, tpu.core_type = #tpu.core_type<tc>, window_params = [{transform_indices = @transform_0, window_bounds = array<i64: 32, 256>}, {transform_indices = @transform_1, window_bounds = array<i64: 256, 256>}, {transform_indices = @transform_2, window_bounds = array<i64: 1, 256>}, {transform_indices = @transform_3, window_bounds = array<i64: 1, 256>}, {transform_indices = @transform_4, window_bounds = array<i64: 32, 256>}]} {
    %c0_i32 = arith.constant 0 : i32
    %0 = arith.cmpi eq, %arg2, %c0_i32 : i32
    %1 = arith.extui %0 : i1 to i32
    %c0_i32_0 = arith.constant 0 : i32
    %2 = arith.cmpi ne, %1, %c0_i32_0 : i32
    scf.if %2 {
      %cst_9 = arith.constant 0.000000e+00 : f32
      %12 = vector.broadcast %cst_9 : f32 to vector<32x256xf32>
      %c0_10 = arith.constant 0 : index
      %c0_11 = arith.constant 0 : index
      %13 = vector.load %arg8[%c0_10, %c0_11] : memref<32x256xf32, #tpu.memory_space<vmem>>, vector<32x256xf32>
      tpu.vector_store %arg8[%c0_10, %c0_11], %12 {strides = array<i32>} : memref<32x256xf32, #tpu.memory_space<vmem>>, vector<32x256xf32>,
    } else {
    }
    %c0 = arith.constant 0 : index
    %c0_1 = arith.constant 0 : index
    %3 = vector.load %arg8[%c0, %c0_1] : memref<32x256xf32, #tpu.memory_space<vmem>>, vector<32x256xf32>
    %c0_2 = arith.constant 0 : index
    %c0_3 = arith.constant 0 : index
    %4 = vector.load %arg3[%c0_2, %c0_3] : memref<32x256xbf16, #tpu.memory_space<vmem>>, vector<32x256xbf16>
    %c0_4 = arith.constant 0 : index
    %c0_5 = arith.constant 0 : index
    %5 = vector.load %arg4[%c0_4, %c0_5] : memref<256x256xbf16, #tpu.memory_space<vmem>>, vector<256x256xbf16>
    %cst = arith.constant dense<0.000000e+00> : vector<32x256xf32>
    %6 = tpu.matmul %4, %5, %cst {dimension_numbers = #tpu.dot_dimension_numbers<[1], [0], [0], [1], [0, 0, 1, 1], [], []>} : vector<32x256xbf16>, vector<256x256xbf16>, vector<32x256xf32> -> vector<32x256xf32>
    %7 = arith.addf %3, %6 : vector<32x256xf32>
    %c0_6 = arith.constant 0 : index
    %c0_7 = arith.constant 0 : index
    %8 = vector.load %arg8[%c0_6, %c0_7] : memref<32x256xf32, #tpu.memory_space<vmem>>, vector<32x256xf32>
    tpu.vector_store %arg8[%c0_6, %c0_7], %7 {strides = array<i32>} : memref<32x256xf32, #tpu.memory_space<vmem>>, vector<32x256xf32>,
    %c8_i32 = arith.constant 8 : i32
    %9 = arith.cmpi eq, %arg2, %c8_i32 : i32
    %10 = arith.extui %9 : i1 to i32
    %c0_i32_8 = arith.constant 0 : i32
    %11 = arith.cmpi ne, %10, %c0_i32_8 : i32
    scf.if %11 {
      %c0_9 = arith.constant 0 : index
      %c0_10 = arith.constant 0 : index
      %12 = vector.load %arg8[%c0_9, %c0_10] : memref<32x256xf32, #tpu.memory_space<vmem>>, vector<32x256xf32>
      %c0_11 = arith.constant 0 : index
      %c0_12 = arith.constant 0 : index
      %13 = vector.load %arg5[%c0_11, %c0_12] : memref<1x256xf32, #tpu.memory_space<vmem>>, vector<1x256xf32>
      %14 = vector.broadcast %13 : vector<1x256xf32> to vector<32x256xf32>
      %15 = arith.mulf %12, %14 : vector<32x256xf32>
      %c0_13 = arith.constant 0 : index
      %c0_14 = arith.constant 0 : index
      %16 = vector.load %arg6[%c0_13, %c0_14] : memref<1x256xf32, #tpu.memory_space<vmem>>, vector<1x256xf32>
      %17 = vector.broadcast %16 : vector<1x256xf32> to vector<32x256xf32>
      %18 = arith.addf %15, %17 : vector<32x256xf32>
      %cst_15 = arith.constant 0.000000e+00 : f32
      %19 = vector.broadcast %cst_15 : f32 to vector<32x256xf32>
      %20 = arith.maximumf %18, %19 : vector<32x256xf32>
      %21 = arith.truncf %20 : vector<32x256xf32> to vector<32x256xbf16>
      %c0_16 = arith.constant 0 : index
      %c0_17 = arith.constant 0 : index
      %22 = vector.load %arg7[%c0_16, %c0_17] : memref<32x256xbf16, #tpu.memory_space<vmem>>, vector<32x256xbf16>
      tpu.vector_store %arg7[%c0_16, %c0_17], %21 {strides = array<i32>} : memref<32x256xbf16, #tpu.memory_space<vmem>>, vector<32x256xbf16>,
    } else {
    }
    return
  }
  func.func @transform_0(%arg0: i32, %arg1: i32, %arg2: i32) -> (i32, i32) {
    %c0_i32 = arith.constant 0 : i32
    return %arg0, %arg2 : i32, i32
  }
  func.func @transform_1(%arg0: i32, %arg1: i32, %arg2: i32) -> (i32, i32) {
    %c0_i32 = arith.constant 0 : i32
    return %arg2, %arg1 : i32, i32
  }
  func.func @transform_2(%arg0: i32, %arg1: i32, %arg2: i32) -> (i32, i32) {
    %c0_i32 = arith.constant 0 : i32
    %c0_i32_0 = arith.constant 0 : i32
    return %c0_i32, %arg1 : i32, i32
  }
  func.func @transform_3(%arg0: i32, %arg1: i32, %arg2: i32) -> (i32, i32) {
    %c0_i32 = arith.constant 0 : i32
    %c0_i32_0 = arith.constant 0 : i32
    return %c0_i32, %arg1 : i32, i32
  }
  func.func @transform_4(%arg0: i32, %arg1: i32, %arg2: i32) -> (i32, i32) {
    %c0_i32 = arith.constant 0 : i32
    return %arg0, %arg1 : i32, i32
  }
}

module attributes {stable_mosaic.version = 11 : i64} {
  func.func @_pair_max_kernel(%arg0: i32, %arg1: memref<4x4096xbf16, #tpu.memory_space<vmem>>, %arg2: memref<4x2048xbf16, #tpu.memory_space<vmem>>) attributes {dimension_semantics = [#tpu.dimension_semantics<parallel>], iteration_bounds = array<i64: 1>, scalar_prefetch = 0 : i64, scratch_operands = 0 : i64, tpu.core_type = #tpu.core_type<tc>, window_params = [{transform_indices = @transform_0, window_bounds = array<i64: 4, 4096>}, {transform_indices = @transform_1, window_bounds = array<i64: 4, 2048>}]} {
    %c0 = arith.constant 0 : index
    %c0_0 = arith.constant 0 : index
    %0 = vector.load %arg1[%c0, %c0_0] : memref<4x4096xbf16, #tpu.memory_space<vmem>>, vector<4x2048xbf16>
    %c0_1 = arith.constant 0 : index
    %c2048 = arith.constant 2048 : index
    %1 = vector.load %arg1[%c0_1, %c2048] : memref<4x4096xbf16, #tpu.memory_space<vmem>>, vector<4x2048xbf16>
    %2 = arith.maximumf %0, %1 : vector<4x2048xbf16>
    %c0_2 = arith.constant 0 : index
    %c0_3 = arith.constant 0 : index
    %3 = vector.load %arg2[%c0_2, %c0_3] : memref<4x2048xbf16, #tpu.memory_space<vmem>>, vector<4x2048xbf16>
    tpu.vector_store %arg2[%c0_2, %c0_3], %2 {strides = array<i32>} : memref<4x2048xbf16, #tpu.memory_space<vmem>>, vector<4x2048xbf16>,
    return
  }
  func.func @transform_0(%arg0: i32) -> (i32, i32) {
    %c0_i32 = arith.constant 0 : i32
    %c0_i32_0 = arith.constant 0 : i32
    return %arg0, %c0_i32 : i32, i32
  }
  func.func @transform_1(%arg0: i32) -> (i32, i32) {
    %c0_i32 = arith.constant 0 : i32
    %c0_i32_0 = arith.constant 0 : i32
    return %arg0, %c0_i32 : i32, i32
  }
}

module attributes {stable_mosaic.version = 11 : i64} {
  func.func @_pair_max_kernel(%arg0: i32, %arg1: memref<8x1024xbf16, #tpu.memory_space<vmem>>, %arg2: memref<8x512xbf16, #tpu.memory_space<vmem>>) attributes {dimension_semantics = [#tpu.dimension_semantics<parallel>], iteration_bounds = array<i64: 1>, scalar_prefetch = 0 : i64, scratch_operands = 0 : i64, tpu.core_type = #tpu.core_type<tc>, window_params = [{transform_indices = @transform_0, window_bounds = array<i64: 8, 1024>}, {transform_indices = @transform_1, window_bounds = array<i64: 8, 512>}]} {
    %c0 = arith.constant 0 : index
    %c0_0 = arith.constant 0 : index
    %0 = vector.load %arg1[%c0, %c0_0] : memref<8x1024xbf16, #tpu.memory_space<vmem>>, vector<8x512xbf16>
    %c0_1 = arith.constant 0 : index
    %c512 = arith.constant 512 : index
    %1 = vector.load %arg1[%c0_1, %c512] : memref<8x1024xbf16, #tpu.memory_space<vmem>>, vector<8x512xbf16>
    %2 = arith.maximumf %0, %1 : vector<8x512xbf16>
    %c0_2 = arith.constant 0 : index
    %c0_3 = arith.constant 0 : index
    %3 = vector.load %arg2[%c0_2, %c0_3] : memref<8x512xbf16, #tpu.memory_space<vmem>>, vector<8x512xbf16>
    tpu.vector_store %arg2[%c0_2, %c0_3], %2 {strides = array<i32>} : memref<8x512xbf16, #tpu.memory_space<vmem>>, vector<8x512xbf16>,
    return
  }
  func.func @transform_0(%arg0: i32) -> (i32, i32) {
    %c0_i32 = arith.constant 0 : i32
    %c0_i32_0 = arith.constant 0 : i32
    return %arg0, %c0_i32 : i32, i32
  }
  func.func @transform_1(%arg0: i32) -> (i32, i32) {
    %c0_i32 = arith.constant 0 : i32
    %c0_i32_0 = arith.constant 0 : i32
    return %arg0, %c0_i32 : i32, i32
  }
}

module attributes {stable_mosaic.version = 11 : i64} {
  func.func @_fused_gemm_kernel(%arg0: i32, %arg1: i32, %arg2: i32, %arg3: memref<8x256xbf16, #tpu.memory_space<vmem>>, %arg4: memref<256x256xbf16, #tpu.memory_space<vmem>>, %arg5: memref<1x256xf32, #tpu.memory_space<vmem>>, %arg6: memref<1x256xf32, #tpu.memory_space<vmem>>, %arg7: memref<8x256xbf16, #tpu.memory_space<vmem>>, %arg8: memref<8x256xf32, #tpu.memory_space<vmem>>) attributes {dimension_semantics = [#tpu.dimension_semantics<parallel>, #tpu.dimension_semantics<parallel>, #tpu.dimension_semantics<arbitrary>], iteration_bounds = array<i64: 1, 4, 18>, scalar_prefetch = 0 : i64, scratch_operands = 1 : i64, tpu.core_type = #tpu.core_type<tc>, window_params = [{transform_indices = @transform_0, window_bounds = array<i64: 8, 256>}, {transform_indices = @transform_1, window_bounds = array<i64: 256, 256>}, {transform_indices = @transform_2, window_bounds = array<i64: 1, 256>}, {transform_indices = @transform_3, window_bounds = array<i64: 1, 256>}, {transform_indices = @transform_4, window_bounds = array<i64: 8, 256>}]} {
    %c0_i32 = arith.constant 0 : i32
    %0 = arith.cmpi eq, %arg2, %c0_i32 : i32
    %1 = arith.extui %0 : i1 to i32
    %c0_i32_0 = arith.constant 0 : i32
    %2 = arith.cmpi ne, %1, %c0_i32_0 : i32
    scf.if %2 {
      %cst_9 = arith.constant 0.000000e+00 : f32
      %12 = vector.broadcast %cst_9 : f32 to vector<8x256xf32>
      %c0_10 = arith.constant 0 : index
      %c0_11 = arith.constant 0 : index
      %13 = vector.load %arg8[%c0_10, %c0_11] : memref<8x256xf32, #tpu.memory_space<vmem>>, vector<8x256xf32>
      tpu.vector_store %arg8[%c0_10, %c0_11], %12 {strides = array<i32>} : memref<8x256xf32, #tpu.memory_space<vmem>>, vector<8x256xf32>,
    } else {
    }
    %c0 = arith.constant 0 : index
    %c0_1 = arith.constant 0 : index
    %3 = vector.load %arg8[%c0, %c0_1] : memref<8x256xf32, #tpu.memory_space<vmem>>, vector<8x256xf32>
    %c0_2 = arith.constant 0 : index
    %c0_3 = arith.constant 0 : index
    %4 = vector.load %arg3[%c0_2, %c0_3] : memref<8x256xbf16, #tpu.memory_space<vmem>>, vector<8x256xbf16>
    %c0_4 = arith.constant 0 : index
    %c0_5 = arith.constant 0 : index
    %5 = vector.load %arg4[%c0_4, %c0_5] : memref<256x256xbf16, #tpu.memory_space<vmem>>, vector<256x256xbf16>
    %cst = arith.constant dense<0.000000e+00> : vector<8x256xf32>
    %6 = tpu.matmul %4, %5, %cst {dimension_numbers = #tpu.dot_dimension_numbers<[1], [0], [0], [1], [0, 0, 1, 1], [], []>} : vector<8x256xbf16>, vector<256x256xbf16>, vector<8x256xf32> -> vector<8x256xf32>
    %7 = arith.addf %3, %6 : vector<8x256xf32>
    %c0_6 = arith.constant 0 : index
    %c0_7 = arith.constant 0 : index
    %8 = vector.load %arg8[%c0_6, %c0_7] : memref<8x256xf32, #tpu.memory_space<vmem>>, vector<8x256xf32>
    tpu.vector_store %arg8[%c0_6, %c0_7], %7 {strides = array<i32>} : memref<8x256xf32, #tpu.memory_space<vmem>>, vector<8x256xf32>,
    %c17_i32 = arith.constant 17 : i32
    %9 = arith.cmpi eq, %arg2, %c17_i32 : i32
    %10 = arith.extui %9 : i1 to i32
    %c0_i32_8 = arith.constant 0 : i32
    %11 = arith.cmpi ne, %10, %c0_i32_8 : i32
    scf.if %11 {
      %c0_9 = arith.constant 0 : index
      %c0_10 = arith.constant 0 : index
      %12 = vector.load %arg8[%c0_9, %c0_10] : memref<8x256xf32, #tpu.memory_space<vmem>>, vector<8x256xf32>
      %c0_11 = arith.constant 0 : index
      %c0_12 = arith.constant 0 : index
      %13 = vector.load %arg5[%c0_11, %c0_12] : memref<1x256xf32, #tpu.memory_space<vmem>>, vector<1x256xf32>
      %14 = vector.broadcast %13 : vector<1x256xf32> to vector<8x256xf32>
      %15 = arith.mulf %12, %14 : vector<8x256xf32>
      %c0_13 = arith.constant 0 : index
      %c0_14 = arith.constant 0 : index
      %16 = vector.load %arg6[%c0_13, %c0_14] : memref<1x256xf32, #tpu.memory_space<vmem>>, vector<1x256xf32>
      %17 = vector.broadcast %16 : vector<1x256xf32> to vector<8x256xf32>
      %18 = arith.addf %15, %17 : vector<8x256xf32>
      %cst_15 = arith.constant 0.000000e+00 : f32
      %19 = vector.broadcast %cst_15 : f32 to vector<8x256xf32>
      %20 = arith.maximumf %18, %19 : vector<8x256xf32>
      %21 = arith.truncf %20 : vector<8x256xf32> to vector<8x256xbf16>
      %c0_16 = arith.constant 0 : index
      %c0_17 = arith.constant 0 : index
      %22 = vector.load %arg7[%c0_16, %c0_17] : memref<8x256xbf16, #tpu.memory_space<vmem>>, vector<8x256xbf16>
      tpu.vector_store %arg7[%c0_16, %c0_17], %21 {strides = array<i32>} : memref<8x256xbf16, #tpu.memory_space<vmem>>, vector<8x256xbf16>,
    } else {
    }
    return
  }
  func.func @transform_0(%arg0: i32, %arg1: i32, %arg2: i32) -> (i32, i32) {
    %c0_i32 = arith.constant 0 : i32
    return %arg0, %arg2 : i32, i32
  }
  func.func @transform_1(%arg0: i32, %arg1: i32, %arg2: i32) -> (i32, i32) {
    %c0_i32 = arith.constant 0 : i32
    return %arg2, %arg1 : i32, i32
  }
  func.func @transform_2(%arg0: i32, %arg1: i32, %arg2: i32) -> (i32, i32) {
    %c0_i32 = arith.constant 0 : i32
    %c0_i32_0 = arith.constant 0 : i32
    return %c0_i32, %arg1 : i32, i32
  }
  func.func @transform_3(%arg0: i32, %arg1: i32, %arg2: i32) -> (i32, i32) {
    %c0_i32 = arith.constant 0 : i32
    %c0_i32_0 = arith.constant 0 : i32
    return %c0_i32, %arg1 : i32, i32
  }
  func.func @transform_4(%arg0: i32, %arg1: i32, %arg2: i32) -> (i32, i32) {
    %c0_i32 = arith.constant 0 : i32
    return %arg0, %arg1 : i32, i32
  }
}

module attributes {stable_mosaic.version = 11 : i64} {
  func.func @_pair_max_kernel(%arg0: i32, %arg1: memref<2x4096xbf16, #tpu.memory_space<vmem>>, %arg2: memref<2x2048xbf16, #tpu.memory_space<vmem>>) attributes {dimension_semantics = [#tpu.dimension_semantics<parallel>], iteration_bounds = array<i64: 1>, scalar_prefetch = 0 : i64, scratch_operands = 0 : i64, tpu.core_type = #tpu.core_type<tc>, window_params = [{transform_indices = @transform_0, window_bounds = array<i64: 2, 4096>}, {transform_indices = @transform_1, window_bounds = array<i64: 2, 2048>}]} {
    %c0 = arith.constant 0 : index
    %c0_0 = arith.constant 0 : index
    %0 = vector.load %arg1[%c0, %c0_0] : memref<2x4096xbf16, #tpu.memory_space<vmem>>, vector<2x2048xbf16>
    %c0_1 = arith.constant 0 : index
    %c2048 = arith.constant 2048 : index
    %1 = vector.load %arg1[%c0_1, %c2048] : memref<2x4096xbf16, #tpu.memory_space<vmem>>, vector<2x2048xbf16>
    %2 = arith.maximumf %0, %1 : vector<2x2048xbf16>
    %c0_2 = arith.constant 0 : index
    %c0_3 = arith.constant 0 : index
    %3 = vector.load %arg2[%c0_2, %c0_3] : memref<2x2048xbf16, #tpu.memory_space<vmem>>, vector<2x2048xbf16>
    tpu.vector_store %arg2[%c0_2, %c0_3], %2 {strides = array<i32>} : memref<2x2048xbf16, #tpu.memory_space<vmem>>, vector<2x2048xbf16>,
    return
  }
  func.func @transform_0(%arg0: i32) -> (i32, i32) {
    %c0_i32 = arith.constant 0 : i32
    %c0_i32_0 = arith.constant 0 : i32
    return %arg0, %c0_i32 : i32, i32
  }
  func.func @transform_1(%arg0: i32) -> (i32, i32) {
    %c0_i32 = arith.constant 0 : i32
    %c0_i32_0 = arith.constant 0 : i32
    return %arg0, %c0_i32 : i32, i32
  }
}

module attributes {stable_mosaic.version = 11 : i64} {
  func.func @_pair_max_kernel(%arg0: i32, %arg1: memref<2x2048xbf16, #tpu.memory_space<vmem>>, %arg2: memref<2x1024xbf16, #tpu.memory_space<vmem>>) attributes {dimension_semantics = [#tpu.dimension_semantics<parallel>], iteration_bounds = array<i64: 1>, scalar_prefetch = 0 : i64, scratch_operands = 0 : i64, tpu.core_type = #tpu.core_type<tc>, window_params = [{transform_indices = @transform_0, window_bounds = array<i64: 2, 2048>}, {transform_indices = @transform_1, window_bounds = array<i64: 2, 1024>}]} {
    %c0 = arith.constant 0 : index
    %c0_0 = arith.constant 0 : index
    %0 = vector.load %arg1[%c0, %c0_0] : memref<2x2048xbf16, #tpu.memory_space<vmem>>, vector<2x1024xbf16>
    %c0_1 = arith.constant 0 : index
    %c1024 = arith.constant 1024 : index
    %1 = vector.load %arg1[%c0_1, %c1024] : memref<2x2048xbf16, #tpu.memory_space<vmem>>, vector<2x1024xbf16>
    %2 = arith.maximumf %0, %1 : vector<2x1024xbf16>
    %c0_2 = arith.constant 0 : index
    %c0_3 = arith.constant 0 : index
    %3 = vector.load %arg2[%c0_2, %c0_3] : memref<2x1024xbf16, #tpu.memory_space<vmem>>, vector<2x1024xbf16>
    tpu.vector_store %arg2[%c0_2, %c0_3], %2 {strides = array<i32>} : memref<2x1024xbf16, #tpu.memory_space<vmem>>, vector<2x1024xbf16>,
    return
  }
  func.func @transform_0(%arg0: i32) -> (i32, i32) {
    %c0_i32 = arith.constant 0 : i32
    %c0_i32_0 = arith.constant 0 : i32
    return %arg0, %c0_i32 : i32, i32
  }
  func.func @transform_1(%arg0: i32) -> (i32, i32) {
    %c0_i32 = arith.constant 0 : i32
    %c0_i32_0 = arith.constant 0 : i32
    return %arg0, %c0_i32 : i32, i32
  }
}

module attributes {stable_mosaic.version = 11 : i64} {
  func.func @_fused_gemm_kernel(%arg0: i32, %arg1: i32, %arg2: i32, %arg3: memref<2x256xbf16, #tpu.memory_space<vmem>>, %arg4: memref<256x256xbf16, #tpu.memory_space<vmem>>, %arg5: memref<1x256xf32, #tpu.memory_space<vmem>>, %arg6: memref<1x256xf32, #tpu.memory_space<vmem>>, %arg7: memref<2x256xbf16, #tpu.memory_space<vmem>>, %arg8: memref<2x256xf32, #tpu.memory_space<vmem>>) attributes {dimension_semantics = [#tpu.dimension_semantics<parallel>, #tpu.dimension_semantics<parallel>, #tpu.dimension_semantics<arbitrary>], iteration_bounds = array<i64: 1, 2, 4>, scalar_prefetch = 0 : i64, scratch_operands = 1 : i64, tpu.core_type = #tpu.core_type<tc>, window_params = [{transform_indices = @transform_0, window_bounds = array<i64: 2, 256>}, {transform_indices = @transform_1, window_bounds = array<i64: 256, 256>}, {transform_indices = @transform_2, window_bounds = array<i64: 1, 256>}, {transform_indices = @transform_3, window_bounds = array<i64: 1, 256>}, {transform_indices = @transform_4, window_bounds = array<i64: 2, 256>}]} {
    %c0_i32 = arith.constant 0 : i32
    %0 = arith.cmpi eq, %arg2, %c0_i32 : i32
    %1 = arith.extui %0 : i1 to i32
    %c0_i32_0 = arith.constant 0 : i32
    %2 = arith.cmpi ne, %1, %c0_i32_0 : i32
    scf.if %2 {
      %cst_9 = arith.constant 0.000000e+00 : f32
      %12 = vector.broadcast %cst_9 : f32 to vector<2x256xf32>
      %c0_10 = arith.constant 0 : index
      %c0_11 = arith.constant 0 : index
      %13 = vector.load %arg8[%c0_10, %c0_11] : memref<2x256xf32, #tpu.memory_space<vmem>>, vector<2x256xf32>
      tpu.vector_store %arg8[%c0_10, %c0_11], %12 {strides = array<i32>} : memref<2x256xf32, #tpu.memory_space<vmem>>, vector<2x256xf32>,
    } else {
    }
    %c0 = arith.constant 0 : index
    %c0_1 = arith.constant 0 : index
    %3 = vector.load %arg8[%c0, %c0_1] : memref<2x256xf32, #tpu.memory_space<vmem>>, vector<2x256xf32>
    %c0_2 = arith.constant 0 : index
    %c0_3 = arith.constant 0 : index
    %4 = vector.load %arg3[%c0_2, %c0_3] : memref<2x256xbf16, #tpu.memory_space<vmem>>, vector<2x256xbf16>
    %c0_4 = arith.constant 0 : index
    %c0_5 = arith.constant 0 : index
    %5 = vector.load %arg4[%c0_4, %c0_5] : memref<256x256xbf16, #tpu.memory_space<vmem>>, vector<256x256xbf16>
    %cst = arith.constant dense<0.000000e+00> : vector<2x256xf32>
    %6 = tpu.matmul %4, %5, %cst {dimension_numbers = #tpu.dot_dimension_numbers<[1], [0], [0], [1], [0, 0, 1, 1], [], []>} : vector<2x256xbf16>, vector<256x256xbf16>, vector<2x256xf32> -> vector<2x256xf32>
    %7 = arith.addf %3, %6 : vector<2x256xf32>
    %c0_6 = arith.constant 0 : index
    %c0_7 = arith.constant 0 : index
    %8 = vector.load %arg8[%c0_6, %c0_7] : memref<2x256xf32, #tpu.memory_space<vmem>>, vector<2x256xf32>
    tpu.vector_store %arg8[%c0_6, %c0_7], %7 {strides = array<i32>} : memref<2x256xf32, #tpu.memory_space<vmem>>, vector<2x256xf32>,
    %c3_i32 = arith.constant 3 : i32
    %9 = arith.cmpi eq, %arg2, %c3_i32 : i32
    %10 = arith.extui %9 : i1 to i32
    %c0_i32_8 = arith.constant 0 : i32
    %11 = arith.cmpi ne, %10, %c0_i32_8 : i32
    scf.if %11 {
      %c0_9 = arith.constant 0 : index
      %c0_10 = arith.constant 0 : index
      %12 = vector.load %arg8[%c0_9, %c0_10] : memref<2x256xf32, #tpu.memory_space<vmem>>, vector<2x256xf32>
      %c0_11 = arith.constant 0 : index
      %c0_12 = arith.constant 0 : index
      %13 = vector.load %arg5[%c0_11, %c0_12] : memref<1x256xf32, #tpu.memory_space<vmem>>, vector<1x256xf32>
      %14 = vector.broadcast %13 : vector<1x256xf32> to vector<2x256xf32>
      %15 = arith.mulf %12, %14 : vector<2x256xf32>
      %c0_13 = arith.constant 0 : index
      %c0_14 = arith.constant 0 : index
      %16 = vector.load %arg6[%c0_13, %c0_14] : memref<1x256xf32, #tpu.memory_space<vmem>>, vector<1x256xf32>
      %17 = vector.broadcast %16 : vector<1x256xf32> to vector<2x256xf32>
      %18 = arith.addf %15, %17 : vector<2x256xf32>
      %cst_15 = arith.constant 0.000000e+00 : f32
      %19 = vector.broadcast %cst_15 : f32 to vector<2x256xf32>
      %20 = arith.maximumf %18, %19 : vector<2x256xf32>
      %21 = arith.truncf %20 : vector<2x256xf32> to vector<2x256xbf16>
      %c0_16 = arith.constant 0 : index
      %c0_17 = arith.constant 0 : index
      %22 = vector.load %arg7[%c0_16, %c0_17] : memref<2x256xbf16, #tpu.memory_space<vmem>>, vector<2x256xbf16>
      tpu.vector_store %arg7[%c0_16, %c0_17], %21 {strides = array<i32>} : memref<2x256xbf16, #tpu.memory_space<vmem>>, vector<2x256xbf16>,
    } else {
    }
    return
  }
  func.func @transform_0(%arg0: i32, %arg1: i32, %arg2: i32) -> (i32, i32) {
    %c0_i32 = arith.constant 0 : i32
    return %arg0, %arg2 : i32, i32
  }
  func.func @transform_1(%arg0: i32, %arg1: i32, %arg2: i32) -> (i32, i32) {
    %c0_i32 = arith.constant 0 : i32
    return %arg2, %arg1 : i32, i32
  }
  func.func @transform_2(%arg0: i32, %arg1: i32, %arg2: i32) -> (i32, i32) {
    %c0_i32 = arith.constant 0 : i32
    %c0_i32_0 = arith.constant 0 : i32
    return %c0_i32, %arg1 : i32, i32
  }
  func.func @transform_3(%arg0: i32, %arg1: i32, %arg2: i32) -> (i32, i32) {
    %c0_i32 = arith.constant 0 : i32
    %c0_i32_0 = arith.constant 0 : i32
    return %c0_i32, %arg1 : i32, i32
  }
  func.func @transform_4(%arg0: i32, %arg1: i32, %arg2: i32) -> (i32, i32) {
    %c0_i32 = arith.constant 0 : i32
    return %arg0, %arg1 : i32, i32
  }
}

module attributes {stable_mosaic.version = 11 : i64} {
  func.func @_fc_softmax_kernel(%arg0: i32, %arg1: memref<2x512xbf16, #tpu.memory_space<vmem>>, %arg2: memref<512x128xbf16, #tpu.memory_space<vmem>>, %arg3: memref<1x128xf32, #tpu.memory_space<vmem>>, %arg4: memref<2x128xf32, #tpu.memory_space<vmem>>) attributes {dimension_semantics = [#tpu.dimension_semantics<parallel>], iteration_bounds = array<i64: 1>, scalar_prefetch = 0 : i64, scratch_operands = 0 : i64, tpu.core_type = #tpu.core_type<tc>, window_params = [{transform_indices = @transform_0, window_bounds = array<i64: 2, 512>}, {pipeline_mode = #tpu.pipeline_mode<synchronous>, transform_indices = @transform_1, window_bounds = array<i64: 512, 128>}, {pipeline_mode = #tpu.pipeline_mode<synchronous>, transform_indices = @transform_2, window_bounds = array<i64: 1, 128>}, {transform_indices = @transform_3, window_bounds = array<i64: 2, 128>}]} {
    %c0 = arith.constant 0 : index
    %c0_0 = arith.constant 0 : index
    %0 = vector.load %arg1[%c0, %c0_0] : memref<2x512xbf16, #tpu.memory_space<vmem>>, vector<2x512xbf16>
    %c0_1 = arith.constant 0 : index
    %c0_2 = arith.constant 0 : index
    %1 = vector.load %arg2[%c0_1, %c0_2] : memref<512x128xbf16, #tpu.memory_space<vmem>>, vector<512x128xbf16>
    %cst = arith.constant dense<0.000000e+00> : vector<2x128xf32>
    %2 = tpu.matmul %0, %1, %cst {dimension_numbers = #tpu.dot_dimension_numbers<[1], [0], [0], [1], [0, 0, 1, 1], [], []>} : vector<2x512xbf16>, vector<512x128xbf16>, vector<2x128xf32> -> vector<2x128xf32>
    %c0_3 = arith.constant 0 : index
    %c0_4 = arith.constant 0 : index
    %3 = vector.load %arg3[%c0_3, %c0_4] : memref<1x128xf32, #tpu.memory_space<vmem>>, vector<1x128xf32>
    %4 = vector.broadcast %3 : vector<1x128xf32> to vector<2x128xf32>
    %5 = arith.addf %2, %4 : vector<2x128xf32>
    %cst_5 = arith.constant dense<0xFF800000> : vector<2xf32>
    %6 = vector.multi_reduction <maximumf>, %5, %cst_5 [1] : vector<2x128xf32> to vector<2xf32>
    %7 = vector.shape_cast %6 : vector<2xf32> to vector<2x1xf32>
    %8 = vector.broadcast %7 : vector<2x1xf32> to vector<2x128xf32>
    %9 = arith.subf %5, %8 : vector<2x128xf32>
    %10 = math.exp %9 : vector<2x128xf32>
    %cst_6 = arith.constant dense<0.000000e+00> : vector<2xf32>
    %11 = vector.multi_reduction <add>, %10, %cst_6 [1] : vector<2x128xf32> to vector<2xf32>
    %12 = vector.shape_cast %11 : vector<2xf32> to vector<2x1xf32>
    %13 = vector.broadcast %12 : vector<2x1xf32> to vector<2x128xf32>
    %14 = arith.divf %10, %13 : vector<2x128xf32>
    %c0_7 = arith.constant 0 : index
    %c0_8 = arith.constant 0 : index
    %15 = vector.load %arg4[%c0_7, %c0_8] : memref<2x128xf32, #tpu.memory_space<vmem>>, vector<2x128xf32>
    tpu.vector_store %arg4[%c0_7, %c0_8], %14 {strides = array<i32>} : memref<2x128xf32, #tpu.memory_space<vmem>>, vector<2x128xf32>,
    return
  }
  func.func @transform_0(%arg0: i32) -> (i32, i32) {
    %c0_i32 = arith.constant 0 : i32
    %c0_i32_0 = arith.constant 0 : i32
    return %arg0, %c0_i32 : i32, i32
  }
  func.func @transform_1(%arg0: i32) -> (i32, i32) {
    %c0_i32 = arith.constant 0 : i32
    %c0_i32_0 = arith.constant 0 : i32
    %c0_i32_1 = arith.constant 0 : i32
    return %c0_i32, %c0_i32_0 : i32, i32
  }
  func.func @transform_2(%arg0: i32) -> (i32, i32) {
    %c0_i32 = arith.constant 0 : i32
    %c0_i32_0 = arith.constant 0 : i32
    %c0_i32_1 = arith.constant 0 : i32
    return %c0_i32, %c0_i32_0 : i32, i32
  }
  func.func @transform_3(%arg0: i32) -> (i32, i32) {
    %c0_i32 = arith.constant 0 : i32
    %c0_i32_0 = arith.constant 0 : i32
    return %arg0, %c0_i32 : i32, i32
  }
}

</mosaic_0001>

<bundles_post_ra>
// kernel: cnn_model_forward.18
= control target key start
LH: loop header
LB: loop body
LE: loop exit
PB: predicated region body
PF: predicated region fallthrough
CT: control target
= control target key end

     0   :  { %s438_s0 = inlined_call_operand.vmem [shape: bf16[32,4096], index: 0, kind: input, shape index: {}]   ;;  %s439_s1 = inlined_call_operand.vmem [shape: bf16[32,2048], index: 1, kind: output, shape index: {}]  }
   0x1   :  { %v8_v0 = vld [vmem:[%s438_s0] sm:$0xff]  ;;  %v9_v2 = vld [vmem:[%s438_s0 + $0x8] sm:$0xff]  ;;  %v10_v5 = vld [vmem:[%s438_s0 + $0x10] sm:$0xff] }
   0x2   :  { %v40_v1 = vld [vmem:[%s438_s0 + $0x40] sm:$0xff]  ;;  %v41_v4 = vld [vmem:[%s438_s0 + $0x48] sm:$0xff]  ;;  %v42_v6 = vld [vmem:[%s438_s0 + $0x50] sm:$0xff] }
   0x3   :  { %v72_v3 = vmax.bf16 %v40_v1, %v8_v0  ;;  %v73_v7 = vmax.bf16 %v41_v4, %v9_v2  ;;  %v74_v8 = vmax.bf16 %v42_v6, %v10_v5  ;;  %v11_v9 = vld [vmem:[%s438_s0 + $0x18] sm:$0xff]  ;;  %v12_v11 = vld [vmem:[%s438_s0 + $0x20] sm:$0xff]  ;;  %v13_v14 = vld [vmem:[%s438_s0 + $0x28] sm:$0xff] }
   0x4   :  { %v43_v10 = vld [vmem:[%s438_s0 + $0x58] sm:$0xff]  ;;  %v44_v13 = vld [vmem:[%s438_s0 + $0x60] sm:$0xff]  ;;  %v45_v15 = vld [vmem:[%s438_s0 + $0x68] sm:$0xff] }
   0x5   :  { %104 = vst [vmem:[%s439_s1] sm:$0xff] %v72_v3  ;;  %v75_v12 = vmax.bf16 %v43_v10, %v11_v9  ;;  %105 = vst [vmem:[%s439_s1 + $0x8] sm:$0xff] %v73_v7  ;;  %v76_v16 = vmax.bf16 %v44_v13, %v12_v11  ;;  %v77_v17 = vmax.bf16 %v45_v15, %v13_v14  ;;  %v14_v18 = vld [vmem:[%s438_s0 + $0x30] sm:$0xff]  ;;  %v15_v20 = vld [vmem:[%s438_s0 + $0x38] sm:$0xff] }
   0x6   :  { %106 = vst [vmem:[%s439_s1 + $0x10] sm:$0xff] %v74_v8  ;;  %v46_v19 = vld [vmem:[%s438_s0 + $0x70] sm:$0xff]  ;;  %v47_v22 = vld [vmem:[%s438_s0 + $0x78] sm:$0xff]  ;;  %v16_v23 = vld [vmem:[%s438_s0 + $0x80] sm:$0xff] }
   0x7   :  { %107 = vst [vmem:[%s439_s1 + $0x18] sm:$0xff] %v75_v12  ;;  %v78_v21 = vmax.bf16 %v46_v19, %v14_v18  ;;  %v48_v24 = vld [vmem:[%s438_s0 + $0xc0] sm:$0xff]  ;;  %108 = vst [vmem:[%s439_s1 + $0x20] sm:$0xff] %v76_v16  ;;  %v79_v25 = vmax.bf16 %v47_v22, %v15_v20  ;;  %v17_v27 = vld [vmem:[%s438_s0 + $0x88] sm:$0xff] }
   0x8   :  { %109 = vst [vmem:[%s439_s1 + $0x28] sm:$0xff] %v77_v17  ;;  %v80_v26 = vmax.bf16 %v48_v24, %v16_v23  ;;  %v49_v28 = vld [vmem:[%s438_s0 + $0xc8] sm:$0xff]  ;;  %v18_v29 = vld [vmem:[%s438_s0 + $0x90] sm:$0xff]  ;;  %v19_v32 = vld [vmem:[%s438_s0 + $0x98] sm:$0xff] }
   0x9   :  { %110 = vst [vmem:[%s439_s1 + $0x30] sm:$0xff] %v78_v21  ;;  %v81_v30 = vmax.bf16 %v49_v28, %v17_v27  ;;  %v50_v31 = vld [vmem:[%s438_s0 + $0xd0] sm:$0xff]  ;;  %v51_v33 = vld [vmem:[%s438_s0 + $0xd8] sm:$0xff]  ;;  %111 = vst [vmem:[%s439_s1 + $0x38] sm:$0xff] %v79_v25 }
   0xa   :  { %112 = vst [vmem:[%s439_s1 + $0x40] sm:$0xff] %v80_v26  ;;  %v82_v34 = vmax.bf16 %v50_v31, %v18_v29  ;;  %v83_v35 = vmax.bf16 %v51_v33, %v19_v32  ;;  %v20_v36 = vld [vmem:[%s438_s0 + $0xa0] sm:$0xff]  ;;  %v21_v38 = vld [vmem:[%s438_s0 + $0xa8] sm:$0xff]  ;;  %v22_v41 = vld [vmem:[%s438_s0 + $0xb0] sm:$0xff] }
   0xb   :  { %v52_v37 = vld [vmem:[%s438_s0 + $0xe0] sm:$0xff]  ;;  %113 = vst [vmem:[%s439_s1 + $0x48] sm:$0xff] %v81_v30  ;;  %v53_v40 = vld [vmem:[%s438_s0 + $0xe8] sm:$0xff]  ;;  %v54_v42 = vld [vmem:[%s438_s0 + $0xf0] sm:$0xff] }
   0xc   :  { %v84_v39 = vmax.bf16 %v52_v37, %v20_v36  ;;  %114 = vst [vmem:[%s439_s1 + $0x50] sm:$0xff] %v82_v34  ;;  %115 = vst [vmem:[%s439_s1 + $0x58] sm:$0xff] %v83_v35  ;;  %v85_v43 = vmax.bf16 %v53_v40, %v21_v38  ;;  %v86_v44 = vmax.bf16 %v54_v42, %v22_v41  ;;  %v23_v45 = vld [vmem:[%s438_s0 + $0xb8] sm:$0xff]  ;;  %v24_v47 = vld [vmem:[%s438_s0 + $0x100] sm:$0xff] }
   0xd   :  { %v55_v46 = vld [vmem:[%s438_s0 + $0xf8] sm:$0xff]  ;;  %v56_v49 = vld [vmem:[%s438_s0 + $0x140] sm:$0xff]  ;;  %v25_v50 = vld [vmem:[%s438_s0 + $0x108] sm:$0xff] }
   0xe   :  { %116 = vst [vmem:[%s439_s1 + $0x60] sm:$0xff] %v84_v39  ;;  %v87_v48 = vmax.bf16 %v55_v46, %v23_v45  ;;  %v57_v51 = vld [vmem:[%s438_s0 + $0x148] sm:$0xff]  ;;  %117 = vst [vmem:[%s439_s1 + $0x68] sm:$0xff] %v85_v43  ;;  %v88_v52 = vmax.bf16 %v56_v49, %v24_v47  ;;  %v26_v54 = vld [vmem:[%s438_s0 + $0x110] sm:$0xff] }
   0xf   :  { %118 = vst [vmem:[%s439_s1 + $0x70] sm:$0xff] %v86_v44  ;;  %v89_v53 = vmax.bf16 %v57_v51, %v25_v50  ;;  %v58_v55 = vld [vmem:[%s438_s0 + $0x150] sm:$0xff]  ;;  %v27_v56 = vld [vmem:[%s438_s0 + $0x118] sm:$0xff]  ;;  %v28_v59 = vld [vmem:[%s438_s0 + $0x120] sm:$0xff] }
  0x10   :  { %119 = vst [vmem:[%s439_s1 + $0x78] sm:$0xff] %v87_v48  ;;  %v90_v57 = vmax.bf16 %v58_v55, %v26_v54  ;;  %v59_v58 = vld [vmem:[%s438_s0 + $0x158] sm:$0xff]  ;;  %v60_v60 = vld [vmem:[%s438_s0 + $0x160] sm:$0xff]  ;;  %120 = vst [vmem:[%s439_s1 + $0x80] sm:$0xff] %v88_v52 }
  0x11   :  { %121 = vst [vmem:[%s439_s1 + $0x88] sm:$0xff] %v89_v53  ;;  %v91_v61 = vmax.bf16 %v59_v58, %v27_v56  ;;  %v92_v62 = vmax.bf16 %v60_v60, %v28_v59  ;;  %v29_v63 = vld [vmem:[%s438_s0 + $0x128] sm:$0xff]  ;;  %v30_v1 = vld [vmem:[%s438_s0 + $0x130] sm:$0xff]  ;;  %v31_v4 = vld [vmem:[%s438_s0 + $0x138] sm:$0xff] }
  0x12   :  { %v61_v0 = vld [vmem:[%s438_s0 + $0x168] sm:$0xff]  ;;  %122 = vst [vmem:[%s439_s1 + $0x90] sm:$0xff] %v90_v57  ;;  %v62_v3 = vld [vmem:[%s438_s0 + $0x170] sm:$0xff]  ;;  %v63_v5 = vld [vmem:[%s438_s0 + $0x178] sm:$0xff] }
  0x13   :  { %v93_v2 = vmax.bf16 %v61_v0, %v29_v63  ;;  %123 = vst [vmem:[%s439_s1 + $0x98] sm:$0xff] %v91_v61  ;;  %124 = vst [vmem:[%s439_s1 + $0xa0] sm:$0xff] %v92_v62  ;;  %v94_v6 = vmax.bf16 %v62_v3, %v30_v1  ;;  %v95_v7 = vmax.bf16 %v63_v5, %v31_v4  ;;  %v32_v8 = vld [vmem:[%s438_s0 + $0x180] sm:$0xff]  ;;  %v33_v10 = vld [vmem:[%s438_s0 + $0x188] sm:$0xff] }
  0x14   :  { %v64_v9 = vld [vmem:[%s438_s0 + $0x1c0] sm:$0xff]  ;;  %v65_v12 = vld [vmem:[%s438_s0 + $0x1c8] sm:$0xff]  ;;  %v34_v13 = vld [vmem:[%s438_s0 + $0x190] sm:$0xff] }
  0x15   :  { %125 = vst [vmem:[%s439_s1 + $0xa8] sm:$0xff] %v93_v2  ;;  %v96_v11 = vmax.bf16 %v64_v9, %v32_v8  ;;  %v66_v14 = vld [vmem:[%s438_s0 + $0x1d0] sm:$0xff]  ;;  %126 = vst [vmem:[%s439_s1 + $0xb0] sm:$0xff] %v94_v6  ;;  %v97_v15 = vmax.bf16 %v65_v12, %v33_v10  ;;  %v35_v17 = vld [vmem:[%s438_s0 + $0x198] sm:$0xff] }
  0x16   :  { %127 = vst [vmem:[%s439_s1 + $0xb8] sm:$0xff] %v95_v7  ;;  %v98_v16 = vmax.bf16 %v66_v14, %v34_v13  ;;  %v67_v18 = vld [vmem:[%s438_s0 + $0x1d8] sm:$0xff]  ;;  %v36_v19 = vld [vmem:[%s438_s0 + $0x1a0] sm:$0xff]  ;;  %v37_v22 = vld [vmem:[%s438_s0 + $0x1a8] sm:$0xff] }
  0x17   :  { %128 = vst [vmem:[%s439_s1 + $0xc0] sm:$0xff] %v96_v11  ;;  %v99_v20 = vmax.bf16 %v67_v18, %v35_v17  ;;  %v68_v21 = vld [vmem:[%s438_s0 + $0x1e0] sm:$0xff]  ;;  %v69_v23 = vld [vmem:[%s438_s0 + $0x1e8] sm:$0xff]  ;;  %129 = vst [vmem:[%s439_s1 + $0xc8] sm:$0xff] %v97_v15 }
  0x18   :  { %130 = vst [vmem:[%s439_s1 + $0xd0] sm:$0xff] %v98_v16  ;;  %v100_v24 = vmax.bf16 %v68_v21, %v36_v19  ;;  %v101_v25 = vmax.bf16 %v69_v23, %v37_v22  ;;  %v38_v26 = vld [vmem:[%s438_s0 + $0x1b0] sm:$0xff]  ;;  %v39_v28 = vld [vmem:[%s438_s0 + $0x1b8] sm:$0xff] }
  0x19   :  { %v70_v27 = vld [vmem:[%s438_s0 + $0x1f0] sm:$0xff]  ;;  %131 = vst [vmem:[%s439_s1 + $0xd8] sm:$0xff] %v99_v20  ;;  %v71_v30 = vld [vmem:[%s438_s0 + $0x1f8] sm:$0xff] }
  0x1a   :  { %v102_v29 = vmax.bf16 %v70_v27, %v38_v26  ;;  %132 = vst [vmem:[%s439_s1 + $0xe0] sm:$0xff] %v100_v24  ;;  %133 = vst [vmem:[%s439_s1 + $0xe8] sm:$0xff] %v101_v25  ;;  %v103_v31 = vmax.bf16 %v71_v30, %v39_v28 }
  0x1c   :  { %134 = vst [vmem:[%s439_s1 + $0xf0] sm:$0xff] %v102_v29  ;;  %135 = vst [vmem:[%s439_s1 + $0xf8] sm:$0xff] %v103_v31 }

// kernel: cnn_model_forward.17
= control target key start
LH: loop header
LB: loop body
LE: loop exit
PB: predicated region body
PF: predicated region fallthrough
CT: control target
= control target key end

     0   :  { %s2541_s15 = smov 0   ;;  %s2543_s16 = smov 0   ;;  %s3198_s0 = inlined_call_operand.vmem [shape: bf16[2048,256], index: 0, kind: input, shape index: {}]   ;;  %s3199_s1 = inlined_call_operand.vmem [shape: bf16[256,64], index: 1, kind: input, shape index: {}]   ;;  %s3200_s2 = inlined_call_operand.vmem [shape: f32[1,64], index: 2, kind: input, shape index: {}]   ;;  %s3201_s3 = inlined_call_operand.vmem [shape: f32[1,64], index: 3, kind: input, shape index: {}]   ;;  %s3202_s4 = inlined_call_operand.vmem [shape: bf16[2048,64], index: 4, kind: output, shape index: {}]  }
   0x1   :  { %s2545_s17 = smov 0  }
   0x2 LB: > { %s33_s18 = sadd.s32 1, %s2508_s16  ;;  %p2099_p0 = scmp.ge.s32.totalorder %s2512_s17, 1  ;;  %s2512_s17 = sphi %s2545_s17, %s14_s17   ;;  %s2508_s16 = sphi %s2543_s16, %s3204_s16   ;;  %s2504_s15 = sphi %s2541_s15, %s3203_s15  }
   0x3   : > { %p35_p1 = scmp.ge.s32.totalorder %s33_s18, 4  ;;  %p224_p2 = scmp.lt.s32.totalorder %s2512_s17, 5 }
   0x5   : > { %s3206_s18 = smov (%p35_p1, %s33_s18), 0  ;;  %p225_p3 = pnand %p2099_p0, %p224_p2 }
   0x6   : > { %s2100_s21 = sshll.u32 (!%p225_p3), %s2504_s15, 6 }
   0x7   : > { %228 = sbr.rel (%p225_p3) target bundleno = 414 (0x19e), region = 36  ;;  %p274_p4 = scmp.lt.s32.totalorder (!%p225_p3), %s2100_s21, 255 }
   0xc   : > { %v2376_v0 = vld [vmem:[%s3199_s1 + $0x38] sm:$0xff]   ;;  %v2514_v1 = vmov 0   ;;  %v2377_v2 = vld [vmem:[%s3199_s1 + $0x30] sm:$0xff]   ;;  %v2378_v3 = vld [vmem:[%s3199_s1 + $0x28] sm:$0xff]   ;;  %s3208_s21 = smov (!%p274_p4, %s2100_s21), 255  ;;  %vm313_vm0 = vcmask 523264  }
   0xd   : > { %954 = vmatprep.subr.bf16.mxu0 %v2514_v1  ;;  %2318 = vmatprep.subr.bf16.mxu1 %v2514_v1  ;;  %v2379_v4 = vld [vmem:[%s3199_s1 + $0x20] sm:$0xff]   ;;  %s2253_s28 = sshll.u32 %s3208_s21, 3  ;;  %v2380_v5 = vld [vmem:[%s3199_s1 + $0x18] sm:$0xff]   ;;  %v2381_v7 = vld [vmem:[%s3199_s1 + $0x10] sm:$0xff]   ;;  %v2515_v19 = vmov 0.0   ;;  %s2104_s12 = sshll.u32 %s3208_s21, 2 }
   0xe   : > { %955 = vmatpush1.bf16.msra.mxu0 %v2376_v0  ;;  %2334 = vmatpush1.bf16.msra.mxu1 %v2376_v0  ;;  %s2588_s7 = scalar_lea.vmem %s3198_s0, %s2253_s28  ;;  %v2382_v9 = vld [vmem:[%s3199_s1 + $0x8] sm:$0xff]   ;;  %v2383_v10 = vld [vmem:[%s3199_s1] sm:$0xff]   ;;  %v2384_v11 = vld [vmem:[%s3199_s1 + $0x78] sm:$0xff]   ;;  %314 = vst.msk [vmem:[#allocation2] sm:$0xff] %vm313_vm0, %v2515_v19  ;;  %s2871_s14 = scalar_lea.vmem %s3202_s4, %s2104_s12  ;;  %vm1901_vm1 = vcmask 519168  }
   0xf   : > { %956 = vmatprep.subr.bf16.mxu0 %v2514_v1  ;;  %2319 = vmatprep.subr.bf16.mxu1 %v2514_v1  ;;  %v2394_v6 = vld [vmem:[%s2588_s7 + $0x4] ss:$8 sps:$4 sm:$0xff]   ;;  %v2385_v12 = vld [vmem:[%s3199_s1 + $0x70] sm:$0xff]   ;;  %v2388_v15 = vld [vmem:[%s3199_s1 + $0x58] sm:$0xff]   ;;  %315 = vst.msk [vmem:[#allocation2 + $0x8] sm:$0xff] %vm313_vm0, %v2515_v19 }
  0x10   : > { %v2397_v8 = vld [vmem:[%s2588_s7 + $0x104] ss:$8 sps:$4 sm:$0xff]   ;;  %986 = vmatprep.mubr.bf16.mxu0 %v2394_v6  ;;  %v2389_v16 = vld [vmem:[%s3199_s1 + $0x50] sm:$0xff]   ;;  %316 = vst.msk [vmem:[#allocation2 + $0x10] sm:$0xff] %vm313_vm0, %v2515_v19  ;;  %317 = vst.msk [vmem:[#allocation2 + $0x18] sm:$0xff] %vm313_vm0, %v2515_v19 }
  0x11   : > { %1114 = vmatprep.mubr.bf16.mxu1 %v2397_v8  ;;  %v2386_v13 = vld [vmem:[%s3199_s1 + $0x68] sm:$0xff]   ;;  %v2387_v14 = vld [vmem:[%s3199_s1 + $0x60] sm:$0xff]   ;;  %318 = vst.msk [vmem:[#allocation2 + $0x20] sm:$0xff] %vm313_vm0, %v2515_v19  ;;  %319 = vst.msk [vmem:[#allocation2 + $0x28] sm:$0xff] %vm313_vm0, %v2515_v19 }
  0x12   : > { %957 = vmatpush1.bf16.msra.mxu0 %v2377_v2  ;;  %2335 = vmatpush1.bf16.msra.mxu1 %v2377_v2  ;;  %v2390_v17 = vld [vmem:[%s3199_s1 + $0x48] sm:$0xff]   ;;  %v2647_v18 = vld [vmem:[%s3199_s1 + $0x40] sm:$0xff]   ;;  %320 = vst.msk [vmem:[#allocation2 + $0x30] sm:$0xff] %vm313_vm0, %v2515_v19  ;;  %321 = vst.msk [vmem:[#allocation2 + $0x38] sm:$0xff] %vm313_vm0, %v2515_v19 }
  0x13   : > { %958 = vmatprep.subr.bf16.mxu0 %v2514_v1  ;;  %2320 = vmatprep.subr.bf16.mxu1 %v2514_v1  ;;  %322 = vst.msk [vmem:[#allocation2 + $0x40] sm:$0xff] %vm313_vm0, %v2515_v19  ;;  %323 = vst.msk [vmem:[#allocation2 + $0x48] sm:$0xff] %vm313_vm0, %v2515_v19  ;;  %v2392_v20 = vld [vmem:[%s2588_s7] ss:$8 sps:$4 sm:$0xff]   ;;  %v2398_v22 = vld [vmem:[%s2588_s7 + $0x14] ss:$8 sps:$4 sm:$0xff]  }
  0x14   : > { %324 = vst.msk [vmem:[#allocation2 + $0x50] sm:$0xff] %vm313_vm0, %v2515_v19  ;;  %325 = vst.msk [vmem:[#allocation2 + $0x58] sm:$0xff] %vm313_vm0, %v2515_v19  ;;  %v2395_v21 = vld [vmem:[%s2588_s7 + $0x100] ss:$8 sps:$4 sm:$0xff]   ;;  %v2400_v23 = vld [vmem:[%s2588_s7 + $0x114] ss:$8 sps:$4 sm:$0xff]  }
  0x15   : > { %326 = vst.msk [vmem:[#allocation2 + $0x60] sm:$0xff] %vm313_vm0, %v2515_v19  ;;  %327 = vst.msk [vmem:[#allocation2 + $0x68] sm:$0xff] %vm313_vm0, %v2515_v19  ;;  %v2402_v24 = vld [vmem:[%s2588_s7 + $0x10] ss:$8 sps:$4 sm:$0xff]   ;;  %v2404_v26 = vld [vmem:[%s2588_s7 + $0x24] ss:$8 sps:$4 sm:$0xff]  }
  0x16   : > { %959 = vmatpush1.bf16.msra.mxu0 %v2378_v3  ;;  %2336 = vmatpush1.bf16.msra.mxu1 %v2378_v3  ;;  %328 = vst.msk [vmem:[#allocation2 + $0x70] sm:$0xff] %vm313_vm0, %v2515_v19  ;;  %329 = vst.msk [vmem:[#allocation2 + $0x78] sm:$0xff] %vm313_vm0, %v2515_v19  ;;  %v2403_v25 = vld [vmem:[%s2588_s7 + $0x110] ss:$8 sps:$4 sm:$0xff]   ;;  %v2406_v27 = vld [vmem:[%s2588_s7 + $0x124] ss:$8 sps:$4 sm:$0xff]  }
  0x17   : > { %960 = vmatprep.subr.bf16.mxu0 %v2514_v1  ;;  %2321 = vmatprep.subr.bf16.mxu1 %v2514_v1  ;;  %330 = vst.msk [vmem:[#allocation2 + $0x80] sm:$0xff] %vm313_vm0, %v2515_v19  ;;  %331 = vst.msk [vmem:[#allocation2 + $0x88] sm:$0xff] %vm313_vm0, %v2515_v19  ;;  %v2408_v28 = vld [vmem:[%s2588_s7 + $0x20] ss:$8 sps:$4 sm:$0xff]   ;;  %v2410_v30 = vld [vmem:[%s2588_s7 + $0x34] ss:$8 sps:$4 sm:$0xff]  }
  0x18   : > { %332 = vst.msk [vmem:[#allocation2 + $0x90] sm:$0xff] %vm313_vm0, %v2515_v19  ;;  %333 = vst.msk [vmem:[#allocation2 + $0x98] sm:$0xff] %vm313_vm0, %v2515_v19  ;;  %v2409_v29 = vld [vmem:[%s2588_s7 + $0x120] ss:$8 sps:$4 sm:$0xff]   ;;  %v2412_v31 = vld [vmem:[%s2588_s7 + $0x134] ss:$8 sps:$4 sm:$0xff]  }
  0x19   : > { %334 = vst.msk [vmem:[#allocation2 + $0xa0] sm:$0xff] %vm313_vm0, %v2515_v19  ;;  %335 = vst.msk [vmem:[#allocation2 + $0xa8] sm:$0xff] %vm313_vm0, %v2515_v19  ;;  %v2414_v32 = vld [vmem:[%s2588_s7 + $0x30] ss:$8 sps:$4 sm:$0xff]   ;;  %v2416_v34 = vld [vmem:[%s2588_s7 + $0x44] ss:$8 sps:$4 sm:$0xff]  }
  0x1a   : > { %961 = vmatpush1.bf16.msra.mxu0 %v2379_v4  ;;  %2337 = vmatpush1.bf16.msra.mxu1 %v2379_v4  ;;  %336 = vst.msk [vmem:[#allocation2 + $0xb0] sm:$0xff] %vm313_vm0, %v2515_v19  ;;  %337 = vst.msk [vmem:[#allocation2 + $0xb8] sm:$0xff] %vm313_vm0, %v2515_v19  ;;  %v2415_v33 = vld [vmem:[%s2588_s7 + $0x130] ss:$8 sps:$4 sm:$0xff]   ;;  %v2418_v35 = vld [vmem:[%s2588_s7 + $0x144] ss:$8 sps:$4 sm:$0xff]  }
  0x1b   : > { %962 = vmatprep.subr.bf16.mxu0 %v2514_v1  ;;  %2322 = vmatprep.subr.bf16.mxu1 %v2514_v1  ;;  %338 = vst.msk [vmem:[#allocation2 + $0xc0] sm:$0xff] %vm313_vm0, %v2515_v19  ;;  %339 = vst.msk [vmem:[#allocation2 + $0xc8] sm:$0xff] %vm313_vm0, %v2515_v19  ;;  %v2420_v36 = vld [vmem:[%s2588_s7 + $0x40] ss:$8 sps:$4 sm:$0xff]   ;;  %v2422_v38 = vld [vmem:[%s2588_s7 + $0x54] ss:$8 sps:$4 sm:$0xff]  }
  0x1c   : > { %340 = vst.msk [vmem:[#allocation2 + $0xd0] sm:$0xff] %vm313_vm0, %v2515_v19  ;;  %341 = vst.msk [vmem:[#allocation2 + $0xd8] sm:$0xff] %vm313_vm0, %v2515_v19  ;;  %v2421_v37 = vld [vmem:[%s2588_s7 + $0x140] ss:$8 sps:$4 sm:$0xff]   ;;  %v2424_v39 = vld [vmem:[%s2588_s7 + $0x154] ss:$8 sps:$4 sm:$0xff]  }
  0x1d   : > { %342 = vst.msk [vmem:[#allocation2 + $0xe0] sm:$0xff] %vm313_vm0, %v2515_v19  ;;  %343 = vst.msk [vmem:[#allocation2 + $0xe8] sm:$0xff] %vm313_vm0, %v2515_v19  ;;  %v2426_v40 = vld [vmem:[%s2588_s7 + $0x50] ss:$8 sps:$4 sm:$0xff]   ;;  %v2428_v42 = vld [vmem:[%s2588_s7 + $0x64] ss:$8 sps:$4 sm:$0xff]  }
  0x1e   : > { %963 = vmatpush1.bf16.msra.mxu0 %v2380_v5  ;;  %2338 = vmatpush1.bf16.msra.mxu1 %v2380_v5  ;;  %344 = vst.msk [vmem:[#allocation2 + $0xf0] sm:$0xff] %vm313_vm0, %v2515_v19  ;;  %345 = vst.msk [vmem:[#allocation2 + $0xf8] sm:$0xff] %vm313_vm0, %v2515_v19  ;;  %v2427_v41 = vld [vmem:[%s2588_s7 + $0x150] ss:$8 sps:$4 sm:$0xff]   ;;  %v2430_v43 = vld [vmem:[%s2588_s7 + $0x164] ss:$8 sps:$4 sm:$0xff]  }
  0x1f   : > { %964 = vmatprep.subr.bf16.mxu0 %v2514_v1  ;;  %2323 = vmatprep.subr.bf16.mxu1 %v2514_v1  ;;  %346 = vst.msk [vmem:[#allocation2 + $0x100] sm:$0xff] %vm313_vm0, %v2515_v19  ;;  %347 = vst.msk [vmem:[#allocation2 + $0x108] sm:$0xff] %vm313_vm0, %v2515_v19  ;;  %v2432_v44 = vld [vmem:[%s2588_s7 + $0x60] ss:$8 sps:$4 sm:$0xff]   ;;  %v2434_v46 = vld [vmem:[%s2588_s7 + $0x74] ss:$8 sps:$4 sm:$0xff]  }
  0x20   : > { %348 = vst.msk [vmem:[#allocation2 + $0x110] sm:$0xff] %vm313_vm0, %v2515_v19  ;;  %349 = vst.msk [vmem:[#allocation2 + $0x118] sm:$0xff] %vm313_vm0, %v2515_v19  ;;  %v2433_v45 = vld [vmem:[%s2588_s7 + $0x160] ss:$8 sps:$4 sm:$0xff]   ;;  %v2436_v47 = vld [vmem:[%s2588_s7 + $0x174] ss:$8 sps:$4 sm:$0xff]  }
  0x21   : > { %350 = vst.msk [vmem:[#allocation2 + $0x120] sm:$0xff] %vm313_vm0, %v2515_v19  ;;  %351 = vst.msk [vmem:[#allocation2 + $0x128] sm:$0xff] %vm313_vm0, %v2515_v19  ;;  %v2438_v48 = vld [vmem:[%s2588_s7 + $0x70] ss:$8 sps:$4 sm:$0xff]   ;;  %v2440_v50 = vld [vmem:[%s2588_s7 + $0x84] ss:$8 sps:$4 sm:$0xff]  }
  0x22   : > { %965 = vmatpush1.bf16.msra.mxu0 %v2381_v7  ;;  %2339 = vmatpush1.bf16.msra.mxu1 %v2381_v7  ;;  %352 = vst.msk [vmem:[#allocation2 + $0x130] sm:$0xff] %vm313_vm0, %v2515_v19  ;;  %353 = vst.msk [vmem:[#allocation2 + $0x138] sm:$0xff] %vm313_vm0, %v2515_v19  ;;  %v2439_v49 = vld [vmem:[%s2588_s7 + $0x170] ss:$8 sps:$4 sm:$0xff]   ;;  %v2442_v51 = vld [vmem:[%s2588_s7 + $0x184] ss:$8 sps:$4 sm:$0xff]  }
  0x23   : > { %966 = vmatprep.subr.bf16.mxu0 %v2514_v1  ;;  %2324 = vmatprep.subr.bf16.mxu1 %v2514_v1  ;;  %354 = vst.msk [vmem:[#allocation2 + $0x140] sm:$0xff] %vm313_vm0, %v2515_v19  ;;  %355 = vst.msk [vmem:[#allocation2 + $0x148] sm:$0xff] %vm313_vm0, %v2515_v19  ;;  %v2444_v52 = vld [vmem:[%s2588_s7 + $0x80] ss:$8 sps:$4 sm:$0xff]   ;;  %v2446_v54 = vld [vmem:[%s2588_s7 + $0x94] ss:$8 sps:$4 sm:$0xff]  }
  0x24   : > { %356 = vst.msk [vmem:[#allocation2 + $0x150] sm:$0xff] %vm313_vm0, %v2515_v19  ;;  %357 = vst.msk [vmem:[#allocation2 + $0x158] sm:$0xff] %vm313_vm0, %v2515_v19  ;;  %v2445_v53 = vld [vmem:[%s2588_s7 + $0x180] ss:$8 sps:$4 sm:$0xff]   ;;  %v2448_v55 = vld [vmem:[%s2588_s7 + $0x194] ss:$8 sps:$4 sm:$0xff]  }
  0x25   : > { %358 = vst.msk [vmem:[#allocation2 + $0x160] sm:$0xff] %vm313_vm0, %v2515_v19  ;;  %359 = vst.msk [vmem:[#allocation2 + $0x168] sm:$0xff] %vm313_vm0, %v2515_v19  ;;  %v2450_v56 = vld [vmem:[%s2588_s7 + $0x90] ss:$8 sps:$4 sm:$0xff]   ;;  %v2452_v58 = vld [vmem:[%s2588_s7 + $0xa4] ss:$8 sps:$4 sm:$0xff]  }
  0x26   : > { %967 = vmatpush1.bf16.msra.mxu0 %v2382_v9  ;;  %2340 = vmatpush1.bf16.msra.mxu1 %v2382_v9  ;;  %360 = vst.msk [vmem:[#allocation2 + $0x170] sm:$0xff] %vm313_vm0, %v2515_v19  ;;  %361 = vst.msk [vmem:[#allocation2 + $0x178] sm:$0xff] %vm313_vm0, %v2515_v19  ;;  %v2451_v57 = vld [vmem:[%s2588_s7 + $0x190] ss:$8 sps:$4 sm:$0xff]   ;;  %v2454_v59 = vld [vmem:[%s2588_s7 + $0x1a4] ss:$8 sps:$4 sm:$0xff]  }
  0x27   : > { %968 = vmatprep.subr.bf16.mxu0 %v2514_v1  ;;  %2325 = vmatprep.subr.bf16.mxu1 %v2514_v1  ;;  %362 = vst.msk [vmem:[#allocation2 + $0x180] sm:$0xff] %vm313_vm0, %v2515_v19  ;;  %363 = vst.msk [vmem:[#allocation2 + $0x188] sm:$0xff] %vm313_vm0, %v2515_v19  ;;  %v2456_v60 = vld [vmem:[%s2588_s7 + $0xa0] ss:$8 sps:$4 sm:$0xff]   ;;  %v2458_v62 = vld [vmem:[%s2588_s7 + $0xb4] ss:$8 sps:$4 sm:$0xff]  }
  0x28   : > { %364 = vst.msk [vmem:[#allocation2 + $0x190] sm:$0xff] %vm313_vm0, %v2515_v19  ;;  %365 = vst.msk [vmem:[#allocation2 + $0x198] sm:$0xff] %vm313_vm0, %v2515_v19  ;;  %v2457_v61 = vld [vmem:[%s2588_s7 + $0x1a0] ss:$8 sps:$4 sm:$0xff]   ;;  %v2460_v63 = vld [vmem:[%s2588_s7 + $0x1b4] ss:$8 sps:$4 sm:$0xff]  }
  0x29   : > { %366 = vst.msk [vmem:[#allocation2 + $0x1a0] sm:$0xff] %vm313_vm0, %v2515_v19  ;;  %367 = vst.msk [vmem:[#allocation2 + $0x1a8] sm:$0xff] %vm313_vm0, %v2515_v19  ;;  %v2462_v0 = vld [vmem:[%s2588_s7 + $0xb0] ss:$8 sps:$4 sm:$0xff]   ;;  %v2464_v2 = vld [vmem:[%s2588_s7 + $0xc4] ss:$8 sps:$4 sm:$0xff]  }
  0x2a   : > { %969 = vmatpush1.bf16.msra.mxu0 %v2383_v10  ;;  %2341 = vmatpush1.bf16.msra.mxu1 %v2383_v10  ;;  %368 = vst.msk [vmem:[#allocation2 + $0x1b0] sm:$0xff] %vm313_vm0, %v2515_v19  ;;  %369 = vst.msk [vmem:[#allocation2 + $0x1b8] sm:$0xff] %vm313_vm0, %v2515_v19  ;;  %v2466_v3 = vld [vmem:[%s2588_s7 + $0x1c4] ss:$8 sps:$4 sm:$0xff]   ;;  %v2468_v4 = vld [vmem:[%s2588_s7 + $0xc0] ss:$8 sps:$4 sm:$0xff]  }
  0x2b   : > { %970 = vmatprep.subr.bf16.mxu0 %v2514_v1  ;;  %2326 = vmatprep.subr.bf16.mxu1 %v2514_v1  ;;  %370 = vst.msk [vmem:[#allocation2 + $0x1c0] sm:$0xff] %vm313_vm0, %v2515_v19  ;;  %371 = vst.msk [vmem:[#allocation2 + $0x1c8] sm:$0xff] %vm313_vm0, %v2515_v19  ;;  %v2469_v5 = vld [vmem:[%s2588_s7 + $0x1c0] ss:$8 sps:$4 sm:$0xff]   ;;  %v2470_v6 = vld [vmem:[%s2588_s7 + $0xd4] ss:$8 sps:$4 sm:$0xff]  }
  0x2c   : > { %372 = vst.msk [vmem:[#allocation2 + $0x1d0] sm:$0xff] %vm313_vm0, %v2515_v19  ;;  %373 = vst.msk [vmem:[#allocation2 + $0x1d8] sm:$0xff] %vm313_vm0, %v2515_v19  ;;  %v2472_v7 = vld [vmem:[%s2588_s7 + $0x1d4] ss:$8 sps:$4 sm:$0xff]   ;;  %v2474_v8 = vld [vmem:[%s2588_s7 + $0xd0] ss:$8 sps:$4 sm:$0xff]  }
  0x2d   : > { %374 = vst.msk [vmem:[#allocation2 + $0x1e0] sm:$0xff] %vm313_vm0, %v2515_v19  ;;  %375 = vst.msk [vmem:[#allocation2 + $0x1e8] sm:$0xff] %vm313_vm0, %v2515_v19  ;;  %v2475_v9 = vld [vmem:[%s2588_s7 + $0x1d0] ss:$8 sps:$4 sm:$0xff]   ;;  %v2476_v10 = vld [vmem:[%s2588_s7 + $0xe4] ss:$8 sps:$4 sm:$0xff]  }
  0x2e   : > { %971 = vmatpush2.bf16.msra.mxu0 %v2384_v11  ;;  %2342 = vmatpush2.bf16.msra.mxu1 %v2384_v11  ;;  %376 = vst.msk [vmem:[#allocation2 + $0x1f0] sm:$0xff] %vm313_vm0, %v2515_v19  ;;  %377 = vst.msk [vmem:[#allocation2 + $0x1f8] sm:$0xff] %vm313_vm0, %v2515_v19  ;;  %v2478_v11 = vld [vmem:[%s2588_s7 + $0x1e4] ss:$8 sps:$4 sm:$0xff]  }
  0x2f   : > { %972 = vmatprep.subr.bf16.mxu0 %v2514_v1  ;;  %2327 = vmatprep.subr.bf16.mxu1 %v2514_v1  ;;  %v410_v19 = vld [vmem:[#allocation2 + $0x100] sm:$0xff] }
  0x32   : > { %973 = vmatpush2.bf16.msra.mxu0 %v2385_v12  ;;  %2343 = vmatpush2.bf16.msra.mxu1 %v2385_v12  ;;  %v2480_v12 = vld [vmem:[%s2588_s7 + $0xe0] ss:$8 sps:$4 sm:$0xff]  }
  0x33   : > { %974 = vmatprep.subr.bf16.mxu0 %v2514_v1  ;;  %2328 = vmatprep.subr.bf16.mxu1 %v2514_v1 }
  0x36   : > { %975 = vmatpush2.bf16.msra.mxu0 %v2386_v13  ;;  %2344 = vmatpush2.bf16.msra.mxu1 %v2386_v13  ;;  %v2481_v13 = vld [vmem:[%s2588_s7 + $0x1e0] ss:$8 sps:$4 sm:$0xff]  }
  0x37   : > { %976 = vmatprep.subr.bf16.mxu0 %v2514_v1  ;;  %2329 = vmatprep.subr.bf16.mxu1 %v2514_v1 }
  0x3a   : > { %977 = vmatpush2.bf16.msra.mxu0 %v2387_v14  ;;  %2345 = vmatpush2.bf16.msra.mxu1 %v2387_v14  ;;  %v2482_v14 = vld [vmem:[%s2588_s7 + $0xf4] ss:$8 sps:$4 sm:$0xff]  }
  0x3b   : > { %978 = vmatprep.subr.bf16.mxu0 %v2514_v1  ;;  %2330 = vmatprep.subr.bf16.mxu1 %v2514_v1 }
  0x3e   : > { %979 = vmatpush2.bf16.msra.mxu0 %v2388_v15  ;;  %2346 = vmatpush2.bf16.msra.mxu1 %v2388_v15  ;;  %v2484_v15 = vld [vmem:[%s2588_s7 + $0x1f4] ss:$8 sps:$4 sm:$0xff]  }
  0x3f   : > { %980 = vmatprep.subr.bf16.mxu0 %v2514_v1  ;;  %2331 = vmatprep.subr.bf16.mxu1 %v2514_v1 }
  0x42   : > { %981 = vmatpush2.bf16.msra.mxu0 %v2389_v16  ;;  %2347 = vmatpush2.bf16.msra.mxu1 %v2389_v16  ;;  %v2486_v16 = vld [vmem:[%s2588_s7 + $0xf0] ss:$8 sps:$4 sm:$0xff]  }
  0x43   : > { %982 = vmatprep.subr.bf16.mxu0 %v2514_v1  ;;  %2332 = vmatprep.subr.bf16.mxu1 %v2514_v1 }
  0x46   : > { %983 = vmatpush2.bf16.msra.mxu0 %v2390_v17  ;;  %2348 = vmatpush2.bf16.msra.mxu1 %v2390_v17  ;;  %v2487_v17 = vld [vmem:[%s2588_s7 + $0x1f0] ss:$8 sps:$4 sm:$0xff]  }
  0x47   : > { %984 = vmatprep.subr.bf16.mxu0 %v2514_v1  ;;  %2333 = vmatprep.subr.bf16.mxu1 %v2514_v1  ;;  %v2463_v1 = vld [vmem:[%s2588_s7 + $0x1b0] ss:$8 sps:$4 sm:$0xff]  }
  0x4a   : > { %985 = vmatpush2.bf16.msra.mxu0 %v2647_v18  ;;  %2349 = vmatpush2.bf16.msra.mxu1 %v2647_v18  ;;  %v378_v18 = vld [vmem:[#allocation2] sm:$0xff] }
  0x4d   : > { %987 = vmatmul.mubr.bf16.vlgmr.msra.gmra.mxu0 %v2392_v20  ;;  %1115 = vmatmul.mubr.bf16.vlgmr.msra.gmra.mxu1 %v2395_v21 }
  0x4e   : > { %994 = vmatprep.mubr.bf16.mxu0 %v2398_v22  ;;  %1122 = vmatprep.mubr.bf16.mxu1 %v2400_v23 }
  0x55   : > { %995 = vmatmul.mubr.bf16.gmra.mxu0 %v2402_v24  ;;  %1123 = vmatmul.mubr.bf16.gmra.mxu1 %v2403_v25 }
  0x56   : > { %1002 = vmatprep.mubr.bf16.mxu0 %v2404_v26  ;;  %1130 = vmatprep.mubr.bf16.mxu1 %v2406_v27  ;;  %v379_v26 = vld [vmem:[#allocation2 + $0x8] sm:$0xff] }
  0x57   : > { %v411_v27 = vld [vmem:[#allocation2 + $0x108] sm:$0xff] }
  0x5d   : > { %1003 = vmatmul.mubr.bf16.gmra.mxu0 %v2408_v28  ;;  %1131 = vmatmul.mubr.bf16.gmra.mxu1 %v2409_v29 }
  0x5e   : > { %1010 = vmatprep.mubr.bf16.mxu0 %v2410_v30  ;;  %1138 = vmatprep.mubr.bf16.mxu1 %v2412_v31 }
  0x65   : > { %1011 = vmatmul.mubr.bf16.gmra.mxu0 %v2414_v32  ;;  %1139 = vmatmul.mubr.bf16.gmra.mxu1 %v2415_v33 }
  0x66   : > { %1018 = vmatprep.mubr.bf16.mxu0 %v2416_v34  ;;  %1146 = vmatprep.mubr.bf16.mxu1 %v2418_v35  ;;  %v380_v34 = vld [vmem:[#allocation2 + $0x10] sm:$0xff] }
  0x67   : > { %v412_v35 = vld [vmem:[#allocation2 + $0x110] sm:$0xff] }
  0x6d   : > { %1019 = vmatmul.mubr.bf16.gmra.mxu0 %v2420_v36  ;;  %1147 = vmatmul.mubr.bf16.gmra.mxu1 %v2421_v37  ;;  %v2850_v36 = vld [vmem:[%s3200_s2] ss:$0 sm:$0xff] }
  0x6e   : > { %1026 = vmatprep.mubr.bf16.mxu0 %v2422_v38  ;;  %1154 = vmatprep.mubr.bf16.mxu1 %v2424_v39  ;;  %v2855_v39 = vld [vmem:[%s3201_s3] ss:$0 sm:$0xff] }
  0x75   : > { %1027 = vmatmul.mubr.bf16.gmra.mxu0 %v2426_v40  ;;  %1155 = vmatmul.mubr.bf16.gmra.mxu1 %v2427_v41 }
  0x76   : > { %1034 = vmatprep.mubr.bf16.mxu0 %v2428_v42  ;;  %1162 = vmatprep.mubr.bf16.mxu1 %v2430_v43  ;;  %v381_v42 = vld [vmem:[#allocation2 + $0x18] sm:$0xff] }
  0x7d   : > { %1035 = vmatmul.mubr.bf16.gmra.mxu0 %v2432_v44  ;;  %1163 = vmatmul.mubr.bf16.gmra.mxu1 %v2433_v45 }
  0x7e   : > { %1042 = vmatprep.mubr.bf16.mxu0 %v2434_v46  ;;  %1170 = vmatprep.mubr.bf16.mxu1 %v2436_v47  ;;  %v413_v47 = vld [vmem:[#allocation2 + $0x118] sm:$0xff] }
  0x85   : > { %1043 = vmatmul.mubr.bf16.gmra.mxu0 %v2438_v48  ;;  %1171 = vmatmul.mubr.bf16.gmra.mxu1 %v2439_v49 }
  0x86   : > { %1050 = vmatprep.mubr.bf16.mxu0 %v2440_v50  ;;  %1178 = vmatprep.mubr.bf16.mxu1 %v2442_v51 }
  0x8d   : > { %1051 = vmatmul.mubr.bf16.gmra.mxu0 %v2444_v52  ;;  %1179 = vmatmul.mubr.bf16.gmra.mxu1 %v2445_v53 }
  0x8e   : > { %1058 = vmatprep.mubr.bf16.mxu0 %v2446_v54  ;;  %1186 = vmatprep.mubr.bf16.mxu1 %v2448_v55 }
  0x95   : > { %1059 = vmatmul.mubr.bf16.gmra.mxu0 %v2450_v56  ;;  %1187 = vmatmul.mubr.bf16.gmra.mxu1 %v2451_v57 }
  0x96   : > { %1066 = vmatprep.mubr.bf16.mxu0 %v2452_v58  ;;  %1194 = vmatprep.mubr.bf16.mxu1 %v2454_v59 }
  0x9d   : > { %1067 = vmatmul.mubr.bf16.gmra.mxu0 %v2456_v60  ;;  %1195 = vmatmul.mubr.bf16.gmra.mxu1 %v2457_v61 }
  0x9e   : > { %1074 = vmatprep.mubr.bf16.mxu0 %v2458_v62  ;;  %1202 = vmatprep.mubr.bf16.mxu1 %v2460_v63 }
  0xa5   : > { %1075 = vmatmul.mubr.bf16.gmra.mxu0 %v2462_v0  ;;  %1203 = vmatmul.mubr.bf16.gmra.mxu1 %v2463_v1  ;;  %v382_v0 = vld [vmem:[#allocation2 + $0x20] sm:$0xff] }
  0xa6   : > { %1082 = vmatprep.mubr.bf16.mxu0 %v2464_v2  ;;  %1210 = vmatprep.mubr.bf16.mxu1 %v2466_v3  ;;  %v414_v1 = vld [vmem:[#allocation2 + $0x120] sm:$0xff] }
  0xad   : > { %1083 = vmatmul.mubr.bf16.gmra.mxu0 %v2468_v4  ;;  %1211 = vmatmul.mubr.bf16.gmra.mxu1 %v2469_v5 }
  0xae   : > { %1090 = vmatprep.mubr.bf16.mxu0 %v2470_v6  ;;  %1218 = vmatprep.mubr.bf16.mxu1 %v2472_v7 }
  0xb5   : > { %1091 = vmatmul.mubr.bf16.gmra.mxu0 %v2474_v8  ;;  %1219 = vmatmul.mubr.bf16.gmra.mxu1 %v2475_v9 }
  0xb6   : > { %1098 = vmatprep.mubr.bf16.mxu0 %v2476_v10  ;;  %1226 = vmatprep.mubr.bf16.mxu1 %v2478_v11 }
  0xbd   : > { %1099 = vmatmul.mubr.bf16.gmra.mxu0 %v2480_v12  ;;  %1227 = vmatmul.mubr.bf16.gmra.mxu1 %v2481_v13 }
  0xbe   : > { %1106 = vmatprep.mubr.bf16.mxu0 %v2482_v14  ;;  %1234 = vmatprep.mubr.bf16.mxu1 %v2484_v15 }
  0xc5   : > { %1107 = vmatmul.mubr.bf16.gmra.mxu0 %v2486_v16  ;;  %1235 = vmatmul.mubr.bf16.gmra.mxu1 %v2487_v17 }
 0x10d   : > { %v988_v20 = vpop.f32.mrf.mxu0  ;;  %v1116_v21 = vpop.f32.mrf.mxu1 }
 0x10e   : > { %v1243_v22 = vadd.f32 %v988_v20, %v378_v18  ;;  %v1275_v23 = vadd.f32 %v1116_v21, %v410_v19  ;;  %v383_v18 = vld [vmem:[#allocation2 + $0x28] sm:$0xff] }
 0x10f   : > { %v990_v24 = vpop.f32.mrf.mxu0  ;;  %v1118_v25 = vpop.f32.mrf.mxu1  ;;  %v415_v19 = vld [vmem:[#allocation2 + $0x128] sm:$0xff] }
 0x110   : > { %1308 = vst.msk [vmem:[#allocation2] sm:$0xff] %vm313_vm0, %v1243_v22  ;;  %1340 = vst.msk [vmem:[#allocation2 + $0x100] sm:$0xff] %vm313_vm0, %v1275_v23 }
 0x111   : > { %v991_v28 = vpop.f32.mrf.mxu0  ;;  %v1119_v29 = vpop.f32.mrf.mxu1 }
 0x112   : > { %v1244_v30 = vadd.f32 %v991_v28, %v379_v26  ;;  %v1276_v31 = vadd.f32 %v1119_v29, %v411_v27 }
 0x113   : > { %v993_v32 = vpop.f32.mrf.mxu0  ;;  %v1121_v33 = vpop.f32.mrf.mxu1 }
 0x114   : > { %1309 = vst.msk [vmem:[#allocation2 + $0x8] sm:$0xff] %vm313_vm0, %v1244_v30  ;;  %1341 = vst.msk [vmem:[#allocation2 + $0x108] sm:$0xff] %vm313_vm0, %v1276_v31 }
 0x115   : > { %v996_v37 = vpop.f32.mrf.mxu0  ;;  %v1124_v38 = vpop.f32.mrf.mxu1 }
 0x116   : > { %v1245_v40 = vadd.f32 %v996_v37, %v380_v34  ;;  %v1277_v41 = vadd.f32 %v1124_v38, %v412_v35  ;;  %v384_v37 = vld [vmem:[#allocation2 + $0x30] sm:$0xff] }
 0x117   : > { %v1375_v43 = vld [vmem:[#allocation2] sm:$0xff]  ;;  %v998_v45 = vpop.f32.mrf.mxu0  ;;  %v1126_v46 = vpop.f32.mrf.mxu1  ;;  %v416_v38 = vld [vmem:[#allocation2 + $0x130] sm:$0xff] }
 0x118   : > { %v1407_v44 = vld [vmem:[#allocation2 + $0x100] sm:$0xff]  ;;  %v1446_v48 = vmul.f32 %v2850_v36, %v1375_v43  ;;  %1310 = vst.msk [vmem:[#allocation2 + $0x10] sm:$0xff] %vm313_vm0, %v1245_v40  ;;  %1342 = vst.msk [vmem:[#allocation2 + $0x110] sm:$0xff] %vm313_vm0, %v1277_v41 }
 0x119   : > { %v1478_v49 = vmul.f32 %v2850_v36, %v1407_v44  ;;  %v999_v50 = vpop.f32.mrf.mxu0  ;;  %v1127_v51 = vpop.f32.mrf.mxu1 }
 0x11a   : > { %v1517_v52 = vadd.f32 %v2855_v39, %v1446_v48  ;;  %v1246_v54 = vadd.f32 %v999_v50, %v381_v42  ;;  %v1278_v55 = vadd.f32 %v1127_v51, %v413_v47  ;;  %v385_v50 = vld [vmem:[#allocation2 + $0x38] sm:$0xff] }
 0x11b   : > { %v1549_v53 = vadd.f32 %v2855_v39, %v1478_v49  ;;  %v1376_v56 = vld [vmem:[#allocation2 + $0x8] sm:$0xff]  ;;  %v1001_v58 = vpop.f32.mrf.mxu0  ;;  %v1129_v59 = vpop.f32.mrf.mxu1  ;;  %v417_v51 = vld [vmem:[#allocation2 + $0x138] sm:$0xff] }
 0x11c   : > { %v1408_v57 = vld [vmem:[#allocation2 + $0x108] sm:$0xff]  ;;  %v1581_v60 = vmax.f32 %v1517_v52, 0.0  ;;  %v1447_v62 = vmul.f32 %v2850_v36, %v1376_v56  ;;  %1311 = vst.msk [vmem:[#allocation2 + $0x18] sm:$0xff] %vm313_vm0, %v1246_v54  ;;  %1343 = vst.msk [vmem:[#allocation2 + $0x118] sm:$0xff] %vm313_vm0, %v1278_v55 }
 0x11d   : > { %v1613_v61 = vmax.f32 %v1549_v53, 0.0  ;;  %v1479_v63 = vmul.f32 %v2850_v36, %v1408_v57  ;;  %v1004_v2 = vpop.f32.mrf.mxu0  ;;  %v1132_v3 = vpop.f32.mrf.mxu1 }
 0x11e   : > { %v2254_v4 = vpack.c.bf16 %v1581_v60, %v1581_v60  ;;  %v1518_v6 = vadd.f32 %v2855_v39, %v1447_v62  ;;  %v1247_v10 = vadd.f32 %v1004_v2, %v382_v0  ;;  %v1279_v11 = vadd.f32 %v1132_v3, %v414_v1 }
 0x11f   : > { %v2286_v5 = vpack.c.bf16 %v1613_v61, %v1613_v61  ;;  %v1550_v7 = vadd.f32 %v2855_v39, %v1479_v63  ;;  %v1377_v8 = vld [vmem:[#allocation2 + $0x10] sm:$0xff]  ;;  %v1006_v12 = vpop.f32.mrf.mxu0  ;;  %v1134_v13 = vpop.f32.mrf.mxu1 }
 0x120   : > { %v1409_v9 = vld [vmem:[#allocation2 + $0x110] sm:$0xff]  ;;  %1902 = vst.msk [vmem:[%s2871_s14] sm:$0xf] %vm1901_vm1, %v2254_v4  ;;  %v1582_v14 = vmax.f32 %v1518_v6, 0.0  ;;  %v1448_v16 = vmul.f32 %v2850_v36, %v1377_v8  ;;  %v386_v4 = vld [vmem:[#allocation2 + $0x40] sm:$0xff] }
 0x121   : > { %1934 = vst.msk [vmem:[%s2871_s14 + $0x80] sm:$0xf] %vm1901_vm1, %v2286_v5  ;;  %v1614_v15 = vmax.f32 %v1550_v7, 0.0  ;;  %v1480_v17 = vmul.f32 %v2850_v36, %v1409_v9  ;;  %v1007_v20 = vpop.f32.mrf.mxu0  ;;  %v1135_v21 = vpop.f32.mrf.mxu1  ;;  %v418_v5 = vld [vmem:[#allocation2 + $0x140] sm:$0xff] }
 0x122   : > { %1312 = vst.msk [vmem:[#allocation2 + $0x20] sm:$0xff] %vm313_vm0, %v1247_v10  ;;  %1344 = vst.msk [vmem:[#allocation2 + $0x120] sm:$0xff] %vm313_vm0, %v1279_v11  ;;  %v2255_v22 = vpack.c.bf16 %v1582_v14, %v1582_v14  ;;  %v1519_v24 = vadd.f32 %v2855_v39, %v1448_v16  ;;  %v1248_v28 = vadd.f32 %v1007_v20, %v383_v18 }
 0x123   : > { %v2287_v23 = vpack.c.bf16 %v1614_v15, %v1614_v15  ;;  %v1551_v25 = vadd.f32 %v2855_v39, %v1480_v17  ;;  %v1378_v26 = vld [vmem:[#allocation2 + $0x18] sm:$0xff]  ;;  %v1280_v29 = vadd.f32 %v1135_v21, %v415_v19  ;;  %v1009_v30 = vpop.f32.mrf.mxu0  ;;  %v1137_v31 = vpop.f32.mrf.mxu1 }
 0x124   : > { %v1410_v27 = vld [vmem:[#allocation2 + $0x118] sm:$0xff]  ;;  %1903 = vst.msk [vmem:[%s2871_s14 + $0x4] sm:$0xf] %vm1901_vm1, %v2255_v22  ;;  %v1583_v32 = vmax.f32 %v1519_v24, 0.0  ;;  %v1449_v34 = vmul.f32 %v2850_v36, %v1378_v26  ;;  %v387_v22 = vld [vmem:[#allocation2 + $0x48] sm:$0xff] }
 0x125   : > { %1935 = vst.msk [vmem:[%s2871_s14 + $0x84] sm:$0xf] %vm1901_vm1, %v2287_v23  ;;  %v1615_v33 = vmax.f32 %v1551_v25, 0.0  ;;  %v1481_v35 = vmul.f32 %v2850_v36, %v1410_v27  ;;  %v1012_v40 = vpop.f32.mrf.mxu0  ;;  %v1140_v41 = vpop.f32.mrf.mxu1  ;;  %v419_v23 = vld [vmem:[#allocation2 + $0x148] sm:$0xff] }
 0x126   : > { %1313 = vst.msk [vmem:[#allocation2 + $0x28] sm:$0xff] %vm313_vm0, %v1248_v28  ;;  %1345 = vst.msk [vmem:[#allocation2 + $0x128] sm:$0xff] %vm313_vm0, %v1280_v29  ;;  %v2256_v42 = vpack.c.bf16 %v1583_v32, %v1583_v32  ;;  %v1520_v44 = vadd.f32 %v2855_v39, %v1449_v34  ;;  %v1249_v46 = vadd.f32 %v1012_v40, %v384_v37  ;;  %v388_v34 = vld [vmem:[#allocation2 + $0x50] sm:$0xff] }
 0x127   : > { %v2288_v43 = vpack.c.bf16 %v1615_v33, %v1615_v33  ;;  %v1552_v45 = vadd.f32 %v2855_v39, %v1481_v35  ;;  %v1281_v47 = vadd.f32 %v1140_v41, %v416_v38  ;;  %v1014_v48 = vpop.f32.mrf.mxu0  ;;  %v1142_v49 = vpop.f32.mrf.mxu1 }
 0x128   : > { %1904 = vst.msk [vmem:[%s2871_s14 + $0x8] sm:$0xf] %vm1901_vm1, %v2256_v42  ;;  %v1584_v52 = vmax.f32 %v1520_v44, 0.0 }
 0x129   : > { %1936 = vst.msk [vmem:[%s2871_s14 + $0x88] sm:$0xf] %vm1901_vm1, %v2288_v43  ;;  %v1616_v53 = vmax.f32 %v1552_v45, 0.0  ;;  %v1379_v54 = vld [vmem:[#allocation2 + $0x20] sm:$0xff]  ;;  %v1015_v58 = vpop.f32.mrf.mxu0  ;;  %v1143_v59 = vpop.f32.mrf.mxu1  ;;  %v420_v45 = vld [vmem:[#allocation2 + $0x150] sm:$0xff] }
 0x12a   : > { %v1411_v55 = vld [vmem:[#allocation2 + $0x120] sm:$0xff]  ;;  %v1450_v56 = vmul.f32 %v2850_v36, %v1379_v54  ;;  %1314 = vst.msk [vmem:[#allocation2 + $0x30] sm:$0xff] %vm313_vm0, %v1249_v46  ;;  %1346 = vst.msk [vmem:[#allocation2 + $0x130] sm:$0xff] %vm313_vm0, %v1281_v47  ;;  %v2257_v60 = vpack.c.bf16 %v1584_v52, %v1584_v52  ;;  %v1250_v62 = vadd.f32 %v1015_v58, %v385_v50 }
 0x12b   : > { %v1482_v57 = vmul.f32 %v2850_v36, %v1411_v55  ;;  %v2289_v61 = vpack.c.bf16 %v1616_v53, %v1616_v53  ;;  %v1282_v63 = vadd.f32 %v1143_v59, %v417_v51  ;;  %v1017_v2 = vpop.f32.mrf.mxu0  ;;  %v1145_v3 = vpop.f32.mrf.mxu1 }
 0x12c   : > { %v1521_v0 = vadd.f32 %v2855_v39, %v1450_v56  ;;  %1905 = vst.msk [vmem:[%s2871_s14 + $0xc] sm:$0xf] %vm1901_vm1, %v2257_v60  ;;  %v389_v2 = vld [vmem:[#allocation2 + $0x58] sm:$0xff] }
 0x12d   : > { %v1553_v1 = vadd.f32 %v2855_v39, %v1482_v57  ;;  %1937 = vst.msk [vmem:[%s2871_s14 + $0x8c] sm:$0xf] %vm1901_vm1, %v2289_v61  ;;  %v1380_v6 = vld [vmem:[#allocation2 + $0x28] sm:$0xff]  ;;  %v1020_v12 = vpop.f32.mrf.mxu0  ;;  %v1148_v13 = vpop.f32.mrf.mxu1  ;;  %v421_v3 = vld [vmem:[#allocation2 + $0x158] sm:$0xff] }
 0x12e   : > { %v1412_v7 = vld [vmem:[#allocation2 + $0x128] sm:$0xff]  ;;  %1315 = vst.msk [vmem:[#allocation2 + $0x38] sm:$0xff] %vm313_vm0, %v1250_v62  ;;  %1347 = vst.msk [vmem:[#allocation2 + $0x138] sm:$0xff] %vm313_vm0, %v1282_v63  ;;  %v1585_v8 = vmax.f32 %v1521_v0, 0.0  ;;  %v1451_v10 = vmul.f32 %v2850_v36, %v1380_v6  ;;  %v1251_v14 = vadd.f32 %v1020_v12, %v386_v4  ;;  %v1283_v15 = vadd.f32 %v1148_v13, %v418_v5 }
 0x12f   : > { %v1617_v9 = vmax.f32 %v1553_v1, 0.0  ;;  %v1483_v11 = vmul.f32 %v2850_v36, %v1412_v7  ;;  %v1022_v20 = vpop.f32.mrf.mxu0  ;;  %v1150_v21 = vpop.f32.mrf.mxu1 }
 0x130   : > { %v2258_v16 = vpack.c.bf16 %v1585_v8, %v1585_v8  ;;  %v1522_v18 = vadd.f32 %v2855_v39, %v1451_v10  ;;  %1316 = vst.msk [vmem:[#allocation2 + $0x40] sm:$0xff] %vm313_vm0, %v1251_v14  ;;  %1348 = vst.msk [vmem:[#allocation2 + $0x140] sm:$0xff] %vm313_vm0, %v1283_v15  ;;  %v390_v20 = vld [vmem:[#allocation2 + $0x60] sm:$0xff] }
 0x131   : > { %v2290_v17 = vpack.c.bf16 %v1617_v9, %v1617_v9  ;;  %v1554_v19 = vadd.f32 %v2855_v39, %v1483_v11  ;;  %v1381_v24 = vld [vmem:[#allocation2 + $0x30] sm:$0xff]  ;;  %v1023_v30 = vpop.f32.mrf.mxu0  ;;  %v1151_v31 = vpop.f32.mrf.mxu1  ;;  %v422_v21 = vld [vmem:[#allocation2 + $0x160] sm:$0xff] }
 0x132   : > { %v1413_v25 = vld [vmem:[#allocation2 + $0x130] sm:$0xff]  ;;  %1906 = vst.msk [vmem:[%s2871_s14 + $0x10] sm:$0xf] %vm1901_vm1, %v2258_v16  ;;  %v1586_v26 = vmax.f32 %v1522_v18, 0.0  ;;  %v1452_v28 = vmul.f32 %v2850_v36, %v1381_v24  ;;  %v1252_v32 = vadd.f32 %v1023_v30, %v387_v22  ;;  %v1284_v33 = vadd.f32 %v1151_v31, %v419_v23 }
 0x133   : > { %1938 = vst.msk [vmem:[%s2871_s14 + $0x90] sm:$0xf] %vm1901_vm1, %v2290_v17  ;;  %v1618_v27 = vmax.f32 %v1554_v19, 0.0  ;;  %v1484_v29 = vmul.f32 %v2850_v36, %v1413_v25  ;;  %v1025_v43 = vpop.f32.mrf.mxu0  ;;  %v1153_v44 = vpop.f32.mrf.mxu1 }
 0x134   : > { %v2259_v35 = vpack.c.bf16 %v1586_v26, %v1586_v26  ;;  %v1523_v38 = vadd.f32 %v2855_v39, %v1452_v28  ;;  %1317 = vst.msk [vmem:[#allocation2 + $0x48] sm:$0xff] %vm313_vm0, %v1252_v32  ;;  %1349 = vst.msk [vmem:[#allocation2 + $0x148] sm:$0xff] %vm313_vm0, %v1284_v33 }
 0x135   : > { %v2291_v37 = vpack.c.bf16 %v1618_v27, %v1618_v27  ;;  %v1555_v40 = vadd.f32 %v2855_v39, %v1484_v29  ;;  %v1382_v41 = vld [vmem:[#allocation2 + $0x38] sm:$0xff]  ;;  %v1028_v50 = vpop.f32.mrf.mxu0  ;;  %v1156_v51 = vpop.f32.mrf.mxu1 }
 0x136   : > { %v1414_v42 = vld [vmem:[#allocation2 + $0x138] sm:$0xff]  ;;  %v1453_v46 = vmul.f32 %v2850_v36, %v1382_v41  ;;  %1907 = vst.msk [vmem:[%s2871_s14 + $0x14] sm:$0xf] %vm1901_vm1, %v2259_v35  ;;  %v1587_v48 = vmax.f32 %v1523_v38, 0.0  ;;  %v1253_v54 = vadd.f32 %v1028_v50, %v388_v34  ;;  %v1285_v55 = vadd.f32 %v1156_v51, %v420_v45  ;;  %v423_v41 = vld [vmem:[#allocation2 + $0x168] sm:$0xff] }
 0x137   : > { %v1485_v47 = vmul.f32 %v2850_v36, %v1414_v42  ;;  %1939 = vst.msk [vmem:[%s2871_s14 + $0x94] sm:$0xf] %vm1901_vm1, %v2291_v37  ;;  %v1619_v49 = vmax.f32 %v1555_v40, 0.0  ;;  %v1383_v58 = vld [vmem:[#allocation2 + $0x40] sm:$0xff]  ;;  %v1030_v60 = vpop.f32.mrf.mxu0  ;;  %v1158_v61 = vpop.f32.mrf.mxu1  ;;  %v391_v40 = vld [vmem:[#allocation2 + $0x68] sm:$0xff] }
 0x138   : > { %v1524_v52 = vadd.f32 %v2855_v39, %v1453_v46  ;;  %v2260_v56 = vpack.c.bf16 %v1587_v48, %v1587_v48  ;;  %v1415_v59 = vld [vmem:[#allocation2 + $0x140] sm:$0xff]  ;;  %v1454_v0 = vmul.f32 %v2850_v36, %v1383_v58  ;;  %1318 = vst.msk [vmem:[#allocation2 + $0x50] sm:$0xff] %vm313_vm0, %v1253_v54  ;;  %1350 = vst.msk [vmem:[#allocation2 + $0x150] sm:$0xff] %vm313_vm0, %v1285_v55 }
 0x139   : > { %v1556_v53 = vadd.f32 %v2855_v39, %v1485_v47  ;;  %v2292_v57 = vpack.c.bf16 %v1619_v49, %v1619_v49  ;;  %v1486_v1 = vmul.f32 %v2850_v36, %v1415_v59  ;;  %v1031_v4 = vpop.f32.mrf.mxu0  ;;  %v1159_v5 = vpop.f32.mrf.mxu1 }
 0x13a   : > { %v1588_v62 = vmax.f32 %v1524_v52, 0.0  ;;  %1908 = vst.msk [vmem:[%s2871_s14 + $0x18] sm:$0xf] %vm1901_vm1, %v2260_v56  ;;  %v1525_v8 = vadd.f32 %v2855_v39, %v1454_v0  ;;  %v1254_v12 = vadd.f32 %v1031_v4, %v389_v2  ;;  %v1286_v13 = vadd.f32 %v1159_v5, %v421_v3  ;;  %v392_v52 = vld [vmem:[#allocation2 + $0x70] sm:$0xff] }
 0x13b   : > { %v1620_v63 = vmax.f32 %v1556_v53, 0.0  ;;  %1940 = vst.msk [vmem:[%s2871_s14 + $0x98] sm:$0xf] %vm1901_vm1, %v2292_v57  ;;  %v1557_v9 = vadd.f32 %v2855_v39, %v1486_v1  ;;  %v1384_v10 = vld [vmem:[#allocation2 + $0x48] sm:$0xff]  ;;  %v1033_v14 = vpop.f32.mrf.mxu0  ;;  %v1161_v15 = vpop.f32.mrf.mxu1  ;;  %v424_v53 = vld [vmem:[#allocation2 + $0x170] sm:$0xff] }
 0x13c   : > { %v2261_v6 = vpack.c.bf16 %v1588_v62, %v1588_v62  ;;  %v1416_v11 = vld [vmem:[#allocation2 + $0x148] sm:$0xff]  ;;  %v1589_v16 = vmax.f32 %v1525_v8, 0.0  ;;  %v1455_v18 = vmul.f32 %v2850_v36, %v1384_v10  ;;  %1319 = vst.msk [vmem:[#allocation2 + $0x58] sm:$0xff] %vm313_vm0, %v1254_v12  ;;  %1351 = vst.msk [vmem:[#allocation2 + $0x158] sm:$0xff] %vm313_vm0, %v1286_v13 }
 0x13d   : > { %v2293_v7 = vpack.c.bf16 %v1620_v63, %v1620_v63  ;;  %v1621_v17 = vmax.f32 %v1557_v9, 0.0  ;;  %v1487_v19 = vmul.f32 %v2850_v36, %v1416_v11  ;;  %v1036_v22 = vpop.f32.mrf.mxu0  ;;  %v1164_v23 = vpop.f32.mrf.mxu1 }
 0x13e   : > { %1909 = vst.msk [vmem:[%s2871_s14 + $0x1c] sm:$0xf] %vm1901_vm1, %v2261_v6  ;;  %v2262_v24 = vpack.c.bf16 %v1589_v16, %v1589_v16  ;;  %v1526_v26 = vadd.f32 %v2855_v39, %v1455_v18  ;;  %v1255_v30 = vadd.f32 %v1036_v22, %v390_v20  ;;  %v1287_v31 = vadd.f32 %v1164_v23, %v422_v21  ;;  %v393_v6 = vld [vmem:[#allocation2 + $0x78] sm:$0xff] }
 0x13f   : > { %1941 = vst.msk [vmem:[%s2871_s14 + $0x9c] sm:$0xf] %vm1901_vm1, %v2293_v7  ;;  %v2294_v25 = vpack.c.bf16 %v1621_v17, %v1621_v17  ;;  %v1558_v27 = vadd.f32 %v2855_v39, %v1487_v19  ;;  %v1385_v28 = vld [vmem:[#allocation2 + $0x50] sm:$0xff]  ;;  %v1038_v32 = vpop.f32.mrf.mxu0  ;;  %v1166_v33 = vpop.f32.mrf.mxu1  ;;  %v425_v7 = vld [vmem:[#allocation2 + $0x178] sm:$0xff] }
 0x140   : > { %v1417_v29 = vld [vmem:[#allocation2 + $0x150] sm:$0xff]  ;;  %1910 = vst.msk [vmem:[%s2871_s14 + $0x20] sm:$0xf] %vm1901_vm1, %v2262_v24  ;;  %v1590_v34 = vmax.f32 %v1526_v26, 0.0  ;;  %v1456_v37 = vmul.f32 %v2850_v36, %v1385_v28  ;;  %v394_v24 = vld [vmem:[#allocation2 + $0x80] sm:$0xff] }
 0x141   : > { %1942 = vst.msk [vmem:[%s2871_s14 + $0xa0] sm:$0xf] %vm1901_vm1, %v2294_v25  ;;  %v1622_v35 = vmax.f32 %v1558_v27, 0.0  ;;  %v1488_v38 = vmul.f32 %v2850_v36, %v1417_v29  ;;  %v1039_v42 = vpop.f32.mrf.mxu0  ;;  %v1167_v43 = vpop.f32.mrf.mxu1  ;;  %v426_v25 = vld [vmem:[#allocation2 + $0x180] sm:$0xff] }
 0x142   : > { %1320 = vst.msk [vmem:[#allocation2 + $0x60] sm:$0xff] %vm313_vm0, %v1255_v30  ;;  %1352 = vst.msk [vmem:[#allocation2 + $0x160] sm:$0xff] %vm313_vm0, %v1287_v31  ;;  %v2263_v44 = vpack.c.bf16 %v1590_v34, %v1590_v34  ;;  %v1527_v46 = vadd.f32 %v2855_v39, %v1456_v37  ;;  %v1256_v48 = vadd.f32 %v1039_v42, %v391_v40  ;;  %v395_v37 = vld [vmem:[#allocation2 + $0x88] sm:$0xff] }
 0x143   : > { %v2295_v45 = vpack.c.bf16 %v1622_v35, %v1622_v35  ;;  %v1559_v47 = vadd.f32 %v2855_v39, %v1488_v38  ;;  %v1288_v49 = vadd.f32 %v1167_v43, %v423_v41  ;;  %v1041_v50 = vpop.f32.mrf.mxu0  ;;  %v1169_v51 = vpop.f32.mrf.mxu1  ;;  %v1386_v56 = vld [vmem:[#allocation2 + $0x58] sm:$0xff] }
 0x144   : > { %1911 = vst.msk [vmem:[%s2871_s14 + $0x24] sm:$0xf] %vm1901_vm1, %v2263_v44  ;;  %v1591_v54 = vmax.f32 %v1527_v46, 0.0  ;;  %v1418_v57 = vld [vmem:[#allocation2 + $0x158] sm:$0xff]  ;;  %v1457_v58 = vmul.f32 %v2850_v36, %v1386_v56 }
 0x145   : > { %1943 = vst.msk [vmem:[%s2871_s14 + $0xa4] sm:$0xf] %vm1901_vm1, %v2295_v45  ;;  %v1623_v55 = vmax.f32 %v1559_v47, 0.0  ;;  %v1489_v59 = vmul.f32 %v2850_v36, %v1418_v57  ;;  %v1044_v60 = vpop.f32.mrf.mxu0  ;;  %v1172_v61 = vpop.f32.mrf.mxu1  ;;  %v427_v47 = vld [vmem:[#allocation2 + $0x188] sm:$0xff] }
 0x146   : > { %1321 = vst.msk [vmem:[#allocation2 + $0x68] sm:$0xff] %vm313_vm0, %v1256_v48  ;;  %1353 = vst.msk [vmem:[#allocation2 + $0x168] sm:$0xff] %vm313_vm0, %v1288_v49  ;;  %v2264_v62 = vpack.c.bf16 %v1591_v54, %v1591_v54  ;;  %v1257_v0 = vadd.f32 %v1044_v60, %v392_v52  ;;  %v1289_v1 = vadd.f32 %v1172_v61, %v424_v53 }
 0x147   : > { %v2296_v63 = vpack.c.bf16 %v1623_v55, %v1623_v55  ;;  %v1528_v2 = vadd.f32 %v2855_v39, %v1457_v58  ;;  %v1560_v3 = vadd.f32 %v2855_v39, %v1489_v59  ;;  %v1046_v4 = vpop.f32.mrf.mxu0  ;;  %v1174_v5 = vpop.f32.mrf.mxu1 }
 0x148   : > { %1912 = vst.msk [vmem:[%s2871_s14 + $0x28] sm:$0xf] %vm1901_vm1, %v2264_v62  ;;  %v396_v4 = vld [vmem:[#allocation2 + $0x90] sm:$0xff] }
 0x149   : > { %1944 = vst.msk [vmem:[%s2871_s14 + $0xa8] sm:$0xf] %vm1901_vm1, %v2296_v63  ;;  %v1387_v8 = vld [vmem:[#allocation2 + $0x60] sm:$0xff]  ;;  %v1592_v10 = vmax.f32 %v1528_v2, 0.0  ;;  %v1624_v11 = vmax.f32 %v1560_v3, 0.0  ;;  %v1047_v14 = vpop.f32.mrf.mxu0  ;;  %v1175_v15 = vpop.f32.mrf.mxu1  ;;  %v428_v5 = vld [vmem:[#allocation2 + $0x190] sm:$0xff] }
 0x14a   : > { %v1419_v9 = vld [vmem:[#allocation2 + $0x160] sm:$0xff]  ;;  %1322 = vst.msk [vmem:[#allocation2 + $0x70] sm:$0xff] %vm313_vm0, %v1257_v0  ;;  %1354 = vst.msk [vmem:[#allocation2 + $0x170] sm:$0xff] %vm313_vm0, %v1289_v1  ;;  %v1458_v12 = vmul.f32 %v2850_v36, %v1387_v8  ;;  %v1258_v16 = vadd.f32 %v1047_v14, %v393_v6  ;;  %v1290_v17 = vadd.f32 %v1175_v15, %v425_v7 }
 0x14b   : > { %v1490_v13 = vmul.f32 %v2850_v36, %v1419_v9  ;;  %v2265_v18 = vpack.c.bf16 %v1592_v10, %v1592_v10  ;;  %v2297_v19 = vpack.c.bf16 %v1624_v11, %v1624_v11  ;;  %v1049_v22 = vpop.f32.mrf.mxu0  ;;  %v1177_v23 = vpop.f32.mrf.mxu1 }
 0x14c   : > { %v1529_v20 = vadd.f32 %v2855_v39, %v1458_v12  ;;  %1323 = vst.msk [vmem:[#allocation2 + $0x78] sm:$0xff] %vm313_vm0, %v1258_v16  ;;  %1355 = vst.msk [vmem:[#allocation2 + $0x178] sm:$0xff] %vm313_vm0, %v1290_v17  ;;  %v397_v22 = vld [vmem:[#allocation2 + $0x98] sm:$0xff] }
 0x14d   : > { %v1561_v21 = vadd.f32 %v2855_v39, %v1490_v13  ;;  %v1388_v26 = vld [vmem:[#allocation2 + $0x68] sm:$0xff]  ;;  %1913 = vst.msk [vmem:[%s2871_s14 + $0x2c] sm:$0xf] %vm1901_vm1, %v2265_v18  ;;  %1945 = vst.msk [vmem:[%s2871_s14 + $0xac] sm:$0xf] %vm1901_vm1, %v2297_v19  ;;  %v1052_v32 = vpop.f32.mrf.mxu0  ;;  %v1180_v33 = vpop.f32.mrf.mxu1  ;;  %v429_v23 = vld [vmem:[#allocation2 + $0x198] sm:$0xff] }
 0x14e   : > { %v1420_v27 = vld [vmem:[#allocation2 + $0x168] sm:$0xff]  ;;  %v1593_v28 = vmax.f32 %v1529_v20, 0.0  ;;  %v1459_v30 = vmul.f32 %v2850_v36, %v1388_v26  ;;  %v1259_v34 = vadd.f32 %v1052_v32, %v394_v24  ;;  %v1291_v35 = vadd.f32 %v1180_v33, %v426_v25 }
 0x14f   : > { %v1625_v29 = vmax.f32 %v1561_v21, 0.0  ;;  %v1491_v31 = vmul.f32 %v2850_v36, %v1420_v27  ;;  %v1054_v45 = vpop.f32.mrf.mxu0  ;;  %v1182_v46 = vpop.f32.mrf.mxu1 }
 0x150   : > { %v2266_v38 = vpack.c.bf16 %v1593_v28, %v1593_v28  ;;  %v1530_v41 = vadd.f32 %v2855_v39, %v1459_v30  ;;  %1324 = vst.msk [vmem:[#allocation2 + $0x80] sm:$0xff] %vm313_vm0, %v1259_v34  ;;  %1356 = vst.msk [vmem:[#allocation2 + $0x180] sm:$0xff] %vm313_vm0, %v1291_v35 }
 0x151   : > { %v2298_v40 = vpack.c.bf16 %v1625_v29, %v1625_v29  ;;  %v1562_v42 = vadd.f32 %v2855_v39, %v1491_v31  ;;  %v1389_v43 = vld [vmem:[#allocation2 + $0x70] sm:$0xff]  ;;  %v1055_v52 = vpop.f32.mrf.mxu0  ;;  %v1183_v53 = vpop.f32.mrf.mxu1 }
 0x152   : > { %v1421_v44 = vld [vmem:[#allocation2 + $0x170] sm:$0xff]  ;;  %v1460_v48 = vmul.f32 %v2850_v36, %v1389_v43  ;;  %1914 = vst.msk [vmem:[%s2871_s14 + $0x30] sm:$0xf] %vm1901_vm1, %v2266_v38  ;;  %v1594_v50 = vmax.f32 %v1530_v41, 0.0  ;;  %v1260_v56 = vadd.f32 %v1055_v52, %v395_v37  ;;  %v1292_v57 = vadd.f32 %v1183_v53, %v427_v47  ;;  %v430_v43 = vld [vmem:[#allocation2 + $0x1a0] sm:$0xff] }
 0x153   : > { %v1492_v49 = vmul.f32 %v2850_v36, %v1421_v44  ;;  %1946 = vst.msk [vmem:[%s2871_s14 + $0xb0] sm:$0xf] %vm1901_vm1, %v2298_v40  ;;  %v1626_v51 = vmax.f32 %v1562_v42, 0.0  ;;  %v1390_v60 = vld [vmem:[#allocation2 + $0x78] sm:$0xff]  ;;  %v1057_v62 = vpop.f32.mrf.mxu0  ;;  %v1185_v63 = vpop.f32.mrf.mxu1  ;;  %v398_v42 = vld [vmem:[#allocation2 + $0xa0] sm:$0xff] }
 0x154   : > { %v1531_v54 = vadd.f32 %v2855_v39, %v1460_v48  ;;  %v2267_v58 = vpack.c.bf16 %v1594_v50, %v1594_v50  ;;  %v1422_v61 = vld [vmem:[#allocation2 + $0x178] sm:$0xff]  ;;  %v1461_v2 = vmul.f32 %v2850_v36, %v1390_v60  ;;  %1325 = vst.msk [vmem:[#allocation2 + $0x88] sm:$0xff] %vm313_vm0, %v1260_v56  ;;  %1357 = vst.msk [vmem:[#allocation2 + $0x188] sm:$0xff] %vm313_vm0, %v1292_v57 }
 0x155   : > { %v1563_v55 = vadd.f32 %v2855_v39, %v1492_v49  ;;  %v2299_v59 = vpack.c.bf16 %v1626_v51, %v1626_v51  ;;  %v1493_v3 = vmul.f32 %v2850_v36, %v1422_v61  ;;  %v1060_v6 = vpop.f32.mrf.mxu0  ;;  %v1188_v7 = vpop.f32.mrf.mxu1 }
 0x156   : > { %v1595_v0 = vmax.f32 %v1531_v54, 0.0  ;;  %1915 = vst.msk [vmem:[%s2871_s14 + $0x34] sm:$0xf] %vm1901_vm1, %v2267_v58  ;;  %v1532_v10 = vadd.f32 %v2855_v39, %v1461_v2  ;;  %v1261_v14 = vadd.f32 %v1060_v6, %v396_v4  ;;  %v1293_v15 = vadd.f32 %v1188_v7, %v428_v5  ;;  %v399_v54 = vld [vmem:[#allocation2 + $0xa8] sm:$0xff] }
 0x157   : > { %v1627_v1 = vmax.f32 %v1563_v55, 0.0  ;;  %1947 = vst.msk [vmem:[%s2871_s14 + $0xb4] sm:$0xf] %vm1901_vm1, %v2299_v59  ;;  %v1564_v11 = vadd.f32 %v2855_v39, %v1493_v3  ;;  %v1391_v12 = vld [vmem:[#allocation2 + $0x80] sm:$0xff]  ;;  %v1062_v16 = vpop.f32.mrf.mxu0  ;;  %v1190_v17 = vpop.f32.mrf.mxu1  ;;  %v431_v55 = vld [vmem:[#allocation2 + $0x1a8] sm:$0xff] }
 0x158   : > { %v2268_v8 = vpack.c.bf16 %v1595_v0, %v1595_v0  ;;  %v1423_v13 = vld [vmem:[#allocation2 + $0x180] sm:$0xff]  ;;  %v1596_v18 = vmax.f32 %v1532_v10, 0.0  ;;  %v1462_v20 = vmul.f32 %v2850_v36, %v1391_v12  ;;  %1326 = vst.msk [vmem:[#allocation2 + $0x90] sm:$0xff] %vm313_vm0, %v1261_v14  ;;  %1358 = vst.msk [vmem:[#allocation2 + $0x190] sm:$0xff] %vm313_vm0, %v1293_v15 }
 0x159   : > { %v2300_v9 = vpack.c.bf16 %v1627_v1, %v1627_v1  ;;  %v1628_v19 = vmax.f32 %v1564_v11, 0.0  ;;  %v1494_v21 = vmul.f32 %v2850_v36, %v1423_v13  ;;  %v1063_v24 = vpop.f32.mrf.mxu0  ;;  %v1191_v25 = vpop.f32.mrf.mxu1 }
 0x15a   : > { %1916 = vst.msk [vmem:[%s2871_s14 + $0x38] sm:$0xf] %vm1901_vm1, %v2268_v8  ;;  %v2269_v26 = vpack.c.bf16 %v1596_v18, %v1596_v18  ;;  %v1533_v28 = vadd.f32 %v2855_v39, %v1462_v20  ;;  %v1262_v32 = vadd.f32 %v1063_v24, %v397_v22  ;;  %v1294_v33 = vadd.f32 %v1191_v25, %v429_v23  ;;  %v400_v8 = vld [vmem:[#allocation2 + $0xb0] sm:$0xff] }
 0x15b   : > { %1948 = vst.msk [vmem:[%s2871_s14 + $0xb8] sm:$0xf] %vm1901_vm1, %v2300_v9  ;;  %v2301_v27 = vpack.c.bf16 %v1628_v19, %v1628_v19  ;;  %v1565_v29 = vadd.f32 %v2855_v39, %v1494_v21  ;;  %v1392_v30 = vld [vmem:[#allocation2 + $0x88] sm:$0xff]  ;;  %v1065_v34 = vpop.f32.mrf.mxu0  ;;  %v1193_v35 = vpop.f32.mrf.mxu1  ;;  %v432_v9 = vld [vmem:[#allocation2 + $0x1b0] sm:$0xff] }
 0x15c   : > { %v1424_v31 = vld [vmem:[#allocation2 + $0x188] sm:$0xff]  ;;  %1917 = vst.msk [vmem:[%s2871_s14 + $0x3c] sm:$0xf] %vm1901_vm1, %v2269_v26  ;;  %v1597_v37 = vmax.f32 %v1533_v28, 0.0  ;;  %v1463_v40 = vmul.f32 %v2850_v36, %v1392_v30  ;;  %v401_v26 = vld [vmem:[#allocation2 + $0xb8] sm:$0xff] }
 0x15d   : > { %1949 = vst.msk [vmem:[%s2871_s14 + $0xbc] sm:$0xf] %vm1901_vm1, %v2301_v27  ;;  %v1629_v38 = vmax.f32 %v1565_v29, 0.0  ;;  %v1495_v41 = vmul.f32 %v2850_v36, %v1424_v31  ;;  %v1068_v44 = vpop.f32.mrf.mxu0  ;;  %v1196_v45 = vpop.f32.mrf.mxu1  ;;  %v433_v27 = vld [vmem:[#allocation2 + $0x1b8] sm:$0xff] }
 0x15e   : > { %1327 = vst.msk [vmem:[#allocation2 + $0x98] sm:$0xff] %vm313_vm0, %v1262_v32  ;;  %1359 = vst.msk [vmem:[#allocation2 + $0x198] sm:$0xff] %vm313_vm0, %v1294_v33  ;;  %v2270_v46 = vpack.c.bf16 %v1597_v37, %v1597_v37  ;;  %v1534_v48 = vadd.f32 %v2855_v39, %v1463_v40  ;;  %v1263_v50 = vadd.f32 %v1068_v44, %v398_v42  ;;  %v402_v40 = vld [vmem:[#allocation2 + $0xc0] sm:$0xff] }
 0x15f   : > { %v2302_v47 = vpack.c.bf16 %v1629_v38, %v1629_v38  ;;  %v1566_v49 = vadd.f32 %v2855_v39, %v1495_v41  ;;  %v1295_v51 = vadd.f32 %v1196_v45, %v430_v43  ;;  %v1070_v52 = vpop.f32.mrf.mxu0  ;;  %v1198_v53 = vpop.f32.mrf.mxu1  ;;  %v1393_v58 = vld [vmem:[#allocation2 + $0x90] sm:$0xff] }
 0x160   : > { %1918 = vst.msk [vmem:[%s2871_s14 + $0x40] sm:$0xf] %vm1901_vm1, %v2270_v46  ;;  %v1598_v56 = vmax.f32 %v1534_v48, 0.0  ;;  %v1425_v59 = vld [vmem:[#allocation2 + $0x190] sm:$0xff]  ;;  %v1464_v60 = vmul.f32 %v2850_v36, %v1393_v58 }
 0x161   : > { %1950 = vst.msk [vmem:[%s2871_s14 + $0xc0] sm:$0xf] %vm1901_vm1, %v2302_v47  ;;  %v1630_v57 = vmax.f32 %v1566_v49, 0.0  ;;  %v1496_v61 = vmul.f32 %v2850_v36, %v1425_v59  ;;  %v1071_v62 = vpop.f32.mrf.mxu0  ;;  %v1199_v63 = vpop.f32.mrf.mxu1  ;;  %v434_v49 = vld [vmem:[#allocation2 + $0x1c0] sm:$0xff] }
 0x162   : > { %1328 = vst.msk [vmem:[#allocation2 + $0xa0] sm:$0xff] %vm313_vm0, %v1263_v50  ;;  %1360 = vst.msk [vmem:[#allocation2 + $0x1a0] sm:$0xff] %vm313_vm0, %v1295_v51  ;;  %v2271_v0 = vpack.c.bf16 %v1598_v56, %v1598_v56  ;;  %v1264_v2 = vadd.f32 %v1071_v62, %v399_v54  ;;  %v1296_v3 = vadd.f32 %v1199_v63, %v431_v55 }
 0x163   : > { %v2303_v1 = vpack.c.bf16 %v1630_v57, %v1630_v57  ;;  %v1535_v4 = vadd.f32 %v2855_v39, %v1464_v60  ;;  %v1567_v5 = vadd.f32 %v2855_v39, %v1496_v61  ;;  %v1073_v6 = vpop.f32.mrf.mxu0  ;;  %v1201_v7 = vpop.f32.mrf.mxu1 }
 0x164   : > { %1919 = vst.msk [vmem:[%s2871_s14 + $0x44] sm:$0xf] %vm1901_vm1, %v2271_v0  ;;  %v403_v6 = vld [vmem:[#allocation2 + $0xc8] sm:$0xff] }
 0x165   : > { %1951 = vst.msk [vmem:[%s2871_s14 + $0xc4] sm:$0xf] %vm1901_vm1, %v2303_v1  ;;  %v1394_v10 = vld [vmem:[#allocation2 + $0x98] sm:$0xff]  ;;  %v1599_v12 = vmax.f32 %v1535_v4, 0.0  ;;  %v1631_v13 = vmax.f32 %v1567_v5, 0.0  ;;  %v1076_v16 = vpop.f32.mrf.mxu0  ;;  %v1204_v17 = vpop.f32.mrf.mxu1  ;;  %v435_v7 = vld [vmem:[#allocation2 + $0x1c8] sm:$0xff] }
 0x166   : > { %v1426_v11 = vld [vmem:[#allocation2 + $0x198] sm:$0xff]  ;;  %1329 = vst.msk [vmem:[#allocation2 + $0xa8] sm:$0xff] %vm313_vm0, %v1264_v2  ;;  %1361 = vst.msk [vmem:[#allocation2 + $0x1a8] sm:$0xff] %vm313_vm0, %v1296_v3  ;;  %v1465_v14 = vmul.f32 %v2850_v36, %v1394_v10  ;;  %v1265_v18 = vadd.f32 %v1076_v16, %v400_v8  ;;  %v1297_v19 = vadd.f32 %v1204_v17, %v432_v9 }
 0x167   : > { %v1497_v15 = vmul.f32 %v2850_v36, %v1426_v11  ;;  %v2272_v20 = vpack.c.bf16 %v1599_v12, %v1599_v12  ;;  %v2304_v21 = vpack.c.bf16 %v1631_v13, %v1631_v13  ;;  %v1078_v24 = vpop.f32.mrf.mxu0  ;;  %v1206_v25 = vpop.f32.mrf.mxu1 }
 0x168   : > { %v1536_v22 = vadd.f32 %v2855_v39, %v1465_v14  ;;  %1330 = vst.msk [vmem:[#allocation2 + $0xb0] sm:$0xff] %vm313_vm0, %v1265_v18  ;;  %1362 = vst.msk [vmem:[#allocation2 + $0x1b0] sm:$0xff] %vm313_vm0, %v1297_v19  ;;  %v436_v24 = vld [vmem:[#allocation2 + $0x1d0] sm:$0xff] }
 0x169   : > { %v1568_v23 = vadd.f32 %v2855_v39, %v1497_v15  ;;  %v1395_v28 = vld [vmem:[#allocation2 + $0xa0] sm:$0xff]  ;;  %1920 = vst.msk [vmem:[%s2871_s14 + $0x48] sm:$0xf] %vm1901_vm1, %v2272_v20  ;;  %1952 = vst.msk [vmem:[%s2871_s14 + $0xc8] sm:$0xf] %vm1901_vm1, %v2304_v21  ;;  %v1079_v34 = vpop.f32.mrf.mxu0  ;;  %v1207_v35 = vpop.f32.mrf.mxu1 }
 0x16a   : > { %v1427_v29 = vld [vmem:[#allocation2 + $0x1a0] sm:$0xff]  ;;  %v1600_v30 = vmax.f32 %v1536_v22, 0.0  ;;  %v1466_v32 = vmul.f32 %v2850_v36, %v1395_v28  ;;  %v1266_v37 = vadd.f32 %v1079_v34, %v401_v26  ;;  %v1298_v38 = vadd.f32 %v1207_v35, %v433_v27 }
 0x16b   : > { %v1632_v31 = vmax.f32 %v1568_v23, 0.0  ;;  %v1498_v33 = vmul.f32 %v2850_v36, %v1427_v29  ;;  %v1081_v47 = vpop.f32.mrf.mxu0  ;;  %v1209_v48 = vpop.f32.mrf.mxu1  ;;  %v3092_v21 = vld [vmem:[%s3200_s2] ss:$0 sm:$0xff]  ;;  %v404_v23 = vld [vmem:[#allocation2 + $0xd0] sm:$0xff] }
 0x16c   : > { %v2273_v41 = vpack.c.bf16 %v1600_v30, %v1600_v30  ;;  %v1537_v43 = vadd.f32 %v2855_v39, %v1466_v32  ;;  %1331 = vst.msk [vmem:[#allocation2 + $0xb8] sm:$0xff] %vm313_vm0, %v1266_v37  ;;  %1363 = vst.msk [vmem:[#allocation2 + $0x1b8] sm:$0xff] %vm313_vm0, %v1298_v38  ;;  %v3101_v29 = vld [vmem:[%s3201_s3] ss:$0 sm:$0xff] }
 0x16d   : > { %v2305_v42 = vpack.c.bf16 %v1632_v31, %v1632_v31  ;;  %v1569_v44 = vadd.f32 %v2855_v39, %v1498_v33  ;;  %v1396_v45 = vld [vmem:[#allocation2 + $0xa8] sm:$0xff]  ;;  %v1084_v54 = vpop.f32.mrf.mxu0  ;;  %v1212_v55 = vpop.f32.mrf.mxu1 }
 0x16e   : > { %v1428_v46 = vld [vmem:[#allocation2 + $0x1a8] sm:$0xff]  ;;  %v1467_v50 = vmul.f32 %v2850_v36, %v1396_v45  ;;  %1921 = vst.msk [vmem:[%s2871_s14 + $0x4c] sm:$0xf] %vm1901_vm1, %v2273_v41  ;;  %v1601_v52 = vmax.f32 %v1537_v43, 0.0  ;;  %v1267_v58 = vadd.f32 %v1084_v54, %v402_v40  ;;  %v1299_v59 = vadd.f32 %v1212_v55, %v434_v49  ;;  %v437_v45 = vld [vmem:[#allocation2 + $0x1d8] sm:$0xff] }
 0x16f   : > { %v1499_v51 = vmul.f32 %v2850_v36, %v1428_v46  ;;  %1953 = vst.msk [vmem:[%s2871_s14 + $0xcc] sm:$0xf] %vm1901_vm1, %v2305_v42  ;;  %v1633_v53 = vmax.f32 %v1569_v44, 0.0  ;;  %v1397_v62 = vld [vmem:[#allocation2 + $0xb0] sm:$0xff]  ;;  %v1086_v0 = vpop.f32.mrf.mxu0  ;;  %v1214_v1 = vpop.f32.mrf.mxu1  ;;  %v405_v44 = vld [vmem:[#allocation2 + $0xd8] sm:$0xff] }
 0x170   : > { %v1538_v56 = vadd.f32 %v2855_v39, %v1467_v50  ;;  %v2274_v60 = vpack.c.bf16 %v1601_v52, %v1601_v52  ;;  %v1429_v63 = vld [vmem:[#allocation2 + $0x1b0] sm:$0xff]  ;;  %v1468_v4 = vmul.f32 %v2850_v36, %v1397_v62  ;;  %1332 = vst.msk [vmem:[#allocation2 + $0xc0] sm:$0xff] %vm313_vm0, %v1267_v58  ;;  %1364 = vst.msk [vmem:[#allocation2 + $0x1c0] sm:$0xff] %vm313_vm0, %v1299_v59 }
 0x171   : > { %v1570_v57 = vadd.f32 %v2855_v39, %v1499_v51  ;;  %v2306_v61 = vpack.c.bf16 %v1633_v53, %v1633_v53  ;;  %v1500_v5 = vmul.f32 %v2850_v36, %v1429_v63  ;;  %v1087_v8 = vpop.f32.mrf.mxu0  ;;  %v1215_v9 = vpop.f32.mrf.mxu1 }
 0x172   : > { %v1602_v2 = vmax.f32 %v1538_v56, 0.0  ;;  %1922 = vst.msk [vmem:[%s2871_s14 + $0x50] sm:$0xf] %vm1901_vm1, %v2274_v60  ;;  %v1539_v12 = vadd.f32 %v2855_v39, %v1468_v4  ;;  %v1268_v15 = vadd.f32 %v1087_v8, %v403_v6  ;;  %v1300_v16 = vadd.f32 %v1215_v9, %v435_v7  ;;  %v406_v56 = vld [vmem:[#allocation2 + $0xe0] sm:$0xff] }
 0x173   : > { %v1634_v3 = vmax.f32 %v1570_v57, 0.0  ;;  %1954 = vst.msk [vmem:[%s2871_s14 + $0xd0] sm:$0xf] %vm1901_vm1, %v2306_v61  ;;  %v1571_v36 = vadd.f32 %v2855_v39, %v1500_v5  ;;  %v1398_v13 = vld [vmem:[#allocation2 + $0xb8] sm:$0xff]  ;;  %v1089_v17 = vpop.f32.mrf.mxu0  ;;  %v1217_v18 = vpop.f32.mrf.mxu1  ;;  %v438_v57 = vld [vmem:[#allocation2 + $0x1e0] sm:$0xff] }
 0x174   : > { %v2275_v10 = vpack.c.bf16 %v1602_v2, %v1602_v2  ;;  %v1430_v14 = vld [vmem:[#allocation2 + $0x1b8] sm:$0xff]  ;;  %v1603_v19 = vmax.f32 %v1539_v12, 0.0  ;;  %v1469_v22 = vmul.f32 %v3092_v21, %v1398_v13  ;;  %1333 = vst.msk [vmem:[#allocation2 + $0xc8] sm:$0xff] %vm313_vm0, %v1268_v15  ;;  %1365 = vst.msk [vmem:[#allocation2 + $0x1c8] sm:$0xff] %vm313_vm0, %v1300_v16 }
 0x175   : > { %v2307_v11 = vpack.c.bf16 %v1634_v3, %v1634_v3  ;;  %v1635_v20 = vmax.f32 %v1571_v36, 0.0  ;;  %v1501_v39 = vmul.f32 %v3092_v21, %v1430_v14  ;;  %v1092_v25 = vpop.f32.mrf.mxu0  ;;  %v1220_v26 = vpop.f32.mrf.mxu1 }
 0x176   : > { %1923 = vst.msk [vmem:[%s2871_s14 + $0x54] sm:$0xf] %vm1901_vm1, %v2275_v10  ;;  %v2276_v27 = vpack.c.bf16 %v1603_v19, %v1603_v19  ;;  %v1540_v30 = vadd.f32 %v3101_v29, %v1469_v22  ;;  %v1269_v34 = vadd.f32 %v1092_v25, %v404_v23  ;;  %v1301_v35 = vadd.f32 %v1220_v26, %v436_v24  ;;  %v407_v10 = vld [vmem:[#allocation2 + $0xe8] sm:$0xff] }
 0x177   : > { %1955 = vst.msk [vmem:[%s2871_s14 + $0xd4] sm:$0xf] %vm1901_vm1, %v2307_v11  ;;  %v2308_v28 = vpack.c.bf16 %v1635_v20, %v1635_v20  ;;  %v1572_v31 = vadd.f32 %v3101_v29, %v1501_v39  ;;  %v1399_v32 = vld [vmem:[#allocation2 + $0xc0] sm:$0xff]  ;;  %v1094_v37 = vpop.f32.mrf.mxu0  ;;  %v1222_v38 = vpop.f32.mrf.mxu1  ;;  %v439_v11 = vld [vmem:[#allocation2 + $0x1e8] sm:$0xff] }
 0x178   : > { %v1431_v33 = vld [vmem:[#allocation2 + $0x1c0] sm:$0xff]  ;;  %1924 = vst.msk [vmem:[%s2871_s14 + $0x58] sm:$0xf] %vm1901_vm1, %v2276_v27  ;;  %v1604_v40 = vmax.f32 %v1540_v30, 0.0  ;;  %v1470_v42 = vmul.f32 %v3092_v21, %v1399_v32  ;;  %v408_v27 = vld [vmem:[#allocation2 + $0xf0] sm:$0xff] }
 0x179   : > { %1956 = vst.msk [vmem:[%s2871_s14 + $0xd8] sm:$0xf] %vm1901_vm1, %v2308_v28  ;;  %v1636_v41 = vmax.f32 %v1572_v31, 0.0  ;;  %v1502_v43 = vmul.f32 %v3092_v21, %v1431_v33  ;;  %v1095_v46 = vpop.f32.mrf.mxu0  ;;  %v1223_v47 = vpop.f32.mrf.mxu1  ;;  %v440_v28 = vld [vmem:[#allocation2 + $0x1f0] sm:$0xff] }
 0x17a   : > { %1334 = vst.msk [vmem:[#allocation2 + $0xd0] sm:$0xff] %vm313_vm0, %v1269_v34  ;;  %1366 = vst.msk [vmem:[#allocation2 + $0x1d0] sm:$0xff] %vm313_vm0, %v1301_v35  ;;  %v2277_v48 = vpack.c.bf16 %v1604_v40, %v1604_v40  ;;  %v1541_v50 = vadd.f32 %v3101_v29, %v1470_v42  ;;  %v1270_v52 = vadd.f32 %v1095_v46, %v405_v44  ;;  %v409_v42 = vld [vmem:[#allocation2 + $0xf8] sm:$0xff] }
 0x17b   : > { %v2309_v49 = vpack.c.bf16 %v1636_v41, %v1636_v41  ;;  %v1573_v51 = vadd.f32 %v3101_v29, %v1502_v43  ;;  %v1302_v53 = vadd.f32 %v1223_v47, %v437_v45  ;;  %v1097_v54 = vpop.f32.mrf.mxu0  ;;  %v1225_v55 = vpop.f32.mrf.mxu1  ;;  %v1400_v60 = vld [vmem:[#allocation2 + $0xc8] sm:$0xff] }
 0x17c   : > { %1925 = vst.msk [vmem:[%s2871_s14 + $0x5c] sm:$0xf] %vm1901_vm1, %v2277_v48  ;;  %v1605_v58 = vmax.f32 %v1541_v50, 0.0  ;;  %v1432_v61 = vld [vmem:[#allocation2 + $0x1c8] sm:$0xff]  ;;  %v1471_v62 = vmul.f32 %v3092_v21, %v1400_v60 }
 0x17d   : > { %1957 = vst.msk [vmem:[%s2871_s14 + $0xdc] sm:$0xf] %vm1901_vm1, %v2309_v49  ;;  %v1637_v59 = vmax.f32 %v1573_v51, 0.0  ;;  %v1503_v63 = vmul.f32 %v3092_v21, %v1432_v61  ;;  %v1100_v0 = vpop.f32.mrf.mxu0  ;;  %v1228_v1 = vpop.f32.mrf.mxu1  ;;  %v441_v51 = vld [vmem:[#allocation2 + $0x1f8] sm:$0xff] }
 0x17e   : > { %1335 = vst.msk [vmem:[#allocation2 + $0xd8] sm:$0xff] %vm313_vm0, %v1270_v52  ;;  %1367 = vst.msk [vmem:[#allocation2 + $0x1d8] sm:$0xff] %vm313_vm0, %v1302_v53  ;;  %v2278_v2 = vpack.c.bf16 %v1605_v58, %v1605_v58  ;;  %v1271_v4 = vadd.f32 %v1100_v0, %v406_v56  ;;  %v1303_v5 = vadd.f32 %v1228_v1, %v438_v57 }
 0x17f   : > { %v2310_v3 = vpack.c.bf16 %v1637_v59, %v1637_v59  ;;  %v1542_v6 = vadd.f32 %v3101_v29, %v1471_v62  ;;  %v1574_v7 = vadd.f32 %v3101_v29, %v1503_v63  ;;  %v1102_v8 = vpop.f32.mrf.mxu0  ;;  %v1230_v9 = vpop.f32.mrf.mxu1 }
 0x180   : > { %1926 = vst.msk [vmem:[%s2871_s14 + $0x60] sm:$0xf] %vm1901_vm1, %v2278_v2 }
 0x181   : > { %1958 = vst.msk [vmem:[%s2871_s14 + $0xe0] sm:$0xf] %vm1901_vm1, %v2310_v3  ;;  %v1401_v12 = vld [vmem:[#allocation2 + $0xd0] sm:$0xff]  ;;  %v1606_v13 = vmax.f32 %v1542_v6, 0.0  ;;  %v1638_v14 = vmax.f32 %v1574_v7, 0.0  ;;  %v1103_v17 = vpop.f32.mrf.mxu0  ;;  %v1231_v18 = vpop.f32.mrf.mxu1 }
 0x182   : > { %v1433_v36 = vld [vmem:[#allocation2 + $0x1d0] sm:$0xff]  ;;  %1336 = vst.msk [vmem:[#allocation2 + $0xe0] sm:$0xff] %vm313_vm0, %v1271_v4  ;;  %1368 = vst.msk [vmem:[#allocation2 + $0x1e0] sm:$0xff] %vm313_vm0, %v1303_v5  ;;  %v1472_v15 = vmul.f32 %v3092_v21, %v1401_v12  ;;  %v1272_v19 = vadd.f32 %v1103_v17, %v407_v10  ;;  %v1304_v20 = vadd.f32 %v1231_v18, %v439_v11 }
 0x183   : > { %v1504_v16 = vmul.f32 %v3092_v21, %v1433_v36  ;;  %v2279_v22 = vpack.c.bf16 %v1606_v13, %v1606_v13  ;;  %v2311_v39 = vpack.c.bf16 %v1638_v14, %v1638_v14  ;;  %v1105_v25 = vpop.f32.mrf.mxu0  ;;  %v1233_v26 = vpop.f32.mrf.mxu1 }
 0x184   : > { %v1543_v23 = vadd.f32 %v3101_v29, %v1472_v15  ;;  %1337 = vst.msk [vmem:[#allocation2 + $0xe8] sm:$0xff] %vm313_vm0, %v1272_v19  ;;  %1369 = vst.msk [vmem:[#allocation2 + $0x1e8] sm:$0xff] %vm313_vm0, %v1304_v20 }
 0x185   : > { %v1575_v24 = vadd.f32 %v3101_v29, %v1504_v16  ;;  %v1402_v30 = vld [vmem:[#allocation2 + $0xd8] sm:$0xff]  ;;  %1927 = vst.msk [vmem:[%s2871_s14 + $0x64] sm:$0xf] %vm1901_vm1, %v2279_v22  ;;  %1959 = vst.msk [vmem:[%s2871_s14 + $0xe4] sm:$0xf] %vm1901_vm1, %v2311_v39  ;;  %v1108_v37 = vpop.f32.mrf.mxu0  ;;  %v1236_v38 = vpop.f32.mrf.mxu1 }
 0x186   : > { %v1434_v31 = vld [vmem:[#allocation2 + $0x1d8] sm:$0xff]  ;;  %v1607_v32 = vmax.f32 %v1543_v23, 0.0  ;;  %v1473_v34 = vmul.f32 %v3092_v21, %v1402_v30  ;;  %v1273_v40 = vadd.f32 %v1108_v37, %v408_v27  ;;  %v1305_v41 = vadd.f32 %v1236_v38, %v440_v28 }
 0x187   : > { %v1639_v33 = vmax.f32 %v1575_v24, 0.0  ;;  %v1505_v35 = vmul.f32 %v3092_v21, %v1434_v31  ;;  %v1110_v49 = vpop.f32.mrf.mxu0  ;;  %v1238_v50 = vpop.f32.mrf.mxu1 }
 0x188   : > { %v2280_v43 = vpack.c.bf16 %v1607_v32, %v1607_v32  ;;  %v1544_v45 = vadd.f32 %v3101_v29, %v1473_v34  ;;  %1338 = vst.msk [vmem:[#allocation2 + $0xf0] sm:$0xff] %vm313_vm0, %v1273_v40  ;;  %1370 = vst.msk [vmem:[#allocation2 + $0x1f0] sm:$0xff] %vm313_vm0, %v1305_v41 }
 0x189   : > { %v2312_v44 = vpack.c.bf16 %v1639_v33, %v1639_v33  ;;  %v1576_v46 = vadd.f32 %v3101_v29, %v1505_v35  ;;  %v1403_v47 = vld [vmem:[#allocation2 + $0xe0] sm:$0xff]  ;;  %v1111_v56 = vpop.f32.mrf.mxu0  ;;  %v1239_v57 = vpop.f32.mrf.mxu1 }
 0x18a   : > { %v1435_v48 = vld [vmem:[#allocation2 + $0x1e0] sm:$0xff]  ;;  %v1474_v52 = vmul.f32 %v3092_v21, %v1403_v47  ;;  %1928 = vst.msk [vmem:[%s2871_s14 + $0x68] sm:$0xf] %vm1901_vm1, %v2280_v43  ;;  %v1608_v54 = vmax.f32 %v1544_v45, 0.0  ;;  %v1274_v60 = vadd.f32 %v1111_v56, %v409_v42  ;;  %v1306_v61 = vadd.f32 %v1239_v57, %v441_v51 }
 0x18b   : > { %v1506_v53 = vmul.f32 %v3092_v21, %v1435_v48  ;;  %1960 = vst.msk [vmem:[%s2871_s14 + $0xe8] sm:$0xf] %vm1901_vm1, %v2312_v44  ;;  %v1640_v55 = vmax.f32 %v1576_v46, 0.0  ;;  %v1404_v0 = vld [vmem:[#allocation2 + $0xe8] sm:$0xff]  ;;  %v1113_v2 = vpop.f32.mrf.mxu0  ;;  %v1241_v3 = vpop.f32.mrf.mxu1 }
 0x18c   : > { %v1545_v58 = vadd.f32 %v3101_v29, %v1474_v52  ;;  %v2281_v62 = vpack.c.bf16 %v1608_v54, %v1608_v54  ;;  %v1436_v1 = vld [vmem:[#allocation2 + $0x1e8] sm:$0xff]  ;;  %v1475_v6 = vmul.f32 %v3092_v21, %v1404_v0  ;;  %1339 = vst.msk [vmem:[#allocation2 + $0xf8] sm:$0xff] %vm313_vm0, %v1274_v60  ;;  %1371 = vst.msk [vmem:[#allocation2 + $0x1f8] sm:$0xff] %vm313_vm0, %v1306_v61 }
 0x18d   : > { %v1577_v59 = vadd.f32 %v3101_v29, %v1506_v53  ;;  %v2313_v63 = vpack.c.bf16 %v1640_v55, %v1640_v55  ;;  %v1507_v7 = vmul.f32 %v3092_v21, %v1436_v1 }
 0x18e   : > { %v1609_v4 = vmax.f32 %v1545_v58, 0.0  ;;  %1929 = vst.msk [vmem:[%s2871_s14 + $0x6c] sm:$0xf] %vm1901_vm1, %v2281_v62  ;;  %v1546_v10 = vadd.f32 %v3101_v29, %v1475_v6 }
 0x18f   : > { %v1641_v5 = vmax.f32 %v1577_v59, 0.0  ;;  %1961 = vst.msk [vmem:[%s2871_s14 + $0xec] sm:$0xf] %vm1901_vm1, %v2313_v63  ;;  %v1578_v11 = vadd.f32 %v3101_v29, %v1507_v7  ;;  %v1405_v12 = vld [vmem:[#allocation2 + $0xf0] sm:$0xff] }
 0x190   : > { %v2282_v8 = vpack.c.bf16 %v1609_v4, %v1609_v4  ;;  %v1437_v36 = vld [vmem:[#allocation2 + $0x1f0] sm:$0xff]  ;;  %v1610_v13 = vmax.f32 %v1546_v10, 0.0  ;;  %v1476_v15 = vmul.f32 %v3092_v21, %v1405_v12 }
 0x191   : > { %v2314_v9 = vpack.c.bf16 %v1641_v5, %v1641_v5  ;;  %v1642_v14 = vmax.f32 %v1578_v11, 0.0  ;;  %v1508_v16 = vmul.f32 %v3092_v21, %v1437_v36 }
 0x192   : > { %1930 = vst.msk [vmem:[%s2871_s14 + $0x70] sm:$0xf] %vm1901_vm1, %v2282_v8  ;;  %v2283_v17 = vpack.c.bf16 %v1610_v13, %v1610_v13  ;;  %v1547_v19 = vadd.f32 %v3101_v29, %v1476_v15 }
 0x193   : > { %1962 = vst.msk [vmem:[%s2871_s14 + $0xf0] sm:$0xf] %vm1901_vm1, %v2314_v9  ;;  %v2315_v18 = vpack.c.bf16 %v1642_v14, %v1642_v14  ;;  %v1579_v20 = vadd.f32 %v3101_v29, %v1508_v16  ;;  %v1406_v22 = vld [vmem:[#allocation2 + $0xf8] sm:$0xff] }
 0x194   : > { %v1438_v39 = vld [vmem:[#allocation2 + $0x1f8] sm:$0xff]  ;;  %1931 = vst.msk [vmem:[%s2871_s14 + $0x74] sm:$0xf] %vm1901_vm1, %v2283_v17  ;;  %v1611_v23 = vmax.f32 %v1547_v19, 0.0  ;;  %v1477_v25 = vmul.f32 %v3092_v21, %v1406_v22 }
 0x195   : > { %1963 = vst.msk [vmem:[%s2871_s14 + $0xf4] sm:$0xf] %vm1901_vm1, %v2315_v18  ;;  %v1643_v24 = vmax.f32 %v1579_v20, 0.0  ;;  %v1509_v26 = vmul.f32 %v3092_v21, %v1438_v39 }
 0x196   : > { %v2284_v27 = vpack.c.bf16 %v1611_v23, %v1611_v23  ;;  %v1548_v30 = vadd.f32 %v3101_v29, %v1477_v25 }
 0x197   : > { %v2316_v28 = vpack.c.bf16 %v1643_v24, %v1643_v24  ;;  %v1580_v31 = vadd.f32 %v3101_v29, %v1509_v26 }
 0x198   : > { %1932 = vst.msk [vmem:[%s2871_s14 + $0x78] sm:$0xf] %vm1901_vm1, %v2284_v27  ;;  %v1612_v32 = vmax.f32 %v1548_v30, 0.0 }
 0x199   : > { %1964 = vst.msk [vmem:[%s2871_s14 + $0xf8] sm:$0xf] %vm1901_vm1, %v2316_v28  ;;  %v1644_v33 = vmax.f32 %v1580_v31, 0.0 }
 0x19a   : > { %v2285_v34 = vpack.c.bf16 %v1612_v32, %v1612_v32 }
 0x19b   : > { %v2317_v35 = vpack.c.bf16 %v1644_v33, %v1644_v33 }
 0x19c   : > { %1933 = vst.msk [vmem:[%s2871_s14 + $0x7c] sm:$0xf] %vm1901_vm1, %v2285_v34 }
 0x19d   : > { %1965 = vst.msk [vmem:[%s2871_s14 + $0xfc] sm:$0xf] %vm1901_vm1, %v2317_v35 }
 0x19e PF: > { %s14_s17 = sadd.s32 1, %s2512_s17   ;;  %s3203_s15 = smov %s2508_s16 }
 0x19f   : > { %p11_p5 = scmp.ge.s32.totalorder %s14_s17, 6   ;;  %s3204_s16 = smov %s3206_s18 }
 0x1a1   :  { %13 = sbr.rel (!%p11_p5) target bundleno = 2 (0x2), region = 83 }

// kernel: cnn_model_forward.19
= control target key start
LH: loop header
LB: loop body
LE: loop exit
PB: predicated region body
PF: predicated region fallthrough
CT: control target
= control target key end

     0   :  { %s462_s10 = smov 64   ;;  %vm392_vm0 = vcmask 519168   ;;  %s1241_s0 = inlined_call_operand.vmem [shape: bf16[512,128], index: 0, kind: input, shape index: {}]   ;;  %s1242_s1 = inlined_call_operand.vmem [shape: bf16[512,64], index: 1, kind: output, shape index: {}]  }
   0x1   :  { %v476_v0 = vld [vmem:[%s1241_s0 + $0x8] sm:$0xf]  ;;  %v481_v1 = vld [vmem:[%s1241_s0] sm:$0xf]  ;;  %v490_v2 = vld [vmem:[%s1241_s0 + $0xc] sm:$0xf] }
   0x2   :  { %140 = vrot.lane.b32.xlu1 %v476_v0, %s462_s10  ;;  %136 = vrot.lane.b32.xlu0 %v481_v1, %s462_s10  ;;  %v495_v3 = vld [vmem:[%s1241_s0 + $0x4] sm:$0xf]  ;;  %v504_v4 = vld [vmem:[%s1241_s0 + $0x14] sm:$0xf] }
   0x3   :  { %v509_v5 = vld [vmem:[%s1241_s0 + $0x10] sm:$0xf]  ;;  %v518_v6 = vld [vmem:[%s1241_s0 + $0x1c] sm:$0xf]  ;;  %v523_v7 = vld [vmem:[%s1241_s0 + $0x18] sm:$0xf] }
   0x4   :  { %v532_v8 = vld [vmem:[%s1241_s0 + $0x24] sm:$0xf]  ;;  %v537_v9 = vld [vmem:[%s1241_s0 + $0x20] sm:$0xf]  ;;  %v546_v10 = vld [vmem:[%s1241_s0 + $0x2c] sm:$0xf] }
   0x5   :  { %v551_v11 = vld [vmem:[%s1241_s0 + $0x28] sm:$0xf]  ;;  %v560_v12 = vld [vmem:[%s1241_s0 + $0x34] sm:$0xf]  ;;  %v565_v13 = vld [vmem:[%s1241_s0 + $0x30] sm:$0xf] }
   0x6   :  { %142 = vrot.lane.b32.xlu1 %v490_v2, %s462_s10  ;;  %138 = vrot.lane.b32.xlu0 %v495_v3, %s462_s10  ;;  %v574_v14 = vld [vmem:[%s1241_s0 + $0x3c] sm:$0xf]  ;;  %v579_v15 = vld [vmem:[%s1241_s0 + $0x38] sm:$0xf] }
   0x7   :  { %v588_v16 = vld [vmem:[%s1241_s0 + $0x44] sm:$0xf]  ;;  %v593_v17 = vld [vmem:[%s1241_s0 + $0x40] sm:$0xf]  ;;  %v602_v18 = vld [vmem:[%s1241_s0 + $0x4c] sm:$0xf] }
   0x8   :  { %v607_v19 = vld [vmem:[%s1241_s0 + $0x48] sm:$0xf]  ;;  %v616_v20 = vld [vmem:[%s1241_s0 + $0x54] sm:$0xf]  ;;  %v621_v21 = vld [vmem:[%s1241_s0 + $0x50] sm:$0xf] }
   0x9   :  { %v630_v22 = vld [vmem:[%s1241_s0 + $0x5c] sm:$0xf]  ;;  %v635_v23 = vld [vmem:[%s1241_s0 + $0x58] sm:$0xf]  ;;  %v644_v24 = vld [vmem:[%s1241_s0 + $0x64] sm:$0xf] }
   0xa   :  { %146 = vrot.lane.b32.xlu1 %v504_v4, %s462_s10  ;;  %144 = vrot.lane.b32.xlu0 %v509_v5, %s462_s10  ;;  %v649_v25 = vld [vmem:[%s1241_s0 + $0x60] sm:$0xf]  ;;  %v658_v26 = vld [vmem:[%s1241_s0 + $0x6c] sm:$0xf] }
   0xb   :  { %v663_v27 = vld [vmem:[%s1241_s0 + $0x68] sm:$0xf]  ;;  %v672_v28 = vld [vmem:[%s1241_s0 + $0x74] sm:$0xf]  ;;  %v677_v29 = vld [vmem:[%s1241_s0 + $0x70] sm:$0xf] }
   0xc   :  { %v686_v30 = vld [vmem:[%s1241_s0 + $0x7c] sm:$0xf]  ;;  %v691_v31 = vld [vmem:[%s1241_s0 + $0x78] sm:$0xf]  ;;  %v700_v32 = vld [vmem:[%s1241_s0 + $0x84] sm:$0xf] }
   0xd   :  { %v705_v33 = vld [vmem:[%s1241_s0 + $0x80] sm:$0xf]  ;;  %v714_v34 = vld [vmem:[%s1241_s0 + $0x8c] sm:$0xf]  ;;  %v719_v35 = vld [vmem:[%s1241_s0 + $0x88] sm:$0xf] }
   0xe   :  { %150 = vrot.lane.b32.xlu1 %v518_v6, %s462_s10  ;;  %148 = vrot.lane.b32.xlu0 %v523_v7, %s462_s10  ;;  %v728_v36 = vld [vmem:[%s1241_s0 + $0x94] sm:$0xf]  ;;  %v733_v37 = vld [vmem:[%s1241_s0 + $0x90] sm:$0xf] }
   0xf   :  { %v742_v38 = vld [vmem:[%s1241_s0 + $0x9c] sm:$0xf]  ;;  %v747_v39 = vld [vmem:[%s1241_s0 + $0x98] sm:$0xf]  ;;  %v756_v40 = vld [vmem:[%s1241_s0 + $0xa4] sm:$0xf] }
  0x10   :  { %v761_v41 = vld [vmem:[%s1241_s0 + $0xa0] sm:$0xf]  ;;  %v770_v42 = vld [vmem:[%s1241_s0 + $0xac] sm:$0xf]  ;;  %v775_v43 = vld [vmem:[%s1241_s0 + $0xa8] sm:$0xf] }
  0x11   :  { %v784_v44 = vld [vmem:[%s1241_s0 + $0xb4] sm:$0xf]  ;;  %v789_v45 = vld [vmem:[%s1241_s0 + $0xb0] sm:$0xf]  ;;  %v798_v46 = vld [vmem:[%s1241_s0 + $0xbc] sm:$0xf] }
  0x12   :  { %154 = vrot.lane.b32.xlu1 %v532_v8, %s462_s10  ;;  %152 = vrot.lane.b32.xlu0 %v537_v9, %s462_s10  ;;  %v803_v47 = vld [vmem:[%s1241_s0 + $0xb8] sm:$0xf]  ;;  %v812_v48 = vld [vmem:[%s1241_s0 + $0xc4] sm:$0xf] }
  0x13   :  { %v817_v49 = vld [vmem:[%s1241_s0 + $0xc0] sm:$0xf]  ;;  %v826_v50 = vld [vmem:[%s1241_s0 + $0xcc] sm:$0xf]  ;;  %v831_v51 = vld [vmem:[%s1241_s0 + $0xc8] sm:$0xf] }
  0x14   :  { %v840_v52 = vld [vmem:[%s1241_s0 + $0xd4] sm:$0xf]  ;;  %v845_v53 = vld [vmem:[%s1241_s0 + $0xd0] sm:$0xf]  ;;  %v854_v54 = vld [vmem:[%s1241_s0 + $0xdc] sm:$0xf] }
  0x15   :  { %v859_v55 = vld [vmem:[%s1241_s0 + $0xd8] sm:$0xf]  ;;  %v868_v56 = vld [vmem:[%s1241_s0 + $0xe4] sm:$0xf]  ;;  %v873_v57 = vld [vmem:[%s1241_s0 + $0xe0] sm:$0xf] }
  0x16   :  { %158 = vrot.lane.b32.xlu1 %v546_v10, %s462_s10  ;;  %156 = vrot.lane.b32.xlu0 %v551_v11, %s462_s10  ;;  %v882_v58 = vld [vmem:[%s1241_s0 + $0xec] sm:$0xf]  ;;  %v887_v59 = vld [vmem:[%s1241_s0 + $0xe8] sm:$0xf] }
  0x17   :  { %1245 = vst [vmem:[#allocation2_spill] sm:$0xff] %v887_v59 }
  0x1a   :  { %162 = vrot.lane.b32.xlu1 %v560_v12, %s462_s10  ;;  %160 = vrot.lane.b32.xlu0 %v565_v13, %s462_s10 }
  0x1e   :  { %166 = vrot.lane.b32.xlu1 %v574_v14, %s462_s10  ;;  %164 = vrot.lane.b32.xlu0 %v579_v15, %s462_s10 }
  0x22   :  { %170 = vrot.lane.b32.xlu1 %v588_v16, %s462_s10  ;;  %168 = vrot.lane.b32.xlu0 %v593_v17, %s462_s10 }
  0x26   :  { %174 = vrot.lane.b32.xlu1 %v602_v18, %s462_s10  ;;  %172 = vrot.lane.b32.xlu0 %v607_v19, %s462_s10 }
  0x2a   :  { %178 = vrot.lane.b32.xlu1 %v616_v20, %s462_s10  ;;  %176 = vrot.lane.b32.xlu0 %v621_v21, %s462_s10 }
  0x2e   :  { %182 = vrot.lane.b32.xlu1 %v630_v22, %s462_s10  ;;  %180 = vrot.lane.b32.xlu0 %v635_v23, %s462_s10 }
  0x32   :  { %186 = vrot.lane.b32.xlu1 %v644_v24, %s462_s10  ;;  %184 = vrot.lane.b32.xlu0 %v649_v25, %s462_s10 }
  0x36   :  { %190 = vrot.lane.b32.xlu1 %v658_v26, %s462_s10  ;;  %188 = vrot.lane.b32.xlu0 %v663_v27, %s462_s10 }
  0x3a   :  { %194 = vrot.lane.b32.xlu1 %v672_v28, %s462_s10  ;;  %192 = vrot.lane.b32.xlu0 %v677_v29, %s462_s10 }
  0x3e   :  { %198 = vrot.lane.b32.xlu1 %v686_v30, %s462_s10  ;;  %196 = vrot.lane.b32.xlu0 %v691_v31, %s462_s10 }
  0x42   :  { %202 = vrot.lane.b32.xlu1 %v700_v32, %s462_s10  ;;  %200 = vrot.lane.b32.xlu0 %v705_v33, %s462_s10 }
  0x46   :  { %206 = vrot.lane.b32.xlu1 %v714_v34, %s462_s10  ;;  %204 = vrot.lane.b32.xlu0 %v719_v35, %s462_s10 }
  0x4a   :  { %210 = vrot.lane.b32.xlu1 %v728_v36, %s462_s10  ;;  %208 = vrot.lane.b32.xlu0 %v733_v37, %s462_s10 }
  0x4e   :  { %214 = vrot.lane.b32.xlu1 %v742_v38, %s462_s10  ;;  %212 = vrot.lane.b32.xlu0 %v747_v39, %s462_s10 }
  0x52   :  { %218 = vrot.lane.b32.xlu1 %v756_v40, %s462_s10  ;;  %216 = vrot.lane.b32.xlu0 %v761_v41, %s462_s10 }
  0x56   :  { %222 = vrot.lane.b32.xlu1 %v770_v42, %s462_s10  ;;  %220 = vrot.lane.b32.xlu0 %v775_v43, %s462_s10 }
  0x5a   :  { %226 = vrot.lane.b32.xlu1 %v784_v44, %s462_s10  ;;  %224 = vrot.lane.b32.xlu0 %v789_v45, %s462_s10 }
  0x5e   :  { %230 = vrot.lane.b32.xlu1 %v798_v46, %s462_s10  ;;  %228 = vrot.lane.b32.xlu0 %v803_v47, %s462_s10 }
  0x62   :  { %234 = vrot.lane.b32.xlu1 %v812_v48, %s462_s10  ;;  %232 = vrot.lane.b32.xlu0 %v817_v49, %s462_s10 }
  0x66   :  { %238 = vrot.lane.b32.xlu1 %v826_v50, %s462_s10  ;;  %236 = vrot.lane.b32.xlu0 %v831_v51, %s462_s10 }
  0x6a   :  { %242 = vrot.lane.b32.xlu1 %v840_v52, %s462_s10  ;;  %240 = vrot.lane.b32.xlu0 %v845_v53, %s462_s10 }
  0x6e   :  { %246 = vrot.lane.b32.xlu1 %v854_v54, %s462_s10  ;;  %244 = vrot.lane.b32.xlu0 %v859_v55, %s462_s10 }
  0x72   :  { %250 = vrot.lane.b32.xlu1 %v868_v56, %s462_s10  ;;  %248 = vrot.lane.b32.xlu0 %v873_v57, %s462_s10 }
  0x74   :  { %v141_v60 = vpop.permute.xlu1 %140  ;;  %v137_v61 = vpop.permute.xlu0 %136 }
  0x75   :  { %v330_v62 = vmax.bf16 %v141_v60, %v476_v0  ;;  %v328_v63 = vmax.bf16 %v137_v61, %v481_v1  ;;  %v906_v0 = vld [vmem:[%s1241_s0 + $0xf4] sm:$0xf]  ;;  %v911_v1 = vld [vmem:[%s1241_s0 + $0xf0] sm:$0xf] }
  0x76   :  { %254 = vrot.lane.b32.xlu1 %v882_v58, %s462_s10  ;;  %252 = vrot.lane.b32.xlu0 %v887_v59, %s462_s10 }
  0x77   :  { %395 = vst.msk [vmem:[%s1242_s1 + $0x8] sm:$0xf] %vm392_vm0, %v330_v62  ;;  %393 = vst.msk [vmem:[%s1242_s1] sm:$0xf] %vm392_vm0, %v328_v63 }
  0x78   :  { %v143_v60 = vpop.permute.xlu1 %142  ;;  %v139_v61 = vpop.permute.xlu0 %138 }
  0x79   :  { %v331_v59 = vmax.bf16 %v143_v60, %v490_v2  ;;  %v329_v62 = vmax.bf16 %v139_v61, %v495_v3  ;;  %v930_v2 = vld [vmem:[%s1241_s0 + $0xfc] sm:$0xf]  ;;  %v935_v3 = vld [vmem:[%s1241_s0 + $0xf8] sm:$0xf] }
  0x7a   :  { %258 = vrot.lane.b32.xlu1 %v906_v0, %s462_s10  ;;  %256 = vrot.lane.b32.xlu0 %v911_v1, %s462_s10  ;;  %1246 = vst [vmem:[#allocation3_spill] sm:$0xff] %v935_v3 }
  0x7b   :  { %396 = vst.msk [vmem:[%s1242_s1 + $0xc] sm:$0xf] %vm392_vm0, %v331_v59  ;;  %394 = vst.msk [vmem:[%s1242_s1 + $0x4] sm:$0xf] %vm392_vm0, %v329_v62 }
  0x7c   :  { %v147_v63 = vpop.permute.xlu1 %146  ;;  %v145_v60 = vpop.permute.xlu0 %144 }
  0x7d   :  { %v333_v61 = vmax.bf16 %v147_v63, %v504_v4  ;;  %v332_v59 = vmax.bf16 %v145_v60, %v509_v5 }
  0x7e   :  { %262 = vrot.lane.b32.xlu1 %v930_v2, %s462_s10  ;;  %260 = vrot.lane.b32.xlu0 %v935_v3, %s462_s10 }
  0x7f   :  { %398 = vst.msk [vmem:[%s1242_s1 + $0x14] sm:$0xf] %vm392_vm0, %v333_v61  ;;  %397 = vst.msk [vmem:[%s1242_s1 + $0x10] sm:$0xf] %vm392_vm0, %v332_v59 }
  0x80   :  { %v151_v62 = vpop.permute.xlu1 %150  ;;  %v149_v4 = vpop.permute.xlu0 %148 }
  0x81   :  { %v335_v5 = vmax.bf16 %v151_v62, %v518_v6  ;;  %v334_v63 = vmax.bf16 %v149_v4, %v523_v7 }
  0x83   :  { %400 = vst.msk [vmem:[%s1242_s1 + $0x1c] sm:$0xf] %vm392_vm0, %v335_v5  ;;  %399 = vst.msk [vmem:[%s1242_s1 + $0x18] sm:$0xf] %vm392_vm0, %v334_v63 }
  0x84   :  { %v155_v60 = vpop.permute.xlu1 %154  ;;  %v153_v61 = vpop.permute.xlu0 %152 }
  0x85   :  { %v337_v59 = vmax.bf16 %v155_v60, %v532_v8  ;;  %v336_v3 = vmax.bf16 %v153_v61, %v537_v9 }
  0x87   :  { %402 = vst.msk [vmem:[%s1242_s1 + $0x24] sm:$0xf] %vm392_vm0, %v337_v59  ;;  %401 = vst.msk [vmem:[%s1242_s1 + $0x20] sm:$0xf] %vm392_vm0, %v336_v3 }
  0x88   :  { %v159_v6 = vpop.permute.xlu1 %158  ;;  %v157_v7 = vpop.permute.xlu0 %156 }
  0x89   :  { %v339_v62 = vmax.bf16 %v159_v6, %v546_v10  ;;  %v338_v4 = vmax.bf16 %v157_v7, %v551_v11 }
  0x8b   :  { %404 = vst.msk [vmem:[%s1242_s1 + $0x2c] sm:$0xf] %vm392_vm0, %v339_v62  ;;  %403 = vst.msk [vmem:[%s1242_s1 + $0x28] sm:$0xf] %vm392_vm0, %v338_v4 }
  0x8c   :  { %v163_v8 = vpop.permute.xlu1 %162  ;;  %v161_v9 = vpop.permute.xlu0 %160 }
  0x8d   :  { %v341_v3 = vmax.bf16 %v163_v8, %v560_v12  ;;  %v340_v5 = vmax.bf16 %v161_v9, %v565_v13 }
  0x8f   :  { %406 = vst.msk [vmem:[%s1242_s1 + $0x34] sm:$0xf] %vm392_vm0, %v341_v3  ;;  %405 = vst.msk [vmem:[%s1242_s1 + $0x30] sm:$0xf] %vm392_vm0, %v340_v5 }
  0x90   :  { %v167_v10 = vpop.permute.xlu1 %166  ;;  %v165_v11 = vpop.permute.xlu0 %164 }
  0x91   :  { %v343_v63 = vmax.bf16 %v167_v10, %v574_v14  ;;  %v342_v60 = vmax.bf16 %v165_v11, %v579_v15 }
  0x93   :  { %408 = vst.msk [vmem:[%s1242_s1 + $0x3c] sm:$0xf] %vm392_vm0, %v343_v63  ;;  %407 = vst.msk [vmem:[%s1242_s1 + $0x38] sm:$0xf] %vm392_vm0, %v342_v60 }
  0x94   :  { %v171_v12 = vpop.permute.xlu1 %170  ;;  %v169_v13 = vpop.permute.xlu0 %168 }
  0x95   :  { %v345_v61 = vmax.bf16 %v171_v12, %v588_v16  ;;  %v344_v59 = vmax.bf16 %v169_v13, %v593_v17 }
  0x97   :  { %410 = vst.msk [vmem:[%s1242_s1 + $0x44] sm:$0xf] %vm392_vm0, %v345_v61  ;;  %409 = vst.msk [vmem:[%s1242_s1 + $0x40] sm:$0xf] %vm392_vm0, %v344_v59 }
  0x98   :  { %v175_v14 = vpop.permute.xlu1 %174  ;;  %v173_v15 = vpop.permute.xlu0 %172 }
  0x99   :  { %v347_v6 = vmax.bf16 %v175_v14, %v602_v18  ;;  %v346_v7 = vmax.bf16 %v173_v15, %v607_v19 }
  0x9b   :  { %412 = vst.msk [vmem:[%s1242_s1 + $0x4c] sm:$0xf] %vm392_vm0, %v347_v6  ;;  %411 = vst.msk [vmem:[%s1242_s1 + $0x48] sm:$0xf] %vm392_vm0, %v346_v7 }
  0x9c   :  { %v179_v16 = vpop.permute.xlu1 %178  ;;  %v177_v17 = vpop.permute.xlu0 %176 }
  0x9d   :  { %v349_v62 = vmax.bf16 %v179_v16, %v616_v20  ;;  %v348_v4 = vmax.bf16 %v177_v17, %v621_v21 }
  0x9f   :  { %414 = vst.msk [vmem:[%s1242_s1 + $0x54] sm:$0xf] %vm392_vm0, %v349_v62  ;;  %413 = vst.msk [vmem:[%s1242_s1 + $0x50] sm:$0xf] %vm392_vm0, %v348_v4 }
  0xa0   :  { %v183_v18 = vpop.permute.xlu1 %182  ;;  %v181_v19 = vpop.permute.xlu0 %180 }
  0xa1   :  { %v351_v8 = vmax.bf16 %v183_v18, %v630_v22  ;;  %v350_v9 = vmax.bf16 %v181_v19, %v635_v23 }
  0xa3   :  { %416 = vst.msk [vmem:[%s1242_s1 + $0x5c] sm:$0xf] %vm392_vm0, %v351_v8  ;;  %415 = vst.msk [vmem:[%s1242_s1 + $0x58] sm:$0xf] %vm392_vm0, %v350_v9 }
  0xa4   :  { %v187_v20 = vpop.permute.xlu1 %186  ;;  %v185_v21 = vpop.permute.xlu0 %184 }
  0xa5   :  { %v353_v3 = vmax.bf16 %v187_v20, %v644_v24  ;;  %v352_v5 = vmax.bf16 %v185_v21, %v649_v25 }
  0xa7   :  { %418 = vst.msk [vmem:[%s1242_s1 + $0x64] sm:$0xf] %vm392_vm0, %v353_v3  ;;  %417 = vst.msk [vmem:[%s1242_s1 + $0x60] sm:$0xf] %vm392_vm0, %v352_v5 }
  0xa8   :  { %v191_v22 = vpop.permute.xlu1 %190  ;;  %v189_v23 = vpop.permute.xlu0 %188 }
  0xa9   :  { %v355_v10 = vmax.bf16 %v191_v22, %v658_v26  ;;  %v354_v11 = vmax.bf16 %v189_v23, %v663_v27 }
  0xab   :  { %420 = vst.msk [vmem:[%s1242_s1 + $0x6c] sm:$0xf] %vm392_vm0, %v355_v10  ;;  %419 = vst.msk [vmem:[%s1242_s1 + $0x68] sm:$0xf] %vm392_vm0, %v354_v11 }
  0xac   :  { %v195_v24 = vpop.permute.xlu1 %194  ;;  %v193_v25 = vpop.permute.xlu0 %192 }
  0xad   :  { %v357_v63 = vmax.bf16 %v195_v24, %v672_v28  ;;  %v356_v60 = vmax.bf16 %v193_v25, %v677_v29 }
  0xaf   :  { %422 = vst.msk [vmem:[%s1242_s1 + $0x74] sm:$0xf] %vm392_vm0, %v357_v63  ;;  %421 = vst.msk [vmem:[%s1242_s1 + $0x70] sm:$0xf] %vm392_vm0, %v356_v60 }
  0xb0   :  { %v199_v26 = vpop.permute.xlu1 %198  ;;  %v197_v27 = vpop.permute.xlu0 %196 }
  0xb1   :  { %v359_v12 = vmax.bf16 %v199_v26, %v686_v30  ;;  %v358_v13 = vmax.bf16 %v197_v27, %v691_v31  ;;  %v1247_v27 = vld [vmem:[#allocation2_spill] sm:$0xff] }
  0xb3   :  { %424 = vst.msk [vmem:[%s1242_s1 + $0x7c] sm:$0xf] %vm392_vm0, %v359_v12  ;;  %423 = vst.msk [vmem:[%s1242_s1 + $0x78] sm:$0xf] %vm392_vm0, %v358_v13 }
  0xb4   :  { %v203_v28 = vpop.permute.xlu1 %202  ;;  %v201_v29 = vpop.permute.xlu0 %200 }
  0xb5   :  { %v361_v61 = vmax.bf16 %v203_v28, %v700_v32  ;;  %v360_v59 = vmax.bf16 %v201_v29, %v705_v33 }
  0xb7   :  { %426 = vst.msk [vmem:[%s1242_s1 + $0x84] sm:$0xf] %vm392_vm0, %v361_v61  ;;  %425 = vst.msk [vmem:[%s1242_s1 + $0x80] sm:$0xf] %vm392_vm0, %v360_v59  ;;  %v1248_v59 = vld [vmem:[#allocation3_spill] sm:$0xff] }
  0xb8   :  { %v207_v30 = vpop.permute.xlu1 %206  ;;  %v205_v31 = vpop.permute.xlu0 %204 }
  0xb9   :  { %v363_v14 = vmax.bf16 %v207_v30, %v714_v34  ;;  %v362_v15 = vmax.bf16 %v205_v31, %v719_v35 }
  0xbb   :  { %428 = vst.msk [vmem:[%s1242_s1 + $0x8c] sm:$0xf] %vm392_vm0, %v363_v14  ;;  %427 = vst.msk [vmem:[%s1242_s1 + $0x88] sm:$0xf] %vm392_vm0, %v362_v15 }
  0xbc   :  { %v211_v32 = vpop.permute.xlu1 %210  ;;  %v209_v33 = vpop.permute.xlu0 %208 }
  0xbd   :  { %v365_v6 = vmax.bf16 %v211_v32, %v728_v36  ;;  %v364_v7 = vmax.bf16 %v209_v33, %v733_v37 }
  0xbf   :  { %430 = vst.msk [vmem:[%s1242_s1 + $0x94] sm:$0xf] %vm392_vm0, %v365_v6  ;;  %429 = vst.msk [vmem:[%s1242_s1 + $0x90] sm:$0xf] %vm392_vm0, %v364_v7 }
  0xc0   :  { %v215_v34 = vpop.permute.xlu1 %214  ;;  %v213_v35 = vpop.permute.xlu0 %212 }
  0xc1   :  { %v367_v16 = vmax.bf16 %v215_v34, %v742_v38  ;;  %v366_v17 = vmax.bf16 %v213_v35, %v747_v39 }
  0xc3   :  { %432 = vst.msk [vmem:[%s1242_s1 + $0x9c] sm:$0xf] %vm392_vm0, %v367_v16  ;;  %431 = vst.msk [vmem:[%s1242_s1 + $0x98] sm:$0xf] %vm392_vm0, %v366_v17 }
  0xc4   :  { %v219_v36 = vpop.permute.xlu1 %218  ;;  %v217_v37 = vpop.permute.xlu0 %216 }
  0xc5   :  { %v369_v62 = vmax.bf16 %v219_v36, %v756_v40  ;;  %v368_v4 = vmax.bf16 %v217_v37, %v761_v41 }
  0xc7   :  { %434 = vst.msk [vmem:[%s1242_s1 + $0xa4] sm:$0xf] %vm392_vm0, %v369_v62  ;;  %433 = vst.msk [vmem:[%s1242_s1 + $0xa0] sm:$0xf] %vm392_vm0, %v368_v4 }
  0xc8   :  { %v223_v38 = vpop.permute.xlu1 %222  ;;  %v221_v39 = vpop.permute.xlu0 %220 }
  0xc9   :  { %v371_v18 = vmax.bf16 %v223_v38, %v770_v42  ;;  %v370_v19 = vmax.bf16 %v221_v39, %v775_v43 }
  0xcb   :  { %436 = vst.msk [vmem:[%s1242_s1 + $0xac] sm:$0xf] %vm392_vm0, %v371_v18  ;;  %435 = vst.msk [vmem:[%s1242_s1 + $0xa8] sm:$0xf] %vm392_vm0, %v370_v19 }
  0xcc   :  { %v227_v40 = vpop.permute.xlu1 %226  ;;  %v225_v41 = vpop.permute.xlu0 %224 }
  0xcd   :  { %v373_v8 = vmax.bf16 %v227_v40, %v784_v44  ;;  %v372_v9 = vmax.bf16 %v225_v41, %v789_v45 }
  0xcf   :  { %438 = vst.msk [vmem:[%s1242_s1 + $0xb4] sm:$0xf] %vm392_vm0, %v373_v8  ;;  %437 = vst.msk [vmem:[%s1242_s1 + $0xb0] sm:$0xf] %vm392_vm0, %v372_v9 }
  0xd0   :  { %v231_v42 = vpop.permute.xlu1 %230  ;;  %v229_v43 = vpop.permute.xlu0 %228 }
  0xd1   :  { %v375_v20 = vmax.bf16 %v231_v42, %v798_v46  ;;  %v374_v21 = vmax.bf16 %v229_v43, %v803_v47 }
  0xd3   :  { %440 = vst.msk [vmem:[%s1242_s1 + $0xbc] sm:$0xf] %vm392_vm0, %v375_v20  ;;  %439 = vst.msk [vmem:[%s1242_s1 + $0xb8] sm:$0xf] %vm392_vm0, %v374_v21 }
  0xd4   :  { %v235_v44 = vpop.permute.xlu1 %234  ;;  %v233_v45 = vpop.permute.xlu0 %232 }
  0xd5   :  { %v377_v3 = vmax.bf16 %v235_v44, %v812_v48  ;;  %v376_v5 = vmax.bf16 %v233_v45, %v817_v49 }
  0xd7   :  { %442 = vst.msk [vmem:[%s1242_s1 + $0xc4] sm:$0xf] %vm392_vm0, %v377_v3  ;;  %441 = vst.msk [vmem:[%s1242_s1 + $0xc0] sm:$0xf] %vm392_vm0, %v376_v5 }
  0xd8   :  { %v239_v46 = vpop.permute.xlu1 %238  ;;  %v237_v47 = vpop.permute.xlu0 %236 }
  0xd9   :  { %v379_v22 = vmax.bf16 %v239_v46, %v826_v50  ;;  %v378_v23 = vmax.bf16 %v237_v47, %v831_v51 }
  0xdb   :  { %444 = vst.msk [vmem:[%s1242_s1 + $0xcc] sm:$0xf] %vm392_vm0, %v379_v22  ;;  %443 = vst.msk [vmem:[%s1242_s1 + $0xc8] sm:$0xf] %vm392_vm0, %v378_v23 }
  0xdc   :  { %v243_v48 = vpop.permute.xlu1 %242  ;;  %v241_v49 = vpop.permute.xlu0 %240 }
  0xdd   :  { %v381_v10 = vmax.bf16 %v243_v48, %v840_v52  ;;  %v380_v11 = vmax.bf16 %v241_v49, %v845_v53 }
  0xdf   :  { %446 = vst.msk [vmem:[%s1242_s1 + $0xd4] sm:$0xf] %vm392_vm0, %v381_v10  ;;  %445 = vst.msk [vmem:[%s1242_s1 + $0xd0] sm:$0xf] %vm392_vm0, %v380_v11 }
  0xe0   :  { %v247_v50 = vpop.permute.xlu1 %246  ;;  %v245_v51 = vpop.permute.xlu0 %244 }
  0xe1   :  { %v383_v24 = vmax.bf16 %v247_v50, %v854_v54  ;;  %v382_v25 = vmax.bf16 %v245_v51, %v859_v55 }
  0xe3   :  { %448 = vst.msk [vmem:[%s1242_s1 + $0xdc] sm:$0xf] %vm392_vm0, %v383_v24  ;;  %447 = vst.msk [vmem:[%s1242_s1 + $0xd8] sm:$0xf] %vm392_vm0, %v382_v25 }
  0xe4   :  { %v251_v52 = vpop.permute.xlu1 %250  ;;  %v249_v53 = vpop.permute.xlu0 %248 }
  0xe5   :  { %v385_v63 = vmax.bf16 %v251_v52, %v868_v56  ;;  %v384_v60 = vmax.bf16 %v249_v53, %v873_v57 }
  0xe7   :  { %450 = vst.msk [vmem:[%s1242_s1 + $0xe4] sm:$0xf] %vm392_vm0, %v385_v63  ;;  %449 = vst.msk [vmem:[%s1242_s1 + $0xe0] sm:$0xf] %vm392_vm0, %v384_v60 }
  0xe8   :  { %v255_v54 = vpop.permute.xlu1 %254  ;;  %v253_v55 = vpop.permute.xlu0 %252 }
  0xe9   :  { %v387_v26 = vmax.bf16 %v255_v54, %v882_v58  ;;  %v386_v12 = vmax.bf16 %v253_v55, %v1247_v27 }
  0xeb   :  { %452 = vst.msk [vmem:[%s1242_s1 + $0xec] sm:$0xf] %vm392_vm0, %v387_v26  ;;  %451 = vst.msk [vmem:[%s1242_s1 + $0xe8] sm:$0xf] %vm392_vm0, %v386_v12 }
  0xec   :  { %v259_v56 = vpop.permute.xlu1 %258  ;;  %v257_v57 = vpop.permute.xlu0 %256 }
  0xed   :  { %v389_v13 = vmax.bf16 %v259_v56, %v906_v0  ;;  %v388_v28 = vmax.bf16 %v257_v57, %v911_v1 }
  0xef   :  { %454 = vst.msk [vmem:[%s1242_s1 + $0xf4] sm:$0xf] %vm392_vm0, %v389_v13  ;;  %453 = vst.msk [vmem:[%s1242_s1 + $0xf0] sm:$0xf] %vm392_vm0, %v388_v28 }
  0xf0   :  { %v263_v58 = vpop.permute.xlu1 %262  ;;  %v261_v29 = vpop.permute.xlu0 %260 }
  0xf1   :  { %v391_v61 = vmax.bf16 %v263_v58, %v930_v2  ;;  %v390_v30 = vmax.bf16 %v261_v29, %v1248_v59 }
  0xf3   :  { %456 = vst.msk [vmem:[%s1242_s1 + $0xfc] sm:$0xf] %vm392_vm0, %v391_v61  ;;  %455 = vst.msk [vmem:[%s1242_s1 + $0xf8] sm:$0xf] %vm392_vm0, %v390_v30 }

// kernel: cnn_model_forward.20
= control target key start
LH: loop header
LB: loop body
LE: loop exit
PB: predicated region body
PF: predicated region fallthrough
CT: control target
= control target key end

     0   :  { %s3034_s15 = smov 0   ;;  %s3036_s16 = smov 0   ;;  %s3647_s0 = inlined_call_operand.vmem [shape: bf16[512,1792], index: 0, kind: input, shape index: {}]   ;;  %s3648_s1 = inlined_call_operand.vmem [shape: bf16[1792,128], index: 1, kind: input, shape index: {}]   ;;  %s3649_s2 = inlined_call_operand.vmem [shape: f32[1,128], index: 2, kind: input, shape index: {}]   ;;  %s3650_s3 = inlined_call_operand.vmem [shape: f32[1,128], index: 3, kind: input, shape index: {}]   ;;  %s3651_s4 = inlined_call_operand.vmem [shape: bf16[512,128], index: 4, kind: output, shape index: {}]  }
   0x1   :  { %s3038_s17 = smov 0   ;;  %s3040_s18 = smov 0  }
   0x2   :  { %s3042_s19 = smov 0  }
   0x3 LB: > { %s26_s20 = sadd.s32 1, %s3001_s18  ;;  %p49_p1 = scmp.ne.s32.totalorder %s2993_s16, %s2989_s15  ;;  %s3005_s19 = sphi %s3042_s19, %s14_s19   ;;  %s3001_s18 = sphi %s3040_s18, %s3655_s18   ;;  %s2997_s17 = sphi %s3038_s17, %s3654_s17   ;;  %s2993_s16 = sphi %s3036_s16, %s3653_s16   ;;  %s2989_s15 = sphi %s3034_s15, %s3652_s15  }
   0x4   : > { %p27_p0 = scmp.ge.s32.totalorder %s26_s20, 7  ;;  %p50_p2 = scmp.eq.s32.totalorder %s3005_s19, 0 }
   0x5   : > { %s42_s22 = sadd.s32 1, %s2993_s16  ;;  %p2365_p5 = scmp.ge.s32.totalorder %s3005_s19, 7 }
   0x6   : > { %s3657_s20 = smov (%p27_p0, %s26_s20), 0  ;;  %p51_p3 = por %p50_p2, %p49_p1 }
   0x7   : > { %s38_s21 = ssub.s32 %s3001_s18, %s3657_s20  ;;  %195 = sbr.rel (%p2365_p5) target bundleno = 48 (0x30), region = 24 }
   0x8   : > { %p40_p4 = scmp.eq.s32.totalorder %s38_s21, 0 }
   0xa   : > { %s3069_s23 = scalar_select %p40_p4, %s2993_s16, %s42_s22  }
   0xc   : > { %198 = sbr.rel (!%p51_p3) target bundleno = 48 (0x30), region = 28  ;;  %s200_s24 = sand.u32 (%p51_p3), 1, %s2993_s16  }
   0xd   : > { %s2525_s25 = sshll.u32 (%p51_p3), %s3001_s18, 3  ;;  %s2366_s26 = sshll.u32 (%p51_p3), %s200_s24, 9 }
   0xe   : > { %s3077_s29 = scalar_lea.vmem (%p51_p3), %s3647_s0, %s2525_s25  ;;  %s3082_s30 = scalar_lea.vmem (%p51_p3), [#allocation3], %s2366_s26 }
   0xf   : > { %v363_v0 = vld [vmem:[%s3077_s29] sm:$0xff] (%p51_p3)  ;;  %v365_v1 = vld [vmem:[%s3077_s29 + $0x38] sm:$0xff] (%p51_p3)  ;;  %v367_v2 = vld [vmem:[%s3077_s29 + $0x70] sm:$0xff] (%p51_p3) }
  0x10   : > { %364 = vst [vmem:[%s3082_s30] sm:$0xff] (%p51_p3), %v363_v0  ;;  %366 = vst [vmem:[%s3082_s30 + $0x8] sm:$0xff] (%p51_p3), %v365_v1  ;;  %v369_v3 = vld [vmem:[%s3077_s29 + $0xa8] sm:$0xff] (%p51_p3)  ;;  %v371_v4 = vld [vmem:[%s3077_s29 + $0xe0] sm:$0xff] (%p51_p3) }
  0x11   : > { %368 = vst [vmem:[%s3082_s30 + $0x10] sm:$0xff] %v367_v2  ;;  %v373_v5 = vld [vmem:[%s3077_s29 + $0x118] sm:$0xff]  ;;  %370 = vst [vmem:[%s3082_s30 + $0x18] sm:$0xff] %v369_v3  ;;  %v375_v6 = vld [vmem:[%s3077_s29 + $0x150] sm:$0xff] }
  0x12   : > { %372 = vst [vmem:[%s3082_s30 + $0x20] sm:$0xff] %v371_v4  ;;  %374 = vst [vmem:[%s3082_s30 + $0x28] sm:$0xff] %v373_v5  ;;  %v377_v7 = vld [vmem:[%s3077_s29 + $0x188] sm:$0xff]  ;;  %v379_v8 = vld [vmem:[%s3077_s29 + $0x1c0] sm:$0xff] }
  0x13   : > { %376 = vst [vmem:[%s3082_s30 + $0x30] sm:$0xff] %v375_v6  ;;  %378 = vst [vmem:[%s3082_s30 + $0x38] sm:$0xff] %v377_v7  ;;  %v381_v9 = vld [vmem:[%s3077_s29 + $0x1f8] sm:$0xff]  ;;  %v383_v10 = vld [vmem:[%s3077_s29 + $0x230] sm:$0xff] }
  0x14   : > { %380 = vst [vmem:[%s3082_s30 + $0x40] sm:$0xff] %v379_v8  ;;  %v385_v11 = vld [vmem:[%s3077_s29 + $0x268] sm:$0xff]  ;;  %382 = vst [vmem:[%s3082_s30 + $0x48] sm:$0xff] %v381_v9  ;;  %v387_v12 = vld [vmem:[%s3077_s29 + $0x2a0] sm:$0xff] }
  0x15   : > { %384 = vst [vmem:[%s3082_s30 + $0x50] sm:$0xff] %v383_v10  ;;  %386 = vst [vmem:[%s3082_s30 + $0x58] sm:$0xff] %v385_v11  ;;  %v389_v13 = vld [vmem:[%s3077_s29 + $0x2d8] sm:$0xff]  ;;  %v391_v14 = vld [vmem:[%s3077_s29 + $0x310] sm:$0xff] }
  0x16   : > { %388 = vst [vmem:[%s3082_s30 + $0x60] sm:$0xff] %v387_v12  ;;  %390 = vst [vmem:[%s3082_s30 + $0x68] sm:$0xff] %v389_v13  ;;  %v393_v15 = vld [vmem:[%s3077_s29 + $0x348] sm:$0xff]  ;;  %v395_v16 = vld [vmem:[%s3077_s29 + $0x380] sm:$0xff] }
  0x17   : > { %392 = vst [vmem:[%s3082_s30 + $0x70] sm:$0xff] %v391_v14  ;;  %v397_v17 = vld [vmem:[%s3077_s29 + $0x3b8] sm:$0xff]  ;;  %394 = vst [vmem:[%s3082_s30 + $0x78] sm:$0xff] %v393_v15  ;;  %v399_v18 = vld [vmem:[%s3077_s29 + $0x3f0] sm:$0xff] }
  0x18   : > { %396 = vst [vmem:[%s3082_s30 + $0x80] sm:$0xff] %v395_v16  ;;  %398 = vst [vmem:[%s3082_s30 + $0x88] sm:$0xff] %v397_v17  ;;  %v401_v19 = vld [vmem:[%s3077_s29 + $0x428] sm:$0xff]  ;;  %v403_v20 = vld [vmem:[%s3077_s29 + $0x460] sm:$0xff] }
  0x19   : > { %400 = vst [vmem:[%s3082_s30 + $0x90] sm:$0xff] %v399_v18  ;;  %402 = vst [vmem:[%s3082_s30 + $0x98] sm:$0xff] %v401_v19  ;;  %v405_v21 = vld [vmem:[%s3077_s29 + $0x498] sm:$0xff]  ;;  %v407_v22 = vld [vmem:[%s3077_s29 + $0x4d0] sm:$0xff] }
  0x1a   : > { %404 = vst [vmem:[%s3082_s30 + $0xa0] sm:$0xff] %v403_v20  ;;  %v409_v23 = vld [vmem:[%s3077_s29 + $0x508] sm:$0xff]  ;;  %406 = vst [vmem:[%s3082_s30 + $0xa8] sm:$0xff] %v405_v21  ;;  %v411_v24 = vld [vmem:[%s3077_s29 + $0x540] sm:$0xff] }
  0x1b   : > { %408 = vst [vmem:[%s3082_s30 + $0xb0] sm:$0xff] %v407_v22  ;;  %410 = vst [vmem:[%s3082_s30 + $0xb8] sm:$0xff] %v409_v23  ;;  %v413_v25 = vld [vmem:[%s3077_s29 + $0x578] sm:$0xff]  ;;  %v415_v26 = vld [vmem:[%s3077_s29 + $0x5b0] sm:$0xff] }
  0x1c   : > { %412 = vst [vmem:[%s3082_s30 + $0xc0] sm:$0xff] %v411_v24  ;;  %414 = vst [vmem:[%s3082_s30 + $0xc8] sm:$0xff] %v413_v25  ;;  %v417_v27 = vld [vmem:[%s3077_s29 + $0x5e8] sm:$0xff]  ;;  %v419_v28 = vld [vmem:[%s3077_s29 + $0x620] sm:$0xff] }
  0x1d   : > { %416 = vst [vmem:[%s3082_s30 + $0xd0] sm:$0xff] %v415_v26  ;;  %v421_v29 = vld [vmem:[%s3077_s29 + $0x658] sm:$0xff]  ;;  %418 = vst [vmem:[%s3082_s30 + $0xd8] sm:$0xff] %v417_v27  ;;  %v423_v30 = vld [vmem:[%s3077_s29 + $0x690] sm:$0xff] }
  0x1e   : > { %420 = vst [vmem:[%s3082_s30 + $0xe0] sm:$0xff] %v419_v28  ;;  %422 = vst [vmem:[%s3082_s30 + $0xe8] sm:$0xff] %v421_v29  ;;  %v425_v31 = vld [vmem:[%s3077_s29 + $0x6c8] sm:$0xff]  ;;  %v427_v32 = vld [vmem:[%s3077_s29 + $0x700] sm:$0xff] }
  0x1f   : > { %424 = vst [vmem:[%s3082_s30 + $0xf0] sm:$0xff] %v423_v30  ;;  %426 = vst [vmem:[%s3082_s30 + $0xf8] sm:$0xff] %v425_v31  ;;  %v429_v33 = vld [vmem:[%s3077_s29 + $0x738] sm:$0xff]  ;;  %v431_v34 = vld [vmem:[%s3077_s29 + $0x770] sm:$0xff] }
  0x20   : > { %428 = vst [vmem:[%s3082_s30 + $0x100] sm:$0xff] %v427_v32  ;;  %v433_v35 = vld [vmem:[%s3077_s29 + $0x7a8] sm:$0xff]  ;;  %430 = vst [vmem:[%s3082_s30 + $0x108] sm:$0xff] %v429_v33  ;;  %v435_v36 = vld [vmem:[%s3077_s29 + $0x7e0] sm:$0xff] }
  0x21   : > { %432 = vst [vmem:[%s3082_s30 + $0x110] sm:$0xff] %v431_v34  ;;  %434 = vst [vmem:[%s3082_s30 + $0x118] sm:$0xff] %v433_v35  ;;  %v437_v37 = vld [vmem:[%s3077_s29 + $0x818] sm:$0xff]  ;;  %v439_v38 = vld [vmem:[%s3077_s29 + $0x850] sm:$0xff] }
  0x22   : > { %436 = vst [vmem:[%s3082_s30 + $0x120] sm:$0xff] %v435_v36  ;;  %438 = vst [vmem:[%s3082_s30 + $0x128] sm:$0xff] %v437_v37  ;;  %v441_v39 = vld [vmem:[%s3077_s29 + $0x888] sm:$0xff]  ;;  %v443_v40 = vld [vmem:[%s3077_s29 + $0x8c0] sm:$0xff] }
  0x23   : > { %440 = vst [vmem:[%s3082_s30 + $0x130] sm:$0xff] %v439_v38  ;;  %v445_v41 = vld [vmem:[%s3077_s29 + $0x8f8] sm:$0xff]  ;;  %442 = vst [vmem:[%s3082_s30 + $0x138] sm:$0xff] %v441_v39  ;;  %v447_v42 = vld [vmem:[%s3077_s29 + $0x930] sm:$0xff] }
  0x24   : > { %444 = vst [vmem:[%s3082_s30 + $0x140] sm:$0xff] %v443_v40  ;;  %446 = vst [vmem:[%s3082_s30 + $0x148] sm:$0xff] %v445_v41  ;;  %v449_v43 = vld [vmem:[%s3077_s29 + $0x968] sm:$0xff]  ;;  %v451_v44 = vld [vmem:[%s3077_s29 + $0x9a0] sm:$0xff] }
  0x25   : > { %448 = vst [vmem:[%s3082_s30 + $0x150] sm:$0xff] %v447_v42  ;;  %450 = vst [vmem:[%s3082_s30 + $0x158] sm:$0xff] %v449_v43  ;;  %v453_v45 = vld [vmem:[%s3077_s29 + $0x9d8] sm:$0xff]  ;;  %v455_v46 = vld [vmem:[%s3077_s29 + $0xa10] sm:$0xff] }
  0x26   : > { %452 = vst [vmem:[%s3082_s30 + $0x160] sm:$0xff] %v451_v44  ;;  %v457_v47 = vld [vmem:[%s3077_s29 + $0xa48] sm:$0xff]  ;;  %454 = vst [vmem:[%s3082_s30 + $0x168] sm:$0xff] %v453_v45  ;;  %v459_v48 = vld [vmem:[%s3077_s29 + $0xa80] sm:$0xff] }
  0x27   : > { %456 = vst [vmem:[%s3082_s30 + $0x170] sm:$0xff] %v455_v46  ;;  %458 = vst [vmem:[%s3082_s30 + $0x178] sm:$0xff] %v457_v47  ;;  %v461_v49 = vld [vmem:[%s3077_s29 + $0xab8] sm:$0xff]  ;;  %v463_v50 = vld [vmem:[%s3077_s29 + $0xaf0] sm:$0xff] }
  0x28   : > { %460 = vst [vmem:[%s3082_s30 + $0x180] sm:$0xff] %v459_v48  ;;  %462 = vst [vmem:[%s3082_s30 + $0x188] sm:$0xff] %v461_v49  ;;  %v465_v51 = vld [vmem:[%s3077_s29 + $0xb28] sm:$0xff]  ;;  %v467_v52 = vld [vmem:[%s3077_s29 + $0xb60] sm:$0xff] }
  0x29   : > { %464 = vst [vmem:[%s3082_s30 + $0x190] sm:$0xff] %v463_v50  ;;  %v469_v53 = vld [vmem:[%s3077_s29 + $0xb98] sm:$0xff]  ;;  %466 = vst [vmem:[%s3082_s30 + $0x198] sm:$0xff] %v465_v51  ;;  %v471_v54 = vld [vmem:[%s3077_s29 + $0xbd0] sm:$0xff] }
  0x2a   : > { %468 = vst [vmem:[%s3082_s30 + $0x1a0] sm:$0xff] %v467_v52  ;;  %470 = vst [vmem:[%s3082_s30 + $0x1a8] sm:$0xff] %v469_v53  ;;  %v473_v55 = vld [vmem:[%s3077_s29 + $0xc08] sm:$0xff]  ;;  %v475_v56 = vld [vmem:[%s3077_s29 + $0xc40] sm:$0xff] }
  0x2b   : > { %472 = vst [vmem:[%s3082_s30 + $0x1b0] sm:$0xff] %v471_v54  ;;  %474 = vst [vmem:[%s3082_s30 + $0x1b8] sm:$0xff] %v473_v55  ;;  %v477_v57 = vld [vmem:[%s3077_s29 + $0xc78] sm:$0xff]  ;;  %v479_v58 = vld [vmem:[%s3077_s29 + $0xcb0] sm:$0xff] }
  0x2c   : > { %476 = vst [vmem:[%s3082_s30 + $0x1c0] sm:$0xff] %v475_v56  ;;  %v481_v59 = vld [vmem:[%s3077_s29 + $0xce8] sm:$0xff]  ;;  %478 = vst [vmem:[%s3082_s30 + $0x1c8] sm:$0xff] %v477_v57  ;;  %v483_v60 = vld [vmem:[%s3077_s29 + $0xd20] sm:$0xff] }
  0x2d   : > { %480 = vst [vmem:[%s3082_s30 + $0x1d0] sm:$0xff] %v479_v58  ;;  %482 = vst [vmem:[%s3082_s30 + $0x1d8] sm:$0xff] %v481_v59  ;;  %v485_v61 = vld [vmem:[%s3077_s29 + $0xd58] sm:$0xff]  ;;  %v487_v62 = vld [vmem:[%s3077_s29 + $0xd90] sm:$0xff] }
  0x2e   : > { %484 = vst [vmem:[%s3082_s30 + $0x1e0] sm:$0xff] %v483_v60  ;;  %486 = vst [vmem:[%s3082_s30 + $0x1e8] sm:$0xff] %v485_v61  ;;  %v489_v63 = vld [vmem:[%s3077_s29 + $0xdc8] sm:$0xff] }
  0x2f   : > { %488 = vst [vmem:[%s3082_s30 + $0x1f0] sm:$0xff] %v487_v62  ;;  %490 = vst [vmem:[%s3082_s30 + $0x1f8] sm:$0xff] %v489_v63 }
  0x30 PF: > { %p2369_p6 = scmp.ge.s32.totalorder %s3005_s19, 1  ;;  %p507_p7 = scmp.lt.s32.totalorder %s3005_s19, 8 }
  0x32   : > { %p508_p8 = pnand %p2369_p6, %p507_p7 }
  0x33   : > { %s514_s5 = sand.u32 (!%p508_p8), 1, %s2989_s15   ;;  %s2371_s6 = sshll.u32 (!%p508_p8), %s2997_s17, 5 }
  0x34   : > { %511 = sbr.rel (%p508_p8) target bundleno = 543 (0x21f), region = 70  ;;  %s2370_s7 = sshll.u32 (!%p508_p8), %s514_s5, 9 }
  0x35   : > { %p559_p9 = scmp.lt.s32.totalorder (!%p508_p8), %s2371_s6, 223  ;;  %s3218_s12 = scalar_lea.vmem (!%p508_p8), [#allocation3], %s2370_s7 }
  0x36   : > { %p2373_p10 = scmp.ne.s32.totalorder (!%p508_p8), %s2997_s17, 0 }
  0x39   : > { %s3659_s6 = smov (!%p559_p9, %s2371_s6), 223  ;;  %586 = sbr.rel (%p2373_p10) target bundleno = 95 (0x5f), region = 78 }
  0x3a   : > { %s2372_s8 = sshll.u32 %s3659_s6, 2 }
  0x3b   : > { %s3216_s11 = scalar_lea.vmem %s3648_s1, %s2372_s8 }
  0x3e   : > { %v3007_v0 = vmov 0.0  }
  0x3f   : > { %587 = vst [vmem:[#allocation2 + $0xb0] sm:$0xff] %v3007_v0  ;;  %588 = vst [vmem:[#allocation2 + $0x1b0] sm:$0xff] %v3007_v0 }
  0x40   : > { %589 = vst [vmem:[#allocation2 + $0xd8] sm:$0xff] %v3007_v0  ;;  %590 = vst [vmem:[#allocation2 + $0x18] sm:$0xff] %v3007_v0 }
  0x41   : > { %591 = vst [vmem:[#allocation2 + $0x50] sm:$0xff] %v3007_v0  ;;  %592 = vst [vmem:[#allocation2 + $0x168] sm:$0xff] %v3007_v0 }
  0x42   : > { %593 = vst [vmem:[#allocation2 + $0x130] sm:$0xff] %v3007_v0  ;;  %594 = vst [vmem:[#allocation2 + $0x48] sm:$0xff] %v3007_v0 }
  0x43   : > { %595 = vst [vmem:[#allocation2 + $0x180] sm:$0xff] %v3007_v0  ;;  %596 = vst [vmem:[#allocation2 + $0x110] sm:$0xff] %v3007_v0 }
  0x44   : > { %597 = vst [vmem:[#allocation2 + $0x118] sm:$0xff] %v3007_v0  ;;  %598 = vst [vmem:[#allocation2 + $0x98] sm:$0xff] %v3007_v0 }
  0x45   : > { %599 = vst [vmem:[#allocation2 + $0x120] sm:$0xff] %v3007_v0  ;;  %600 = vst [vmem:[#allocation2 + $0x150] sm:$0xff] %v3007_v0 }
  0x46   : > { %601 = vst [vmem:[#allocation2 + $0x108] sm:$0xff] %v3007_v0  ;;  %602 = vst [vmem:[#allocation2 + $0x60] sm:$0xff] %v3007_v0 }
  0x47   : > { %603 = vst [vmem:[#allocation2 + $0xe0] sm:$0xff] %v3007_v0  ;;  %604 = vst [vmem:[#allocation2 + $0x188] sm:$0xff] %v3007_v0 }
  0x48   : > { %605 = vst [vmem:[#allocation2 + $0x138] sm:$0xff] %v3007_v0  ;;  %606 = vst [vmem:[#allocation2 + $0x140] sm:$0xff] %v3007_v0 }
  0x49   : > { %607 = vst [vmem:[#allocation2 + $0x80] sm:$0xff] %v3007_v0  ;;  %608 = vst [vmem:[#allocation2 + $0x1a8] sm:$0xff] %v3007_v0 }
  0x4a   : > { %609 = vst [vmem:[#allocation2 + $0x1b8] sm:$0xff] %v3007_v0  ;;  %610 = vst [vmem:[#allocation2 + $0x28] sm:$0xff] %v3007_v0 }
  0x4b   : > { %611 = vst [vmem:[#allocation2 + $0x1e8] sm:$0xff] %v3007_v0  ;;  %612 = vst [vmem:[#allocation2 + $0xf8] sm:$0xff] %v3007_v0 }
  0x4c   : > { %613 = vst [vmem:[#allocation2 + $0x160] sm:$0xff] %v3007_v0  ;;  %614 = vst [vmem:[#allocation2 + $0x30] sm:$0xff] %v3007_v0 }
  0x4d   : > { %615 = vst [vmem:[#allocation2 + $0x1e0] sm:$0xff] %v3007_v0  ;;  %616 = vst [vmem:[#allocation2] sm:$0xff] %v3007_v0 }
  0x4e   : > { %617 = vst [vmem:[#allocation2 + $0xf0] sm:$0xff] %v3007_v0  ;;  %618 = vst [vmem:[#allocation2 + $0x8] sm:$0xff] %v3007_v0 }
  0x4f   : > { %619 = vst [vmem:[#allocation2 + $0x148] sm:$0xff] %v3007_v0  ;;  %620 = vst [vmem:[#allocation2 + $0x1d0] sm:$0xff] %v3007_v0 }
  0x50   : > { %621 = vst [vmem:[#allocation2 + $0x100] sm:$0xff] %v3007_v0  ;;  %622 = vst [vmem:[#allocation2 + $0xc8] sm:$0xff] %v3007_v0 }
  0x51   : > { %623 = vst [vmem:[#allocation2 + $0x40] sm:$0xff] %v3007_v0  ;;  %624 = vst [vmem:[#allocation2 + $0x1f8] sm:$0xff] %v3007_v0 }
  0x52   : > { %625 = vst [vmem:[#allocation2 + $0x20] sm:$0xff] %v3007_v0  ;;  %626 = vst [vmem:[#allocation2 + $0x128] sm:$0xff] %v3007_v0 }
  0x53   : > { %627 = vst [vmem:[#allocation2 + $0x1a0] sm:$0xff] %v3007_v0  ;;  %628 = vst [vmem:[#allocation2 + $0x1f0] sm:$0xff] %v3007_v0 }
  0x54   : > { %629 = vst [vmem:[#allocation2 + $0xe8] sm:$0xff] %v3007_v0  ;;  %630 = vst [vmem:[#allocation2 + $0x78] sm:$0xff] %v3007_v0 }
  0x55   : > { %631 = vst [vmem:[#allocation2 + $0x70] sm:$0xff] %v3007_v0  ;;  %632 = vst [vmem:[#allocation2 + $0x90] sm:$0xff] %v3007_v0 }
  0x56   : > { %633 = vst [vmem:[#allocation2 + $0x1d8] sm:$0xff] %v3007_v0  ;;  %634 = vst [vmem:[#allocation2 + $0xd0] sm:$0xff] %v3007_v0 }
  0x57   : > { %635 = vst [vmem:[#allocation2 + $0xb8] sm:$0xff] %v3007_v0  ;;  %636 = vst [vmem:[#allocation2 + $0x88] sm:$0xff] %v3007_v0 }
  0x58   : > { %637 = vst [vmem:[#allocation2 + $0xa8] sm:$0xff] %v3007_v0  ;;  %638 = vst [vmem:[#allocation2 + $0x1c8] sm:$0xff] %v3007_v0 }
  0x59   : > { %639 = vst [vmem:[#allocation2 + $0x170] sm:$0xff] %v3007_v0  ;;  %640 = vst [vmem:[#allocation2 + $0x178] sm:$0xff] %v3007_v0 }
  0x5a   : > { %641 = vst [vmem:[#allocation2 + $0x68] sm:$0xff] %v3007_v0  ;;  %642 = vst [vmem:[#allocation2 + $0x190] sm:$0xff] %v3007_v0 }
  0x5b   : > { %643 = vst [vmem:[#allocation2 + $0x198] sm:$0xff] %v3007_v0  ;;  %644 = vst [vmem:[#allocation2 + $0x38] sm:$0xff] %v3007_v0 }
  0x5c   : > { %645 = vst [vmem:[#allocation2 + $0xc0] sm:$0xff] %v3007_v0  ;;  %646 = vst [vmem:[#allocation2 + $0x1c0] sm:$0xff] %v3007_v0 }
  0x5d   : > { %647 = vst [vmem:[#allocation2 + $0x158] sm:$0xff] %v3007_v0  ;;  %648 = vst [vmem:[#allocation2 + $0x10] sm:$0xff] %v3007_v0 }
  0x5e   : > { %649 = vst [vmem:[#allocation2 + $0x58] sm:$0xff] %v3007_v0  ;;  %650 = vst [vmem:[#allocation2 + $0xa0] sm:$0xff] %v3007_v0 }
  0x5f PF: > { %v2855_v1 = vld [vmem:[%s3216_s11 + $0x38] sm:$0xff]   ;;  %v3008_v2 = vmov 0   ;;  %v2856_v3 = vld [vmem:[%s3216_s11 + $0x30] sm:$0xff]   ;;  %v2857_v4 = vld [vmem:[%s3216_s11 + $0x28] sm:$0xff]   ;;  %p2454_p11 = scmp.ne.s32.totalorder %s2997_s17, 6 }
  0x60   : > { %1227 = vmatprep.subr.bf16.mxu0 %v3008_v2  ;;  %2781 = vmatprep.subr.bf16.mxu1 %v3008_v2  ;;  %v2858_v5 = vld [vmem:[%s3216_s11 + $0x20] sm:$0xff]   ;;  %v2859_v6 = vld [vmem:[%s3216_s11 + $0x18] sm:$0xff]   ;;  %v2860_v8 = vld [vmem:[%s3216_s11 + $0x10] sm:$0xff]  }
  0x61   : > { %1228 = vmatpush1.bf16.msra.mxu0 %v2855_v1  ;;  %2797 = vmatpush1.bf16.msra.mxu1 %v2855_v1  ;;  %v2873_v7 = vld [vmem:[%s3218_s12 + $0x4] ss:$8 sps:$4 sm:$0xff]   ;;  %v2863_v12 = vld [vmem:[%s3216_s11 + $0x78] sm:$0xff]   ;;  %v2864_v13 = vld [vmem:[%s3216_s11 + $0x70] sm:$0xff]  }
  0x62   : > { %1229 = vmatprep.subr.bf16.mxu0 %v3008_v2  ;;  %2782 = vmatprep.subr.bf16.mxu1 %v3008_v2  ;;  %v2876_v9 = vld [vmem:[%s3218_s12 + $0x104] ss:$8 sps:$4 sm:$0xff]   ;;  %v2867_v16 = vld [vmem:[%s3216_s11 + $0x58] sm:$0xff]   ;;  %v2868_v17 = vld [vmem:[%s3216_s11 + $0x50] sm:$0xff]  }
  0x63   : > { %1259 = vmatprep.mubr.bf16.mxu0 %v2873_v7  ;;  %1387 = vmatprep.mubr.bf16.mxu1 %v2876_v9  ;;  %v2861_v10 = vld [vmem:[%s3216_s11 + $0x8] sm:$0xff]   ;;  %v2862_v11 = vld [vmem:[%s3216_s11] sm:$0xff]   ;;  %v2877_v22 = vld [vmem:[%s3218_s12 + $0x14] ss:$8 sps:$4 sm:$0xff]  }
  0x64   : > { %v2865_v14 = vld [vmem:[%s3216_s11 + $0x68] sm:$0xff]   ;;  %v2866_v15 = vld [vmem:[%s3216_s11 + $0x60] sm:$0xff]   ;;  %v2879_v23 = vld [vmem:[%s3218_s12 + $0x114] ss:$8 sps:$4 sm:$0xff]  }
  0x65   : > { %1230 = vmatpush1.bf16.msra.mxu0 %v2856_v3  ;;  %2798 = vmatpush1.bf16.msra.mxu1 %v2856_v3  ;;  %v2869_v18 = vld [vmem:[%s3216_s11 + $0x48] sm:$0xff]   ;;  %v2870_v19 = vld [vmem:[%s3216_s11 + $0x40] sm:$0xff]   ;;  %v2881_v24 = vld [vmem:[%s3218_s12 + $0x10] ss:$8 sps:$4 sm:$0xff]  }
  0x66   : > { %1231 = vmatprep.subr.bf16.mxu0 %v3008_v2  ;;  %2783 = vmatprep.subr.bf16.mxu1 %v3008_v2  ;;  %v2871_v20 = vld [vmem:[%s3218_s12] ss:$8 sps:$4 sm:$0xff]   ;;  %v2882_v25 = vld [vmem:[%s3218_s12 + $0x110] ss:$8 sps:$4 sm:$0xff]   ;;  %v2883_v26 = vld [vmem:[%s3218_s12 + $0x24] ss:$8 sps:$4 sm:$0xff]  }
  0x67   : > { %v2874_v21 = vld [vmem:[%s3218_s12 + $0x100] ss:$8 sps:$4 sm:$0xff]   ;;  %v2885_v27 = vld [vmem:[%s3218_s12 + $0x124] ss:$8 sps:$4 sm:$0xff]   ;;  %v2889_v30 = vld [vmem:[%s3218_s12 + $0x34] ss:$8 sps:$4 sm:$0xff]  }
  0x68   : > { %v2887_v28 = vld [vmem:[%s3218_s12 + $0x20] ss:$8 sps:$4 sm:$0xff]   ;;  %v2891_v31 = vld [vmem:[%s3218_s12 + $0x134] ss:$8 sps:$4 sm:$0xff]   ;;  %v2893_v32 = vld [vmem:[%s3218_s12 + $0x30] ss:$8 sps:$4 sm:$0xff]  }
  0x69   : > { %1232 = vmatpush1.bf16.msra.mxu0 %v2857_v4  ;;  %2799 = vmatpush1.bf16.msra.mxu1 %v2857_v4  ;;  %v2888_v29 = vld [vmem:[%s3218_s12 + $0x120] ss:$8 sps:$4 sm:$0xff]   ;;  %v2894_v33 = vld [vmem:[%s3218_s12 + $0x130] ss:$8 sps:$4 sm:$0xff]   ;;  %v2895_v34 = vld [vmem:[%s3218_s12 + $0x44] ss:$8 sps:$4 sm:$0xff]  }
  0x6a   : > { %1233 = vmatprep.subr.bf16.mxu0 %v3008_v2  ;;  %2784 = vmatprep.subr.bf16.mxu1 %v3008_v2  ;;  %v2897_v35 = vld [vmem:[%s3218_s12 + $0x144] ss:$8 sps:$4 sm:$0xff]   ;;  %v2899_v36 = vld [vmem:[%s3218_s12 + $0x40] ss:$8 sps:$4 sm:$0xff]   ;;  %v2901_v38 = vld [vmem:[%s3218_s12 + $0x54] ss:$8 sps:$4 sm:$0xff]  }
  0x6b   : > { %v2900_v37 = vld [vmem:[%s3218_s12 + $0x140] ss:$8 sps:$4 sm:$0xff]   ;;  %v2903_v39 = vld [vmem:[%s3218_s12 + $0x154] ss:$8 sps:$4 sm:$0xff]   ;;  %v2905_v40 = vld [vmem:[%s3218_s12 + $0x50] ss:$8 sps:$4 sm:$0xff]  }
  0x6c   : > { %v2906_v41 = vld [vmem:[%s3218_s12 + $0x150] ss:$8 sps:$4 sm:$0xff]   ;;  %v2907_v42 = vld [vmem:[%s3218_s12 + $0x64] ss:$8 sps:$4 sm:$0xff]   ;;  %v2911_v44 = vld [vmem:[%s3218_s12 + $0x60] ss:$8 sps:$4 sm:$0xff]  }
  0x6d   : > { %1234 = vmatpush1.bf16.msra.mxu0 %v2858_v5  ;;  %2800 = vmatpush1.bf16.msra.mxu1 %v2858_v5  ;;  %v2909_v43 = vld [vmem:[%s3218_s12 + $0x164] ss:$8 sps:$4 sm:$0xff]   ;;  %v2912_v45 = vld [vmem:[%s3218_s12 + $0x160] ss:$8 sps:$4 sm:$0xff]   ;;  %v2913_v46 = vld [vmem:[%s3218_s12 + $0x74] ss:$8 sps:$4 sm:$0xff]  }
  0x6e   : > { %1235 = vmatprep.subr.bf16.mxu0 %v3008_v2  ;;  %2785 = vmatprep.subr.bf16.mxu1 %v3008_v2  ;;  %v2915_v47 = vld [vmem:[%s3218_s12 + $0x174] ss:$8 sps:$4 sm:$0xff]   ;;  %v2917_v48 = vld [vmem:[%s3218_s12 + $0x70] ss:$8 sps:$4 sm:$0xff]   ;;  %v2919_v50 = vld [vmem:[%s3218_s12 + $0x84] ss:$8 sps:$4 sm:$0xff]  }
  0x6f   : > { %v2918_v49 = vld [vmem:[%s3218_s12 + $0x170] ss:$8 sps:$4 sm:$0xff]   ;;  %v2921_v51 = vld [vmem:[%s3218_s12 + $0x184] ss:$8 sps:$4 sm:$0xff]   ;;  %v2923_v52 = vld [vmem:[%s3218_s12 + $0x80] ss:$8 sps:$4 sm:$0xff]  }
  0x70   : > { %v2924_v53 = vld [vmem:[%s3218_s12 + $0x180] ss:$8 sps:$4 sm:$0xff]   ;;  %v2925_v54 = vld [vmem:[%s3218_s12 + $0x94] ss:$8 sps:$4 sm:$0xff]   ;;  %v2929_v56 = vld [vmem:[%s3218_s12 + $0x90] ss:$8 sps:$4 sm:$0xff]  }
  0x71   : > { %1236 = vmatpush1.bf16.msra.mxu0 %v2859_v6  ;;  %2801 = vmatpush1.bf16.msra.mxu1 %v2859_v6  ;;  %v2927_v55 = vld [vmem:[%s3218_s12 + $0x194] ss:$8 sps:$4 sm:$0xff]   ;;  %v2930_v57 = vld [vmem:[%s3218_s12 + $0x190] ss:$8 sps:$4 sm:$0xff]   ;;  %v2931_v58 = vld [vmem:[%s3218_s12 + $0xa4] ss:$8 sps:$4 sm:$0xff]  }
  0x72   : > { %1237 = vmatprep.subr.bf16.mxu0 %v3008_v2  ;;  %2786 = vmatprep.subr.bf16.mxu1 %v3008_v2  ;;  %v2933_v59 = vld [vmem:[%s3218_s12 + $0x1a4] ss:$8 sps:$4 sm:$0xff]   ;;  %v2935_v60 = vld [vmem:[%s3218_s12 + $0xa0] ss:$8 sps:$4 sm:$0xff]   ;;  %v2937_v62 = vld [vmem:[%s3218_s12 + $0xb4] ss:$8 sps:$4 sm:$0xff]  }
  0x73   : > { %v2936_v61 = vld [vmem:[%s3218_s12 + $0x1a0] ss:$8 sps:$4 sm:$0xff]   ;;  %v2939_v63 = vld [vmem:[%s3218_s12 + $0x1b4] ss:$8 sps:$4 sm:$0xff]   ;;  %v2941_v0 = vld [vmem:[%s3218_s12 + $0xb0] ss:$8 sps:$4 sm:$0xff]  }
  0x74   : > { %v2942_v1 = vld [vmem:[%s3218_s12 + $0x1b0] ss:$8 sps:$4 sm:$0xff]   ;;  %v2945_v3 = vld [vmem:[%s3218_s12 + $0x1c4] ss:$8 sps:$4 sm:$0xff]   ;;  %v2947_v4 = vld [vmem:[%s3218_s12 + $0xc0] ss:$8 sps:$4 sm:$0xff]  }
  0x75   : > { %1238 = vmatpush1.bf16.msra.mxu0 %v2860_v8  ;;  %2802 = vmatpush1.bf16.msra.mxu1 %v2860_v8  ;;  %v2948_v5 = vld [vmem:[%s3218_s12 + $0x1c0] ss:$8 sps:$4 sm:$0xff]   ;;  %v2949_v6 = vld [vmem:[%s3218_s12 + $0xd4] ss:$8 sps:$4 sm:$0xff]   ;;  %v2953_v8 = vld [vmem:[%s3218_s12 + $0xd0] ss:$8 sps:$4 sm:$0xff]  }
  0x76   : > { %1239 = vmatprep.subr.bf16.mxu0 %v3008_v2  ;;  %2787 = vmatprep.subr.bf16.mxu1 %v3008_v2  ;;  %v2951_v7 = vld [vmem:[%s3218_s12 + $0x1d4] ss:$8 sps:$4 sm:$0xff]   ;;  %v2954_v9 = vld [vmem:[%s3218_s12 + $0x1d0] ss:$8 sps:$4 sm:$0xff]  }
  0x79   : > { %1240 = vmatpush1.bf16.msra.mxu0 %v2861_v10  ;;  %2803 = vmatpush1.bf16.msra.mxu1 %v2861_v10  ;;  %v2955_v10 = vld [vmem:[%s3218_s12 + $0xe4] ss:$8 sps:$4 sm:$0xff]  }
  0x7a   : > { %1241 = vmatprep.subr.bf16.mxu0 %v3008_v2  ;;  %2788 = vmatprep.subr.bf16.mxu1 %v3008_v2 }
  0x7d   : > { %1242 = vmatpush1.bf16.msra.mxu0 %v2862_v11  ;;  %2804 = vmatpush1.bf16.msra.mxu1 %v2862_v11  ;;  %v2957_v11 = vld [vmem:[%s3218_s12 + $0x1e4] ss:$8 sps:$4 sm:$0xff]  }
  0x7e   : > { %1243 = vmatprep.subr.bf16.mxu0 %v3008_v2  ;;  %2789 = vmatprep.subr.bf16.mxu1 %v3008_v2 }
  0x81   : > { %1244 = vmatpush2.bf16.msra.mxu0 %v2863_v12  ;;  %2805 = vmatpush2.bf16.msra.mxu1 %v2863_v12  ;;  %v2959_v12 = vld [vmem:[%s3218_s12 + $0xe0] ss:$8 sps:$4 sm:$0xff]  }
  0x82   : > { %1245 = vmatprep.subr.bf16.mxu0 %v3008_v2  ;;  %2790 = vmatprep.subr.bf16.mxu1 %v3008_v2 }
  0x85   : > { %1246 = vmatpush2.bf16.msra.mxu0 %v2864_v13  ;;  %2806 = vmatpush2.bf16.msra.mxu1 %v2864_v13  ;;  %v2960_v13 = vld [vmem:[%s3218_s12 + $0x1e0] ss:$8 sps:$4 sm:$0xff]  }
  0x86   : > { %1247 = vmatprep.subr.bf16.mxu0 %v3008_v2  ;;  %2791 = vmatprep.subr.bf16.mxu1 %v3008_v2 }
  0x89   : > { %1248 = vmatpush2.bf16.msra.mxu0 %v2865_v14  ;;  %2807 = vmatpush2.bf16.msra.mxu1 %v2865_v14  ;;  %v2961_v14 = vld [vmem:[%s3218_s12 + $0xf4] ss:$8 sps:$4 sm:$0xff]  }
  0x8a   : > { %1249 = vmatprep.subr.bf16.mxu0 %v3008_v2  ;;  %2792 = vmatprep.subr.bf16.mxu1 %v3008_v2 }
  0x8d   : > { %1250 = vmatpush2.bf16.msra.mxu0 %v2866_v15  ;;  %2808 = vmatpush2.bf16.msra.mxu1 %v2866_v15  ;;  %v2963_v15 = vld [vmem:[%s3218_s12 + $0x1f4] ss:$8 sps:$4 sm:$0xff]  }
  0x8e   : > { %1251 = vmatprep.subr.bf16.mxu0 %v3008_v2  ;;  %2793 = vmatprep.subr.bf16.mxu1 %v3008_v2 }
  0x91   : > { %1252 = vmatpush2.bf16.msra.mxu0 %v2867_v16  ;;  %2809 = vmatpush2.bf16.msra.mxu1 %v2867_v16  ;;  %v2965_v16 = vld [vmem:[%s3218_s12 + $0xf0] ss:$8 sps:$4 sm:$0xff]  }
  0x92   : > { %1253 = vmatprep.subr.bf16.mxu0 %v3008_v2  ;;  %2794 = vmatprep.subr.bf16.mxu1 %v3008_v2 }
  0x95   : > { %1254 = vmatpush2.bf16.msra.mxu0 %v2868_v17  ;;  %2810 = vmatpush2.bf16.msra.mxu1 %v2868_v17  ;;  %v2966_v17 = vld [vmem:[%s3218_s12 + $0x1f0] ss:$8 sps:$4 sm:$0xff]  }
  0x96   : > { %1255 = vmatprep.subr.bf16.mxu0 %v3008_v2  ;;  %2795 = vmatprep.subr.bf16.mxu1 %v3008_v2 }
  0x99   : > { %1256 = vmatpush2.bf16.msra.mxu0 %v2869_v18  ;;  %2811 = vmatpush2.bf16.msra.mxu1 %v2869_v18  ;;  %v651_v18 = vld [vmem:[#allocation2 + $0xb0] sm:$0xff] }
  0x9a   : > { %1257 = vmatprep.subr.bf16.mxu0 %v3008_v2  ;;  %2796 = vmatprep.subr.bf16.mxu1 %v3008_v2  ;;  %v2943_v2 = vld [vmem:[%s3218_s12 + $0xc4] ss:$8 sps:$4 sm:$0xff]  }
  0x9d   : > { %1258 = vmatpush2.bf16.msra.mxu0 %v2870_v19  ;;  %2812 = vmatpush2.bf16.msra.mxu1 %v2870_v19  ;;  %v683_v19 = vld [vmem:[#allocation2 + $0x148] sm:$0xff] }
  0xa0   : > { %1260 = vmatmul.mubr.bf16.vlgmr.msra.gmra.mxu0 %v2871_v20  ;;  %1388 = vmatmul.mubr.bf16.vlgmr.msra.gmra.mxu1 %v2874_v21 }
  0xa1   : > { %1267 = vmatprep.mubr.bf16.mxu0 %v2877_v22  ;;  %1395 = vmatprep.mubr.bf16.mxu1 %v2879_v23 }
  0xa8   : > { %1268 = vmatmul.mubr.bf16.gmra.mxu0 %v2881_v24  ;;  %1396 = vmatmul.mubr.bf16.gmra.mxu1 %v2882_v25 }
  0xa9   : > { %1275 = vmatprep.mubr.bf16.mxu0 %v2883_v26  ;;  %1403 = vmatprep.mubr.bf16.mxu1 %v2885_v27  ;;  %v652_v26 = vld [vmem:[#allocation2 + $0x1b0] sm:$0xff] }
  0xaa   : > { %v684_v27 = vld [vmem:[#allocation2 + $0x1d0] sm:$0xff] }
  0xb0   : > { %1276 = vmatmul.mubr.bf16.gmra.mxu0 %v2887_v28  ;;  %1404 = vmatmul.mubr.bf16.gmra.mxu1 %v2888_v29 }
  0xb1   : > { %1283 = vmatprep.mubr.bf16.mxu0 %v2889_v30  ;;  %1411 = vmatprep.mubr.bf16.mxu1 %v2891_v31 }
  0xb8   : > { %1284 = vmatmul.mubr.bf16.gmra.mxu0 %v2893_v32  ;;  %1412 = vmatmul.mubr.bf16.gmra.mxu1 %v2894_v33 }
  0xb9   : > { %1291 = vmatprep.mubr.bf16.mxu0 %v2895_v34  ;;  %1419 = vmatprep.mubr.bf16.mxu1 %v2897_v35  ;;  %v653_v34 = vld [vmem:[#allocation2 + $0xd8] sm:$0xff]  ;;  %v685_v35 = vld [vmem:[#allocation2 + $0x100] sm:$0xff] }
  0xc0   : > { %1292 = vmatmul.mubr.bf16.gmra.mxu0 %v2899_v36  ;;  %1420 = vmatmul.mubr.bf16.gmra.mxu1 %v2900_v37 }
  0xc1   : > { %1299 = vmatprep.mubr.bf16.mxu0 %v2901_v38  ;;  %1427 = vmatprep.mubr.bf16.mxu1 %v2903_v39 }
  0xc8   : > { %1300 = vmatmul.mubr.bf16.gmra.mxu0 %v2905_v40  ;;  %1428 = vmatmul.mubr.bf16.gmra.mxu1 %v2906_v41 }
  0xc9   : > { %1307 = vmatprep.mubr.bf16.mxu0 %v2907_v42  ;;  %1435 = vmatprep.mubr.bf16.mxu1 %v2909_v43  ;;  %v654_v42 = vld [vmem:[#allocation2 + $0x18] sm:$0xff]  ;;  %v686_v43 = vld [vmem:[#allocation2 + $0xc8] sm:$0xff] }
  0xd0   : > { %1308 = vmatmul.mubr.bf16.gmra.mxu0 %v2911_v44  ;;  %1436 = vmatmul.mubr.bf16.gmra.mxu1 %v2912_v45 }
  0xd1   : > { %1315 = vmatprep.mubr.bf16.mxu0 %v2913_v46  ;;  %1443 = vmatprep.mubr.bf16.mxu1 %v2915_v47 }
  0xd8   : > { %1316 = vmatmul.mubr.bf16.gmra.mxu0 %v2917_v48  ;;  %1444 = vmatmul.mubr.bf16.gmra.mxu1 %v2918_v49 }
  0xd9   : > { %1323 = vmatprep.mubr.bf16.mxu0 %v2919_v50  ;;  %1451 = vmatprep.mubr.bf16.mxu1 %v2921_v51  ;;  %v655_v50 = vld [vmem:[#allocation2 + $0x50] sm:$0xff]  ;;  %v687_v51 = vld [vmem:[#allocation2 + $0x40] sm:$0xff] }
  0xe0   : > { %1324 = vmatmul.mubr.bf16.gmra.mxu0 %v2923_v52  ;;  %1452 = vmatmul.mubr.bf16.gmra.mxu1 %v2924_v53 }
  0xe1   : > { %1331 = vmatprep.mubr.bf16.mxu0 %v2925_v54  ;;  %1459 = vmatprep.mubr.bf16.mxu1 %v2927_v55 }
  0xe8   : > { %1332 = vmatmul.mubr.bf16.gmra.mxu0 %v2929_v56  ;;  %1460 = vmatmul.mubr.bf16.gmra.mxu1 %v2930_v57 }
  0xe9   : > { %1339 = vmatprep.mubr.bf16.mxu0 %v2931_v58  ;;  %1467 = vmatprep.mubr.bf16.mxu1 %v2933_v59  ;;  %v656_v58 = vld [vmem:[#allocation2 + $0x168] sm:$0xff]  ;;  %v688_v59 = vld [vmem:[#allocation2 + $0x1f8] sm:$0xff] }
  0xf0   : > { %1340 = vmatmul.mubr.bf16.gmra.mxu0 %v2935_v60  ;;  %1468 = vmatmul.mubr.bf16.gmra.mxu1 %v2936_v61 }
  0xf1   : > { %1347 = vmatprep.mubr.bf16.mxu0 %v2937_v62  ;;  %1475 = vmatprep.mubr.bf16.mxu1 %v2939_v63 }
  0xf8   : > { %1348 = vmatmul.mubr.bf16.gmra.mxu0 %v2941_v0  ;;  %1476 = vmatmul.mubr.bf16.gmra.mxu1 %v2942_v1 }
  0xf9   : > { %1355 = vmatprep.mubr.bf16.mxu0 %v2943_v2  ;;  %1483 = vmatprep.mubr.bf16.mxu1 %v2945_v3  ;;  %v657_v2 = vld [vmem:[#allocation2 + $0x130] sm:$0xff]  ;;  %v689_v3 = vld [vmem:[#allocation2 + $0x20] sm:$0xff] }
 0x100   : > { %1356 = vmatmul.mubr.bf16.gmra.mxu0 %v2947_v4  ;;  %1484 = vmatmul.mubr.bf16.gmra.mxu1 %v2948_v5 }
 0x101   : > { %1363 = vmatprep.mubr.bf16.mxu0 %v2949_v6  ;;  %1491 = vmatprep.mubr.bf16.mxu1 %v2951_v7 }
 0x108   : > { %1364 = vmatmul.mubr.bf16.gmra.mxu0 %v2953_v8  ;;  %1492 = vmatmul.mubr.bf16.gmra.mxu1 %v2954_v9 }
 0x109   : > { %1371 = vmatprep.mubr.bf16.mxu0 %v2955_v10  ;;  %1499 = vmatprep.mubr.bf16.mxu1 %v2957_v11  ;;  %v658_v10 = vld [vmem:[#allocation2 + $0x48] sm:$0xff] }
 0x10a   : > { %v690_v11 = vld [vmem:[#allocation2 + $0x128] sm:$0xff] }
 0x110   : > { %1372 = vmatmul.mubr.bf16.gmra.mxu0 %v2959_v12  ;;  %1500 = vmatmul.mubr.bf16.gmra.mxu1 %v2960_v13 }
 0x111   : > { %1379 = vmatprep.mubr.bf16.mxu0 %v2961_v14  ;;  %1507 = vmatprep.mubr.bf16.mxu1 %v2963_v15 }
 0x118   : > { %1380 = vmatmul.mubr.bf16.gmra.mxu0 %v2965_v16  ;;  %1508 = vmatmul.mubr.bf16.gmra.mxu1 %v2966_v17 }
 0x160   : > { %v1261_v20 = vpop.f32.mrf.mxu0  ;;  %v1389_v21 = vpop.f32.mrf.mxu1 }
 0x161   : > { %v1516_v22 = vadd.f32 %v1261_v20, %v651_v18  ;;  %v1548_v23 = vadd.f32 %v1389_v21, %v683_v19  ;;  %v659_v18 = vld [vmem:[#allocation2 + $0x180] sm:$0xff] }
 0x162   : > { %v1263_v24 = vpop.f32.mrf.mxu0  ;;  %v1391_v25 = vpop.f32.mrf.mxu1  ;;  %v691_v19 = vld [vmem:[#allocation2 + $0x1a0] sm:$0xff] }
 0x163   : > { %1580 = vst [vmem:[#allocation2 + $0xb0] sm:$0xff] %v1516_v22  ;;  %1612 = vst [vmem:[#allocation2 + $0x148] sm:$0xff] %v1548_v23 }
 0x164   : > { %v1264_v28 = vpop.f32.mrf.mxu0  ;;  %v1392_v29 = vpop.f32.mrf.mxu1 }
 0x165   : > { %v1517_v30 = vadd.f32 %v1264_v28, %v652_v26  ;;  %v1549_v31 = vadd.f32 %v1392_v29, %v684_v27  ;;  %v660_v26 = vld [vmem:[#allocation2 + $0x110] sm:$0xff] }
 0x166   : > { %v1266_v32 = vpop.f32.mrf.mxu0  ;;  %v1394_v33 = vpop.f32.mrf.mxu1  ;;  %v692_v27 = vld [vmem:[#allocation2 + $0x1f0] sm:$0xff] }
 0x167   : > { %1581 = vst [vmem:[#allocation2 + $0x1b0] sm:$0xff] %v1517_v30  ;;  %1613 = vst [vmem:[#allocation2 + $0x1d0] sm:$0xff] %v1549_v31 }
 0x168   : > { %v1269_v36 = vpop.f32.mrf.mxu0  ;;  %v1397_v37 = vpop.f32.mrf.mxu1 }
 0x169   : > { %v1518_v38 = vadd.f32 %v1269_v36, %v653_v34  ;;  %v1550_v39 = vadd.f32 %v1397_v37, %v685_v35  ;;  %v661_v34 = vld [vmem:[#allocation2 + $0x118] sm:$0xff]  ;;  %v693_v35 = vld [vmem:[#allocation2 + $0xe8] sm:$0xff] }
 0x16a   : > { %v1271_v40 = vpop.f32.mrf.mxu0  ;;  %v1399_v41 = vpop.f32.mrf.mxu1 }
 0x16b   : > { %1582 = vst [vmem:[#allocation2 + $0xd8] sm:$0xff] %v1518_v38  ;;  %1614 = vst [vmem:[#allocation2 + $0x100] sm:$0xff] %v1550_v39 }
 0x16c   : > { %v1272_v44 = vpop.f32.mrf.mxu0  ;;  %v1400_v45 = vpop.f32.mrf.mxu1 }
 0x16d   : > { %v1519_v46 = vadd.f32 %v1272_v44, %v654_v42  ;;  %v1551_v47 = vadd.f32 %v1400_v45, %v686_v43  ;;  %v662_v42 = vld [vmem:[#allocation2 + $0x98] sm:$0xff] }
 0x16e   : > { %v1274_v48 = vpop.f32.mrf.mxu0  ;;  %v1402_v49 = vpop.f32.mrf.mxu1  ;;  %v694_v43 = vld [vmem:[#allocation2 + $0x78] sm:$0xff] }
 0x16f   : > { %1583 = vst [vmem:[#allocation2 + $0x18] sm:$0xff] %v1519_v46  ;;  %1615 = vst [vmem:[#allocation2 + $0xc8] sm:$0xff] %v1551_v47 }
 0x170   : > { %v1277_v52 = vpop.f32.mrf.mxu0  ;;  %v1405_v53 = vpop.f32.mrf.mxu1 }
 0x171   : > { %v1520_v54 = vadd.f32 %v1277_v52, %v655_v50  ;;  %v1552_v55 = vadd.f32 %v1405_v53, %v687_v51  ;;  %v663_v50 = vld [vmem:[#allocation2 + $0x120] sm:$0xff]  ;;  %v695_v51 = vld [vmem:[#allocation2 + $0x70] sm:$0xff] }
 0x172   : > { %v1279_v56 = vpop.f32.mrf.mxu0  ;;  %v1407_v57 = vpop.f32.mrf.mxu1 }
 0x173   : > { %1584 = vst [vmem:[#allocation2 + $0x50] sm:$0xff] %v1520_v54  ;;  %1616 = vst [vmem:[#allocation2 + $0x40] sm:$0xff] %v1552_v55 }
 0x174   : > { %v1280_v60 = vpop.f32.mrf.mxu0  ;;  %v1408_v61 = vpop.f32.mrf.mxu1 }
 0x175   : > { %v1521_v62 = vadd.f32 %v1280_v60, %v656_v58  ;;  %v1553_v63 = vadd.f32 %v1408_v61, %v688_v59  ;;  %v664_v58 = vld [vmem:[#allocation2 + $0x150] sm:$0xff] }
 0x176   : > { %v1282_v0 = vpop.f32.mrf.mxu0  ;;  %v1410_v1 = vpop.f32.mrf.mxu1  ;;  %v696_v59 = vld [vmem:[#allocation2 + $0x90] sm:$0xff] }
 0x177   : > { %1585 = vst [vmem:[#allocation2 + $0x168] sm:$0xff] %v1521_v62  ;;  %1617 = vst [vmem:[#allocation2 + $0x1f8] sm:$0xff] %v1553_v63 }
 0x178   : > { %v1285_v4 = vpop.f32.mrf.mxu0  ;;  %v1413_v5 = vpop.f32.mrf.mxu1 }
 0x179   : > { %v1522_v6 = vadd.f32 %v1285_v4, %v657_v2  ;;  %v1554_v7 = vadd.f32 %v1413_v5, %v689_v3  ;;  %v665_v2 = vld [vmem:[#allocation2 + $0x108] sm:$0xff]  ;;  %v697_v3 = vld [vmem:[#allocation2 + $0x1d8] sm:$0xff] }
 0x17a   : > { %v1287_v8 = vpop.f32.mrf.mxu0  ;;  %v1415_v9 = vpop.f32.mrf.mxu1 }
 0x17b   : > { %1586 = vst [vmem:[#allocation2 + $0x130] sm:$0xff] %v1522_v6  ;;  %1618 = vst [vmem:[#allocation2 + $0x20] sm:$0xff] %v1554_v7 }
 0x17c   : > { %v1288_v12 = vpop.f32.mrf.mxu0  ;;  %v1416_v13 = vpop.f32.mrf.mxu1 }
 0x17d   : > { %v1523_v14 = vadd.f32 %v1288_v12, %v658_v10  ;;  %v1555_v15 = vadd.f32 %v1416_v13, %v690_v11  ;;  %v666_v10 = vld [vmem:[#allocation2 + $0x60] sm:$0xff]  ;;  %v698_v11 = vld [vmem:[#allocation2 + $0xd0] sm:$0xff] }
 0x17e   : > { %v1290_v16 = vpop.f32.mrf.mxu0  ;;  %v1418_v17 = vpop.f32.mrf.mxu1 }
 0x17f   : > { %1587 = vst [vmem:[#allocation2 + $0x48] sm:$0xff] %v1523_v14  ;;  %1619 = vst [vmem:[#allocation2 + $0x128] sm:$0xff] %v1555_v15 }
 0x180   : > { %v1293_v20 = vpop.f32.mrf.mxu0  ;;  %v1421_v21 = vpop.f32.mrf.mxu1 }
 0x181   : > { %v1524_v22 = vadd.f32 %v1293_v20, %v659_v18  ;;  %v1556_v23 = vadd.f32 %v1421_v21, %v691_v19  ;;  %v667_v18 = vld [vmem:[#allocation2 + $0xe0] sm:$0xff]  ;;  %v699_v19 = vld [vmem:[#allocation2 + $0xb8] sm:$0xff] }
 0x182   : > { %v1295_v24 = vpop.f32.mrf.mxu0  ;;  %v1423_v25 = vpop.f32.mrf.mxu1 }
 0x183   : > { %1588 = vst [vmem:[#allocation2 + $0x180] sm:$0xff] %v1524_v22  ;;  %1620 = vst [vmem:[#allocation2 + $0x1a0] sm:$0xff] %v1556_v23 }
 0x184   : > { %v1296_v28 = vpop.f32.mrf.mxu0  ;;  %v1424_v29 = vpop.f32.mrf.mxu1 }
 0x185   : > { %v1525_v30 = vadd.f32 %v1296_v28, %v660_v26  ;;  %v1557_v31 = vadd.f32 %v1424_v29, %v692_v27  ;;  %v668_v26 = vld [vmem:[#allocation2 + $0x188] sm:$0xff] }
 0x186   : > { %v1298_v32 = vpop.f32.mrf.mxu0  ;;  %v1426_v33 = vpop.f32.mrf.mxu1  ;;  %v700_v27 = vld [vmem:[#allocation2 + $0x88] sm:$0xff] }
 0x187   : > { %1589 = vst [vmem:[#allocation2 + $0x110] sm:$0xff] %v1525_v30  ;;  %1621 = vst [vmem:[#allocation2 + $0x1f0] sm:$0xff] %v1557_v31 }
 0x188   : > { %v1301_v36 = vpop.f32.mrf.mxu0  ;;  %v1429_v37 = vpop.f32.mrf.mxu1 }
 0x189   : > { %v1526_v38 = vadd.f32 %v1301_v36, %v661_v34  ;;  %v1558_v39 = vadd.f32 %v1429_v37, %v693_v35  ;;  %v669_v34 = vld [vmem:[#allocation2 + $0x138] sm:$0xff]  ;;  %v701_v35 = vld [vmem:[#allocation2 + $0xa8] sm:$0xff] }
 0x18a   : > { %v1303_v40 = vpop.f32.mrf.mxu0  ;;  %v1431_v41 = vpop.f32.mrf.mxu1 }
 0x18b   : > { %1590 = vst [vmem:[#allocation2 + $0x118] sm:$0xff] %v1526_v38  ;;  %1622 = vst [vmem:[#allocation2 + $0xe8] sm:$0xff] %v1558_v39 }
 0x18c   : > { %v1304_v44 = vpop.f32.mrf.mxu0  ;;  %v1432_v45 = vpop.f32.mrf.mxu1 }
 0x18d   : > { %v1527_v46 = vadd.f32 %v1304_v44, %v662_v42  ;;  %v1559_v47 = vadd.f32 %v1432_v45, %v694_v43  ;;  %v670_v42 = vld [vmem:[#allocation2 + $0x140] sm:$0xff]  ;;  %v702_v43 = vld [vmem:[#allocation2 + $0x1c8] sm:$0xff] }
 0x18e   : > { %v1306_v48 = vpop.f32.mrf.mxu0  ;;  %v1434_v49 = vpop.f32.mrf.mxu1 }
 0x18f   : > { %1591 = vst [vmem:[#allocation2 + $0x98] sm:$0xff] %v1527_v46  ;;  %1623 = vst [vmem:[#allocation2 + $0x78] sm:$0xff] %v1559_v47 }
 0x190   : > { %v1309_v52 = vpop.f32.mrf.mxu0  ;;  %v1437_v53 = vpop.f32.mrf.mxu1 }
 0x191   : > { %v1528_v54 = vadd.f32 %v1309_v52, %v663_v50  ;;  %v1560_v55 = vadd.f32 %v1437_v53, %v695_v51  ;;  %v671_v50 = vld [vmem:[#allocation2 + $0x80] sm:$0xff]  ;;  %v703_v51 = vld [vmem:[#allocation2 + $0x170] sm:$0xff] }
 0x192   : > { %v1311_v56 = vpop.f32.mrf.mxu0  ;;  %v1439_v57 = vpop.f32.mrf.mxu1 }
 0x193   : > { %1592 = vst [vmem:[#allocation2 + $0x120] sm:$0xff] %v1528_v54  ;;  %1624 = vst [vmem:[#allocation2 + $0x70] sm:$0xff] %v1560_v55 }
 0x194   : > { %v1312_v60 = vpop.f32.mrf.mxu0  ;;  %v1440_v61 = vpop.f32.mrf.mxu1 }
 0x195   : > { %v1529_v62 = vadd.f32 %v1312_v60, %v664_v58  ;;  %v1561_v63 = vadd.f32 %v1440_v61, %v696_v59  ;;  %v672_v58 = vld [vmem:[#allocation2 + $0x1a8] sm:$0xff]  ;;  %v704_v59 = vld [vmem:[#allocation2 + $0x178] sm:$0xff] }
 0x196   : > { %v1314_v0 = vpop.f32.mrf.mxu0  ;;  %v1442_v1 = vpop.f32.mrf.mxu1 }
 0x197   : > { %1593 = vst [vmem:[#allocation2 + $0x150] sm:$0xff] %v1529_v62  ;;  %1625 = vst [vmem:[#allocation2 + $0x90] sm:$0xff] %v1561_v63 }
 0x198   : > { %v1317_v4 = vpop.f32.mrf.mxu0  ;;  %v1445_v5 = vpop.f32.mrf.mxu1 }
 0x199   : > { %v1530_v6 = vadd.f32 %v1317_v4, %v665_v2  ;;  %v1562_v7 = vadd.f32 %v1445_v5, %v697_v3  ;;  %v673_v2 = vld [vmem:[#allocation2 + $0x1b8] sm:$0xff]  ;;  %v705_v3 = vld [vmem:[#allocation2 + $0x68] sm:$0xff] }
 0x19a   : > { %v1319_v8 = vpop.f32.mrf.mxu0  ;;  %v1447_v9 = vpop.f32.mrf.mxu1 }
 0x19b   : > { %1594 = vst [vmem:[#allocation2 + $0x108] sm:$0xff] %v1530_v6  ;;  %1626 = vst [vmem:[#allocation2 + $0x1d8] sm:$0xff] %v1562_v7 }
 0x19c   : > { %v1320_v12 = vpop.f32.mrf.mxu0  ;;  %v1448_v13 = vpop.f32.mrf.mxu1 }
 0x19d   : > { %v1531_v14 = vadd.f32 %v1320_v12, %v666_v10  ;;  %v1563_v15 = vadd.f32 %v1448_v13, %v698_v11  ;;  %v674_v10 = vld [vmem:[#allocation2 + $0x28] sm:$0xff]  ;;  %v706_v11 = vld [vmem:[#allocation2 + $0x190] sm:$0xff] }
 0x19e   : > { %v1322_v16 = vpop.f32.mrf.mxu0  ;;  %v1450_v17 = vpop.f32.mrf.mxu1 }
 0x19f   : > { %1595 = vst [vmem:[#allocation2 + $0x60] sm:$0xff] %v1531_v14  ;;  %1627 = vst [vmem:[#allocation2 + $0xd0] sm:$0xff] %v1563_v15 }
 0x1a0   : > { %v1325_v20 = vpop.f32.mrf.mxu0  ;;  %v1453_v21 = vpop.f32.mrf.mxu1 }
 0x1a1   : > { %v1532_v22 = vadd.f32 %v1325_v20, %v667_v18  ;;  %v1564_v23 = vadd.f32 %v1453_v21, %v699_v19  ;;  %v675_v18 = vld [vmem:[#allocation2 + $0x1e8] sm:$0xff]  ;;  %v707_v19 = vld [vmem:[#allocation2 + $0x198] sm:$0xff] }
 0x1a2   : > { %v1327_v24 = vpop.f32.mrf.mxu0  ;;  %v1455_v25 = vpop.f32.mrf.mxu1 }
 0x1a3   : > { %1596 = vst [vmem:[#allocation2 + $0xe0] sm:$0xff] %v1532_v22  ;;  %1628 = vst [vmem:[#allocation2 + $0xb8] sm:$0xff] %v1564_v23 }
 0x1a4   : > { %v1328_v28 = vpop.f32.mrf.mxu0  ;;  %v1456_v29 = vpop.f32.mrf.mxu1 }
 0x1a5   : > { %v1533_v30 = vadd.f32 %v1328_v28, %v668_v26  ;;  %v1565_v31 = vadd.f32 %v1456_v29, %v700_v27  ;;  %v676_v26 = vld [vmem:[#allocation2 + $0xf8] sm:$0xff] }
 0x1a6   : > { %v1330_v32 = vpop.f32.mrf.mxu0  ;;  %v1458_v33 = vpop.f32.mrf.mxu1  ;;  %v708_v27 = vld [vmem:[#allocation2 + $0x38] sm:$0xff] }
 0x1a7   : > { %1597 = vst [vmem:[#allocation2 + $0x188] sm:$0xff] %v1533_v30  ;;  %1629 = vst [vmem:[#allocation2 + $0x88] sm:$0xff] %v1565_v31 }
 0x1a8   : > { %v1333_v36 = vpop.f32.mrf.mxu0  ;;  %v1461_v37 = vpop.f32.mrf.mxu1 }
 0x1a9   : > { %v1534_v38 = vadd.f32 %v1333_v36, %v669_v34  ;;  %v1566_v39 = vadd.f32 %v1461_v37, %v701_v35  ;;  %v677_v34 = vld [vmem:[#allocation2 + $0x160] sm:$0xff] }
 0x1aa   : > { %v1335_v40 = vpop.f32.mrf.mxu0  ;;  %v1463_v41 = vpop.f32.mrf.mxu1  ;;  %v709_v35 = vld [vmem:[#allocation2 + $0xc0] sm:$0xff] }
 0x1ab   : > { %1598 = vst [vmem:[#allocation2 + $0x138] sm:$0xff] %v1534_v38  ;;  %1630 = vst [vmem:[#allocation2 + $0xa8] sm:$0xff] %v1566_v39 }
 0x1ac   : > { %v1336_v44 = vpop.f32.mrf.mxu0  ;;  %v1464_v45 = vpop.f32.mrf.mxu1 }
 0x1ad   : > { %v1535_v46 = vadd.f32 %v1336_v44, %v670_v42  ;;  %v1567_v47 = vadd.f32 %v1464_v45, %v702_v43  ;;  %v678_v42 = vld [vmem:[#allocation2 + $0x30] sm:$0xff]  ;;  %v710_v43 = vld [vmem:[#allocation2 + $0x1c0] sm:$0xff] }
 0x1ae   : > { %v1338_v48 = vpop.f32.mrf.mxu0  ;;  %v1466_v49 = vpop.f32.mrf.mxu1 }
 0x1af   : > { %1599 = vst [vmem:[#allocation2 + $0x140] sm:$0xff] %v1535_v46  ;;  %1631 = vst [vmem:[#allocation2 + $0x1c8] sm:$0xff] %v1567_v47 }
 0x1b0   : > { %v1341_v52 = vpop.f32.mrf.mxu0  ;;  %v1469_v53 = vpop.f32.mrf.mxu1 }
 0x1b1   : > { %v1536_v54 = vadd.f32 %v1341_v52, %v671_v50  ;;  %v1568_v55 = vadd.f32 %v1469_v53, %v703_v51  ;;  %v679_v50 = vld [vmem:[#allocation2 + $0x1e0] sm:$0xff]  ;;  %v711_v51 = vld [vmem:[#allocation2 + $0x158] sm:$0xff] }
 0x1b2   : > { %v1343_v56 = vpop.f32.mrf.mxu0  ;;  %v1471_v57 = vpop.f32.mrf.mxu1 }
 0x1b3   : > { %1600 = vst [vmem:[#allocation2 + $0x80] sm:$0xff] %v1536_v54  ;;  %1632 = vst [vmem:[#allocation2 + $0x170] sm:$0xff] %v1568_v55 }
 0x1b4   : > { %v1344_v60 = vpop.f32.mrf.mxu0  ;;  %v1472_v61 = vpop.f32.mrf.mxu1 }
 0x1b5   : > { %v1537_v62 = vadd.f32 %v1344_v60, %v672_v58  ;;  %v1569_v63 = vadd.f32 %v1472_v61, %v704_v59  ;;  %v680_v58 = vld [vmem:[#allocation2] sm:$0xff]  ;;  %v712_v59 = vld [vmem:[#allocation2 + $0x10] sm:$0xff] }
 0x1b6   : > { %v1346_v0 = vpop.f32.mrf.mxu0  ;;  %v1474_v1 = vpop.f32.mrf.mxu1 }
 0x1b7   : > { %1601 = vst [vmem:[#allocation2 + $0x1a8] sm:$0xff] %v1537_v62  ;;  %1633 = vst [vmem:[#allocation2 + $0x178] sm:$0xff] %v1569_v63 }
 0x1b8   : > { %v1349_v4 = vpop.f32.mrf.mxu0  ;;  %v1477_v5 = vpop.f32.mrf.mxu1 }
 0x1b9   : > { %v1538_v6 = vadd.f32 %v1349_v4, %v673_v2  ;;  %v1570_v7 = vadd.f32 %v1477_v5, %v705_v3  ;;  %v681_v2 = vld [vmem:[#allocation2 + $0xf0] sm:$0xff]  ;;  %v713_v3 = vld [vmem:[#allocation2 + $0x58] sm:$0xff] }
 0x1ba   : > { %v1351_v8 = vpop.f32.mrf.mxu0  ;;  %v1479_v9 = vpop.f32.mrf.mxu1 }
 0x1bb   : > { %1602 = vst [vmem:[#allocation2 + $0x1b8] sm:$0xff] %v1538_v6  ;;  %1634 = vst [vmem:[#allocation2 + $0x68] sm:$0xff] %v1570_v7 }
 0x1bc   : > { %v1352_v12 = vpop.f32.mrf.mxu0  ;;  %v1480_v13 = vpop.f32.mrf.mxu1 }
 0x1bd   : > { %v1539_v14 = vadd.f32 %v1352_v12, %v674_v10  ;;  %v1571_v15 = vadd.f32 %v1480_v13, %v706_v11  ;;  %v682_v10 = vld [vmem:[#allocation2 + $0x8] sm:$0xff]  ;;  %v714_v11 = vld [vmem:[#allocation2 + $0xa0] sm:$0xff] }
 0x1be   : > { %v1354_v16 = vpop.f32.mrf.mxu0  ;;  %v1482_v17 = vpop.f32.mrf.mxu1 }
 0x1bf   : > { %1603 = vst [vmem:[#allocation2 + $0x28] sm:$0xff] %v1539_v14  ;;  %1635 = vst [vmem:[#allocation2 + $0x190] sm:$0xff] %v1571_v15 }
 0x1c0   : > { %v1357_v20 = vpop.f32.mrf.mxu0  ;;  %v1485_v21 = vpop.f32.mrf.mxu1 }
 0x1c1   : > { %v1540_v22 = vadd.f32 %v1357_v20, %v675_v18  ;;  %v1572_v23 = vadd.f32 %v1485_v21, %v707_v19 }
 0x1c2   : > { %v1359_v24 = vpop.f32.mrf.mxu0  ;;  %v1487_v25 = vpop.f32.mrf.mxu1 }
 0x1c3   : > { %1604 = vst [vmem:[#allocation2 + $0x1e8] sm:$0xff] %v1540_v22  ;;  %1636 = vst [vmem:[#allocation2 + $0x198] sm:$0xff] %v1572_v23 }
 0x1c4   : > { %v1360_v28 = vpop.f32.mrf.mxu0  ;;  %v1488_v29 = vpop.f32.mrf.mxu1 }
 0x1c5   : > { %v1541_v30 = vadd.f32 %v1360_v28, %v676_v26  ;;  %v1573_v31 = vadd.f32 %v1488_v29, %v708_v27 }
 0x1c6   : > { %v1362_v32 = vpop.f32.mrf.mxu0  ;;  %v1490_v33 = vpop.f32.mrf.mxu1 }
 0x1c7   : > { %1605 = vst [vmem:[#allocation2 + $0xf8] sm:$0xff] %v1541_v30  ;;  %1637 = vst [vmem:[#allocation2 + $0x38] sm:$0xff] %v1573_v31 }
 0x1c8   : > { %v1365_v36 = vpop.f32.mrf.mxu0  ;;  %v1493_v37 = vpop.f32.mrf.mxu1 }
 0x1c9   : > { %v1542_v38 = vadd.f32 %v1365_v36, %v677_v34  ;;  %v1574_v39 = vadd.f32 %v1493_v37, %v709_v35 }
 0x1ca   : > { %v1367_v40 = vpop.f32.mrf.mxu0  ;;  %v1495_v41 = vpop.f32.mrf.mxu1 }
 0x1cb   : > { %1606 = vst [vmem:[#allocation2 + $0x160] sm:$0xff] %v1542_v38  ;;  %1638 = vst [vmem:[#allocation2 + $0xc0] sm:$0xff] %v1574_v39 }
 0x1cc   : > { %v1368_v44 = vpop.f32.mrf.mxu0  ;;  %v1496_v45 = vpop.f32.mrf.mxu1 }
 0x1cd   : > { %v1543_v46 = vadd.f32 %v1368_v44, %v678_v42  ;;  %v1575_v47 = vadd.f32 %v1496_v45, %v710_v43 }
 0x1ce   : > { %v1370_v48 = vpop.f32.mrf.mxu0  ;;  %v1498_v49 = vpop.f32.mrf.mxu1 }
 0x1cf   : > { %1607 = vst [vmem:[#allocation2 + $0x30] sm:$0xff] %v1543_v46  ;;  %1639 = vst [vmem:[#allocation2 + $0x1c0] sm:$0xff] %v1575_v47 }
 0x1d0   : > { %v1373_v52 = vpop.f32.mrf.mxu0  ;;  %v1501_v53 = vpop.f32.mrf.mxu1 }
 0x1d1   : > { %v1544_v54 = vadd.f32 %v1373_v52, %v679_v50  ;;  %v1576_v55 = vadd.f32 %v1501_v53, %v711_v51 }
 0x1d2   : > { %v1375_v56 = vpop.f32.mrf.mxu0  ;;  %v1503_v57 = vpop.f32.mrf.mxu1 }
 0x1d3   : > { %1608 = vst [vmem:[#allocation2 + $0x1e0] sm:$0xff] %v1544_v54  ;;  %1640 = vst [vmem:[#allocation2 + $0x158] sm:$0xff] %v1576_v55 }
 0x1d4   : > { %v1376_v60 = vpop.f32.mrf.mxu0  ;;  %v1504_v61 = vpop.f32.mrf.mxu1 }
 0x1d5   : > { %v1545_v62 = vadd.f32 %v1376_v60, %v680_v58  ;;  %v1577_v63 = vadd.f32 %v1504_v61, %v712_v59 }
 0x1d6   : > { %v1378_v0 = vpop.f32.mrf.mxu0  ;;  %v1506_v1 = vpop.f32.mrf.mxu1 }
 0x1d7   : > { %1609 = vst [vmem:[#allocation2] sm:$0xff] %v1545_v62  ;;  %1641 = vst [vmem:[#allocation2 + $0x10] sm:$0xff] %v1577_v63 }
 0x1d8   : > { %v1381_v4 = vpop.f32.mrf.mxu0  ;;  %v1509_v5 = vpop.f32.mrf.mxu1 }
 0x1d9   : > { %v1546_v6 = vadd.f32 %v1381_v4, %v681_v2  ;;  %v1578_v7 = vadd.f32 %v1509_v5, %v713_v3 }
 0x1da   : > { %v1383_v8 = vpop.f32.mrf.mxu0  ;;  %v1511_v9 = vpop.f32.mrf.mxu1 }
 0x1db   : > { %1610 = vst [vmem:[#allocation2 + $0xf0] sm:$0xff] %v1546_v6  ;;  %1642 = vst [vmem:[#allocation2 + $0x58] sm:$0xff] %v1578_v7  ;;  %1647 = sbr.rel (%p2454_p11) target bundleno = 543 (0x21f), region = 82 }
 0x1dc   : > { %v1384_v12 = vpop.f32.mrf.mxu0  ;;  %v1512_v13 = vpop.f32.mrf.mxu1 }
 0x1dd   : > { %v1547_v14 = vadd.f32 %v1384_v12, %v682_v10  ;;  %v1579_v15 = vadd.f32 %v1512_v13, %v714_v11 }
 0x1de   : > { %v1386_v16 = vpop.f32.mrf.mxu0  ;;  %v1514_v17 = vpop.f32.mrf.mxu1 }
 0x1df   : > { %1611 = vst [vmem:[#allocation2 + $0x8] sm:$0xff] %v1547_v14  ;;  %1643 = vst [vmem:[#allocation2 + $0xa0] sm:$0xff] %v1579_v15 }
 0x1e0   : > { %v1648_v18 = vld [vmem:[#allocation2 + $0xb0] sm:$0xff]  ;;  %v3401_v20 = vld [vmem:[%s3649_s2] ss:$0 sm:$0xff]  ;;  %v1650_v24 = vld [vmem:[#allocation2 + $0xd8] sm:$0xff] }
 0x1e1   : > { %v1649_v19 = vld [vmem:[#allocation2 + $0x1b0] sm:$0xff]  ;;  %v1719_v21 = vmul.f32 %v3401_v20, %v1648_v18  ;;  %v3408_v23 = vld [vmem:[%s3650_s3] ss:$0 sm:$0xff]  ;;  %v1651_v25 = vld [vmem:[#allocation2 + $0x18] sm:$0xff]  ;;  %v1721_v26 = vmul.f32 %v3401_v20, %v1650_v24 }
 0x1e2   : > { %v1720_v22 = vmul.f32 %v3401_v20, %v1649_v19  ;;  %v1722_v27 = vmul.f32 %v3401_v20, %v1651_v25  ;;  %v1652_v28 = vld [vmem:[#allocation2 + $0x50] sm:$0xff]  ;;  %v1653_v29 = vld [vmem:[#allocation2 + $0x168] sm:$0xff]  ;;  %v1656_v40 = vld [vmem:[#allocation2 + $0x180] sm:$0xff] }
 0x1e3   : > { %v1654_v30 = vld [vmem:[#allocation2 + $0x130] sm:$0xff]  ;;  %v1790_v31 = vadd.f32 %v3408_v23, %v1719_v21  ;;  %v1723_v33 = vmul.f32 %v3401_v20, %v1652_v28  ;;  %v1724_v34 = vmul.f32 %v3401_v20, %v1653_v29  ;;  %v1655_v35 = vld [vmem:[#allocation2 + $0x48] sm:$0xff]  ;;  %v1792_v36 = vadd.f32 %v3408_v23, %v1721_v26  ;;  %v1658_v50 = vld [vmem:[#allocation2 + $0x118] sm:$0xff] }
 0x1e4   : > { %v1791_v32 = vadd.f32 %v3408_v23, %v1720_v22  ;;  %v1793_v37 = vadd.f32 %v3408_v23, %v1722_v27  ;;  %v1725_v38 = vmul.f32 %v3401_v20, %v1654_v30  ;;  %v1726_v39 = vmul.f32 %v3401_v20, %v1655_v35  ;;  %v1657_v45 = vld [vmem:[#allocation2 + $0x110] sm:$0xff]  ;;  %v1659_v51 = vld [vmem:[#allocation2 + $0x98] sm:$0xff]  ;;  %v1660_v56 = vld [vmem:[#allocation2 + $0x120] sm:$0xff] }
 0x1e5   : > { %v1854_v41 = vmax.f32 %v1790_v31, 0.0  ;;  %v1794_v43 = vadd.f32 %v3408_v23, %v1723_v33  ;;  %v1795_v44 = vadd.f32 %v3408_v23, %v1724_v34  ;;  %v1856_v46 = vmax.f32 %v1792_v36, 0.0  ;;  %v1661_v57 = vld [vmem:[#allocation2 + $0x150] sm:$0xff]  ;;  %v1662_v62 = vld [vmem:[#allocation2 + $0x108] sm:$0xff]  ;;  %v1663_v3 = vld [vmem:[#allocation2 + $0x60] sm:$0xff] }
 0x1e6   : > { %v1855_v42 = vmax.f32 %v1791_v32, 0.0  ;;  %v1857_v47 = vmax.f32 %v1793_v37, 0.0  ;;  %v1796_v48 = vadd.f32 %v3408_v23, %v1725_v38  ;;  %v1797_v49 = vadd.f32 %v3408_v23, %v1726_v39  ;;  %v1664_v8 = vld [vmem:[#allocation2 + $0xe0] sm:$0xff]  ;;  %v1665_v17 = vld [vmem:[#allocation2 + $0x188] sm:$0xff]  ;;  %v1666_v24 = vld [vmem:[#allocation2 + $0x138] sm:$0xff] }
 0x1e7   : > { %v1858_v53 = vmax.f32 %v1794_v43, 0.0  ;;  %v1859_v54 = vmax.f32 %v1795_v44, 0.0  ;;  %v1727_v55 = vmul.f32 %v3401_v20, %v1656_v40  ;;  %v1728_v61 = vmul.f32 %v3401_v20, %v1657_v45  ;;  %v1667_v25 = vld [vmem:[#allocation2 + $0x140] sm:$0xff]  ;;  %v1669_v31 = vld [vmem:[#allocation2 + $0x1a8] sm:$0xff]  ;;  %v1670_v36 = vld [vmem:[#allocation2 + $0x1b8] sm:$0xff] }
 0x1e8   : > { %v2593_v52 = vpack.c.bf16 %v1855_v42, %v1854_v41  ;;  %v2598_v58 = vpack.c.bf16 %v1857_v47, %v1856_v46  ;;  %v1860_v59 = vmax.f32 %v1796_v48, 0.0  ;;  %v1861_v60 = vmax.f32 %v1797_v49, 0.0  ;;  %v1668_v30 = vld [vmem:[#allocation2 + $0x80] sm:$0xff]  ;;  %v1671_v41 = vld [vmem:[#allocation2 + $0x28] sm:$0xff] }
 0x1e9   : > { %v2603_v63 = vpack.c.bf16 %v1859_v54, %v1858_v53  ;;  %v1798_v0 = vadd.f32 %v3408_v23, %v1727_v55  ;;  %v1729_v1 = vmul.f32 %v3401_v20, %v1658_v50  ;;  %v1730_v2 = vmul.f32 %v3401_v20, %v1659_v51  ;;  %v1672_v46 = vld [vmem:[#allocation2 + $0x1e8] sm:$0xff]  ;;  %v1673_v55 = vld [vmem:[#allocation2 + $0xf8] sm:$0xff] }
 0x1ea   : > { %2594 = vst [vmem:[%s3651_s4] sm:$0xff] %v2593_v52   ;;  %2750 = vst [vmem:[%s3651_s4 + $0x8] sm:$0xff] %v2598_v58   ;;  %v2608_v4 = vpack.c.bf16 %v1861_v60, %v1860_v59  ;;  %v1799_v5 = vadd.f32 %v3408_v23, %v1728_v61  ;;  %v1731_v6 = vmul.f32 %v3401_v20, %v1660_v56  ;;  %v1674_v60 = vld [vmem:[#allocation2 + $0x160] sm:$0xff]  ;;  %v1675_v61 = vld [vmem:[#allocation2 + $0x30] sm:$0xff] }
 0x1eb   : > { %v1732_v7 = vmul.f32 %v3401_v20, %v1661_v57  ;;  %2751 = vst [vmem:[%s3651_s4 + $0x10] sm:$0xff] %v2603_v63   ;;  %v1862_v9 = vmax.f32 %v1798_v0, 0.0  ;;  %v1800_v10 = vadd.f32 %v3408_v23, %v1729_v1  ;;  %v1801_v11 = vadd.f32 %v3408_v23, %v1730_v2  ;;  %v1676_v2 = vld [vmem:[#allocation2 + $0x1e0] sm:$0xff] }
 0x1ec   : > { %v1733_v12 = vmul.f32 %v3401_v20, %v1662_v62  ;;  %2752 = vst [vmem:[%s3651_s4 + $0x18] sm:$0xff] %v2608_v4   ;;  %v1863_v13 = vmax.f32 %v1799_v5, 0.0  ;;  %v1802_v14 = vadd.f32 %v3408_v23, %v1731_v6  ;;  %v1734_v16 = vmul.f32 %v3401_v20, %v1663_v3  ;;  %v1677_v3 = vld [vmem:[#allocation2] sm:$0xff] }
 0x1ed   : > { %v1803_v15 = vadd.f32 %v3408_v23, %v1732_v7  ;;  %v1864_v18 = vmax.f32 %v1800_v10, 0.0  ;;  %v1865_v19 = vmax.f32 %v1801_v11, 0.0  ;;  %v1735_v22 = vmul.f32 %v3401_v20, %v1664_v8  ;;  %v1678_v8 = vld [vmem:[#allocation2 + $0xf0] sm:$0xff] }
 0x1ee   : > { %v1804_v21 = vadd.f32 %v3408_v23, %v1733_v12  ;;  %v2613_v26 = vpack.c.bf16 %v1863_v13, %v1862_v9  ;;  %v1866_v27 = vmax.f32 %v1802_v14, 0.0  ;;  %v1805_v29 = vadd.f32 %v3408_v23, %v1734_v16  ;;  %v1679_v13 = vld [vmem:[#allocation2 + $0x8] sm:$0xff] }
 0x1ef   : > { %v1867_v28 = vmax.f32 %v1803_v15, 0.0  ;;  %v2618_v32 = vpack.c.bf16 %v1865_v19, %v1864_v18  ;;  %v1736_v34 = vmul.f32 %v3401_v20, %v1665_v17  ;;  %v1806_v35 = vadd.f32 %v3408_v23, %v1735_v22  ;;  %v1680_v18 = vld [vmem:[#allocation2 + $0x148] sm:$0xff] }
 0x1f0   : > { %v1868_v33 = vmax.f32 %v1804_v21, 0.0  ;;  %2753 = vst [vmem:[%s3651_s4 + $0x20] sm:$0xff] %v2613_v26   ;;  %v1869_v38 = vmax.f32 %v1805_v29, 0.0  ;;  %v1737_v39 = vmul.f32 %v3401_v20, %v1666_v24  ;;  %v1738_v40 = vmul.f32 %v3401_v20, %v1667_v25  ;;  %v1681_v29 = vld [vmem:[#allocation2 + $0x1d0] sm:$0xff] }
 0x1f1   : > { %v2623_v37 = vpack.c.bf16 %v1867_v28, %v1866_v27  ;;  %2754 = vst [vmem:[%s3651_s4 + $0x28] sm:$0xff] %v2618_v32   ;;  %v1807_v42 = vadd.f32 %v3408_v23, %v1736_v34  ;;  %v1870_v43 = vmax.f32 %v1806_v35, 0.0  ;;  %v1739_v44 = vmul.f32 %v3401_v20, %v1668_v30  ;;  %v1682_v34 = vld [vmem:[#allocation2 + $0x100] sm:$0xff]  ;;  %v1683_v35 = vld [vmem:[#allocation2 + $0xc8] sm:$0xff] }
 0x1f2   : > { %v1740_v45 = vmul.f32 %v3401_v20, %v1669_v31  ;;  %v2628_v47 = vpack.c.bf16 %v1869_v38, %v1868_v33  ;;  %v1808_v48 = vadd.f32 %v3408_v23, %v1737_v39  ;;  %v1809_v49 = vadd.f32 %v3408_v23, %v1738_v40  ;;  %v1684_v40 = vld [vmem:[#allocation2 + $0x40] sm:$0xff] }
 0x1f3   : > { %2755 = vst [vmem:[%s3651_s4 + $0x30] sm:$0xff] %v2623_v37   ;;  %v1741_v50 = vmul.f32 %v3401_v20, %v1670_v36  ;;  %v1871_v51 = vmax.f32 %v1807_v42, 0.0  ;;  %v1810_v52 = vadd.f32 %v3408_v23, %v1739_v44  ;;  %v1742_v54 = vmul.f32 %v3401_v20, %v1671_v41  ;;  %v1685_v41 = vld [vmem:[#allocation2 + $0x1f8] sm:$0xff] }
 0x1f4   : > { %v1811_v53 = vadd.f32 %v3408_v23, %v1740_v45  ;;  %2756 = vst [vmem:[%s3651_s4 + $0x38] sm:$0xff] %v2628_v47   ;;  %v1872_v56 = vmax.f32 %v1808_v48, 0.0  ;;  %v1873_v57 = vmax.f32 %v1809_v49, 0.0  ;;  %v1743_v59 = vmul.f32 %v3401_v20, %v1672_v46  ;;  %v1686_v46 = vld [vmem:[#allocation2 + $0x20] sm:$0xff] }
 0x1f5   : > { %v1812_v58 = vadd.f32 %v3408_v23, %v1741_v50  ;;  %v2633_v62 = vpack.c.bf16 %v1871_v51, %v1870_v43  ;;  %v1874_v63 = vmax.f32 %v1810_v52, 0.0  ;;  %v1813_v1 = vadd.f32 %v3408_v23, %v1742_v54  ;;  %v1687_v51 = vld [vmem:[#allocation2 + $0x128] sm:$0xff] }
 0x1f6   : > { %v1875_v0 = vmax.f32 %v1811_v53, 0.0  ;;  %v2638_v4 = vpack.c.bf16 %v1873_v57, %v1872_v56  ;;  %v1744_v6 = vmul.f32 %v3401_v20, %v1673_v55  ;;  %v1814_v7 = vadd.f32 %v3408_v23, %v1743_v59  ;;  %v1688_v56 = vld [vmem:[#allocation2 + $0x1a0] sm:$0xff] }
 0x1f7   : > { %v1876_v5 = vmax.f32 %v1812_v58, 0.0  ;;  %2757 = vst [vmem:[%s3651_s4 + $0x40] sm:$0xff] %v2633_v62   ;;  %v1877_v10 = vmax.f32 %v1813_v1, 0.0  ;;  %v1745_v11 = vmul.f32 %v3401_v20, %v1674_v60  ;;  %v1746_v12 = vmul.f32 %v3401_v20, %v1675_v61  ;;  %v1689_v1 = vld [vmem:[#allocation2 + $0x1f0] sm:$0xff] }
 0x1f8   : > { %v2643_v9 = vpack.c.bf16 %v1875_v0, %v1874_v63  ;;  %2758 = vst [vmem:[%s3651_s4 + $0x48] sm:$0xff] %v2638_v4   ;;  %v1815_v14 = vadd.f32 %v3408_v23, %v1744_v6  ;;  %v1878_v15 = vmax.f32 %v1814_v7, 0.0  ;;  %v1747_v16 = vmul.f32 %v3401_v20, %v1676_v2  ;;  %v1690_v6 = vld [vmem:[#allocation2 + $0xe8] sm:$0xff]  ;;  %v1691_v7 = vld [vmem:[#allocation2 + $0x78] sm:$0xff] }
 0x1f9   : > { %v1748_v17 = vmul.f32 %v3401_v20, %v1677_v3  ;;  %v2648_v19 = vpack.c.bf16 %v1877_v10, %v1876_v5  ;;  %v1816_v21 = vadd.f32 %v3408_v23, %v1745_v11  ;;  %v1817_v22 = vadd.f32 %v3408_v23, %v1746_v12  ;;  %v1692_v12 = vld [vmem:[#allocation2 + $0x70] sm:$0xff] }
 0x1fa   : > { %2759 = vst [vmem:[%s3651_s4 + $0x50] sm:$0xff] %v2643_v9   ;;  %v1749_v24 = vmul.f32 %v3401_v20, %v1678_v8  ;;  %v1879_v25 = vmax.f32 %v1815_v14, 0.0  ;;  %v1818_v26 = vadd.f32 %v3408_v23, %v1747_v16  ;;  %v1750_v28 = vmul.f32 %v3401_v20, %v1679_v13  ;;  %v1693_v13 = vld [vmem:[#allocation2 + $0x90] sm:$0xff] }
 0x1fb   : > { %v1819_v27 = vadd.f32 %v3408_v23, %v1748_v17  ;;  %2760 = vst [vmem:[%s3651_s4 + $0x58] sm:$0xff] %v2648_v19   ;;  %v1880_v30 = vmax.f32 %v1816_v21, 0.0  ;;  %v1881_v31 = vmax.f32 %v1817_v22, 0.0  ;;  %v1751_v33 = vmul.f32 %v3401_v20, %v1680_v18  ;;  %v1694_v18 = vld [vmem:[#allocation2 + $0x1d8] sm:$0xff] }
 0x1fc   : > { %v1820_v32 = vadd.f32 %v3408_v23, %v1749_v24  ;;  %v2653_v36 = vpack.c.bf16 %v1879_v25, %v1878_v15  ;;  %v1882_v37 = vmax.f32 %v1818_v26, 0.0  ;;  %v1821_v39 = vadd.f32 %v3408_v23, %v1750_v28  ;;  %v1695_v25 = vld [vmem:[#allocation2 + $0xd0] sm:$0xff] }
 0x1fd   : > { %v1883_v38 = vmax.f32 %v1819_v27, 0.0  ;;  %v2658_v42 = vpack.c.bf16 %v1881_v31, %v1880_v30  ;;  %v1752_v44 = vmul.f32 %v3401_v20, %v1681_v29  ;;  %v1822_v45 = vadd.f32 %v3408_v23, %v1751_v33  ;;  %v1696_v30 = vld [vmem:[#allocation2 + $0xb8] sm:$0xff] }
 0x1fe   : > { %v1884_v43 = vmax.f32 %v1820_v32, 0.0  ;;  %2761 = vst [vmem:[%s3651_s4 + $0x60] sm:$0xff] %v2653_v36   ;;  %v1885_v48 = vmax.f32 %v1821_v39, 0.0  ;;  %v1753_v49 = vmul.f32 %v3401_v20, %v1682_v34  ;;  %v1754_v50 = vmul.f32 %v3401_v20, %v1683_v35  ;;  %v1697_v39 = vld [vmem:[#allocation2 + $0x88] sm:$0xff] }
 0x1ff   : > { %v2663_v47 = vpack.c.bf16 %v1883_v38, %v1882_v37  ;;  %2762 = vst [vmem:[%s3651_s4 + $0x68] sm:$0xff] %v2658_v42   ;;  %v1823_v52 = vadd.f32 %v3408_v23, %v1752_v44  ;;  %v1886_v53 = vmax.f32 %v1822_v45, 0.0  ;;  %v1755_v54 = vmul.f32 %v3401_v20, %v1684_v40  ;;  %v1698_v44 = vld [vmem:[#allocation2 + $0xa8] sm:$0xff] }
 0x200   : > { %v1756_v55 = vmul.f32 %v3401_v20, %v1685_v41  ;;  %v2668_v57 = vpack.c.bf16 %v1885_v48, %v1884_v43  ;;  %v1824_v58 = vadd.f32 %v3408_v23, %v1753_v49  ;;  %v1825_v59 = vadd.f32 %v3408_v23, %v1754_v50  ;;  %v1699_v45 = vld [vmem:[#allocation2 + $0x1c8] sm:$0xff]  ;;  %v1700_v50 = vld [vmem:[#allocation2 + $0x170] sm:$0xff] }
 0x201   : > { %2763 = vst [vmem:[%s3651_s4 + $0x70] sm:$0xff] %v2663_v47   ;;  %v1757_v60 = vmul.f32 %v3401_v20, %v1686_v46  ;;  %v1887_v61 = vmax.f32 %v1823_v52, 0.0  ;;  %v1826_v62 = vadd.f32 %v3408_v23, %v1755_v54  ;;  %v1758_v0 = vmul.f32 %v3401_v20, %v1687_v51  ;;  %v1701_v51 = vld [vmem:[#allocation2 + $0x178] sm:$0xff] }
 0x202   : > { %v1827_v63 = vadd.f32 %v3408_v23, %v1756_v55  ;;  %2764 = vst [vmem:[%s3651_s4 + $0x78] sm:$0xff] %v2668_v57   ;;  %v1888_v2 = vmax.f32 %v1824_v58, 0.0  ;;  %v1889_v3 = vmax.f32 %v1825_v59, 0.0  ;;  %v1759_v5 = vmul.f32 %v3401_v20, %v1688_v56  ;;  %v1702_v56 = vld [vmem:[#allocation2 + $0x68] sm:$0xff] }
 0x203   : > { %v1828_v4 = vadd.f32 %v3408_v23, %v1757_v60  ;;  %v2673_v8 = vpack.c.bf16 %v1887_v61, %v1886_v53  ;;  %v1890_v9 = vmax.f32 %v1826_v62, 0.0  ;;  %v1829_v11 = vadd.f32 %v3408_v23, %v1758_v0  ;;  %v1703_v61 = vld [vmem:[#allocation2 + $0x190] sm:$0xff] }
 0x204   : > { %v1891_v10 = vmax.f32 %v1827_v63, 0.0  ;;  %v2678_v14 = vpack.c.bf16 %v1889_v3, %v1888_v2  ;;  %v1760_v16 = vmul.f32 %v3401_v20, %v1689_v1  ;;  %v1830_v17 = vadd.f32 %v3408_v23, %v1759_v5  ;;  %v1704_v2 = vld [vmem:[#allocation2 + $0x198] sm:$0xff] }
 0x205   : > { %v1892_v15 = vmax.f32 %v1828_v4, 0.0  ;;  %2765 = vst [vmem:[%s3651_s4 + $0x80] sm:$0xff] %v2673_v8   ;;  %v1893_v21 = vmax.f32 %v1829_v11, 0.0  ;;  %v1761_v22 = vmul.f32 %v3401_v20, %v1690_v6  ;;  %v1762_v24 = vmul.f32 %v3401_v20, %v1691_v7  ;;  %v1705_v11 = vld [vmem:[#allocation2 + $0x38] sm:$0xff] }
 0x206   : > { %v2683_v19 = vpack.c.bf16 %v1891_v10, %v1890_v9  ;;  %2766 = vst [vmem:[%s3651_s4 + $0x88] sm:$0xff] %v2678_v14   ;;  %v1831_v26 = vadd.f32 %v3408_v23, %v1760_v16  ;;  %v1894_v27 = vmax.f32 %v1830_v17, 0.0  ;;  %v1763_v28 = vmul.f32 %v3401_v20, %v1692_v12  ;;  %v1706_v16 = vld [vmem:[#allocation2 + $0xc0] sm:$0xff] }
 0x207   : > { %v1764_v29 = vmul.f32 %v3401_v20, %v1693_v13  ;;  %v2688_v31 = vpack.c.bf16 %v1893_v21, %v1892_v15  ;;  %v1832_v32 = vadd.f32 %v3408_v23, %v1761_v22  ;;  %v1833_v33 = vadd.f32 %v3408_v23, %v1762_v24  ;;  %v1707_v17 = vld [vmem:[#allocation2 + $0x1c0] sm:$0xff]  ;;  %v1708_v24 = vld [vmem:[#allocation2 + $0x158] sm:$0xff] }
 0x208   : > { %2767 = vst [vmem:[%s3651_s4 + $0x90] sm:$0xff] %v2683_v19   ;;  %v1765_v34 = vmul.f32 %v3401_v20, %v1694_v18  ;;  %v1895_v35 = vmax.f32 %v1831_v26, 0.0  ;;  %v1834_v36 = vadd.f32 %v3408_v23, %v1763_v28  ;;  %v1766_v38 = vmul.f32 %v3401_v20, %v1695_v25  ;;  %v1709_v25 = vld [vmem:[#allocation2 + $0x10] sm:$0xff] }
 0x209   : > { %v1835_v37 = vadd.f32 %v3408_v23, %v1764_v29  ;;  %2768 = vst [vmem:[%s3651_s4 + $0x98] sm:$0xff] %v2688_v31   ;;  %v1896_v40 = vmax.f32 %v1832_v32, 0.0  ;;  %v1897_v41 = vmax.f32 %v1833_v33, 0.0  ;;  %v1767_v43 = vmul.f32 %v3401_v20, %v1696_v30  ;;  %v1710_v30 = vld [vmem:[#allocation2 + $0x58] sm:$0xff] }
 0x20a   : > { %v1836_v42 = vadd.f32 %v3408_v23, %v1765_v34  ;;  %v2693_v46 = vpack.c.bf16 %v1895_v35, %v1894_v27  ;;  %v1898_v47 = vmax.f32 %v1834_v36, 0.0  ;;  %v1837_v49 = vadd.f32 %v3408_v23, %v1766_v38  ;;  %v1711_v35 = vld [vmem:[#allocation2 + $0xa0] sm:$0xff] }
 0x20b   : > { %v1899_v48 = vmax.f32 %v1835_v37, 0.0  ;;  %v2698_v52 = vpack.c.bf16 %v1897_v41, %v1896_v40  ;;  %v1768_v54 = vmul.f32 %v3401_v20, %v1697_v39  ;;  %v1838_v55 = vadd.f32 %v3408_v23, %v1767_v43 }
 0x20c   : > { %v1900_v53 = vmax.f32 %v1836_v42, 0.0  ;;  %2769 = vst [vmem:[%s3651_s4 + $0xa0] sm:$0xff] %v2693_v46   ;;  %v1901_v58 = vmax.f32 %v1837_v49, 0.0  ;;  %v1769_v59 = vmul.f32 %v3401_v20, %v1698_v44  ;;  %v1770_v60 = vmul.f32 %v3401_v20, %v1699_v45 }
 0x20d   : > { %v2703_v57 = vpack.c.bf16 %v1899_v48, %v1898_v47  ;;  %2770 = vst [vmem:[%s3651_s4 + $0xa8] sm:$0xff] %v2698_v52   ;;  %v1839_v62 = vadd.f32 %v3408_v23, %v1768_v54  ;;  %v1902_v63 = vmax.f32 %v1838_v55, 0.0  ;;  %v1771_v0 = vmul.f32 %v3401_v20, %v1700_v50 }
 0x20e   : > { %v1772_v1 = vmul.f32 %v3401_v20, %v1701_v51  ;;  %v2708_v3 = vpack.c.bf16 %v1901_v58, %v1900_v53  ;;  %v1840_v4 = vadd.f32 %v3408_v23, %v1769_v59  ;;  %v1841_v5 = vadd.f32 %v3408_v23, %v1770_v60 }
 0x20f   : > { %2771 = vst [vmem:[%s3651_s4 + $0xb0] sm:$0xff] %v2703_v57   ;;  %v1773_v6 = vmul.f32 %v3401_v20, %v1702_v56  ;;  %v1903_v7 = vmax.f32 %v1839_v62, 0.0  ;;  %v1842_v8 = vadd.f32 %v3408_v23, %v1771_v0  ;;  %v1774_v10 = vmul.f32 %v3401_v20, %v1703_v61 }
 0x210   : > { %v1843_v9 = vadd.f32 %v3408_v23, %v1772_v1  ;;  %2772 = vst [vmem:[%s3651_s4 + $0xb8] sm:$0xff] %v2708_v3   ;;  %v1904_v12 = vmax.f32 %v1840_v4, 0.0  ;;  %v1905_v13 = vmax.f32 %v1841_v5, 0.0  ;;  %v1775_v15 = vmul.f32 %v3401_v20, %v1704_v2 }
 0x211   : > { %v1844_v14 = vadd.f32 %v3408_v23, %v1773_v6  ;;  %v2713_v18 = vpack.c.bf16 %v1903_v7, %v1902_v63  ;;  %v1906_v19 = vmax.f32 %v1842_v8, 0.0  ;;  %v1845_v22 = vadd.f32 %v3408_v23, %v1774_v10 }
 0x212   : > { %v1907_v21 = vmax.f32 %v1843_v9, 0.0  ;;  %v2718_v26 = vpack.c.bf16 %v1905_v13, %v1904_v12  ;;  %v1776_v28 = vmul.f32 %v3401_v20, %v1705_v11  ;;  %v1846_v29 = vadd.f32 %v3408_v23, %v1775_v15 }
 0x213   : > { %v1908_v27 = vmax.f32 %v1844_v14, 0.0  ;;  %2773 = vst [vmem:[%s3651_s4 + $0xc0] sm:$0xff] %v2713_v18   ;;  %v1909_v32 = vmax.f32 %v1845_v22, 0.0  ;;  %v1777_v33 = vmul.f32 %v3401_v20, %v1706_v16  ;;  %v1778_v34 = vmul.f32 %v3401_v20, %v1707_v17 }
 0x214   : > { %v2723_v31 = vpack.c.bf16 %v1907_v21, %v1906_v19  ;;  %2774 = vst [vmem:[%s3651_s4 + $0xc8] sm:$0xff] %v2718_v26   ;;  %v1847_v36 = vadd.f32 %v3408_v23, %v1776_v28  ;;  %v1910_v37 = vmax.f32 %v1846_v29, 0.0  ;;  %v1779_v38 = vmul.f32 %v3401_v20, %v1708_v24 }
 0x215   : > { %v1780_v39 = vmul.f32 %v3401_v20, %v1709_v25  ;;  %v2728_v40 = vpack.c.bf16 %v1909_v32, %v1908_v27  ;;  %v1848_v41 = vadd.f32 %v3408_v23, %v1777_v33  ;;  %v1849_v42 = vadd.f32 %v3408_v23, %v1778_v34 }
 0x216   : > { %2775 = vst [vmem:[%s3651_s4 + $0xd0] sm:$0xff] %v2723_v31   ;;  %v1781_v43 = vmul.f32 %v3401_v20, %v1710_v30  ;;  %v1911_v44 = vmax.f32 %v1847_v36, 0.0  ;;  %v1850_v45 = vadd.f32 %v3408_v23, %v1779_v38  ;;  %v1782_v47 = vmul.f32 %v3401_v20, %v1711_v35 }
 0x217   : > { %v1851_v46 = vadd.f32 %v3408_v23, %v1780_v39  ;;  %2776 = vst [vmem:[%s3651_s4 + $0xd8] sm:$0xff] %v2728_v40   ;;  %v1912_v48 = vmax.f32 %v1848_v41, 0.0  ;;  %v1913_v49 = vmax.f32 %v1849_v42, 0.0 }
 0x218   : > { %v1852_v50 = vadd.f32 %v3408_v23, %v1781_v43  ;;  %v2733_v51 = vpack.c.bf16 %v1911_v44, %v1910_v37  ;;  %v1914_v52 = vmax.f32 %v1850_v45, 0.0  ;;  %v1853_v54 = vadd.f32 %v3408_v23, %v1782_v47 }
 0x219   : > { %v1915_v53 = vmax.f32 %v1851_v46, 0.0  ;;  %v2738_v55 = vpack.c.bf16 %v1913_v49, %v1912_v48 }
 0x21a   : > { %v1916_v56 = vmax.f32 %v1852_v50, 0.0  ;;  %2777 = vst [vmem:[%s3651_s4 + $0xe0] sm:$0xff] %v2733_v51   ;;  %v1917_v57 = vmax.f32 %v1853_v54, 0.0 }
 0x21b   : > { %v2743_v20 = vpack.c.bf16 %v1915_v53, %v1914_v52  ;;  %2778 = vst [vmem:[%s3651_s4 + $0xe8] sm:$0xff] %v2738_v55  }
 0x21c   : > { %v2748_v58 = vpack.c.bf16 %v1917_v57, %v1916_v56 }
 0x21d   : > { %2779 = vst [vmem:[%s3651_s4 + $0xf0] sm:$0xff] %v2743_v20  }
 0x21e   : > { %2780 = vst [vmem:[%s3651_s4 + $0xf8] sm:$0xff] %v2748_v58  }
 0x21f PF: > { %s14_s19 = sadd.s32 1, %s3005_s19   ;;  %s3652_s15 = smov %s2993_s16 }
 0x220   : > { %p11_p12 = scmp.ge.s32.totalorder %s14_s19, 9   ;;  %s3653_s16 = smov %s3069_s23 }
 0x221   : > { %s3654_s17 = smov %s3001_s18  ;;  %s3655_s18 = smov %s3657_s20 }
 0x222   :  { %13 = sbr.rel (!%p11_p12) target bundleno = 3 (0x3), region = 126 }

// kernel: cnn_model_forward.21
= control target key start
LH: loop header
LB: loop body
LE: loop exit
PB: predicated region body
PF: predicated region fallthrough
CT: control target
= control target key end

     0   :  { %s230_s0 = inlined_call_operand.vmem [shape: bf16[16,4096], index: 0, kind: input, shape index: {}]   ;;  %s231_s1 = inlined_call_operand.vmem [shape: bf16[16,2048], index: 1, kind: output, shape index: {}]  }
   0x1   :  { %v8_v0 = vld [vmem:[%s230_s0] sm:$0xff]  ;;  %v9_v2 = vld [vmem:[%s230_s0 + $0x8] sm:$0xff]  ;;  %v10_v5 = vld [vmem:[%s230_s0 + $0x10] sm:$0xff] }
   0x2   :  { %v24_v1 = vld [vmem:[%s230_s0 + $0x40] sm:$0xff]  ;;  %v25_v4 = vld [vmem:[%s230_s0 + $0x48] sm:$0xff]  ;;  %v26_v6 = vld [vmem:[%s230_s0 + $0x50] sm:$0xff] }
   0x3   :  { %v40_v3 = vmax.bf16 %v24_v1, %v8_v0  ;;  %v41_v7 = vmax.bf16 %v25_v4, %v9_v2  ;;  %v42_v8 = vmax.bf16 %v26_v6, %v10_v5  ;;  %v11_v9 = vld [vmem:[%s230_s0 + $0x18] sm:$0xff]  ;;  %v12_v11 = vld [vmem:[%s230_s0 + $0x20] sm:$0xff]  ;;  %v13_v14 = vld [vmem:[%s230_s0 + $0x28] sm:$0xff] }
   0x4   :  { %v27_v10 = vld [vmem:[%s230_s0 + $0x58] sm:$0xff]  ;;  %v28_v13 = vld [vmem:[%s230_s0 + $0x60] sm:$0xff]  ;;  %v29_v15 = vld [vmem:[%s230_s0 + $0x68] sm:$0xff] }
   0x5   :  { %56 = vst [vmem:[%s231_s1] sm:$0xff] %v40_v3  ;;  %v43_v12 = vmax.bf16 %v27_v10, %v11_v9  ;;  %57 = vst [vmem:[%s231_s1 + $0x8] sm:$0xff] %v41_v7  ;;  %v44_v16 = vmax.bf16 %v28_v13, %v12_v11  ;;  %v45_v17 = vmax.bf16 %v29_v15, %v13_v14  ;;  %v14_v18 = vld [vmem:[%s230_s0 + $0x30] sm:$0xff]  ;;  %v15_v20 = vld [vmem:[%s230_s0 + $0x38] sm:$0xff] }
   0x6   :  { %58 = vst [vmem:[%s231_s1 + $0x10] sm:$0xff] %v42_v8  ;;  %v30_v19 = vld [vmem:[%s230_s0 + $0x70] sm:$0xff]  ;;  %v31_v22 = vld [vmem:[%s230_s0 + $0x78] sm:$0xff]  ;;  %v16_v23 = vld [vmem:[%s230_s0 + $0x80] sm:$0xff] }
   0x7   :  { %59 = vst [vmem:[%s231_s1 + $0x18] sm:$0xff] %v43_v12  ;;  %v46_v21 = vmax.bf16 %v30_v19, %v14_v18  ;;  %v32_v24 = vld [vmem:[%s230_s0 + $0xc0] sm:$0xff]  ;;  %60 = vst [vmem:[%s231_s1 + $0x20] sm:$0xff] %v44_v16  ;;  %v47_v25 = vmax.bf16 %v31_v22, %v15_v20  ;;  %v17_v27 = vld [vmem:[%s230_s0 + $0x88] sm:$0xff] }
   0x8   :  { %61 = vst [vmem:[%s231_s1 + $0x28] sm:$0xff] %v45_v17  ;;  %v48_v26 = vmax.bf16 %v32_v24, %v16_v23  ;;  %v33_v28 = vld [vmem:[%s230_s0 + $0xc8] sm:$0xff]  ;;  %v18_v29 = vld [vmem:[%s230_s0 + $0x90] sm:$0xff]  ;;  %v19_v32 = vld [vmem:[%s230_s0 + $0x98] sm:$0xff] }
   0x9   :  { %62 = vst [vmem:[%s231_s1 + $0x30] sm:$0xff] %v46_v21  ;;  %v49_v30 = vmax.bf16 %v33_v28, %v17_v27  ;;  %v34_v31 = vld [vmem:[%s230_s0 + $0xd0] sm:$0xff]  ;;  %v35_v33 = vld [vmem:[%s230_s0 + $0xd8] sm:$0xff]  ;;  %63 = vst [vmem:[%s231_s1 + $0x38] sm:$0xff] %v47_v25 }
   0xa   :  { %64 = vst [vmem:[%s231_s1 + $0x40] sm:$0xff] %v48_v26  ;;  %v50_v34 = vmax.bf16 %v34_v31, %v18_v29  ;;  %v51_v35 = vmax.bf16 %v35_v33, %v19_v32  ;;  %v20_v36 = vld [vmem:[%s230_s0 + $0xa0] sm:$0xff]  ;;  %v21_v38 = vld [vmem:[%s230_s0 + $0xa8] sm:$0xff]  ;;  %v22_v41 = vld [vmem:[%s230_s0 + $0xb0] sm:$0xff] }
   0xb   :  { %v36_v37 = vld [vmem:[%s230_s0 + $0xe0] sm:$0xff]  ;;  %65 = vst [vmem:[%s231_s1 + $0x48] sm:$0xff] %v49_v30  ;;  %v37_v40 = vld [vmem:[%s230_s0 + $0xe8] sm:$0xff]  ;;  %v38_v42 = vld [vmem:[%s230_s0 + $0xf0] sm:$0xff] }
   0xc   :  { %v52_v39 = vmax.bf16 %v36_v37, %v20_v36  ;;  %66 = vst [vmem:[%s231_s1 + $0x50] sm:$0xff] %v50_v34  ;;  %67 = vst [vmem:[%s231_s1 + $0x58] sm:$0xff] %v51_v35  ;;  %v53_v43 = vmax.bf16 %v37_v40, %v21_v38  ;;  %v54_v44 = vmax.bf16 %v38_v42, %v22_v41  ;;  %v23_v45 = vld [vmem:[%s230_s0 + $0xb8] sm:$0xff] }
   0xd   :  { %v39_v46 = vld [vmem:[%s230_s0 + $0xf8] sm:$0xff] }
   0xe   :  { %68 = vst [vmem:[%s231_s1 + $0x60] sm:$0xff] %v52_v39  ;;  %v55_v47 = vmax.bf16 %v39_v46, %v23_v45  ;;  %69 = vst [vmem:[%s231_s1 + $0x68] sm:$0xff] %v53_v43 }
   0xf   :  { %70 = vst [vmem:[%s231_s1 + $0x70] sm:$0xff] %v54_v44 }
  0x10   :  { %71 = vst [vmem:[%s231_s1 + $0x78] sm:$0xff] %v55_v47 }

// kernel: cnn_model_forward.22
= control target key start
LH: loop header
LB: loop body
LE: loop exit
PB: predicated region body
PF: predicated region fallthrough
CT: control target
= control target key end

     0   :  { %s261_s0 = inlined_call_operand.vmem [shape: bf16[128,256], index: 0, kind: input, shape index: {}]   ;;  %s262_s1 = inlined_call_operand.vmem [shape: bf16[128,128], index: 1, kind: output, shape index: {}]  }
   0x1   :  { %v8_v0 = vld [vmem:[%s261_s0] sm:$0xf]  ;;  %v9_v1 = vld [vmem:[%s261_s0 + $0x8] sm:$0xf]  ;;  %v24_v2 = vld [vmem:[%s261_s0 + $0x4] sm:$0xf] }
   0x2   :  { %v25_v3 = vld [vmem:[%s261_s0 + $0xc] sm:$0xf]  ;;  %v40_v4 = vmax.bf16 %v24_v2, %v8_v0  ;;  %v10_v5 = vld [vmem:[%s261_s0 + $0x10] sm:$0xf]  ;;  %v11_v6 = vld [vmem:[%s261_s0 + $0x18] sm:$0xf] }
   0x3   :  { %v41_v7 = vmax.bf16 %v25_v3, %v9_v1  ;;  %v26_v8 = vld [vmem:[%s261_s0 + $0x14] sm:$0xf]  ;;  %v27_v9 = vld [vmem:[%s261_s0 + $0x1c] sm:$0xf]  ;;  %v12_v10 = vld [vmem:[%s261_s0 + $0x20] sm:$0xf] }
   0x4   :  { %v42_v11 = vmax.bf16 %v26_v8, %v10_v5  ;;  %v43_v12 = vmax.bf16 %v27_v9, %v11_v6  ;;  %v13_v13 = vld [vmem:[%s261_s0 + $0x28] sm:$0xf]  ;;  %v28_v14 = vld [vmem:[%s261_s0 + $0x24] sm:$0xf]  ;;  %v29_v15 = vld [vmem:[%s261_s0 + $0x2c] sm:$0xf] }
   0x5   :  { %v116_v16 = vcombine.low %v40_v4, %v41_v7  ;;  %v44_v17 = vmax.bf16 %v28_v14, %v12_v10  ;;  %v45_v18 = vmax.bf16 %v29_v15, %v13_v13  ;;  %v14_v19 = vld [vmem:[%s261_s0 + $0x30] sm:$0xf]  ;;  %v15_v20 = vld [vmem:[%s261_s0 + $0x38] sm:$0xf]  ;;  %v30_v21 = vld [vmem:[%s261_s0 + $0x34] sm:$0xf] }
   0x6   :  { %v117_v22 = vcombine.low %v42_v11, %v43_v12  ;;  %v31_v23 = vld [vmem:[%s261_s0 + $0x3c] sm:$0xf]  ;;  %v46_v24 = vmax.bf16 %v30_v21, %v14_v19  ;;  %v16_v25 = vld [vmem:[%s261_s0 + $0x40] sm:$0xf]  ;;  %v17_v26 = vld [vmem:[%s261_s0 + $0x48] sm:$0xf] }
   0x7   :  { %80 = vst [vmem:[%s262_s1] sm:$0xff] %v116_v16   ;;  %v119_v27 = vcombine.low %v44_v17, %v45_v18  ;;  %v47_v28 = vmax.bf16 %v31_v23, %v15_v20  ;;  %v32_v29 = vld [vmem:[%s261_s0 + $0x44] sm:$0xf]  ;;  %v33_v30 = vld [vmem:[%s261_s0 + $0x4c] sm:$0xf]  ;;  %v18_v31 = vld [vmem:[%s261_s0 + $0x50] sm:$0xf] }
   0x8   :  { %118 = vst [vmem:[%s262_s1 + $0x8] sm:$0xff] %v117_v22   ;;  %v48_v32 = vmax.bf16 %v32_v29, %v16_v25  ;;  %v49_v33 = vmax.bf16 %v33_v30, %v17_v26  ;;  %v19_v34 = vld [vmem:[%s261_s0 + $0x58] sm:$0xf]  ;;  %v34_v35 = vld [vmem:[%s261_s0 + $0x54] sm:$0xf] }
   0x9   :  { %v35_v36 = vld [vmem:[%s261_s0 + $0x5c] sm:$0xf]  ;;  %120 = vst [vmem:[%s262_s1 + $0x10] sm:$0xff] %v119_v27   ;;  %v121_v37 = vcombine.low %v46_v24, %v47_v28  ;;  %v50_v38 = vmax.bf16 %v34_v35, %v18_v31  ;;  %v20_v40 = vld [vmem:[%s261_s0 + $0x60] sm:$0xf] }
   0xa   :  { %v51_v39 = vmax.bf16 %v35_v36, %v19_v34  ;;  %v21_v41 = vld [vmem:[%s261_s0 + $0x68] sm:$0xf]  ;;  %v36_v42 = vld [vmem:[%s261_s0 + $0x64] sm:$0xf]  ;;  %v123_v43 = vcombine.low %v48_v32, %v49_v33  ;;  %v37_v44 = vld [vmem:[%s261_s0 + $0x6c] sm:$0xf] }
   0xb   :  { %v52_v45 = vmax.bf16 %v36_v42, %v20_v40  ;;  %v22_v46 = vld [vmem:[%s261_s0 + $0x70] sm:$0xf]  ;;  %v23_v47 = vld [vmem:[%s261_s0 + $0x78] sm:$0xf]  ;;  %122 = vst [vmem:[%s262_s1 + $0x18] sm:$0xff] %v121_v37   ;;  %v53_v49 = vmax.bf16 %v37_v44, %v21_v41 }
   0xc   :  { %v125_v48 = vcombine.low %v50_v38, %v51_v39  ;;  %v38_v50 = vld [vmem:[%s261_s0 + $0x74] sm:$0xf]  ;;  %v39_v51 = vld [vmem:[%s261_s0 + $0x7c] sm:$0xf]  ;;  %124 = vst [vmem:[%s262_s1 + $0x20] sm:$0xff] %v123_v43  }
   0xd   :  { %v54_v52 = vmax.bf16 %v38_v50, %v22_v46  ;;  %v55_v53 = vmax.bf16 %v39_v51, %v23_v47  ;;  %v127_v54 = vcombine.low %v52_v45, %v53_v49 }
   0xe   :  { %126 = vst [vmem:[%s262_s1 + $0x28] sm:$0xff] %v125_v48  }
   0xf   :  { %v129_v55 = vcombine.low %v54_v52, %v55_v53  ;;  %128 = vst [vmem:[%s262_s1 + $0x30] sm:$0xff] %v127_v54  }
  0x11   :  { %130 = vst [vmem:[%s262_s1 + $0x38] sm:$0xff] %v129_v55  }

// kernel: cnn_model_forward.23
= control target key start
LH: loop header
LB: loop body
LE: loop exit
PB: predicated region body
PF: predicated region fallthrough
CT: control target
= control target key end

     0   :  { %s1661_s15 = smov 0   ;;  %s1663_s16 = smov 0   ;;  %s1924_s0 = inlined_call_operand.vmem [shape: bf16[128,1280], index: 0, kind: input, shape index: {}]   ;;  %s1925_s1 = inlined_call_operand.vmem [shape: bf16[1280,256], index: 1, kind: input, shape index: {}]   ;;  %s1926_s2 = inlined_call_operand.vmem [shape: f32[1,256], index: 2, kind: input, shape index: {}]   ;;  %s1927_s3 = inlined_call_operand.vmem [shape: f32[1,256], index: 3, kind: input, shape index: {}]   ;;  %s1928_s4 = inlined_call_operand.vmem [shape: bf16[128,256], index: 4, kind: output, shape index: {}]  }
   0x1   :  { %s1665_s17 = smov 0   ;;  %s1667_s18 = smov 0  }
   0x2   :  { %s1669_s19 = smov 0  }
   0x3 LB: > { %s26_s20 = sadd.s32 1, %s1629_s18  ;;  %p49_p1 = scmp.ne.s32.totalorder %s1621_s16, %s1617_s15  ;;  %s1633_s19 = sphi %s1669_s19, %s14_s19   ;;  %s1629_s18 = sphi %s1667_s18, %s1932_s18   ;;  %s1625_s17 = sphi %s1665_s17, %s1931_s17   ;;  %s1621_s16 = sphi %s1663_s16, %s1930_s16   ;;  %s1617_s15 = sphi %s1661_s15, %s1929_s15  }
   0x4   : > { %p27_p0 = scmp.ge.s32.totalorder %s26_s20, 5  ;;  %p50_p2 = scmp.eq.s32.totalorder %s1633_s19, 0 }
   0x5   : > { %s42_s22 = sadd.s32 1, %s1621_s16  ;;  %p1353_p5 = scmp.ge.s32.totalorder %s1633_s19, 5 }
   0x6   : > { %s1934_s20 = smov (%p27_p0, %s26_s20), 0  ;;  %p51_p3 = por %p50_p2, %p49_p1 }
   0x7   : > { %s38_s21 = ssub.s32 %s1629_s18, %s1934_s20  ;;  %199 = sbr.rel (%p1353_p5) target bundleno = 24 (0x18), region = 24 }
   0x8   : > { %p40_p4 = scmp.eq.s32.totalorder %s38_s21, 0 }
   0xa   : > { %s1696_s23 = scalar_select %p40_p4, %s1621_s16, %s42_s22  }
   0xc   : > { %202 = sbr.rel (!%p51_p3) target bundleno = 24 (0x18), region = 28  ;;  %s204_s24 = sand.u32 (%p51_p3), 1, %s1621_s16  }
   0xd   : > { %s1432_s25 = sshll.u32 (%p51_p3), %s1629_s18, 3  ;;  %s1354_s26 = sshll.u32 (%p51_p3), %s204_s24, 7 }
   0xe   : > { %s1704_s29 = scalar_lea.vmem (%p51_p3), %s1924_s0, %s1432_s25  ;;  %s206_s30 = scalar_lea.vmem (%p51_p3), [#allocation3], %s1354_s26 }
   0xf   : > { %v271_v0 = vld [vmem:[%s1704_s29] sm:$0xff] (%p51_p3)  ;;  %v273_v1 = vld [vmem:[%s1704_s29 + $0x28] sm:$0xff] (%p51_p3)  ;;  %v275_v2 = vld [vmem:[%s1704_s29 + $0x50] sm:$0xff] (%p51_p3) }
  0x10   : > { %272 = vst [vmem:[%s206_s30] sm:$0xff] (%p51_p3), %v271_v0  ;;  %274 = vst [vmem:[%s206_s30 + $0x8] sm:$0xff] (%p51_p3), %v273_v1  ;;  %v277_v3 = vld [vmem:[%s1704_s29 + $0x78] sm:$0xff] (%p51_p3)  ;;  %v279_v4 = vld [vmem:[%s1704_s29 + $0xa0] sm:$0xff] (%p51_p3) }
  0x11   : > { %276 = vst [vmem:[%s206_s30 + $0x10] sm:$0xff] %v275_v2  ;;  %v281_v5 = vld [vmem:[%s1704_s29 + $0xc8] sm:$0xff]  ;;  %278 = vst [vmem:[%s206_s30 + $0x18] sm:$0xff] %v277_v3  ;;  %v283_v6 = vld [vmem:[%s1704_s29 + $0xf0] sm:$0xff] }
  0x12   : > { %280 = vst [vmem:[%s206_s30 + $0x20] sm:$0xff] %v279_v4  ;;  %282 = vst [vmem:[%s206_s30 + $0x28] sm:$0xff] %v281_v5  ;;  %v285_v7 = vld [vmem:[%s1704_s29 + $0x118] sm:$0xff]  ;;  %v287_v8 = vld [vmem:[%s1704_s29 + $0x140] sm:$0xff] }
  0x13   : > { %284 = vst [vmem:[%s206_s30 + $0x30] sm:$0xff] %v283_v6  ;;  %286 = vst [vmem:[%s206_s30 + $0x38] sm:$0xff] %v285_v7  ;;  %v289_v9 = vld [vmem:[%s1704_s29 + $0x168] sm:$0xff]  ;;  %v291_v10 = vld [vmem:[%s1704_s29 + $0x190] sm:$0xff] }
  0x14   : > { %288 = vst [vmem:[%s206_s30 + $0x40] sm:$0xff] %v287_v8  ;;  %v293_v11 = vld [vmem:[%s1704_s29 + $0x1b8] sm:$0xff]  ;;  %290 = vst [vmem:[%s206_s30 + $0x48] sm:$0xff] %v289_v9  ;;  %v295_v12 = vld [vmem:[%s1704_s29 + $0x1e0] sm:$0xff] }
  0x15   : > { %292 = vst [vmem:[%s206_s30 + $0x50] sm:$0xff] %v291_v10  ;;  %294 = vst [vmem:[%s206_s30 + $0x58] sm:$0xff] %v293_v11  ;;  %v297_v13 = vld [vmem:[%s1704_s29 + $0x208] sm:$0xff]  ;;  %v299_v14 = vld [vmem:[%s1704_s29 + $0x230] sm:$0xff] }
  0x16   : > { %296 = vst [vmem:[%s206_s30 + $0x60] sm:$0xff] %v295_v12  ;;  %298 = vst [vmem:[%s206_s30 + $0x68] sm:$0xff] %v297_v13  ;;  %v301_v15 = vld [vmem:[%s1704_s29 + $0x258] sm:$0xff] }
  0x17   : > { %300 = vst [vmem:[%s206_s30 + $0x70] sm:$0xff] %v299_v14  ;;  %302 = vst [vmem:[%s206_s30 + $0x78] sm:$0xff] %v301_v15 }
  0x18 PF: > { %p1357_p6 = scmp.ge.s32.totalorder %s1633_s19, 1  ;;  %p322_p7 = scmp.lt.s32.totalorder %s1633_s19, 6 }
  0x1a   : > { %p323_p8 = pnand %p1357_p6, %p322_p7 }
  0x1b   : > { %s329_s5 = sand.u32 (!%p323_p8), 1, %s1617_s15   ;;  %s1359_s6 = sshll.u32 (!%p323_p8), %s1625_s17, 5 }
  0x1c   : > { %326 = sbr.rel (%p323_p8) target bundleno = 387 (0x183), region = 70  ;;  %s1358_s7 = sshll.u32 (!%p323_p8), %s329_s5, 7 }
  0x1d   : > { %p381_p9 = scmp.lt.s32.totalorder (!%p323_p8), %s1359_s6, 159  ;;  %s1731_s12 = scalar_lea.vmem (!%p323_p8), [#allocation3], %s1358_s7 }
  0x1e   : > { %p1362_p10 = scmp.ne.s32.totalorder (!%p323_p8), %s1625_s17, 0 }
  0x21   : > { %s1936_s6 = smov (!%p381_p9, %s1359_s6), 159  ;;  %416 = sbr.rel (%p1362_p10) target bundleno = 55 (0x37), region = 78 }
  0x22   : > { %s1433_s8 = sshll.u32 %s1936_s6, 3 }
  0x23   : > { %s1729_s11 = scalar_lea.vmem %s1925_s1, %s1433_s8 }
  0x26   : > { %v1635_v16 = vmov 0.0  }
  0x27   : > { %417 = vst [vmem:[#allocation2 + $0xb0] sm:$0xff] %v1635_v16  ;;  %418 = vst [vmem:[#allocation2] sm:$0xff] %v1635_v16 }
  0x28   : > { %419 = vst [vmem:[#allocation2 + $0xd8] sm:$0xff] %v1635_v16  ;;  %420 = vst [vmem:[#allocation2 + $0x18] sm:$0xff] %v1635_v16 }
  0x29   : > { %421 = vst [vmem:[#allocation2 + $0x50] sm:$0xff] %v1635_v16  ;;  %422 = vst [vmem:[#allocation2 + $0x68] sm:$0xff] %v1635_v16 }
  0x2a   : > { %423 = vst [vmem:[#allocation2 + $0x30] sm:$0xff] %v1635_v16  ;;  %424 = vst [vmem:[#allocation2 + $0x48] sm:$0xff] %v1635_v16 }
  0x2b   : > { %425 = vst [vmem:[#allocation2 + $0x80] sm:$0xff] %v1635_v16  ;;  %426 = vst [vmem:[#allocation2 + $0x88] sm:$0xff] %v1635_v16 }
  0x2c   : > { %427 = vst [vmem:[#allocation2 + $0xe8] sm:$0xff] %v1635_v16  ;;  %428 = vst [vmem:[#allocation2 + $0xb8] sm:$0xff] %v1635_v16 }
  0x2d   : > { %429 = vst [vmem:[#allocation2 + $0x60] sm:$0xff] %v1635_v16  ;;  %430 = vst [vmem:[#allocation2 + $0xf0] sm:$0xff] %v1635_v16 }
  0x2e   : > { %431 = vst [vmem:[#allocation2 + $0x8] sm:$0xff] %v1635_v16  ;;  %432 = vst [vmem:[#allocation2 + $0x78] sm:$0xff] %v1635_v16 }
  0x2f   : > { %433 = vst [vmem:[#allocation2 + $0x38] sm:$0xff] %v1635_v16  ;;  %434 = vst [vmem:[#allocation2 + $0x58] sm:$0xff] %v1635_v16 }
  0x30   : > { %435 = vst [vmem:[#allocation2 + $0x40] sm:$0xff] %v1635_v16  ;;  %436 = vst [vmem:[#allocation2 + $0xc8] sm:$0xff] %v1635_v16 }
  0x31   : > { %437 = vst [vmem:[#allocation2 + $0xe0] sm:$0xff] %v1635_v16  ;;  %438 = vst [vmem:[#allocation2 + $0x90] sm:$0xff] %v1635_v16 }
  0x32   : > { %439 = vst [vmem:[#allocation2 + $0x70] sm:$0xff] %v1635_v16  ;;  %440 = vst [vmem:[#allocation2 + $0xc0] sm:$0xff] %v1635_v16 }
  0x33   : > { %441 = vst [vmem:[#allocation2 + $0xa8] sm:$0xff] %v1635_v16  ;;  %442 = vst [vmem:[#allocation2 + $0xd0] sm:$0xff] %v1635_v16 }
  0x34   : > { %443 = vst [vmem:[#allocation2 + $0x10] sm:$0xff] %v1635_v16  ;;  %444 = vst [vmem:[#allocation2 + $0x28] sm:$0xff] %v1635_v16 }
  0x35   : > { %445 = vst [vmem:[#allocation2 + $0xa0] sm:$0xff] %v1635_v16  ;;  %446 = vst [vmem:[#allocation2 + $0xf8] sm:$0xff] %v1635_v16 }
  0x36   : > { %447 = vst [vmem:[#allocation2 + $0x20] sm:$0xff] %v1635_v16  ;;  %448 = vst [vmem:[#allocation2 + $0x98] sm:$0xff] %v1635_v16 }
  0x37 PF: > { %v1523_v17 = vld [vmem:[%s1729_s11 + $0x74] ss:$8 sps:$4 sm:$0xff]   ;;  %v1525_v18 = vld [vmem:[%s1729_s11 + $0x70] ss:$8 sps:$4 sm:$0xff]   ;;  %v1526_v19 = vld [vmem:[%s1729_s11 + $0x64] ss:$8 sps:$4 sm:$0xff]  }
  0x38   : > { %769 = vmatprep.subr.bf16.mxu0 %v1523_v17  ;;  %1450 = vmatprep.subr.bf16.mxu1 %v1523_v17  ;;  %v1528_v20 = vld [vmem:[%s1729_s11 + $0x60] ss:$8 sps:$4 sm:$0xff]   ;;  %v1529_v21 = vld [vmem:[%s1729_s11 + $0x54] ss:$8 sps:$4 sm:$0xff]   ;;  %v1531_v22 = vld [vmem:[%s1729_s11 + $0x50] ss:$8 sps:$4 sm:$0xff]  }
  0x39   : > { %770 = vmatpush1.bf16.msra.mxu0 %v1525_v18  ;;  %1466 = vmatpush1.bf16.msra.mxu1 %v1525_v18  ;;  %v1532_v23 = vld [vmem:[%s1729_s11 + $0x44] ss:$8 sps:$4 sm:$0xff]   ;;  %v1534_v24 = vld [vmem:[%s1729_s11 + $0x40] ss:$8 sps:$4 sm:$0xff]   ;;  %v1535_v25 = vld [vmem:[%s1729_s11 + $0x34] ss:$8 sps:$4 sm:$0xff]  }
  0x3a   : > { %771 = vmatprep.subr.bf16.mxu0 %v1526_v19  ;;  %1451 = vmatprep.subr.bf16.mxu1 %v1526_v19  ;;  %v1537_v26 = vld [vmem:[%s1729_s11 + $0x30] ss:$8 sps:$4 sm:$0xff]   ;;  %v1538_v27 = vld [vmem:[%s1729_s11 + $0x24] ss:$8 sps:$4 sm:$0xff]   ;;  %v1540_v28 = vld [vmem:[%s1729_s11 + $0x20] ss:$8 sps:$4 sm:$0xff]  }
  0x3b   : > { %v1541_v29 = vld [vmem:[%s1729_s11 + $0x14] ss:$8 sps:$4 sm:$0xff]   ;;  %v1573_v30 = vld [vmem:[%s1731_s12 + $0x4] ss:$8 sps:$4 sm:$0xff]   ;;  %v1543_v31 = vld [vmem:[%s1729_s11 + $0x10] ss:$8 sps:$4 sm:$0xff]  }
  0x3c   : > { %v1576_v32 = vld [vmem:[%s1731_s12 + $0x44] ss:$8 sps:$4 sm:$0xff]   ;;  %801 = vmatprep.mubr.bf16.mxu0 %v1573_v30  ;;  %v1546_v34 = vld [vmem:[%s1729_s11] ss:$8 sps:$4 sm:$0xff]   ;;  %v1547_v35 = vld [vmem:[%s1729_s11 + $0xf4] ss:$8 sps:$4 sm:$0xff]  }
  0x3d   : > { %772 = vmatpush1.bf16.msra.mxu0 %v1528_v20  ;;  %1467 = vmatpush1.bf16.msra.mxu1 %v1528_v20  ;;  %v1544_v33 = vld [vmem:[%s1729_s11 + $0x4] ss:$8 sps:$4 sm:$0xff]   ;;  %v1549_v36 = vld [vmem:[%s1729_s11 + $0xf0] ss:$8 sps:$4 sm:$0xff]   ;;  %v1552_v38 = vld [vmem:[%s1729_s11 + $0xe0] ss:$8 sps:$4 sm:$0xff]  }
  0x3e   : > { %773 = vmatprep.subr.bf16.mxu0 %v1529_v21  ;;  %1452 = vmatprep.subr.bf16.mxu1 %v1529_v21  ;;  %v1550_v37 = vld [vmem:[%s1729_s11 + $0xe4] ss:$8 sps:$4 sm:$0xff]   ;;  %v1553_v39 = vld [vmem:[%s1729_s11 + $0xd4] ss:$8 sps:$4 sm:$0xff]   ;;  %v1555_v40 = vld [vmem:[%s1729_s11 + $0xd0] ss:$8 sps:$4 sm:$0xff]  }
  0x3f   : > { %841 = vmatprep.mubr.bf16.mxu1 %v1576_v32  ;;  %v1556_v41 = vld [vmem:[%s1729_s11 + $0xc4] ss:$8 sps:$4 sm:$0xff]   ;;  %v1558_v42 = vld [vmem:[%s1729_s11 + $0xc0] ss:$8 sps:$4 sm:$0xff]   ;;  %v1559_v43 = vld [vmem:[%s1729_s11 + $0xb4] ss:$8 sps:$4 sm:$0xff]  }
  0x40   : > { %v1561_v44 = vld [vmem:[%s1729_s11 + $0xb0] ss:$8 sps:$4 sm:$0xff]   ;;  %v1562_v45 = vld [vmem:[%s1729_s11 + $0xa4] ss:$8 sps:$4 sm:$0xff]   ;;  %v1564_v46 = vld [vmem:[%s1729_s11 + $0xa0] ss:$8 sps:$4 sm:$0xff]  }
  0x41   : > { %774 = vmatpush1.bf16.msra.mxu0 %v1531_v22  ;;  %1468 = vmatpush1.bf16.msra.mxu1 %v1531_v22  ;;  %v1565_v47 = vld [vmem:[%s1729_s11 + $0x94] ss:$8 sps:$4 sm:$0xff]   ;;  %v1567_v48 = vld [vmem:[%s1729_s11 + $0x90] ss:$8 sps:$4 sm:$0xff]   ;;  %v1568_v49 = vld [vmem:[%s1729_s11 + $0x84] ss:$8 sps:$4 sm:$0xff]  }
  0x42   : > { %775 = vmatprep.subr.bf16.mxu0 %v1532_v23  ;;  %1453 = vmatprep.subr.bf16.mxu1 %v1532_v23  ;;  %v1570_v50 = vld [vmem:[%s1729_s11 + $0x80] ss:$8 sps:$4 sm:$0xff]   ;;  %v1577_v53 = vld [vmem:[%s1731_s12 + $0x14] ss:$8 sps:$4 sm:$0xff]   ;;  %v1581_v55 = vld [vmem:[%s1731_s12 + $0x10] ss:$8 sps:$4 sm:$0xff]  }
  0x43   : > { %v1571_v51 = vld [vmem:[%s1731_s12] ss:$8 sps:$4 sm:$0xff]   ;;  %v1579_v54 = vld [vmem:[%s1731_s12 + $0x54] ss:$8 sps:$4 sm:$0xff]   ;;  %v1582_v56 = vld [vmem:[%s1731_s12 + $0x50] ss:$8 sps:$4 sm:$0xff]  }
  0x44   : > { %v1574_v52 = vld [vmem:[%s1731_s12 + $0x40] ss:$8 sps:$4 sm:$0xff]   ;;  %v1583_v57 = vld [vmem:[%s1731_s12 + $0x24] ss:$8 sps:$4 sm:$0xff]   ;;  %v1589_v61 = vld [vmem:[%s1731_s12 + $0x34] ss:$8 sps:$4 sm:$0xff]  }
  0x45   : > { %776 = vmatpush1.bf16.msra.mxu0 %v1534_v24  ;;  %1469 = vmatpush1.bf16.msra.mxu1 %v1534_v24  ;;  %v1585_v58 = vld [vmem:[%s1731_s12 + $0x64] ss:$8 sps:$4 sm:$0xff]   ;;  %v1587_v59 = vld [vmem:[%s1731_s12 + $0x20] ss:$8 sps:$4 sm:$0xff]   ;;  %v1591_v62 = vld [vmem:[%s1731_s12 + $0x74] ss:$8 sps:$4 sm:$0xff]  }
  0x46   : > { %777 = vmatprep.subr.bf16.mxu0 %v1535_v25  ;;  %1454 = vmatprep.subr.bf16.mxu1 %v1535_v25  ;;  %v1588_v60 = vld [vmem:[%s1731_s12 + $0x60] ss:$8 sps:$4 sm:$0xff]   ;;  %v1593_v63 = vld [vmem:[%s1731_s12 + $0x30] ss:$8 sps:$4 sm:$0xff]   ;;  %p1411_p11 = scmp.ne.s32.totalorder %s1625_s17, 4 }
  0x47   : > { %v1594_v0 = vld [vmem:[%s1731_s12 + $0x70] ss:$8 sps:$4 sm:$0xff]   ;;  %v450_v5 = vld [vmem:[#allocation2] sm:$0xff]  ;;  %v468_v18 = vld [vmem:[#allocation2 + $0xc8] sm:$0xff] }
  0x48   : > { %v449_v1 = vld [vmem:[#allocation2 + $0xb0] sm:$0xff]  ;;  %v465_v2 = vld [vmem:[#allocation2 + $0x38] sm:$0xff]  ;;  %v467_v12 = vld [vmem:[#allocation2 + $0x40] sm:$0xff] }
  0x49   : > { %778 = vmatpush1.bf16.msra.mxu0 %v1537_v26  ;;  %1470 = vmatpush1.bf16.msra.mxu1 %v1537_v26  ;;  %v466_v6 = vld [vmem:[#allocation2 + $0x58] sm:$0xff]  ;;  %v453_v23 = vld [vmem:[#allocation2 + $0x50] sm:$0xff]  ;;  %v469_v24 = vld [vmem:[#allocation2 + $0xe0] sm:$0xff] }
  0x4a   : > { %779 = vmatprep.subr.bf16.mxu0 %v1538_v27  ;;  %1455 = vmatprep.subr.bf16.mxu1 %v1538_v27  ;;  %v451_v11 = vld [vmem:[#allocation2 + $0xd8] sm:$0xff]  ;;  %v470_v30 = vld [vmem:[#allocation2 + $0x90] sm:$0xff] }
  0x4b   : > { %v452_v17 = vld [vmem:[#allocation2 + $0x18] sm:$0xff] }
  0x4d   : > { %780 = vmatpush1.bf16.msra.mxu0 %v1540_v28  ;;  %1471 = vmatpush1.bf16.msra.mxu1 %v1540_v28 }
  0x4e   : > { %781 = vmatprep.subr.bf16.mxu0 %v1541_v29  ;;  %1456 = vmatprep.subr.bf16.mxu1 %v1541_v29  ;;  %v454_v29 = vld [vmem:[#allocation2 + $0x68] sm:$0xff] }
  0x51   : > { %782 = vmatpush1.bf16.msra.mxu0 %v1543_v31  ;;  %1472 = vmatpush1.bf16.msra.mxu1 %v1543_v31 }
  0x52   : > { %783 = vmatprep.subr.bf16.mxu0 %v1544_v33  ;;  %1457 = vmatprep.subr.bf16.mxu1 %v1544_v33 }
  0x55   : > { %784 = vmatpush1.bf16.msra.mxu0 %v1546_v34  ;;  %1473 = vmatpush1.bf16.msra.mxu1 %v1546_v34 }
  0x56   : > { %785 = vmatprep.subr.bf16.mxu0 %v1547_v35  ;;  %1458 = vmatprep.subr.bf16.mxu1 %v1547_v35  ;;  %v455_v35 = vld [vmem:[#allocation2 + $0x30] sm:$0xff] }
  0x59   : > { %786 = vmatpush2.bf16.msra.mxu0 %v1549_v36  ;;  %1474 = vmatpush2.bf16.msra.mxu1 %v1549_v36  ;;  %v471_v36 = vld [vmem:[#allocation2 + $0x70] sm:$0xff] }
  0x5a   : > { %787 = vmatprep.subr.bf16.mxu0 %v1550_v37  ;;  %1459 = vmatprep.subr.bf16.mxu1 %v1550_v37 }
  0x5d   : > { %788 = vmatpush2.bf16.msra.mxu0 %v1552_v38  ;;  %1475 = vmatpush2.bf16.msra.mxu1 %v1552_v38 }
  0x5e   : > { %789 = vmatprep.subr.bf16.mxu0 %v1553_v39  ;;  %1460 = vmatprep.subr.bf16.mxu1 %v1553_v39 }
  0x61   : > { %790 = vmatpush2.bf16.msra.mxu0 %v1555_v40  ;;  %1476 = vmatpush2.bf16.msra.mxu1 %v1555_v40 }
  0x62   : > { %791 = vmatprep.subr.bf16.mxu0 %v1556_v41  ;;  %1461 = vmatprep.subr.bf16.mxu1 %v1556_v41  ;;  %v456_v41 = vld [vmem:[#allocation2 + $0x48] sm:$0xff] }
  0x65   : > { %792 = vmatpush2.bf16.msra.mxu0 %v1558_v42  ;;  %1477 = vmatpush2.bf16.msra.mxu1 %v1558_v42  ;;  %v472_v42 = vld [vmem:[#allocation2 + $0xc0] sm:$0xff] }
  0x66   : > { %793 = vmatprep.subr.bf16.mxu0 %v1559_v43  ;;  %1462 = vmatprep.subr.bf16.mxu1 %v1559_v43 }
  0x69   : > { %794 = vmatpush2.bf16.msra.mxu0 %v1561_v44  ;;  %1478 = vmatpush2.bf16.msra.mxu1 %v1561_v44 }
  0x6a   : > { %795 = vmatprep.subr.bf16.mxu0 %v1562_v45  ;;  %1463 = vmatprep.subr.bf16.mxu1 %v1562_v45 }
  0x6d   : > { %796 = vmatpush2.bf16.msra.mxu0 %v1564_v46  ;;  %1479 = vmatpush2.bf16.msra.mxu1 %v1564_v46 }
  0x6e   : > { %797 = vmatprep.subr.bf16.mxu0 %v1565_v47  ;;  %1464 = vmatprep.subr.bf16.mxu1 %v1565_v47  ;;  %v457_v47 = vld [vmem:[#allocation2 + $0x80] sm:$0xff] }
  0x71   : > { %798 = vmatpush2.bf16.msra.mxu0 %v1567_v48  ;;  %1480 = vmatpush2.bf16.msra.mxu1 %v1567_v48  ;;  %v473_v48 = vld [vmem:[#allocation2 + $0xa8] sm:$0xff] }
  0x72   : > { %799 = vmatprep.subr.bf16.mxu0 %v1568_v49  ;;  %1465 = vmatprep.subr.bf16.mxu1 %v1568_v49 }
  0x75   : > { %800 = vmatpush2.bf16.msra.mxu0 %v1570_v50  ;;  %1481 = vmatpush2.bf16.msra.mxu1 %v1570_v50 }
  0x78   : > { %802 = vmatmul.mubr.bf16.vlgmr.msra.gmra.mxu0 %v1571_v51  ;;  %842 = vmatmul.mubr.bf16.vlgmr.msra.gmra.mxu1 %v1574_v52 }
  0x79   : > { %811 = vmatprep.mubr.bf16.mxu0 %v1577_v53  ;;  %851 = vmatprep.mubr.bf16.mxu1 %v1579_v54  ;;  %v458_v53 = vld [vmem:[#allocation2 + $0x88] sm:$0xff]  ;;  %v474_v54 = vld [vmem:[#allocation2 + $0xd0] sm:$0xff] }
  0x80   : > { %812 = vmatmul.mubr.bf16.gmra.mxu0 %v1581_v55  ;;  %852 = vmatmul.mubr.bf16.gmra.mxu1 %v1582_v56 }
  0x81   : > { %821 = vmatprep.mubr.bf16.mxu0 %v1583_v57  ;;  %861 = vmatprep.mubr.bf16.mxu1 %v1585_v58 }
  0x88   : > { %822 = vmatmul.mubr.bf16.gmra.mxu0 %v1587_v59  ;;  %862 = vmatmul.mubr.bf16.gmra.mxu1 %v1588_v60  ;;  %v459_v59 = vld [vmem:[#allocation2 + $0xe8] sm:$0xff]  ;;  %v475_v60 = vld [vmem:[#allocation2 + $0x10] sm:$0xff] }
  0x89   : > { %831 = vmatprep.mubr.bf16.mxu0 %v1589_v61  ;;  %871 = vmatprep.mubr.bf16.mxu1 %v1591_v62 }
  0x90   : > { %832 = vmatmul.mubr.bf16.gmra.mxu0 %v1593_v63  ;;  %872 = vmatmul.mubr.bf16.gmra.mxu1 %v1594_v0 }
 0x138   : > { %v803_v3 = vpop.f32.mrf.mxu0  ;;  %v843_v4 = vpop.f32.mrf.mxu1 }
 0x139   : > { %v882_v7 = vadd.f32 %v803_v3, %v449_v1  ;;  %v898_v8 = vadd.f32 %v843_v4, %v465_v2  ;;  %v460_v1 = vld [vmem:[#allocation2 + $0xb8] sm:$0xff]  ;;  %v476_v2 = vld [vmem:[#allocation2 + $0x28] sm:$0xff] }
 0x13a   : > { %v805_v9 = vpop.f32.mrf.mxu0  ;;  %v845_v10 = vpop.f32.mrf.mxu1 }
 0x13b   : > { %914 = vst [vmem:[#allocation2 + $0xb0] sm:$0xff] %v882_v7  ;;  %930 = vst [vmem:[#allocation2 + $0x38] sm:$0xff] %v898_v8  ;;  %v883_v13 = vadd.f32 %v805_v9, %v450_v5  ;;  %v899_v14 = vadd.f32 %v845_v10, %v466_v6  ;;  %v461_v7 = vld [vmem:[#allocation2 + $0x60] sm:$0xff] }
 0x13c   : > { %v807_v15 = vpop.f32.mrf.mxu0  ;;  %v847_v16 = vpop.f32.mrf.mxu1  ;;  %v477_v8 = vld [vmem:[#allocation2 + $0xa0] sm:$0xff] }
 0x13d   : > { %915 = vst [vmem:[#allocation2] sm:$0xff] %v883_v13  ;;  %931 = vst [vmem:[#allocation2 + $0x58] sm:$0xff] %v899_v14  ;;  %v884_v19 = vadd.f32 %v807_v15, %v451_v11  ;;  %v900_v20 = vadd.f32 %v847_v16, %v467_v12  ;;  %v462_v13 = vld [vmem:[#allocation2 + $0xf0] sm:$0xff]  ;;  %v478_v14 = vld [vmem:[#allocation2 + $0xf8] sm:$0xff] }
 0x13e   : > { %v809_v21 = vpop.f32.mrf.mxu0  ;;  %v849_v22 = vpop.f32.mrf.mxu1 }
 0x13f   : > { %916 = vst [vmem:[#allocation2 + $0xd8] sm:$0xff] %v884_v19  ;;  %932 = vst [vmem:[#allocation2 + $0x40] sm:$0xff] %v900_v20  ;;  %v885_v25 = vadd.f32 %v809_v21, %v452_v17  ;;  %v901_v26 = vadd.f32 %v849_v22, %v468_v18  ;;  %v463_v19 = vld [vmem:[#allocation2 + $0x8] sm:$0xff]  ;;  %v479_v20 = vld [vmem:[#allocation2 + $0x20] sm:$0xff] }
 0x140   : > { %v813_v27 = vpop.f32.mrf.mxu0  ;;  %v853_v28 = vpop.f32.mrf.mxu1 }
 0x141   : > { %917 = vst [vmem:[#allocation2 + $0x18] sm:$0xff] %v885_v25  ;;  %933 = vst [vmem:[#allocation2 + $0xc8] sm:$0xff] %v901_v26  ;;  %v886_v31 = vadd.f32 %v813_v27, %v453_v23  ;;  %v902_v32 = vadd.f32 %v853_v28, %v469_v24  ;;  %v464_v25 = vld [vmem:[#allocation2 + $0x78] sm:$0xff] }
 0x142   : > { %v815_v33 = vpop.f32.mrf.mxu0  ;;  %v855_v34 = vpop.f32.mrf.mxu1  ;;  %v480_v26 = vld [vmem:[#allocation2 + $0x98] sm:$0xff] }
 0x143   : > { %918 = vst [vmem:[#allocation2 + $0x50] sm:$0xff] %v886_v31  ;;  %934 = vst [vmem:[#allocation2 + $0xe0] sm:$0xff] %v902_v32  ;;  %v887_v37 = vadd.f32 %v815_v33, %v454_v29  ;;  %v903_v38 = vadd.f32 %v855_v34, %v470_v30 }
 0x144   : > { %v817_v39 = vpop.f32.mrf.mxu0  ;;  %v857_v40 = vpop.f32.mrf.mxu1 }
 0x145   : > { %919 = vst [vmem:[#allocation2 + $0x68] sm:$0xff] %v887_v37  ;;  %935 = vst [vmem:[#allocation2 + $0x90] sm:$0xff] %v903_v38  ;;  %v888_v43 = vadd.f32 %v817_v39, %v455_v35  ;;  %v904_v44 = vadd.f32 %v857_v40, %v471_v36 }
 0x146   : > { %v819_v45 = vpop.f32.mrf.mxu0  ;;  %v859_v46 = vpop.f32.mrf.mxu1 }
 0x147   : > { %920 = vst [vmem:[#allocation2 + $0x30] sm:$0xff] %v888_v43  ;;  %936 = vst [vmem:[#allocation2 + $0x70] sm:$0xff] %v904_v44  ;;  %v889_v49 = vadd.f32 %v819_v45, %v456_v41  ;;  %v905_v50 = vadd.f32 %v859_v46, %v472_v42 }
 0x148   : > { %v823_v51 = vpop.f32.mrf.mxu0  ;;  %v863_v52 = vpop.f32.mrf.mxu1 }
 0x149   : > { %921 = vst [vmem:[#allocation2 + $0x48] sm:$0xff] %v889_v49  ;;  %937 = vst [vmem:[#allocation2 + $0xc0] sm:$0xff] %v905_v50  ;;  %v890_v55 = vadd.f32 %v823_v51, %v457_v47  ;;  %v906_v56 = vadd.f32 %v863_v52, %v473_v48 }
 0x14a   : > { %v825_v57 = vpop.f32.mrf.mxu0  ;;  %v865_v58 = vpop.f32.mrf.mxu1 }
 0x14b   : > { %922 = vst [vmem:[#allocation2 + $0x80] sm:$0xff] %v890_v55  ;;  %938 = vst [vmem:[#allocation2 + $0xa8] sm:$0xff] %v906_v56  ;;  %v891_v61 = vadd.f32 %v825_v57, %v458_v53  ;;  %v907_v62 = vadd.f32 %v865_v58, %v474_v54 }
 0x14c   : > { %v827_v63 = vpop.f32.mrf.mxu0  ;;  %v867_v0 = vpop.f32.mrf.mxu1 }
 0x14d   : > { %923 = vst [vmem:[#allocation2 + $0x88] sm:$0xff] %v891_v61  ;;  %939 = vst [vmem:[#allocation2 + $0xd0] sm:$0xff] %v907_v62  ;;  %v892_v3 = vadd.f32 %v827_v63, %v459_v59  ;;  %v908_v4 = vadd.f32 %v867_v0, %v475_v60 }
 0x14e   : > { %v829_v5 = vpop.f32.mrf.mxu0  ;;  %v869_v6 = vpop.f32.mrf.mxu1 }
 0x14f   : > { %924 = vst [vmem:[#allocation2 + $0xe8] sm:$0xff] %v892_v3  ;;  %940 = vst [vmem:[#allocation2 + $0x10] sm:$0xff] %v908_v4  ;;  %v893_v9 = vadd.f32 %v829_v5, %v460_v1  ;;  %v909_v10 = vadd.f32 %v869_v6, %v476_v2 }
 0x150   : > { %v833_v11 = vpop.f32.mrf.mxu0  ;;  %v873_v12 = vpop.f32.mrf.mxu1 }
 0x151   : > { %925 = vst [vmem:[#allocation2 + $0xb8] sm:$0xff] %v893_v9  ;;  %941 = vst [vmem:[#allocation2 + $0x28] sm:$0xff] %v909_v10  ;;  %v894_v15 = vadd.f32 %v833_v11, %v461_v7  ;;  %v910_v16 = vadd.f32 %v873_v12, %v477_v8 }
 0x152   : > { %v835_v17 = vpop.f32.mrf.mxu0  ;;  %v875_v18 = vpop.f32.mrf.mxu1 }
 0x153   : > { %926 = vst [vmem:[#allocation2 + $0x60] sm:$0xff] %v894_v15  ;;  %942 = vst [vmem:[#allocation2 + $0xa0] sm:$0xff] %v910_v16  ;;  %v895_v21 = vadd.f32 %v835_v17, %v462_v13  ;;  %v911_v22 = vadd.f32 %v875_v18, %v478_v14 }
 0x154   : > { %v837_v23 = vpop.f32.mrf.mxu0  ;;  %v877_v24 = vpop.f32.mrf.mxu1 }
 0x155   : > { %927 = vst [vmem:[#allocation2 + $0xf0] sm:$0xff] %v895_v21  ;;  %943 = vst [vmem:[#allocation2 + $0xf8] sm:$0xff] %v911_v22  ;;  %v896_v27 = vadd.f32 %v837_v23, %v463_v19  ;;  %v912_v28 = vadd.f32 %v877_v24, %v479_v20  ;;  %949 = sbr.rel (%p1411_p11) target bundleno = 387 (0x183), region = 82 }
 0x156   : > { %v839_v29 = vpop.f32.mrf.mxu0  ;;  %v879_v30 = vpop.f32.mrf.mxu1 }
 0x157   : > { %928 = vst [vmem:[#allocation2 + $0x8] sm:$0xff] %v896_v27  ;;  %944 = vst [vmem:[#allocation2 + $0x20] sm:$0xff] %v912_v28  ;;  %v897_v31 = vadd.f32 %v839_v29, %v464_v25  ;;  %v913_v32 = vadd.f32 %v879_v30, %v480_v26 }
 0x159   : > { %929 = vst [vmem:[#allocation2 + $0x78] sm:$0xff] %v897_v31  ;;  %945 = vst [vmem:[#allocation2 + $0x98] sm:$0xff] %v913_v32 }
 0x15a   : > { %v984_v33 = vlaneseq  ;;  %v982_v35 = vld [vmem:[%s1926_s2] sm:$0x3]  ;;  %v950_v37 = vld [vmem:[#allocation2 + $0xb0] sm:$0xff]  ;;  %v952_v41 = vld [vmem:[#allocation2 + $0xd8] sm:$0xff] }
 0x15b   : > { %v1026_v36 = vld [vmem:[%s1927_s3] sm:$0x3]  ;;  %v953_v42 = vld [vmem:[#allocation2 + $0x18] sm:$0xff]  ;;  %v954_v43 = vld [vmem:[#allocation2 + $0x50] sm:$0xff] }
 0x15c   : > { %v985_v34 = vshrl.u32 %v984_v33, 7  ;;  %v951_v38 = vld [vmem:[#allocation2] sm:$0xff]  ;;  %v955_v48 = vld [vmem:[#allocation2 + $0x68] sm:$0xff]  ;;  %v956_v49 = vld [vmem:[#allocation2 + $0x30] sm:$0xff] }
 0x15d   : > { %v957_v50 = vld [vmem:[#allocation2 + $0x48] sm:$0xff]  ;;  %v958_v3 = vld [vmem:[#allocation2 + $0x80] sm:$0xff]  ;;  %v961_v10 = vld [vmem:[#allocation2 + $0xb8] sm:$0xff] }
 0x15e   : > { %v986_v39 = vsub.s32 0, %v985_v34  ;;  %v990_v40 = vsub.s32 1, %v985_v34  ;;  %v959_v4 = vld [vmem:[#allocation2 + $0x88] sm:$0xff]  ;;  %v962_v15 = vld [vmem:[#allocation2 + $0x60] sm:$0xff]  ;;  %v963_v16 = vld [vmem:[#allocation2 + $0xf0] sm:$0xff] }
 0x15f   : > { %v960_v9 = vld [vmem:[#allocation2 + $0xe8] sm:$0xff] }
 0x160   : > { %v1789_v44 = vrot.slane %v982_v35, %v986_v39  ;;  %v1791_v45 = vrot.slane %v982_v35, %v990_v40  ;;  %v1793_v46 = vrot.slane %v1026_v36, %v986_v39  ;;  %v1795_v47 = vrot.slane %v1026_v36, %v990_v40  ;;  %v964_v21 = vld [vmem:[#allocation2 + $0x8] sm:$0xff]  ;;  %v965_v22 = vld [vmem:[#allocation2 + $0x78] sm:$0xff] }
 0x161   : > { %v966_v35 = vld [vmem:[#allocation2 + $0x38] sm:$0xff] }
 0x162   : > { %v994_v51 = vmul.f32 %v1789_v44, %v950_v37  ;;  %v995_v52 = vmul.f32 %v1791_v45, %v951_v38  ;;  %v996_v53 = vmul.f32 %v1789_v44, %v952_v41  ;;  %v997_v54 = vmul.f32 %v1791_v45, %v953_v42  ;;  %v967_v40 = vld [vmem:[#allocation2 + $0x58] sm:$0xff] }
 0x163   : > { %v998_v55 = vmul.f32 %v1789_v44, %v954_v43  ;;  %v999_v56 = vmul.f32 %v1791_v45, %v955_v48  ;;  %v1000_v57 = vmul.f32 %v1789_v44, %v956_v49  ;;  %v1001_v58 = vmul.f32 %v1791_v45, %v957_v50  ;;  %v968_v49 = vld [vmem:[#allocation2 + $0x40] sm:$0xff]  ;;  %v969_v50 = vld [vmem:[#allocation2 + $0xc8] sm:$0xff] }
 0x164   : > { %v1038_v59 = vadd.f32 %v1793_v46, %v994_v51  ;;  %v1039_v60 = vadd.f32 %v1795_v47, %v995_v52  ;;  %v1040_v61 = vadd.f32 %v1793_v46, %v996_v53  ;;  %v1041_v62 = vadd.f32 %v1795_v47, %v997_v54 }
 0x165   : > { %v1042_v63 = vadd.f32 %v1793_v46, %v998_v55  ;;  %v1043_v0 = vadd.f32 %v1795_v47, %v999_v56  ;;  %v1044_v1 = vadd.f32 %v1793_v46, %v1000_v57  ;;  %v1045_v2 = vadd.f32 %v1795_v47, %v1001_v58  ;;  %v970_v55 = vld [vmem:[#allocation2 + $0xe0] sm:$0xff]  ;;  %v971_v56 = vld [vmem:[#allocation2 + $0x90] sm:$0xff] }
 0x166   : > { %v1070_v5 = vmax.f32 %v1038_v59, 0.0  ;;  %v1071_v6 = vmax.f32 %v1039_v60, 0.0  ;;  %v1072_v7 = vmax.f32 %v1040_v61, 0.0  ;;  %v1073_v8 = vmax.f32 %v1041_v62, 0.0  ;;  %v972_v61 = vld [vmem:[#allocation2 + $0x70] sm:$0xff] }
 0x167   : > { %v1074_v11 = vmax.f32 %v1042_v63, 0.0  ;;  %v1075_v12 = vmax.f32 %v1043_v0, 0.0  ;;  %v1076_v13 = vmax.f32 %v1044_v1, 0.0  ;;  %v1077_v14 = vmax.f32 %v1045_v2, 0.0  ;;  %v973_v2 = vld [vmem:[#allocation2 + $0xc0] sm:$0xff] }
 0x168   : > { %v1434_v17 = vpack.c.bf16 %v1071_v6, %v1070_v5  ;;  %v1435_v18 = vpack.c.bf16 %v1073_v8, %v1072_v7  ;;  %v1002_v19 = vmul.f32 %v1789_v44, %v958_v3  ;;  %v1003_v20 = vmul.f32 %v1791_v45, %v959_v4  ;;  %v974_v7 = vld [vmem:[#allocation2 + $0xa8] sm:$0xff] }
 0x169   : > { %v1436_v23 = vpack.c.bf16 %v1075_v12, %v1074_v11  ;;  %v1437_v24 = vpack.c.bf16 %v1077_v14, %v1076_v13  ;;  %v1004_v25 = vmul.f32 %v1789_v44, %v960_v9  ;;  %v1005_v26 = vmul.f32 %v1791_v45, %v961_v10 }
 0x16a   : > { %1198 = vst [vmem:[%s1928_s4] sm:$0xff] %v1434_v17  ;;  %1199 = vst [vmem:[%s1928_s4 + $0x8] sm:$0xff] %v1435_v18  ;;  %v1046_v27 = vadd.f32 %v1793_v46, %v1002_v19  ;;  %v1047_v28 = vadd.f32 %v1795_v47, %v1003_v20  ;;  %v1006_v29 = vmul.f32 %v1789_v44, %v962_v15 }
 0x16b   : > { %v1007_v30 = vmul.f32 %v1791_v45, %v963_v16  ;;  %1200 = vst [vmem:[%s1928_s4 + $0x10] sm:$0xff] %v1436_v23  ;;  %1201 = vst [vmem:[%s1928_s4 + $0x18] sm:$0xff] %v1437_v24  ;;  %v1048_v31 = vadd.f32 %v1793_v46, %v1004_v25  ;;  %v1049_v32 = vadd.f32 %v1795_v47, %v1005_v26  ;;  %v975_v16 = vld [vmem:[#allocation2 + $0xd0] sm:$0xff] }
 0x16c   : > { %v1008_v33 = vmul.f32 %v1789_v44, %v964_v21  ;;  %v1009_v34 = vmul.f32 %v1791_v45, %v965_v22  ;;  %v1078_v36 = vmax.f32 %v1046_v27, 0.0  ;;  %v1079_v37 = vmax.f32 %v1047_v28, 0.0  ;;  %v976_v21 = vld [vmem:[#allocation2 + $0x10] sm:$0xff]  ;;  %v977_v22 = vld [vmem:[#allocation2 + $0x28] sm:$0xff]  ;;  %v978_v27 = vld [vmem:[#allocation2 + $0xa0] sm:$0xff] }
 0x16d   : > { %v1050_v38 = vadd.f32 %v1793_v46, %v1006_v29  ;;  %v1051_v39 = vadd.f32 %v1795_v47, %v1007_v30  ;;  %v1080_v41 = vmax.f32 %v1048_v31, 0.0  ;;  %v1081_v42 = vmax.f32 %v1049_v32, 0.0  ;;  %v979_v28 = vld [vmem:[#allocation2 + $0xf8] sm:$0xff] }
 0x16e   : > { %v1052_v43 = vadd.f32 %v1793_v46, %v1008_v33  ;;  %v1053_v48 = vadd.f32 %v1795_v47, %v1009_v34  ;;  %v1438_v51 = vpack.c.bf16 %v1079_v37, %v1078_v36  ;;  %v1010_v54 = vmul.f32 %v1789_v44, %v966_v35  ;;  %v980_v33 = vld [vmem:[#allocation2 + $0x20] sm:$0xff] }
 0x16f   : > { %v1082_v52 = vmax.f32 %v1050_v38, 0.0  ;;  %v1083_v53 = vmax.f32 %v1051_v39, 0.0  ;;  %v1439_v57 = vpack.c.bf16 %v1081_v42, %v1080_v41  ;;  %v1011_v60 = vmul.f32 %v1791_v45, %v967_v40  ;;  %v981_v38 = vld [vmem:[#allocation2 + $0x98] sm:$0xff] }
 0x170   : > { %v1084_v58 = vmax.f32 %v1052_v43, 0.0  ;;  %v1085_v59 = vmax.f32 %v1053_v48, 0.0  ;;  %1202 = vst [vmem:[%s1928_s4 + $0x20] sm:$0xff] %v1438_v51  ;;  %v1054_v63 = vadd.f32 %v1793_v46, %v1010_v54  ;;  %v1012_v0 = vmul.f32 %v1789_v44, %v968_v49 }
 0x171   : > { %v1440_v62 = vpack.c.bf16 %v1083_v53, %v1082_v52  ;;  %v1013_v1 = vmul.f32 %v1791_v45, %v969_v50  ;;  %1203 = vst [vmem:[%s1928_s4 + $0x28] sm:$0xff] %v1439_v57  ;;  %v1055_v4 = vadd.f32 %v1795_v47, %v1011_v60  ;;  %v1014_v5 = vmul.f32 %v1789_v44, %v970_v55 }
 0x172   : > { %v1441_v3 = vpack.c.bf16 %v1085_v59, %v1084_v58  ;;  %v1015_v6 = vmul.f32 %v1791_v45, %v971_v56  ;;  %v1086_v8 = vmax.f32 %v1054_v63, 0.0  ;;  %v1056_v9 = vadd.f32 %v1793_v46, %v1012_v0 }
 0x173   : > { %1204 = vst [vmem:[%s1928_s4 + $0x30] sm:$0xff] %v1440_v62  ;;  %v1057_v10 = vadd.f32 %v1795_v47, %v1013_v1  ;;  %v1016_v11 = vmul.f32 %v1789_v44, %v972_v61  ;;  %v1087_v12 = vmax.f32 %v1055_v4, 0.0  ;;  %v1058_v13 = vadd.f32 %v1793_v46, %v1014_v5 }
 0x174   : > { %1205 = vst [vmem:[%s1928_s4 + $0x38] sm:$0xff] %v1441_v3  ;;  %v1059_v14 = vadd.f32 %v1795_v47, %v1015_v6  ;;  %v1017_v15 = vmul.f32 %v1791_v45, %v973_v2  ;;  %v1088_v17 = vmax.f32 %v1056_v9, 0.0  ;;  %v1018_v20 = vmul.f32 %v1789_v44, %v974_v7 }
 0x175   : > { %v1089_v18 = vmax.f32 %v1057_v10, 0.0  ;;  %v1060_v19 = vadd.f32 %v1793_v46, %v1016_v11  ;;  %v1442_v23 = vpack.c.bf16 %v1087_v12, %v1086_v8  ;;  %v1090_v24 = vmax.f32 %v1058_v13, 0.0 }
 0x176   : > { %v1091_v25 = vmax.f32 %v1059_v14, 0.0  ;;  %v1061_v26 = vadd.f32 %v1795_v47, %v1017_v15  ;;  %v1019_v31 = vmul.f32 %v1791_v45, %v975_v16  ;;  %v1062_v32 = vadd.f32 %v1793_v46, %v1018_v20 }
 0x177   : > { %v1443_v29 = vpack.c.bf16 %v1089_v18, %v1088_v17  ;;  %v1092_v30 = vmax.f32 %v1060_v19, 0.0  ;;  %1206 = vst [vmem:[%s1928_s4 + $0x40] sm:$0xff] %v1442_v23  ;;  %v1020_v36 = vmul.f32 %v1789_v44, %v976_v21  ;;  %v1021_v37 = vmul.f32 %v1791_v45, %v977_v22 }
 0x178   : > { %v1444_v34 = vpack.c.bf16 %v1091_v25, %v1090_v24  ;;  %v1093_v35 = vmax.f32 %v1061_v26, 0.0  ;;  %v1063_v39 = vadd.f32 %v1795_v47, %v1019_v31  ;;  %v1094_v40 = vmax.f32 %v1062_v32, 0.0 }
 0x179   : > { %1207 = vst [vmem:[%s1928_s4 + $0x48] sm:$0xff] %v1443_v29  ;;  %v1022_v41 = vmul.f32 %v1789_v44, %v978_v27  ;;  %v1023_v42 = vmul.f32 %v1791_v45, %v979_v28  ;;  %v1064_v48 = vadd.f32 %v1793_v46, %v1020_v36  ;;  %v1065_v49 = vadd.f32 %v1795_v47, %v1021_v37 }
 0x17a   : > { %1208 = vst [vmem:[%s1928_s4 + $0x50] sm:$0xff] %v1444_v34  ;;  %v1445_v43 = vpack.c.bf16 %v1093_v35, %v1092_v30  ;;  %v1024_v50 = vmul.f32 %v1789_v44, %v980_v33  ;;  %v1095_v51 = vmax.f32 %v1063_v39, 0.0  ;;  %v1025_v54 = vmul.f32 %v1791_v45, %v981_v38 }
 0x17b   : > { %v1066_v52 = vadd.f32 %v1793_v46, %v1022_v41  ;;  %v1067_v53 = vadd.f32 %v1795_v47, %v1023_v42  ;;  %v1096_v55 = vmax.f32 %v1064_v48, 0.0  ;;  %v1097_v56 = vmax.f32 %v1065_v49, 0.0 }
 0x17c   : > { %1209 = vst [vmem:[%s1928_s4 + $0x58] sm:$0xff] %v1445_v43  ;;  %v1068_v57 = vadd.f32 %v1793_v46, %v1024_v50  ;;  %v1446_v58 = vpack.c.bf16 %v1095_v51, %v1094_v40  ;;  %v1069_v44 = vadd.f32 %v1795_v47, %v1025_v54 }
 0x17d   : > { %v1098_v59 = vmax.f32 %v1066_v52, 0.0  ;;  %v1099_v60 = vmax.f32 %v1067_v53, 0.0  ;;  %v1447_v61 = vpack.c.bf16 %v1097_v56, %v1096_v55 }
 0x17e   : > { %v1100_v62 = vmax.f32 %v1068_v57, 0.0  ;;  %1210 = vst [vmem:[%s1928_s4 + $0x60] sm:$0xff] %v1446_v58  ;;  %v1101_v63 = vmax.f32 %v1069_v44, 0.0 }
 0x17f   : > { %v1448_v45 = vpack.c.bf16 %v1099_v60, %v1098_v59  ;;  %1211 = vst [vmem:[%s1928_s4 + $0x68] sm:$0xff] %v1447_v61 }
 0x180   : > { %v1449_v46 = vpack.c.bf16 %v1101_v63, %v1100_v62 }
 0x181   : > { %1212 = vst [vmem:[%s1928_s4 + $0x70] sm:$0xff] %v1448_v45 }
 0x182   : > { %1213 = vst [vmem:[%s1928_s4 + $0x78] sm:$0xff] %v1449_v46 }
 0x183 PF: > { %s14_s19 = sadd.s32 1, %s1633_s19   ;;  %s1929_s15 = smov %s1621_s16 }
 0x184   : > { %p11_p12 = scmp.ge.s32.totalorder %s14_s19, 7   ;;  %s1930_s16 = smov %s1696_s23 }
 0x185   : > { %s1931_s17 = smov %s1629_s18  ;;  %s1932_s18 = smov %s1934_s20 }
 0x186   :  { %13 = sbr.rel (!%p11_p12) target bundleno = 3 (0x3), region = 126 }

// kernel: cnn_model_forward.24
= control target key start
LH: loop header
LB: loop body
LE: loop exit
PB: predicated region body
PF: predicated region fallthrough
CT: control target
= control target key end

     0   :  { %s126_s0 = inlined_call_operand.vmem [shape: bf16[8,4096], index: 0, kind: input, shape index: {}]   ;;  %s127_s1 = inlined_call_operand.vmem [shape: bf16[8,2048], index: 1, kind: output, shape index: {}]  }
   0x1   :  { %v8_v0 = vld [vmem:[%s126_s0] sm:$0xff]  ;;  %v9_v2 = vld [vmem:[%s126_s0 + $0x8] sm:$0xff]  ;;  %v10_v5 = vld [vmem:[%s126_s0 + $0x10] sm:$0xff] }
   0x2   :  { %v16_v1 = vld [vmem:[%s126_s0 + $0x40] sm:$0xff]  ;;  %v17_v4 = vld [vmem:[%s126_s0 + $0x48] sm:$0xff]  ;;  %v18_v6 = vld [vmem:[%s126_s0 + $0x50] sm:$0xff] }
   0x3   :  { %v24_v3 = vmax.bf16 %v16_v1, %v8_v0  ;;  %v25_v7 = vmax.bf16 %v17_v4, %v9_v2  ;;  %v26_v8 = vmax.bf16 %v18_v6, %v10_v5  ;;  %v11_v9 = vld [vmem:[%s126_s0 + $0x18] sm:$0xff]  ;;  %v12_v11 = vld [vmem:[%s126_s0 + $0x20] sm:$0xff]  ;;  %v13_v14 = vld [vmem:[%s126_s0 + $0x28] sm:$0xff] }
   0x4   :  { %v19_v10 = vld [vmem:[%s126_s0 + $0x58] sm:$0xff]  ;;  %v20_v13 = vld [vmem:[%s126_s0 + $0x60] sm:$0xff]  ;;  %v21_v15 = vld [vmem:[%s126_s0 + $0x68] sm:$0xff] }
   0x5   :  { %32 = vst [vmem:[%s127_s1] sm:$0xff] %v24_v3  ;;  %v27_v12 = vmax.bf16 %v19_v10, %v11_v9  ;;  %33 = vst [vmem:[%s127_s1 + $0x8] sm:$0xff] %v25_v7  ;;  %v28_v16 = vmax.bf16 %v20_v13, %v12_v11  ;;  %v29_v17 = vmax.bf16 %v21_v15, %v13_v14  ;;  %v14_v18 = vld [vmem:[%s126_s0 + $0x30] sm:$0xff]  ;;  %v15_v20 = vld [vmem:[%s126_s0 + $0x38] sm:$0xff] }
   0x6   :  { %34 = vst [vmem:[%s127_s1 + $0x10] sm:$0xff] %v26_v8  ;;  %v22_v19 = vld [vmem:[%s126_s0 + $0x70] sm:$0xff]  ;;  %v23_v22 = vld [vmem:[%s126_s0 + $0x78] sm:$0xff] }
   0x7   :  { %35 = vst [vmem:[%s127_s1 + $0x18] sm:$0xff] %v27_v12  ;;  %v30_v21 = vmax.bf16 %v22_v19, %v14_v18  ;;  %36 = vst [vmem:[%s127_s1 + $0x20] sm:$0xff] %v28_v16  ;;  %v31_v23 = vmax.bf16 %v23_v22, %v15_v20 }
   0x8   :  { %37 = vst [vmem:[%s127_s1 + $0x28] sm:$0xff] %v29_v17 }
   0x9   :  { %38 = vst [vmem:[%s127_s1 + $0x30] sm:$0xff] %v30_v21  ;;  %39 = vst [vmem:[%s127_s1 + $0x38] sm:$0xff] %v31_v23 }

// kernel: cnn_model_forward.25
= control target key start
LH: loop header
LB: loop body
LE: loop exit
PB: predicated region body
PF: predicated region fallthrough
CT: control target
= control target key end

     0   :  { %s74_s0 = inlined_call_operand.vmem [shape: bf16[32,512], index: 0, kind: input, shape index: {}]   ;;  %s75_s1 = inlined_call_operand.vmem [shape: bf16[32,256], index: 1, kind: output, shape index: {}]  }
   0x1   :  { %v8_v0 = vld [vmem:[%s74_s0] sm:$0xff]  ;;  %v12_v1 = vld [vmem:[%s74_s0 + $0x8] sm:$0xff]  ;;  %v9_v2 = vld [vmem:[%s74_s0 + $0x10] sm:$0xff] }
   0x2   :  { %v16_v3 = vmax.bf16 %v12_v1, %v8_v0  ;;  %v13_v4 = vld [vmem:[%s74_s0 + $0x18] sm:$0xff]  ;;  %v10_v5 = vld [vmem:[%s74_s0 + $0x20] sm:$0xff]  ;;  %v14_v6 = vld [vmem:[%s74_s0 + $0x28] sm:$0xff] }
   0x3   :  { %v17_v7 = vmax.bf16 %v13_v4, %v9_v2  ;;  %v18_v8 = vmax.bf16 %v14_v6, %v10_v5  ;;  %v11_v9 = vld [vmem:[%s74_s0 + $0x30] sm:$0xff]  ;;  %v15_v10 = vld [vmem:[%s74_s0 + $0x38] sm:$0xff] }
   0x4   :  { %20 = vst [vmem:[%s75_s1] sm:$0xff] %v16_v3  ;;  %v19_v11 = vmax.bf16 %v15_v10, %v11_v9 }
   0x5   :  { %21 = vst [vmem:[%s75_s1 + $0x8] sm:$0xff] %v17_v7  ;;  %22 = vst [vmem:[%s75_s1 + $0x10] sm:$0xff] %v18_v8 }
   0x6   :  { %23 = vst [vmem:[%s75_s1 + $0x18] sm:$0xff] %v19_v11 }

// kernel: cnn_model_forward.26
= control target key start
LH: loop header
LB: loop body
LE: loop exit
PB: predicated region body
PF: predicated region fallthrough
CT: control target
= control target key end

     0   :  { %s1722_s0 = inlined_call_operand.vmem [shape: bf16[32,2304], index: 0, kind: input, shape index: {}]   ;;  %s1723_s1 = inlined_call_operand.vmem [shape: bf16[2304,512], index: 1, kind: input, shape index: {}]   ;;  %s1724_s2 = inlined_call_operand.vmem [shape: f32[1,512], index: 2, kind: input, shape index: {}]   ;;  %s1725_s3 = inlined_call_operand.vmem [shape: f32[1,512], index: 3, kind: input, shape index: {}]   ;;  %s1726_s4 = inlined_call_operand.vmem [shape: bf16[32,512], index: 4, kind: output, shape index: {}]  }
   0x1   :  { %1729 = sst [smem:[#allocation8_spill]] %s1722_s0 }
   0x2   :  { %1730 = sst [smem:[#allocation9_spill]] %s1723_s1 }
   0x3   :  { %s1423_s15 = smov 0   ;;  %s1425_s16 = smov 0  }
   0x4   :  { %s1427_s17 = smov 0   ;;  %s1429_s18 = smov 0  }
   0x5   :  { %s1431_s19 = smov 0   ;;  %s1433_s20 = smov 0  }
   0x6   :  { %s1435_s21 = smov 0   ;;  %s1437_s22 = smov 0  }
   0x7   :  { %s1439_s23 = smov 0   ;;  %s1441_s24 = smov 0  }
   0x8   :  { %s1443_s25 = smov 0  }
   0x9 LB: > { %s1062_s26 = sadd.s32 4294967295, %s1395_s25   ;;  %s26_s27 = sadd.s32 1, %s1387_s23  ;;  %s1395_s25 = sphi %s1443_s25, %s14_s25   ;;  %s1391_s24 = sphi %s1441_s24, %s1749_s24   ;;  %s1387_s23 = sphi %s1439_s23, %s1748_s23   ;;  %s1383_s22 = sphi %s1437_s22, %s1747_s22   ;;  %s1379_s21 = sphi %s1435_s21, %s1746_s21   ;;  %s1375_s20 = sphi %s1433_s20, %s1745_s20   ;;  %s1371_s19 = sphi %s1431_s19, %s1744_s19   ;;  %s1367_s18 = sphi %s1429_s18, %s1743_s18   ;;  %s1363_s17 = sphi %s1427_s17, %s1742_s17   ;;  %s1359_s16 = sphi %s1425_s16, %s1741_s16   ;;  %s1355_s15 = sphi %s1423_s15, %s1740_s15  }
   0xa   : > { %p27_p0 = scmp.ge.s32.totalorder %s26_s27, 9  ;;  %s29_s28 = sadd.s32 1, %s1391_s24 }
   0xb   : > { %s42_s29 = sadd.s32 1, %s1375_s20  ;;  %p49_p1 = scmp.ne.s32.totalorder %s1375_s20, %s1371_s19 }
   0xc   : > { %s1751_s27 = smov (%p27_p0, %s26_s27), 0  ;;  %s1753_s28 = smov (!%p27_p0, %s29_s28), %s1391_s24 }
   0xd   : > { %1731 = sst [smem:[#allocation6_spill]] %s1751_s27  ;;  %s38_s30 = ssub.s32 %s1387_s23, %s1751_s27 }
   0xe   : > { %p50_p2 = scmp.eq.s32.totalorder %s1395_s25, 0  ;;  %p31_p3 = scmp.ge.s32.totalorder %s1753_s28, 2 }
   0xf   : > { %p40_p4 = scmp.eq.s32.totalorder %s38_s30, 0  ;;  %s70_s6 = sadd.s32 1, %s1367_s18 }
  0x10   : > { %p1490_p5 = por %p50_p2, %p49_p1  ;;  %s1755_s28 = smov (%p31_p3, %s1753_s28), 0 }
  0x11   : > { %1733 = sst [smem:[#allocation7_spill]] %s1755_s28  ;;  %s66_s8 = ssub.s32 %s1391_s24, %s1755_s28 }
  0x12   : > { %s1498_s7 = scalar_select %p40_p4, %s1375_s20, %s42_s29  }
  0x13   : > { %p77_p6 = scmp.ne.s32.totalorder %s1367_s18, %s1363_s17  ;;  %s67_s9 = sor.u32 %s66_s8, %s38_s30 }
  0x14   : > { %p148_p7 = scmp.eq.s32.totalorder %s66_s8, 0  ;;  %p68_p8 = scmp.eq.s32.totalorder %s67_s9, 0 }
  0x15   : > { %p1504_p9 = por %p77_p6, %p50_p2  ;;  %s150_s11 = sadd.s32 1, %s1359_s16 }
  0x16   : > { %p160_p10 = scmp.ne.s32.totalorder %s1359_s16, %s1355_s15  ;;  %p161_p11 = scmp.eq.s32.totalorder %s1062_s26, 17 }
  0x17   : > { %s1512_s12 = scalar_select %p68_p8, %s1367_s18, %s70_s6  }
  0x18   : > { %s1515_s13 = scalar_select %p148_p7, %s1359_s16, %s150_s11  }
  0x19   : > { %p1517_p12 = por %p161_p11, %p160_p10  ;;  %p1065_p13 = scmp.ge.s32.totalorder %s1395_s25, 18 }
  0x1b   : > { %183 = sbr.rel (%p1065_p13) target bundleno = 70 (0x46), region = 16 }
  0x20   : > { %186 = sbr.rel (!%p1490_p5) target bundleno = 44 (0x2c), region = 20  ;;  %s188_s29 = sand.u32 (%p1490_p5), 1, %s1375_s20  }
  0x21   : > { %s1127_s30 = sshll.u32 (%p1490_p5), %s1387_s23, 3  ;;  %s1066_s8 = sshll.u32 (%p1490_p5), %s188_s29, 5 }
  0x22   : > { %s1736_s0 = sld [smem:[#allocation8_spill]] (%p1490_p5)  ;;  %s190_s26 = scalar_lea.vmem (%p1490_p5), [#allocation3], %s1066_s8 }
  0x28   : > { %s196_s11 = scalar_lea.vmem %s1736_s0, %s1127_s30 }
  0x29   : > { %v231_v0 = vld [vmem:[%s196_s11] sm:$0xff]  ;;  %v233_v1 = vld [vmem:[%s196_s11 + $0x48] sm:$0xff]  ;;  %v235_v2 = vld [vmem:[%s196_s11 + $0x90] sm:$0xff] }
  0x2a   : > { %232 = vst [vmem:[%s190_s26] sm:$0xff] %v231_v0  ;;  %234 = vst [vmem:[%s190_s26 + $0x8] sm:$0xff] %v233_v1  ;;  %v237_v3 = vld [vmem:[%s196_s11 + $0xd8] sm:$0xff] }
  0x2b   : > { %236 = vst [vmem:[%s190_s26 + $0x10] sm:$0xff] %v235_v2  ;;  %238 = vst [vmem:[%s190_s26 + $0x18] sm:$0xff] %v237_v3 }
  0x2c PF: > { %244 = sbr.rel (!%p1504_p9) target bundleno = 70 (0x46), region = 58  ;;  %s246_s5 = sand.u32 (%p1504_p9), 1, %s1367_s18  }
  0x2d   : > { %s1071_s29 = sshll.u32 (%p1504_p9), %s1391_s24, 1  ;;  %s1069_s6 = sshll.u32 (%p1504_p9), %s246_s5, 8 }
  0x2e   : > { %s1128_s30 = sshll.u32 (%p1504_p9), %s1387_s23, 7  ;;  %s1737_s1 = sld [smem:[#allocation9_spill]] (%p1504_p9) }
  0x2f   : > { %s252_s9 = sadd.s32 (%p1504_p9), %s1128_s30, %s1071_s29  ;;  %s1542_s10 = scalar_lea.vmem (%p1504_p9), [#allocation4], %s1069_s6 }
  0x30   : > { %s1073_s0 = sshll.u32 (%p1504_p9), %s252_s9, 2 }
  0x34   : > { %s1537_s27 = scalar_lea.vmem %s1737_s1, %s1073_s0 }
  0x35   : > { %v345_v4 = vld [vmem:[%s1537_s27] sm:$0xff]  ;;  %v347_v5 = vld [vmem:[%s1537_s27 + $0x10] sm:$0xff] }
  0x36   : > { %v349_v6 = vld [vmem:[%s1537_s27 + $0x20] sm:$0xff]  ;;  %346 = vst [vmem:[%s1542_s10] sm:$0xff] %v345_v4  ;;  %348 = vst [vmem:[%s1542_s10 + $0x8] sm:$0xff] %v347_v5  ;;  %v351_v7 = vld [vmem:[%s1537_s27 + $0x30] sm:$0xff] }
  0x37   : > { %350 = vst [vmem:[%s1542_s10 + $0x10] sm:$0xff] %v349_v6  ;;  %v353_v8 = vld [vmem:[%s1537_s27 + $0x40] sm:$0xff]  ;;  %v355_v9 = vld [vmem:[%s1537_s27 + $0x50] sm:$0xff]  ;;  %352 = vst [vmem:[%s1542_s10 + $0x18] sm:$0xff] %v351_v7 }
  0x38   : > { %354 = vst [vmem:[%s1542_s10 + $0x20] sm:$0xff] %v353_v8  ;;  %356 = vst [vmem:[%s1542_s10 + $0x28] sm:$0xff] %v355_v9  ;;  %v357_v10 = vld [vmem:[%s1537_s27 + $0x60] sm:$0xff]  ;;  %v359_v11 = vld [vmem:[%s1537_s27 + $0x70] sm:$0xff] }
  0x39   : > { %v361_v12 = vld [vmem:[%s1537_s27 + $0x80] sm:$0xff]  ;;  %358 = vst [vmem:[%s1542_s10 + $0x30] sm:$0xff] %v357_v10  ;;  %360 = vst [vmem:[%s1542_s10 + $0x38] sm:$0xff] %v359_v11  ;;  %v363_v13 = vld [vmem:[%s1537_s27 + $0x90] sm:$0xff] }
  0x3a   : > { %362 = vst [vmem:[%s1542_s10 + $0x40] sm:$0xff] %v361_v12  ;;  %v365_v14 = vld [vmem:[%s1537_s27 + $0xa0] sm:$0xff]  ;;  %v367_v15 = vld [vmem:[%s1537_s27 + $0xb0] sm:$0xff]  ;;  %364 = vst [vmem:[%s1542_s10 + $0x48] sm:$0xff] %v363_v13 }
  0x3b   : > { %366 = vst [vmem:[%s1542_s10 + $0x50] sm:$0xff] %v365_v14  ;;  %368 = vst [vmem:[%s1542_s10 + $0x58] sm:$0xff] %v367_v15  ;;  %v369_v16 = vld [vmem:[%s1537_s27 + $0xc0] sm:$0xff]  ;;  %v371_v17 = vld [vmem:[%s1537_s27 + $0xd0] sm:$0xff] }
  0x3c   : > { %v373_v18 = vld [vmem:[%s1537_s27 + $0xe0] sm:$0xff]  ;;  %370 = vst [vmem:[%s1542_s10 + $0x60] sm:$0xff] %v369_v16  ;;  %372 = vst [vmem:[%s1542_s10 + $0x68] sm:$0xff] %v371_v17  ;;  %v375_v19 = vld [vmem:[%s1537_s27 + $0xf0] sm:$0xff] }
  0x3d   : > { %374 = vst [vmem:[%s1542_s10 + $0x70] sm:$0xff] %v373_v18  ;;  %v377_v20 = vld [vmem:[%s1537_s27 + $0x100] sm:$0xff]  ;;  %v379_v21 = vld [vmem:[%s1537_s27 + $0x110] sm:$0xff]  ;;  %376 = vst [vmem:[%s1542_s10 + $0x78] sm:$0xff] %v375_v19 }
  0x3e   : > { %378 = vst [vmem:[%s1542_s10 + $0x80] sm:$0xff] %v377_v20  ;;  %380 = vst [vmem:[%s1542_s10 + $0x88] sm:$0xff] %v379_v21  ;;  %v381_v22 = vld [vmem:[%s1537_s27 + $0x120] sm:$0xff]  ;;  %v383_v23 = vld [vmem:[%s1537_s27 + $0x130] sm:$0xff] }
  0x3f   : > { %v385_v24 = vld [vmem:[%s1537_s27 + $0x140] sm:$0xff]  ;;  %382 = vst [vmem:[%s1542_s10 + $0x90] sm:$0xff] %v381_v22  ;;  %384 = vst [vmem:[%s1542_s10 + $0x98] sm:$0xff] %v383_v23  ;;  %v387_v25 = vld [vmem:[%s1537_s27 + $0x150] sm:$0xff] }
  0x40   : > { %386 = vst [vmem:[%s1542_s10 + $0xa0] sm:$0xff] %v385_v24  ;;  %v389_v26 = vld [vmem:[%s1537_s27 + $0x160] sm:$0xff]  ;;  %v391_v27 = vld [vmem:[%s1537_s27 + $0x170] sm:$0xff]  ;;  %388 = vst [vmem:[%s1542_s10 + $0xa8] sm:$0xff] %v387_v25 }
  0x41   : > { %390 = vst [vmem:[%s1542_s10 + $0xb0] sm:$0xff] %v389_v26  ;;  %392 = vst [vmem:[%s1542_s10 + $0xb8] sm:$0xff] %v391_v27  ;;  %v393_v28 = vld [vmem:[%s1537_s27 + $0x180] sm:$0xff]  ;;  %v395_v29 = vld [vmem:[%s1537_s27 + $0x190] sm:$0xff] }
  0x42   : > { %v397_v30 = vld [vmem:[%s1537_s27 + $0x1a0] sm:$0xff]  ;;  %394 = vst [vmem:[%s1542_s10 + $0xc0] sm:$0xff] %v393_v28  ;;  %396 = vst [vmem:[%s1542_s10 + $0xc8] sm:$0xff] %v395_v29  ;;  %v399_v31 = vld [vmem:[%s1537_s27 + $0x1b0] sm:$0xff] }
  0x43   : > { %398 = vst [vmem:[%s1542_s10 + $0xd0] sm:$0xff] %v397_v30  ;;  %v401_v32 = vld [vmem:[%s1537_s27 + $0x1c0] sm:$0xff]  ;;  %v403_v33 = vld [vmem:[%s1537_s27 + $0x1d0] sm:$0xff]  ;;  %400 = vst [vmem:[%s1542_s10 + $0xd8] sm:$0xff] %v399_v31 }
  0x44   : > { %402 = vst [vmem:[%s1542_s10 + $0xe0] sm:$0xff] %v401_v32  ;;  %404 = vst [vmem:[%s1542_s10 + $0xe8] sm:$0xff] %v403_v33  ;;  %v405_v34 = vld [vmem:[%s1537_s27 + $0x1e0] sm:$0xff]  ;;  %v407_v35 = vld [vmem:[%s1537_s27 + $0x1f0] sm:$0xff] }
  0x45   : > { %406 = vst [vmem:[%s1542_s10 + $0xf0] sm:$0xff] %v405_v34  ;;  %408 = vst [vmem:[%s1542_s10 + $0xf8] sm:$0xff] %v407_v35 }
  0x46 PF: > { %p1074_p0 = scmp.ge.s32.totalorder %s1395_s25, 1  ;;  %p429_p1 = scmp.lt.s32.totalorder %s1395_s25, 19 }
  0x48   : > { %p430_p2 = pnand %p1074_p0, %p429_p1 }
  0x49   : > { %s436_s0 = sand.u32 (!%p430_p2), 1, %s1371_s19   ;;  %s443_s28 = sand.u32 (!%p430_p2), 1, %s1363_s17  }
  0x4a   : > { %433 = sbr.rel (%p430_p2) target bundleno = 384 (0x180), region = 104  ;;  %s1075_s11 = sshll.u32 (!%p430_p2), %s436_s0, 5 }
  0x4b   : > { %s1076_s26 = sshll.u32 (!%p430_p2), %s443_s28, 8  ;;  %s476_s5 = sand.u32 (!%p430_p2), 1, %s1355_s15  }
  0x4c   : > { %s1078_s27 = sshll.u32 (!%p430_p2), %s1383_s22, 1  ;;  %s1077_s29 = sshll.u32 (!%p430_p2), %s476_s5, 5 }
  0x4d   : > { %p484_p3 = scmp.lt.s32.totalorder (!%p430_p2), %s1078_s27, 3  ;;  %s1621_s19 = scalar_lea.vmem (!%p430_p2), [#allocation3], %s1075_s11 }
  0x4e   : > { %s1623_s17 = scalar_lea.vmem (!%p430_p2), [#allocation4], %s1076_s26  ;;  %s1625_s15 = scalar_lea.vmem (!%p430_p2), [#allocation5], %s1077_s29 }
  0x4f   : > { %s1757_s27 = smov (!%p484_p3, %s1078_s27), 3  ;;  %p1080_p4 = scmp.ne.s32.totalorder %s1379_s21, 0 }
  0x50   : > { %s486_s9 = scalar_lea.vmem %s1724_s2, %s1757_s27  ;;  %s491_s1 = scalar_lea.vmem %s1725_s3, %s1757_s27 }
  0x51   : > { %498 = sbr.rel (%p1080_p4) target bundleno = 91 (0x5b), region = 116 }
  0x56   : > { %v1397_v36 = vmov 0.0  }
  0x57   : > { %499 = vst [vmem:[#allocation2 + $0x30] sm:$0xff] %v1397_v36  ;;  %500 = vst [vmem:[#allocation2] sm:$0xff] %v1397_v36 }
  0x58   : > { %501 = vst [vmem:[#allocation2 + $0x18] sm:$0xff] %v1397_v36  ;;  %502 = vst [vmem:[#allocation2 + $0x10] sm:$0xff] %v1397_v36 }
  0x59   : > { %503 = vst [vmem:[#allocation2 + $0x8] sm:$0xff] %v1397_v36  ;;  %504 = vst [vmem:[#allocation2 + $0x20] sm:$0xff] %v1397_v36 }
  0x5a   : > { %505 = vst [vmem:[#allocation2 + $0x28] sm:$0xff] %v1397_v36  ;;  %506 = vst [vmem:[#allocation2 + $0x38] sm:$0xff] %v1397_v36 }
  0x5b PF: > { %v1255_v37 = vld [vmem:[%s1623_s17 + $0x74] ss:$8 sps:$4 sm:$0xff]   ;;  %v1257_v38 = vld [vmem:[%s1623_s17 + $0x70] ss:$8 sps:$4 sm:$0xff]   ;;  %v1258_v39 = vld [vmem:[%s1623_s17 + $0x64] ss:$8 sps:$4 sm:$0xff]  }
  0x5c   : > { %731 = vmatprep.subr.bf16.mxu0 %v1255_v37  ;;  %1134 = vmatprep.subr.bf16.mxu1 %v1255_v37  ;;  %v1260_v40 = vld [vmem:[%s1623_s17 + $0x60] ss:$8 sps:$4 sm:$0xff]   ;;  %v1261_v41 = vld [vmem:[%s1623_s17 + $0x54] ss:$8 sps:$4 sm:$0xff]   ;;  %v1263_v42 = vld [vmem:[%s1623_s17 + $0x50] ss:$8 sps:$4 sm:$0xff]  }
  0x5d   : > { %732 = vmatpush1.bf16.msra.mxu0 %v1257_v38  ;;  %1150 = vmatpush1.bf16.msra.mxu1 %v1257_v38  ;;  %v1264_v43 = vld [vmem:[%s1623_s17 + $0x44] ss:$8 sps:$4 sm:$0xff]   ;;  %v1266_v44 = vld [vmem:[%s1623_s17 + $0x40] ss:$8 sps:$4 sm:$0xff]   ;;  %v1267_v45 = vld [vmem:[%s1623_s17 + $0x34] ss:$8 sps:$4 sm:$0xff]  }
  0x5e   : > { %733 = vmatprep.subr.bf16.mxu0 %v1258_v39  ;;  %1135 = vmatprep.subr.bf16.mxu1 %v1258_v39  ;;  %v1269_v46 = vld [vmem:[%s1623_s17 + $0x30] ss:$8 sps:$4 sm:$0xff]   ;;  %v1270_v47 = vld [vmem:[%s1623_s17 + $0x24] ss:$8 sps:$4 sm:$0xff]   ;;  %v1272_v48 = vld [vmem:[%s1623_s17 + $0x20] ss:$8 sps:$4 sm:$0xff]  }
  0x5f   : > { %v1273_v49 = vld [vmem:[%s1623_s17 + $0x14] ss:$8 sps:$4 sm:$0xff]   ;;  %v1305_v50 = vld [vmem:[%s1621_s19 + $0x4] ss:$8 sps:$4 sm:$0xff]   ;;  %v1275_v51 = vld [vmem:[%s1623_s17 + $0x10] ss:$8 sps:$4 sm:$0xff]  }
  0x60   : > { %v1308_v52 = vld [vmem:[%s1621_s19 + $0x14] ss:$8 sps:$4 sm:$0xff]   ;;  %v1276_v53 = vld [vmem:[%s1623_s17 + $0x4] ss:$8 sps:$4 sm:$0xff]   ;;  %763 = vmatprep.mubr.bf16.mxu0 %v1305_v50  ;;  %v1278_v54 = vld [vmem:[%s1623_s17] ss:$8 sps:$4 sm:$0xff]  }
  0x61   : > { %734 = vmatpush1.bf16.msra.mxu0 %v1260_v40  ;;  %1151 = vmatpush1.bf16.msra.mxu1 %v1260_v40  ;;  %v1279_v55 = vld [vmem:[%s1623_s17 + $0xf4] ss:$8 sps:$4 sm:$0xff]   ;;  %v1281_v56 = vld [vmem:[%s1623_s17 + $0xf0] ss:$8 sps:$4 sm:$0xff]   ;;  %v1282_v57 = vld [vmem:[%s1623_s17 + $0xe4] ss:$8 sps:$4 sm:$0xff]  }
  0x62   : > { %735 = vmatprep.subr.bf16.mxu0 %v1261_v41  ;;  %1136 = vmatprep.subr.bf16.mxu1 %v1261_v41  ;;  %v1284_v58 = vld [vmem:[%s1623_s17 + $0xe0] ss:$8 sps:$4 sm:$0xff]   ;;  %v1285_v59 = vld [vmem:[%s1623_s17 + $0xd4] ss:$8 sps:$4 sm:$0xff]   ;;  %v1287_v60 = vld [vmem:[%s1623_s17 + $0xd0] ss:$8 sps:$4 sm:$0xff]  }
  0x63   : > { %773 = vmatprep.mubr.bf16.mxu1 %v1308_v52  ;;  %v1288_v61 = vld [vmem:[%s1623_s17 + $0xc4] ss:$8 sps:$4 sm:$0xff]   ;;  %v1290_v62 = vld [vmem:[%s1623_s17 + $0xc0] ss:$8 sps:$4 sm:$0xff]   ;;  %v1291_v63 = vld [vmem:[%s1623_s17 + $0xb4] ss:$8 sps:$4 sm:$0xff]  }
  0x64   : > { %v1293_v0 = vld [vmem:[%s1623_s17 + $0xb0] ss:$8 sps:$4 sm:$0xff]   ;;  %v1294_v1 = vld [vmem:[%s1623_s17 + $0xa4] ss:$8 sps:$4 sm:$0xff]   ;;  %v1296_v2 = vld [vmem:[%s1623_s17 + $0xa0] ss:$8 sps:$4 sm:$0xff]  }
  0x65   : > { %736 = vmatpush1.bf16.msra.mxu0 %v1263_v42  ;;  %1152 = vmatpush1.bf16.msra.mxu1 %v1263_v42  ;;  %v1297_v3 = vld [vmem:[%s1623_s17 + $0x94] ss:$8 sps:$4 sm:$0xff]   ;;  %v1299_v4 = vld [vmem:[%s1623_s17 + $0x90] ss:$8 sps:$4 sm:$0xff]   ;;  %v1300_v5 = vld [vmem:[%s1623_s17 + $0x84] ss:$8 sps:$4 sm:$0xff]  }
  0x66   : > { %737 = vmatprep.subr.bf16.mxu0 %v1264_v43  ;;  %1137 = vmatprep.subr.bf16.mxu1 %v1264_v43  ;;  %v1302_v6 = vld [vmem:[%s1623_s17 + $0x80] ss:$8 sps:$4 sm:$0xff]   ;;  %v1306_v8 = vld [vmem:[%s1621_s19 + $0x10] ss:$8 sps:$4 sm:$0xff]   ;;  %p1117_p5 = scmp.ne.s32.totalorder %s1379_s21, 8 }
  0x67   : > { %v1303_v7 = vld [vmem:[%s1621_s19] ss:$8 sps:$4 sm:$0xff]   ;;  %v507_v9 = vld [vmem:[#allocation2 + $0x30] sm:$0xff]  ;;  %v509_v19 = vld [vmem:[#allocation2 + $0x18] sm:$0xff] }
  0x68   : > { %v511_v10 = vld [vmem:[#allocation2 + $0x8] sm:$0xff]  ;;  %v508_v13 = vld [vmem:[#allocation2] sm:$0xff]  ;;  %v510_v25 = vld [vmem:[#allocation2 + $0x10] sm:$0xff] }
  0x69   : > { %738 = vmatpush1.bf16.msra.mxu0 %v1266_v44  ;;  %1153 = vmatpush1.bf16.msra.mxu1 %v1266_v44  ;;  %v512_v14 = vld [vmem:[#allocation2 + $0x20] sm:$0xff]  ;;  %v513_v20 = vld [vmem:[#allocation2 + $0x28] sm:$0xff]  ;;  %v514_v26 = vld [vmem:[#allocation2 + $0x38] sm:$0xff] }
  0x6a   : > { %739 = vmatprep.subr.bf16.mxu0 %v1267_v45  ;;  %1138 = vmatprep.subr.bf16.mxu1 %v1267_v45 }
  0x6d   : > { %740 = vmatpush1.bf16.msra.mxu0 %v1269_v46  ;;  %1154 = vmatpush1.bf16.msra.mxu1 %v1269_v46 }
  0x6e   : > { %741 = vmatprep.subr.bf16.mxu0 %v1270_v47  ;;  %1139 = vmatprep.subr.bf16.mxu1 %v1270_v47 }
  0x71   : > { %742 = vmatpush1.bf16.msra.mxu0 %v1272_v48  ;;  %1155 = vmatpush1.bf16.msra.mxu1 %v1272_v48 }
  0x72   : > { %743 = vmatprep.subr.bf16.mxu0 %v1273_v49  ;;  %1140 = vmatprep.subr.bf16.mxu1 %v1273_v49 }
  0x75   : > { %744 = vmatpush1.bf16.msra.mxu0 %v1275_v51  ;;  %1156 = vmatpush1.bf16.msra.mxu1 %v1275_v51 }
  0x76   : > { %745 = vmatprep.subr.bf16.mxu0 %v1276_v53  ;;  %1141 = vmatprep.subr.bf16.mxu1 %v1276_v53 }
  0x79   : > { %746 = vmatpush1.bf16.msra.mxu0 %v1278_v54  ;;  %1157 = vmatpush1.bf16.msra.mxu1 %v1278_v54 }
  0x7a   : > { %747 = vmatprep.subr.bf16.mxu0 %v1279_v55  ;;  %1142 = vmatprep.subr.bf16.mxu1 %v1279_v55 }
  0x7d   : > { %748 = vmatpush2.bf16.msra.mxu0 %v1281_v56  ;;  %1158 = vmatpush2.bf16.msra.mxu1 %v1281_v56 }
  0x7e   : > { %749 = vmatprep.subr.bf16.mxu0 %v1282_v57  ;;  %1143 = vmatprep.subr.bf16.mxu1 %v1282_v57 }
  0x81   : > { %750 = vmatpush2.bf16.msra.mxu0 %v1284_v58  ;;  %1159 = vmatpush2.bf16.msra.mxu1 %v1284_v58 }
  0x82   : > { %751 = vmatprep.subr.bf16.mxu0 %v1285_v59  ;;  %1144 = vmatprep.subr.bf16.mxu1 %v1285_v59 }
  0x85   : > { %752 = vmatpush2.bf16.msra.mxu0 %v1287_v60  ;;  %1160 = vmatpush2.bf16.msra.mxu1 %v1287_v60 }
  0x86   : > { %753 = vmatprep.subr.bf16.mxu0 %v1288_v61  ;;  %1145 = vmatprep.subr.bf16.mxu1 %v1288_v61 }
  0x89   : > { %754 = vmatpush2.bf16.msra.mxu0 %v1290_v62  ;;  %1161 = vmatpush2.bf16.msra.mxu1 %v1290_v62 }
  0x8a   : > { %755 = vmatprep.subr.bf16.mxu0 %v1291_v63  ;;  %1146 = vmatprep.subr.bf16.mxu1 %v1291_v63 }
  0x8d   : > { %756 = vmatpush2.bf16.msra.mxu0 %v1293_v0  ;;  %1162 = vmatpush2.bf16.msra.mxu1 %v1293_v0 }
  0x8e   : > { %757 = vmatprep.subr.bf16.mxu0 %v1294_v1  ;;  %1147 = vmatprep.subr.bf16.mxu1 %v1294_v1 }
  0x91   : > { %758 = vmatpush2.bf16.msra.mxu0 %v1296_v2  ;;  %1163 = vmatpush2.bf16.msra.mxu1 %v1296_v2 }
  0x92   : > { %759 = vmatprep.subr.bf16.mxu0 %v1297_v3  ;;  %1148 = vmatprep.subr.bf16.mxu1 %v1297_v3 }
  0x95   : > { %760 = vmatpush2.bf16.msra.mxu0 %v1299_v4  ;;  %1164 = vmatpush2.bf16.msra.mxu1 %v1299_v4 }
  0x96   : > { %761 = vmatprep.subr.bf16.mxu0 %v1300_v5  ;;  %1149 = vmatprep.subr.bf16.mxu1 %v1300_v5 }
  0x99   : > { %762 = vmatpush2.bf16.msra.mxu0 %v1302_v6  ;;  %1165 = vmatpush2.bf16.msra.mxu1 %v1302_v6 }
  0x9c   : > { %764 = vmatmul.mubr.bf16.vlgmr.msra.gmra.mxu0 %v1303_v7  ;;  %774 = vmatmul.mubr.bf16.vlgmr.msra.gmra.mxu1 %v1306_v8 }
 0x15c   : > { %v765_v11 = vpop.f32.mrf.mxu0  ;;  %v775_v12 = vpop.f32.mrf.mxu1 }
 0x15d   : > { %v784_v15 = vadd.f32 %v765_v11, %v507_v9  ;;  %v788_v16 = vadd.f32 %v775_v12, %v511_v10 }
 0x15e   : > { %v767_v17 = vpop.f32.mrf.mxu0  ;;  %v777_v18 = vpop.f32.mrf.mxu1 }
 0x15f   : > { %792 = vst [vmem:[#allocation2 + $0x30] sm:$0xff] %v784_v15  ;;  %796 = vst [vmem:[#allocation2 + $0x8] sm:$0xff] %v788_v16  ;;  %v785_v21 = vadd.f32 %v767_v17, %v508_v13  ;;  %v789_v22 = vadd.f32 %v777_v18, %v512_v14 }
 0x160   : > { %v769_v23 = vpop.f32.mrf.mxu0  ;;  %v779_v24 = vpop.f32.mrf.mxu1 }
 0x161   : > { %793 = vst [vmem:[#allocation2] sm:$0xff] %v785_v21  ;;  %797 = vst [vmem:[#allocation2 + $0x20] sm:$0xff] %v789_v22  ;;  %v786_v27 = vadd.f32 %v769_v23, %v509_v19  ;;  %v790_v28 = vadd.f32 %v779_v24, %v513_v20  ;;  %803 = sbr.rel (%p1117_p5) target bundleno = 376 (0x178), region = 120 }
 0x162   : > { %v771_v29 = vpop.f32.mrf.mxu0  ;;  %v781_v30 = vpop.f32.mrf.mxu1 }
 0x163   : > { %794 = vst [vmem:[#allocation2 + $0x18] sm:$0xff] %v786_v27  ;;  %798 = vst [vmem:[#allocation2 + $0x28] sm:$0xff] %v790_v28  ;;  %v787_v31 = vadd.f32 %v771_v29, %v510_v25  ;;  %v791_v32 = vadd.f32 %v781_v30, %v514_v26 }
 0x165   : > { %795 = vst [vmem:[#allocation2 + $0x10] sm:$0xff] %v787_v31  ;;  %799 = vst [vmem:[#allocation2 + $0x38] sm:$0xff] %v791_v32 }
 0x166   : > { %v814_v33 = vlaneseq  ;;  %v812_v35 = vld [vmem:[%s486_s9] sm:$0x3]  ;;  %v804_v37 = vld [vmem:[#allocation2 + $0x30] sm:$0xff]  ;;  %v808_v43 = vld [vmem:[#allocation2 + $0x8] sm:$0xff] }
 0x167   : > { %v832_v36 = vld [vmem:[%s491_s1] sm:$0x3] }
 0x168   : > { %v815_v34 = vshrl.u32 %v814_v33, 7  ;;  %v805_v38 = vld [vmem:[#allocation2] sm:$0xff] }
 0x169   : > { %v809_v48 = vld [vmem:[#allocation2 + $0x20] sm:$0xff] }
 0x16a   : > { %v816_v39 = vsub.s32 0, %v815_v34  ;;  %v820_v40 = vsub.s32 1, %v815_v34  ;;  %v806_v41 = vld [vmem:[#allocation2 + $0x18] sm:$0xff]  ;;  %v810_v49 = vld [vmem:[#allocation2 + $0x28] sm:$0xff] }
 0x16c   : > { %v807_v42 = vld [vmem:[#allocation2 + $0x10] sm:$0xff]  ;;  %v817_v44 = vrot.slane %v812_v35, %v816_v39  ;;  %v821_v45 = vrot.slane %v812_v35, %v820_v40  ;;  %v837_v46 = vrot.slane %v832_v36, %v816_v39  ;;  %v841_v47 = vrot.slane %v832_v36, %v820_v40  ;;  %v811_v50 = vld [vmem:[#allocation2 + $0x38] sm:$0xff] }
 0x16e   : > { %v824_v51 = vmul.f32 %v817_v44, %v804_v37  ;;  %v825_v52 = vmul.f32 %v821_v45, %v805_v38  ;;  %v826_v53 = vmul.f32 %v817_v44, %v806_v41  ;;  %v827_v54 = vmul.f32 %v821_v45, %v807_v42 }
 0x16f   : > { %v828_v55 = vmul.f32 %v817_v44, %v808_v43  ;;  %v829_v56 = vmul.f32 %v821_v45, %v809_v48  ;;  %v830_v57 = vmul.f32 %v817_v44, %v810_v49  ;;  %v831_v58 = vmul.f32 %v821_v45, %v811_v50 }
 0x170   : > { %v844_v59 = vadd.f32 %v837_v46, %v824_v51  ;;  %v845_v60 = vadd.f32 %v841_v47, %v825_v52  ;;  %v846_v61 = vadd.f32 %v837_v46, %v826_v53  ;;  %v847_v62 = vadd.f32 %v841_v47, %v827_v54 }
 0x171   : > { %v848_v63 = vadd.f32 %v837_v46, %v828_v55  ;;  %v849_v0 = vadd.f32 %v841_v47, %v829_v56  ;;  %v850_v1 = vadd.f32 %v837_v46, %v830_v57  ;;  %v851_v2 = vadd.f32 %v841_v47, %v831_v58 }
 0x172   : > { %v852_v3 = vmax.f32 %v844_v59, 0.0  ;;  %v853_v4 = vmax.f32 %v845_v60, 0.0  ;;  %v854_v5 = vmax.f32 %v846_v61, 0.0  ;;  %v855_v6 = vmax.f32 %v847_v62, 0.0 }
 0x173   : > { %v856_v7 = vmax.f32 %v848_v63, 0.0  ;;  %v857_v8 = vmax.f32 %v849_v0, 0.0  ;;  %v858_v9 = vmax.f32 %v850_v1, 0.0  ;;  %v859_v10 = vmax.f32 %v851_v2, 0.0 }
 0x174   : > { %v1129_v11 = vpack.c.bf16 %v853_v4, %v852_v3  ;;  %v1130_v12 = vpack.c.bf16 %v855_v6, %v854_v5 }
 0x175   : > { %v1131_v13 = vpack.c.bf16 %v857_v8, %v856_v7  ;;  %v1132_v14 = vpack.c.bf16 %v859_v10, %v858_v9 }
 0x176   : > { %884 = vst [vmem:[%s1625_s15] sm:$0xff] %v1129_v11  ;;  %885 = vst [vmem:[%s1625_s15 + $0x8] sm:$0xff] %v1130_v12 }
 0x177   : > { %886 = vst [vmem:[%s1625_s15 + $0x10] sm:$0xff] %v1131_v13  ;;  %887 = vst [vmem:[%s1625_s15 + $0x18] sm:$0xff] %v1132_v14 }
 0x178 PF: > { %894 = sbr.rel (!%p1517_p12) target bundleno = 384 (0x180), region = 124  ;;  %s1133_s1 = sshll.u32 (%p1517_p12), %s1383_s22, 3 }
 0x179   : > { %s900_s27 = scalar_lea.vmem (%p1517_p12), %s1726_s4, %s1133_s1 }
 0x17d   : > { %v935_v15 = vld [vmem:[%s1625_s15] sm:$0xff]  ;;  %v937_v16 = vld [vmem:[%s1625_s15 + $0x8] sm:$0xff] }
 0x17e   : > { %v939_v17 = vld [vmem:[%s1625_s15 + $0x10] sm:$0xff]  ;;  %v941_v18 = vld [vmem:[%s1625_s15 + $0x18] sm:$0xff]  ;;  %936 = vst [vmem:[%s900_s27] sm:$0xff] %v935_v15  ;;  %938 = vst [vmem:[%s900_s27 + $0x10] sm:$0xff] %v937_v16 }
 0x17f   : > { %940 = vst [vmem:[%s900_s27 + $0x20] sm:$0xff] %v939_v17  ;;  %942 = vst [vmem:[%s900_s27 + $0x30] sm:$0xff] %v941_v18 }
 0x180 PF: > { %s14_s25 = sadd.s32 1, %s1395_s25   ;;  %s1738_s14 = sld [smem:[#allocation6_spill]] }
 0x181   : > { %p11_p6 = scmp.ge.s32.totalorder %s14_s25, 20   ;;  %s1739_s29 = sld [smem:[#allocation7_spill]] }
 0x182   : > { %s1740_s15 = smov %s1359_s16  ;;  %s1741_s16 = smov %s1515_s13 }
 0x183   : > { %s1742_s17 = smov %s1367_s18  ;;  %s1743_s18 = smov %s1512_s12 }
 0x184   : > { %s1744_s19 = smov %s1375_s20  ;;  %s1745_s20 = smov %s1498_s7 }
 0x185   : > { %s1746_s21 = smov %s1387_s23  ;;  %s1747_s22 = smov %s1391_s24 }
 0x186   : > { %s1748_s23 = smov %s1738_s14  ;;  %13 = sbr.rel (!%p11_p6) target bundleno = 9 (0x9), region = 207 }
 0x187   : > { %s1749_s24 = smov %s1739_s29 }

// kernel: cnn_model_forward.27
= control target key start
LH: loop header
LB: loop body
LE: loop exit
PB: predicated region body
PF: predicated region fallthrough
CT: control target
= control target key end

     0   :  { %s74_s0 = inlined_call_operand.vmem [shape: bf16[4,4096], index: 0, kind: input, shape index: {}]   ;;  %s75_s1 = inlined_call_operand.vmem [shape: bf16[4,2048], index: 1, kind: output, shape index: {}]  }
   0x1   :  { %v8_v0 = vld [vmem:[%s74_s0] sm:$0xff]  ;;  %v9_v2 = vld [vmem:[%s74_s0 + $0x8] sm:$0xff]  ;;  %v10_v5 = vld [vmem:[%s74_s0 + $0x10] sm:$0xff] }
   0x2   :  { %v12_v1 = vld [vmem:[%s74_s0 + $0x20] sm:$0xff]  ;;  %v13_v4 = vld [vmem:[%s74_s0 + $0x28] sm:$0xff]  ;;  %v14_v6 = vld [vmem:[%s74_s0 + $0x30] sm:$0xff] }
   0x3   :  { %v16_v3 = vmax.bf16 %v12_v1, %v8_v0  ;;  %v17_v7 = vmax.bf16 %v13_v4, %v9_v2  ;;  %v18_v8 = vmax.bf16 %v14_v6, %v10_v5  ;;  %v11_v9 = vld [vmem:[%s74_s0 + $0x18] sm:$0xff] }
   0x4   :  { %v15_v10 = vld [vmem:[%s74_s0 + $0x38] sm:$0xff] }
   0x5   :  { %20 = vst [vmem:[%s75_s1] sm:$0xff] %v16_v3  ;;  %v19_v11 = vmax.bf16 %v15_v10, %v11_v9  ;;  %21 = vst [vmem:[%s75_s1 + $0x8] sm:$0xff] %v17_v7 }
   0x6   :  { %22 = vst [vmem:[%s75_s1 + $0x10] sm:$0xff] %v18_v8 }
   0x7   :  { %23 = vst [vmem:[%s75_s1 + $0x18] sm:$0xff] %v19_v11 }

// kernel: cnn_model_forward.28
= control target key start
LH: loop header
LB: loop body
LE: loop exit
PB: predicated region body
PF: predicated region fallthrough
CT: control target
= control target key end

     0   :  { %s48_s0 = inlined_call_operand.vmem [shape: bf16[8,1024], index: 0, kind: input, shape index: {}]   ;;  %s49_s1 = inlined_call_operand.vmem [shape: bf16[8,512], index: 1, kind: output, shape index: {}]  }
   0x1   :  { %v8_v0 = vld [vmem:[%s48_s0] sm:$0xff]  ;;  %v10_v1 = vld [vmem:[%s48_s0 + $0x10] sm:$0xff]  ;;  %v9_v2 = vld [vmem:[%s48_s0 + $0x8] sm:$0xff] }
   0x2   :  { %v12_v3 = vmax.bf16 %v10_v1, %v8_v0  ;;  %v11_v4 = vld [vmem:[%s48_s0 + $0x18] sm:$0xff] }
   0x3   :  { %v13_v5 = vmax.bf16 %v11_v4, %v9_v2 }
   0x4   :  { %14 = vst [vmem:[%s49_s1] sm:$0xff] %v12_v3 }
   0x5   :  { %15 = vst [vmem:[%s49_s1 + $0x8] sm:$0xff] %v13_v5 }

// kernel: cnn_model_forward.29
= control target key start
LH: loop header
LB: loop body
LE: loop exit
PB: predicated region body
PF: predicated region fallthrough
CT: control target
= control target key end

     0   :  { %s1146_s15 = smov 0   ;;  %s1148_s16 = smov 0   ;;  %s1369_s0 = inlined_call_operand.vmem [shape: bf16[8,4608], index: 0, kind: input, shape index: {}]   ;;  %s1370_s1 = inlined_call_operand.vmem [shape: bf16[4608,1024], index: 1, kind: input, shape index: {}]   ;;  %s1371_s2 = inlined_call_operand.vmem [shape: f32[1,1024], index: 2, kind: input, shape index: {}]   ;;  %s1372_s3 = inlined_call_operand.vmem [shape: f32[1,1024], index: 3, kind: input, shape index: {}]   ;;  %s1373_s4 = inlined_call_operand.vmem [shape: bf16[8,1024], index: 4, kind: output, shape index: {}]  }
   0x1   :  { %s1150_s17 = smov 0   ;;  %s1152_s18 = smov 0  }
   0x2   :  { %s1154_s19 = smov 0   ;;  %s1156_s20 = smov 0  }
   0x3   :  { %s1158_s21 = smov 0  }
   0x4 LB: > { %s26_s22 = sadd.s32 1, %s1110_s19  ;;  %s29_s23 = sadd.s32 1, %s1114_s20  ;;  %s1118_s21 = sphi %s1158_s21, %s14_s21   ;;  %s1114_s20 = sphi %s1156_s20, %s1379_s20   ;;  %s1110_s19 = sphi %s1154_s19, %s1378_s19   ;;  %s1106_s18 = sphi %s1152_s18, %s1377_s18   ;;  %s1102_s17 = sphi %s1150_s17, %s1376_s17   ;;  %s1098_s16 = sphi %s1148_s16, %s1375_s16   ;;  %s1094_s15 = sphi %s1146_s15, %s1374_s15  }
   0x5   : > { %p27_p0 = scmp.ge.s32.totalorder %s26_s22, 18  ;;  %p77_p1 = scmp.ne.s32.totalorder %s1098_s16, %s1094_s15 }
   0x6   : > { %p78_p2 = scmp.eq.s32.totalorder %s1118_s21, 0  ;;  %s70_s27 = sadd.s32 1, %s1098_s16 }
   0x7   : > { %s1381_s22 = smov (%p27_p0, %s26_s22), 0  ;;  %s1383_s23 = smov (!%p27_p0, %s29_s23), %s1114_s20 }
   0x8   : > { %p79_p3 = por %p78_p2, %p77_p1  ;;  %p31_p4 = scmp.ge.s32.totalorder %s1383_s23, 4 }
   0x9   : > { %s65_s24 = ssub.s32 %s1110_s19, %s1381_s22  ;;  %p902_p6 = scmp.ge.s32.totalorder %s1118_s21, 72 }
   0xa   : > { %s1385_s23 = smov (%p31_p4, %s1383_s23), 0 }
   0xb   : > { %s66_s25 = ssub.s32 %s1114_s20, %s1385_s23  ;;  %183 = sbr.rel (%p902_p6) target bundleno = 55 (0x37), region = 16 }
   0xc   : > { %s67_s26 = sor.u32 %s66_s25, %s65_s24 }
   0xd   : > { %p68_p5 = scmp.eq.s32.totalorder %s67_s26, 0 }
   0xf   : > { %s1197_s28 = scalar_select %p68_p5, %s1098_s16, %s70_s27  }
  0x10   : > { %199 = sbr.rel (!%p79_p3) target bundleno = 55 (0x37), region = 24  ;;  %s201_s29 = sand.u32 (%p79_p3), 1, %s1098_s16  }
  0x11   : > { %s905_s30 = sshll.u32 (%p79_p3), %s1114_s20, 1  ;;  %s903_s5 = sshll.u32 (%p79_p3), %s201_s29, 8 }
  0x12   : > { %s955_s6 = sshll.u32 (%p79_p3), %s1110_s19, 8  ;;  %s1211_s12 = scalar_lea.vmem (%p79_p3), [#allocation3], %s903_s5 }
  0x13   : > { %s207_s7 = sadd.s32 (%p79_p3), %s955_s6, %s905_s30 }
  0x14   : > { %s907_s8 = sshll.u32 (%p79_p3), %s207_s7, 2 }
  0x15   : > { %s1206_s11 = scalar_lea.vmem %s1370_s1, %s907_s8 }
  0x16   : > { %v300_v0 = vld [vmem:[%s1206_s11] sm:$0xff] }
  0x17   : > { %v302_v1 = vld [vmem:[%s1206_s11 + $0x20] sm:$0xff]  ;;  %301 = vst [vmem:[%s1211_s12] sm:$0xff] %v300_v0 }
  0x18   : > { %v304_v2 = vld [vmem:[%s1206_s11 + $0x40] sm:$0xff]  ;;  %303 = vst [vmem:[%s1211_s12 + $0x8] sm:$0xff] %v302_v1 }
  0x19   : > { %305 = vst [vmem:[%s1211_s12 + $0x10] sm:$0xff] %v304_v2  ;;  %v306_v3 = vld [vmem:[%s1206_s11 + $0x60] sm:$0xff] }
  0x1a   : > { %v308_v4 = vld [vmem:[%s1206_s11 + $0x80] sm:$0xff]  ;;  %307 = vst [vmem:[%s1211_s12 + $0x18] sm:$0xff] %v306_v3 }
  0x1b   : > { %v310_v5 = vld [vmem:[%s1206_s11 + $0xa0] sm:$0xff]  ;;  %309 = vst [vmem:[%s1211_s12 + $0x20] sm:$0xff] %v308_v4 }
  0x1c   : > { %311 = vst [vmem:[%s1211_s12 + $0x28] sm:$0xff] %v310_v5  ;;  %v312_v6 = vld [vmem:[%s1206_s11 + $0xc0] sm:$0xff] }
  0x1d   : > { %v314_v7 = vld [vmem:[%s1206_s11 + $0xe0] sm:$0xff]  ;;  %313 = vst [vmem:[%s1211_s12 + $0x30] sm:$0xff] %v312_v6 }
  0x1e   : > { %v316_v8 = vld [vmem:[%s1206_s11 + $0x100] sm:$0xff]  ;;  %315 = vst [vmem:[%s1211_s12 + $0x38] sm:$0xff] %v314_v7 }
  0x1f   : > { %317 = vst [vmem:[%s1211_s12 + $0x40] sm:$0xff] %v316_v8  ;;  %v318_v9 = vld [vmem:[%s1206_s11 + $0x120] sm:$0xff] }
  0x20   : > { %v320_v10 = vld [vmem:[%s1206_s11 + $0x140] sm:$0xff]  ;;  %319 = vst [vmem:[%s1211_s12 + $0x48] sm:$0xff] %v318_v9 }
  0x21   : > { %v322_v11 = vld [vmem:[%s1206_s11 + $0x160] sm:$0xff]  ;;  %321 = vst [vmem:[%s1211_s12 + $0x50] sm:$0xff] %v320_v10 }
  0x22   : > { %323 = vst [vmem:[%s1211_s12 + $0x58] sm:$0xff] %v322_v11  ;;  %v324_v12 = vld [vmem:[%s1206_s11 + $0x180] sm:$0xff] }
  0x23   : > { %v326_v13 = vld [vmem:[%s1206_s11 + $0x1a0] sm:$0xff]  ;;  %325 = vst [vmem:[%s1211_s12 + $0x60] sm:$0xff] %v324_v12 }
  0x24   : > { %v328_v14 = vld [vmem:[%s1206_s11 + $0x1c0] sm:$0xff]  ;;  %327 = vst [vmem:[%s1211_s12 + $0x68] sm:$0xff] %v326_v13 }
  0x25   : > { %329 = vst [vmem:[%s1211_s12 + $0x70] sm:$0xff] %v328_v14  ;;  %v330_v15 = vld [vmem:[%s1206_s11 + $0x1e0] sm:$0xff] }
  0x26   : > { %v332_v16 = vld [vmem:[%s1206_s11 + $0x200] sm:$0xff]  ;;  %331 = vst [vmem:[%s1211_s12 + $0x78] sm:$0xff] %v330_v15 }
  0x27   : > { %v334_v17 = vld [vmem:[%s1206_s11 + $0x220] sm:$0xff]  ;;  %333 = vst [vmem:[%s1211_s12 + $0x80] sm:$0xff] %v332_v16 }
  0x28   : > { %335 = vst [vmem:[%s1211_s12 + $0x88] sm:$0xff] %v334_v17  ;;  %v336_v18 = vld [vmem:[%s1206_s11 + $0x240] sm:$0xff] }
  0x29   : > { %v338_v19 = vld [vmem:[%s1206_s11 + $0x260] sm:$0xff]  ;;  %337 = vst [vmem:[%s1211_s12 + $0x90] sm:$0xff] %v336_v18 }
  0x2a   : > { %v340_v20 = vld [vmem:[%s1206_s11 + $0x280] sm:$0xff]  ;;  %339 = vst [vmem:[%s1211_s12 + $0x98] sm:$0xff] %v338_v19 }
  0x2b   : > { %341 = vst [vmem:[%s1211_s12 + $0xa0] sm:$0xff] %v340_v20  ;;  %v342_v21 = vld [vmem:[%s1206_s11 + $0x2a0] sm:$0xff] }
  0x2c   : > { %v344_v22 = vld [vmem:[%s1206_s11 + $0x2c0] sm:$0xff]  ;;  %343 = vst [vmem:[%s1211_s12 + $0xa8] sm:$0xff] %v342_v21 }
  0x2d   : > { %v346_v23 = vld [vmem:[%s1206_s11 + $0x2e0] sm:$0xff]  ;;  %345 = vst [vmem:[%s1211_s12 + $0xb0] sm:$0xff] %v344_v22 }
  0x2e   : > { %347 = vst [vmem:[%s1211_s12 + $0xb8] sm:$0xff] %v346_v23  ;;  %v348_v24 = vld [vmem:[%s1206_s11 + $0x300] sm:$0xff] }
  0x2f   : > { %v350_v25 = vld [vmem:[%s1206_s11 + $0x320] sm:$0xff]  ;;  %349 = vst [vmem:[%s1211_s12 + $0xc0] sm:$0xff] %v348_v24 }
  0x30   : > { %v352_v26 = vld [vmem:[%s1206_s11 + $0x340] sm:$0xff]  ;;  %351 = vst [vmem:[%s1211_s12 + $0xc8] sm:$0xff] %v350_v25 }
  0x31   : > { %353 = vst [vmem:[%s1211_s12 + $0xd0] sm:$0xff] %v352_v26  ;;  %v354_v27 = vld [vmem:[%s1206_s11 + $0x360] sm:$0xff] }
  0x32   : > { %v356_v28 = vld [vmem:[%s1206_s11 + $0x380] sm:$0xff]  ;;  %355 = vst [vmem:[%s1211_s12 + $0xd8] sm:$0xff] %v354_v27 }
  0x33   : > { %v358_v29 = vld [vmem:[%s1206_s11 + $0x3a0] sm:$0xff]  ;;  %357 = vst [vmem:[%s1211_s12 + $0xe0] sm:$0xff] %v356_v28 }
  0x34   : > { %359 = vst [vmem:[%s1211_s12 + $0xe8] sm:$0xff] %v358_v29  ;;  %v360_v30 = vld [vmem:[%s1206_s11 + $0x3c0] sm:$0xff] }
  0x35   : > { %v362_v31 = vld [vmem:[%s1206_s11 + $0x3e0] sm:$0xff]  ;;  %361 = vst [vmem:[%s1211_s12 + $0xf0] sm:$0xff] %v360_v30 }
  0x36   : > { %363 = vst [vmem:[%s1211_s12 + $0xf8] sm:$0xff] %v362_v31 }
  0x37 PF: > { %p908_p7 = scmp.ge.s32.totalorder %s1118_s21, 1  ;;  %p384_p8 = scmp.lt.s32.totalorder %s1118_s21, 73 }
  0x39   : > { %p385_p9 = pnand %p908_p7, %p384_p8 }
  0x3a   : > { %s391_s13 = sand.u32 (!%p385_p9), 1, %s1094_s15   ;;  %s910_s14 = sshll.u32 (!%p385_p9), %s1102_s17, 1 }
  0x3b   : > { %388 = sbr.rel (%p385_p9) target bundleno = 355 (0x163), region = 70  ;;  %s909_s24 = sshll.u32 (!%p385_p9), %s391_s13, 8 }
  0x3c   : > { %p440_p10 = scmp.lt.s32.totalorder (!%p385_p9), %s910_s14, 35  ;;  %s912_s25 = sshll.u32 (!%p385_p9), %s1106_s18, 1 }
  0x3d   : > { %p450_p11 = scmp.lt.s32.totalorder (!%p385_p9), %s912_s25, 7  ;;  %s1300_s13 = scalar_lea.vmem (!%p385_p9), [#allocation3], %s909_s24 }
  0x3e   : > { %p916_p12 = scmp.ne.s32.totalorder (!%p385_p9), %s1102_s17, 0 }
  0x40   : > { %s1387_s14 = smov (!%p440_p10, %s910_s14), 35  ;;  %s1389_s25 = smov (!%p450_p11, %s912_s25), 7 }
  0x41   : > { %s911_s26 = sshll.u32 %s1387_s14, 2  ;;  %s452_s15 = scalar_lea.vmem %s1371_s2, %s1389_s25 }
  0x42   : > { %s1282_s30 = scalar_lea.vmem %s1369_s0, %s911_s26  ;;  %s457_s18 = scalar_lea.vmem %s1372_s3, %s1389_s25 }
  0x43   : > { %s915_s9 = sshll.u32 %s1389_s25, 2  ;;  %472 = sbr.rel (%p916_p12) target bundleno = 74 (0x4a), region = 78 }
  0x44   : > { %s1298_s12 = scalar_lea.vmem %s1373_s4, %s915_s9 }
  0x48   : > { %v1120_v32 = vmov 0.0  }
  0x49   : > { %473 = vst [vmem:[#allocation2] sm:$0xff] %v1120_v32  ;;  %474 = vst [vmem:[#allocation2 + $0x8] sm:$0xff] %v1120_v32 }
  0x4a PF: > { %v1014_v33 = vld [vmem:[%s1300_s13 + $0x74] ss:$8 sps:$4 sm:$0xff]   ;;  %v1016_v34 = vld [vmem:[%s1300_s13 + $0x70] ss:$8 sps:$4 sm:$0xff]   ;;  %v1017_v35 = vld [vmem:[%s1300_s13 + $0x64] ss:$8 sps:$4 sm:$0xff]  }
  0x4b   : > { %677 = vmatprep.subr.bf16.mxu0 %v1014_v33  ;;  %v1019_v36 = vld [vmem:[%s1300_s13 + $0x60] ss:$8 sps:$4 sm:$0xff]   ;;  %v1020_v37 = vld [vmem:[%s1300_s13 + $0x54] ss:$8 sps:$4 sm:$0xff]   ;;  %v1022_v38 = vld [vmem:[%s1300_s13 + $0x50] ss:$8 sps:$4 sm:$0xff]  }
  0x4c   : > { %678 = vmatpush1.bf16.msra.mxu0 %v1016_v34  ;;  %v1023_v39 = vld [vmem:[%s1300_s13 + $0x44] ss:$8 sps:$4 sm:$0xff]   ;;  %v1025_v40 = vld [vmem:[%s1300_s13 + $0x40] ss:$8 sps:$4 sm:$0xff]   ;;  %v1026_v41 = vld [vmem:[%s1300_s13 + $0x34] ss:$8 sps:$4 sm:$0xff]  }
  0x4d   : > { %679 = vmatprep.subr.bf16.mxu0 %v1017_v35  ;;  %v1028_v42 = vld [vmem:[%s1300_s13 + $0x30] ss:$8 sps:$4 sm:$0xff]   ;;  %v1029_v43 = vld [vmem:[%s1300_s13 + $0x24] ss:$8 sps:$4 sm:$0xff]   ;;  %v1031_v44 = vld [vmem:[%s1300_s13 + $0x20] ss:$8 sps:$4 sm:$0xff]  }
  0x4e   : > { %v1032_v45 = vld [vmem:[%s1300_s13 + $0x14] ss:$8 sps:$4 sm:$0xff]   ;;  %v1034_v48 = vld [vmem:[%s1300_s13 + $0x10] ss:$8 sps:$4 sm:$0xff]   ;;  %v1035_v49 = vld [vmem:[%s1300_s13 + $0x4] ss:$8 sps:$4 sm:$0xff]  }
  0x4f   : > { %v477_v46 = vld [vmem:[%s1282_s30] sm:$0xff]  ;;  %v1037_v50 = vld [vmem:[%s1300_s13] ss:$8 sps:$4 sm:$0xff]   ;;  %v1041_v53 = vld [vmem:[%s1300_s13 + $0xe4] ss:$8 sps:$4 sm:$0xff]   ;;  %p951_p13 = scmp.ne.s32.totalorder %s1102_s17, 17 }
  0x50   : > { %680 = vmatpush1.bf16.msra.mxu0 %v1019_v36  ;;  %v918_v47 = vcombine.high %v477_v46, %v477_v46  ;;  %v1038_v51 = vld [vmem:[%s1300_s13 + $0xf4] ss:$8 sps:$4 sm:$0xff]   ;;  %v1040_v52 = vld [vmem:[%s1300_s13 + $0xf0] ss:$8 sps:$4 sm:$0xff]   ;;  %v1043_v54 = vld [vmem:[%s1300_s13 + $0xe0] ss:$8 sps:$4 sm:$0xff]   ;;  %v917_v3 = vcombine.low %v477_v46, %v477_v46 }
  0x51   : > { %681 = vmatprep.subr.bf16.mxu0 %v1020_v37  ;;  %v1044_v55 = vld [vmem:[%s1300_s13 + $0xd4] ss:$8 sps:$4 sm:$0xff]   ;;  %v1046_v56 = vld [vmem:[%s1300_s13 + $0xd0] ss:$8 sps:$4 sm:$0xff]   ;;  %v1047_v57 = vld [vmem:[%s1300_s13 + $0xc4] ss:$8 sps:$4 sm:$0xff]  }
  0x52   : > { %709 = vmatprep.mubr.bf16.mxu0 %v918_v47  ;;  %v1049_v58 = vld [vmem:[%s1300_s13 + $0xc0] ss:$8 sps:$4 sm:$0xff]   ;;  %v1050_v59 = vld [vmem:[%s1300_s13 + $0xb4] ss:$8 sps:$4 sm:$0xff]   ;;  %v1052_v60 = vld [vmem:[%s1300_s13 + $0xb0] ss:$8 sps:$4 sm:$0xff]  }
  0x53   : > { %v1053_v61 = vld [vmem:[%s1300_s13 + $0xa4] ss:$8 sps:$4 sm:$0xff]   ;;  %v1055_v62 = vld [vmem:[%s1300_s13 + $0xa0] ss:$8 sps:$4 sm:$0xff]   ;;  %v1056_v63 = vld [vmem:[%s1300_s13 + $0x94] ss:$8 sps:$4 sm:$0xff]  }
  0x54   : > { %682 = vmatpush1.bf16.msra.mxu0 %v1022_v38  ;;  %v1058_v0 = vld [vmem:[%s1300_s13 + $0x90] ss:$8 sps:$4 sm:$0xff]   ;;  %v1059_v1 = vld [vmem:[%s1300_s13 + $0x84] ss:$8 sps:$4 sm:$0xff]   ;;  %v1061_v2 = vld [vmem:[%s1300_s13 + $0x80] ss:$8 sps:$4 sm:$0xff]  }
  0x55   : > { %683 = vmatprep.subr.bf16.mxu0 %v1023_v39  ;;  %v475_v4 = vld [vmem:[#allocation2] sm:$0xff]  ;;  %v476_v6 = vld [vmem:[#allocation2 + $0x8] sm:$0xff] }
  0x58   : > { %684 = vmatpush1.bf16.msra.mxu0 %v1025_v40 }
  0x59   : > { %685 = vmatprep.subr.bf16.mxu0 %v1026_v41 }
  0x5c   : > { %686 = vmatpush1.bf16.msra.mxu0 %v1028_v42 }
  0x5d   : > { %687 = vmatprep.subr.bf16.mxu0 %v1029_v43 }
  0x60   : > { %688 = vmatpush1.bf16.msra.mxu0 %v1031_v44 }
  0x61   : > { %689 = vmatprep.subr.bf16.mxu0 %v1032_v45 }
  0x64   : > { %690 = vmatpush1.bf16.msra.mxu0 %v1034_v48 }
  0x65   : > { %691 = vmatprep.subr.bf16.mxu0 %v1035_v49 }
  0x68   : > { %692 = vmatpush1.bf16.msra.mxu0 %v1037_v50 }
  0x69   : > { %693 = vmatprep.subr.bf16.mxu0 %v1038_v51 }
  0x6c   : > { %694 = vmatpush2.bf16.msra.mxu0 %v1040_v52 }
  0x6d   : > { %695 = vmatprep.subr.bf16.mxu0 %v1041_v53 }
  0x70   : > { %696 = vmatpush2.bf16.msra.mxu0 %v1043_v54 }
  0x71   : > { %697 = vmatprep.subr.bf16.mxu0 %v1044_v55 }
  0x74   : > { %698 = vmatpush2.bf16.msra.mxu0 %v1046_v56 }
  0x75   : > { %699 = vmatprep.subr.bf16.mxu0 %v1047_v57 }
  0x78   : > { %700 = vmatpush2.bf16.msra.mxu0 %v1049_v58 }
  0x79   : > { %701 = vmatprep.subr.bf16.mxu0 %v1050_v59 }
  0x7c   : > { %702 = vmatpush2.bf16.msra.mxu0 %v1052_v60 }
  0x7d   : > { %703 = vmatprep.subr.bf16.mxu0 %v1053_v61 }
  0x80   : > { %704 = vmatpush2.bf16.msra.mxu0 %v1055_v62 }
  0x81   : > { %705 = vmatprep.subr.bf16.mxu0 %v1056_v63 }
  0x84   : > { %706 = vmatpush2.bf16.msra.mxu0 %v1058_v0 }
  0x85   : > { %707 = vmatprep.subr.bf16.mxu0 %v1059_v1 }
  0x88   : > { %708 = vmatpush2.bf16.msra.mxu0 %v1061_v2 }
  0x8b   : > { %710 = vmatmul.mubr.bf16.vlgmr.msra.gmra.mxu0 %v917_v3 }
 0x14b   : > { %v711_v5 = vpop.f32.mrf.mxu0 }
 0x14c   : > { %v718_v7 = vadd.f32 %v711_v5, %v475_v4 }
 0x14d   : > { %v713_v8 = vpop.f32.mrf.mxu0  ;;  %725 = sbr.rel (%p951_p13) target bundleno = 355 (0x163), region = 82 }
 0x14e   : > { %720 = vst [vmem:[#allocation2] sm:$0xff] %v718_v7  ;;  %v719_v9 = vadd.f32 %v713_v8, %v476_v6 }
 0x14f   : > { %v715_v10 = vpop.f32.mrf.mxu0 }
 0x150   : > { %721 = vst [vmem:[#allocation2 + $0x8] sm:$0xff] %v719_v9 }
 0x151   : > { %v716_v11 = vpop.f32.mrf.mxu0 }
 0x152   : > { %v730_v12 = vlaneseq  ;;  %v728_v14 = vld [vmem:[%s452_s15] sm:$0x3] }
 0x153   : > { %v742_v15 = vld [vmem:[%s457_s18] sm:$0x3] }
 0x154   : > { %v731_v13 = vshrl.u32 %v730_v12, 7 }
 0x155   : > { %v726_v18 = vld [vmem:[#allocation2] sm:$0xff] }
 0x156   : > { %v732_v16 = vsub.s32 0, %v731_v13  ;;  %v736_v17 = vsub.s32 1, %v731_v13 }
 0x157   : > { %v727_v19 = vld [vmem:[#allocation2 + $0x8] sm:$0xff] }
 0x158   : > { %v733_v20 = vrot.slane %v728_v14, %v732_v16  ;;  %v737_v21 = vrot.slane %v728_v14, %v736_v17  ;;  %v747_v22 = vrot.slane %v742_v15, %v732_v16  ;;  %v751_v23 = vrot.slane %v742_v15, %v736_v17 }
 0x15a   : > { %v740_v24 = vmul.f32 %v733_v20, %v726_v18  ;;  %v741_v25 = vmul.f32 %v737_v21, %v727_v19 }
 0x15c   : > { %v754_v26 = vadd.f32 %v747_v22, %v740_v24  ;;  %v755_v27 = vadd.f32 %v751_v23, %v741_v25 }
 0x15e   : > { %v756_v28 = vmax.f32 %v754_v26, 0.0  ;;  %v757_v29 = vmax.f32 %v755_v27, 0.0 }
 0x160   : > { %v956_v30 = vpack.c.bf16 %v757_v29, %v756_v28 }
 0x162   : > { %766 = vst [vmem:[%s1298_s12] sm:$0xff] %v956_v30 }
 0x163 PF: > { %s14_s21 = sadd.s32 1, %s1118_s21   ;;  %s1374_s15 = smov %s1098_s16 }
 0x164   : > { %p11_p0 = scmp.ge.s32.totalorder %s14_s21, 74   ;;  %s1375_s16 = smov %s1197_s28 }
 0x165   : > { %s1376_s17 = smov %s1110_s19  ;;  %s1377_s18 = smov %s1114_s20 }
 0x166   : > { %s1378_s19 = smov %s1381_s22  ;;  %s1379_s20 = smov %s1385_s23 }
 0x167   :  { %13 = sbr.rel (!%p11_p0) target bundleno = 4 (0x4), region = 126 }

// kernel: cnn_model_forward.30
= control target key start
LH: loop header
LB: loop body
LE: loop exit
PB: predicated region body
PF: predicated region fallthrough
CT: control target
= control target key end

     0   :  { %s48_s0 = inlined_call_operand.vmem [shape: bf16[2,4096], index: 0, kind: input, shape index: {}]   ;;  %s49_s1 = inlined_call_operand.vmem [shape: bf16[2,2048], index: 1, kind: output, shape index: {}]  }
   0x1   :  { %v8_v0 = vld [vmem:[%s48_s0] sm:$0xff]  ;;  %v10_v1 = vld [vmem:[%s48_s0 + $0x10] sm:$0xff]  ;;  %v9_v2 = vld [vmem:[%s48_s0 + $0x8] sm:$0xff] }
   0x2   :  { %v12_v3 = vmax.bf16 %v10_v1, %v8_v0  ;;  %v11_v4 = vld [vmem:[%s48_s0 + $0x18] sm:$0xff] }
   0x3   :  { %v13_v5 = vmax.bf16 %v11_v4, %v9_v2 }
   0x4   :  { %14 = vst [vmem:[%s49_s1] sm:$0xff] %v12_v3 }
   0x5   :  { %15 = vst [vmem:[%s49_s1 + $0x8] sm:$0xff] %v13_v5 }

// kernel: cnn_model_forward.31
= control target key start
LH: loop header
LB: loop body
LE: loop exit
PB: predicated region body
PF: predicated region fallthrough
CT: control target
= control target key end

     0   :  { %s35_s0 = inlined_call_operand.vmem [shape: bf16[2,2048], index: 0, kind: input, shape index: {}]   ;;  %s36_s1 = inlined_call_operand.vmem [shape: bf16[2,1024], index: 1, kind: output, shape index: {}]  }
   0x1   :  { %v8_v0 = vld [vmem:[%s35_s0] sm:$0xff]  ;;  %v9_v1 = vld [vmem:[%s35_s0 + $0x8] sm:$0xff] }
   0x2   :  { %v10_v2 = vmax.bf16 %v9_v1, %v8_v0 }
   0x4   :  { %11 = vst [vmem:[%s36_s1] sm:$0xff] %v10_v2 }

// kernel: cnn_model_forward.32
= control target key start
LH: loop header
LB: loop body
LE: loop exit
PB: predicated region body
PF: predicated region fallthrough
CT: control target
= control target key end

     0   :  { %s1189_s15 = smov 0   ;;  %s1191_s16 = smov 0   ;;  %s1430_s0 = inlined_call_operand.vmem [shape: bf16[2,1024], index: 0, kind: input, shape index: {}]   ;;  %s1431_s1 = inlined_call_operand.vmem [shape: bf16[1024,512], index: 1, kind: input, shape index: {}]   ;;  %s1432_s2 = inlined_call_operand.vmem [shape: f32[1,512], index: 2, kind: input, shape index: {}]   ;;  %s1433_s3 = inlined_call_operand.vmem [shape: f32[1,512], index: 3, kind: input, shape index: {}]   ;;  %s1434_s4 = inlined_call_operand.vmem [shape: bf16[2,512], index: 4, kind: output, shape index: {}]  }
   0x1   :  { %s1193_s17 = smov 0   ;;  %s1195_s18 = smov 0  }
   0x2   :  { %s1197_s19 = smov 0   ;;  %s1199_s20 = smov 0  }
   0x3   :  { %s1201_s21 = smov 0  }
   0x4 LB: > { %s26_s22 = sadd.s32 1, %s1151_s19  ;;  %s29_s23 = sadd.s32 1, %s1155_s20  ;;  %s1159_s21 = sphi %s1201_s21, %s14_s21   ;;  %s1155_s20 = sphi %s1199_s20, %s1440_s20   ;;  %s1151_s19 = sphi %s1197_s19, %s1439_s19   ;;  %s1147_s18 = sphi %s1195_s18, %s1438_s18   ;;  %s1143_s17 = sphi %s1193_s17, %s1437_s17   ;;  %s1139_s16 = sphi %s1191_s16, %s1436_s16   ;;  %s1135_s15 = sphi %s1189_s15, %s1435_s15  }
   0x5   : > { %p27_p0 = scmp.ge.s32.totalorder %s26_s22, 4  ;;  %p77_p1 = scmp.ne.s32.totalorder %s1139_s16, %s1135_s15 }
   0x6   : > { %p78_p2 = scmp.eq.s32.totalorder %s1159_s21, 0  ;;  %s70_s27 = sadd.s32 1, %s1139_s16 }
   0x7   : > { %s1442_s22 = smov (%p27_p0, %s26_s22), 0  ;;  %s1444_s23 = smov (!%p27_p0, %s29_s23), %s1155_s20 }
   0x8   : > { %p79_p3 = por %p78_p2, %p77_p1  ;;  %p31_p4 = scmp.ge.s32.totalorder %s1444_s23, 2 }
   0x9   : > { %s65_s24 = ssub.s32 %s1151_s19, %s1442_s22  ;;  %p946_p6 = scmp.ge.s32.totalorder %s1159_s21, 8 }
   0xa   : > { %s1446_s23 = smov (%p31_p4, %s1444_s23), 0 }
   0xb   : > { %s66_s25 = ssub.s32 %s1155_s20, %s1446_s23  ;;  %183 = sbr.rel (%p946_p6) target bundleno = 39 (0x27), region = 16 }
   0xc   : > { %s67_s26 = sor.u32 %s66_s25, %s65_s24 }
   0xd   : > { %p68_p5 = scmp.eq.s32.totalorder %s67_s26, 0 }
   0xf   : > { %s1240_s28 = scalar_select %p68_p5, %s1139_s16, %s70_s27  }
  0x10   : > { %198 = sbr.rel (!%p79_p3) target bundleno = 39 (0x27), region = 24  ;;  %s200_s29 = sand.u32 (%p79_p3), 1, %s1139_s16  }
  0x11   : > { %s949_s30 = sshll.u32 (%p79_p3), %s1155_s20, 1  ;;  %s947_s5 = sshll.u32 (%p79_p3), %s200_s29, 8 }
  0x12   : > { %s997_s6 = sshll.u32 (%p79_p3), %s1151_s19, 7  ;;  %s1254_s12 = scalar_lea.vmem (%p79_p3), [#allocation3], %s947_s5 }
  0x13   : > { %s206_s7 = sadd.s32 (%p79_p3), %s997_s6, %s949_s30 }
  0x14   : > { %s951_s8 = sshll.u32 (%p79_p3), %s206_s7, 2 }
  0x15   : > { %s1249_s11 = scalar_lea.vmem %s1431_s1, %s951_s8 }
  0x16   : > { %v299_v0 = vld [vmem:[%s1249_s11] sm:$0xff]  ;;  %v301_v1 = vld [vmem:[%s1249_s11 + $0x10] sm:$0xff] }
  0x17   : > { %v303_v2 = vld [vmem:[%s1249_s11 + $0x20] sm:$0xff]  ;;  %300 = vst [vmem:[%s1254_s12] sm:$0xff] %v299_v0  ;;  %302 = vst [vmem:[%s1254_s12 + $0x8] sm:$0xff] %v301_v1  ;;  %v305_v3 = vld [vmem:[%s1249_s11 + $0x30] sm:$0xff] }
  0x18   : > { %304 = vst [vmem:[%s1254_s12 + $0x10] sm:$0xff] %v303_v2  ;;  %v307_v4 = vld [vmem:[%s1249_s11 + $0x40] sm:$0xff]  ;;  %v309_v5 = vld [vmem:[%s1249_s11 + $0x50] sm:$0xff]  ;;  %306 = vst [vmem:[%s1254_s12 + $0x18] sm:$0xff] %v305_v3 }
  0x19   : > { %308 = vst [vmem:[%s1254_s12 + $0x20] sm:$0xff] %v307_v4  ;;  %310 = vst [vmem:[%s1254_s12 + $0x28] sm:$0xff] %v309_v5  ;;  %v311_v6 = vld [vmem:[%s1249_s11 + $0x60] sm:$0xff]  ;;  %v313_v7 = vld [vmem:[%s1249_s11 + $0x70] sm:$0xff] }
  0x1a   : > { %v315_v8 = vld [vmem:[%s1249_s11 + $0x80] sm:$0xff]  ;;  %312 = vst [vmem:[%s1254_s12 + $0x30] sm:$0xff] %v311_v6  ;;  %314 = vst [vmem:[%s1254_s12 + $0x38] sm:$0xff] %v313_v7  ;;  %v317_v9 = vld [vmem:[%s1249_s11 + $0x90] sm:$0xff] }
  0x1b   : > { %316 = vst [vmem:[%s1254_s12 + $0x40] sm:$0xff] %v315_v8  ;;  %v319_v10 = vld [vmem:[%s1249_s11 + $0xa0] sm:$0xff]  ;;  %v321_v11 = vld [vmem:[%s1249_s11 + $0xb0] sm:$0xff]  ;;  %318 = vst [vmem:[%s1254_s12 + $0x48] sm:$0xff] %v317_v9 }
  0x1c   : > { %320 = vst [vmem:[%s1254_s12 + $0x50] sm:$0xff] %v319_v10  ;;  %322 = vst [vmem:[%s1254_s12 + $0x58] sm:$0xff] %v321_v11  ;;  %v323_v12 = vld [vmem:[%s1249_s11 + $0xc0] sm:$0xff]  ;;  %v325_v13 = vld [vmem:[%s1249_s11 + $0xd0] sm:$0xff] }
  0x1d   : > { %v327_v14 = vld [vmem:[%s1249_s11 + $0xe0] sm:$0xff]  ;;  %324 = vst [vmem:[%s1254_s12 + $0x60] sm:$0xff] %v323_v12  ;;  %326 = vst [vmem:[%s1254_s12 + $0x68] sm:$0xff] %v325_v13  ;;  %v329_v15 = vld [vmem:[%s1249_s11 + $0xf0] sm:$0xff] }
  0x1e   : > { %328 = vst [vmem:[%s1254_s12 + $0x70] sm:$0xff] %v327_v14  ;;  %v331_v16 = vld [vmem:[%s1249_s11 + $0x100] sm:$0xff]  ;;  %v333_v17 = vld [vmem:[%s1249_s11 + $0x110] sm:$0xff]  ;;  %330 = vst [vmem:[%s1254_s12 + $0x78] sm:$0xff] %v329_v15 }
  0x1f   : > { %332 = vst [vmem:[%s1254_s12 + $0x80] sm:$0xff] %v331_v16  ;;  %334 = vst [vmem:[%s1254_s12 + $0x88] sm:$0xff] %v333_v17  ;;  %v335_v18 = vld [vmem:[%s1249_s11 + $0x120] sm:$0xff]  ;;  %v337_v19 = vld [vmem:[%s1249_s11 + $0x130] sm:$0xff] }
  0x20   : > { %v339_v20 = vld [vmem:[%s1249_s11 + $0x140] sm:$0xff]  ;;  %336 = vst [vmem:[%s1254_s12 + $0x90] sm:$0xff] %v335_v18  ;;  %338 = vst [vmem:[%s1254_s12 + $0x98] sm:$0xff] %v337_v19  ;;  %v341_v21 = vld [vmem:[%s1249_s11 + $0x150] sm:$0xff] }
  0x21   : > { %340 = vst [vmem:[%s1254_s12 + $0xa0] sm:$0xff] %v339_v20  ;;  %v343_v22 = vld [vmem:[%s1249_s11 + $0x160] sm:$0xff]  ;;  %v345_v23 = vld [vmem:[%s1249_s11 + $0x170] sm:$0xff]  ;;  %342 = vst [vmem:[%s1254_s12 + $0xa8] sm:$0xff] %v341_v21 }
  0x22   : > { %344 = vst [vmem:[%s1254_s12 + $0xb0] sm:$0xff] %v343_v22  ;;  %346 = vst [vmem:[%s1254_s12 + $0xb8] sm:$0xff] %v345_v23  ;;  %v347_v24 = vld [vmem:[%s1249_s11 + $0x180] sm:$0xff]  ;;  %v349_v25 = vld [vmem:[%s1249_s11 + $0x190] sm:$0xff] }
  0x23   : > { %v351_v26 = vld [vmem:[%s1249_s11 + $0x1a0] sm:$0xff]  ;;  %348 = vst [vmem:[%s1254_s12 + $0xc0] sm:$0xff] %v347_v24  ;;  %350 = vst [vmem:[%s1254_s12 + $0xc8] sm:$0xff] %v349_v25  ;;  %v353_v27 = vld [vmem:[%s1249_s11 + $0x1b0] sm:$0xff] }
  0x24   : > { %352 = vst [vmem:[%s1254_s12 + $0xd0] sm:$0xff] %v351_v26  ;;  %v355_v28 = vld [vmem:[%s1249_s11 + $0x1c0] sm:$0xff]  ;;  %v357_v29 = vld [vmem:[%s1249_s11 + $0x1d0] sm:$0xff]  ;;  %354 = vst [vmem:[%s1254_s12 + $0xd8] sm:$0xff] %v353_v27 }
  0x25   : > { %356 = vst [vmem:[%s1254_s12 + $0xe0] sm:$0xff] %v355_v28  ;;  %358 = vst [vmem:[%s1254_s12 + $0xe8] sm:$0xff] %v357_v29  ;;  %v359_v30 = vld [vmem:[%s1249_s11 + $0x1e0] sm:$0xff]  ;;  %v361_v31 = vld [vmem:[%s1249_s11 + $0x1f0] sm:$0xff] }
  0x26   : > { %360 = vst [vmem:[%s1254_s12 + $0xf0] sm:$0xff] %v359_v30  ;;  %362 = vst [vmem:[%s1254_s12 + $0xf8] sm:$0xff] %v361_v31 }
  0x27 PF: > { %p952_p7 = scmp.ge.s32.totalorder %s1159_s21, 1  ;;  %p383_p8 = scmp.lt.s32.totalorder %s1159_s21, 9 }
  0x29   : > { %p384_p9 = pnand %p952_p7, %p383_p8 }
  0x2a   : > { %s390_s13 = sand.u32 (!%p384_p9), 1, %s1135_s15   ;;  %s954_s14 = sshll.u32 (!%p384_p9), %s1143_s17, 1 }
  0x2b   : > { %387 = sbr.rel (%p384_p9) target bundleno = 348 (0x15c), region = 70  ;;  %s953_s24 = sshll.u32 (!%p384_p9), %s390_s13, 8 }
  0x2c   : > { %p437_p10 = scmp.lt.s32.totalorder (!%p384_p9), %s954_s14, 7  ;;  %s955_s25 = sshll.u32 (!%p384_p9), %s1147_s18, 1 }
  0x2d   : > { %p446_p11 = scmp.lt.s32.totalorder (!%p384_p9), %s955_s25, 3  ;;  %s1342_s11 = scalar_lea.vmem (!%p384_p9), [#allocation3], %s953_s24 }
  0x2e   : > { %p958_p12 = scmp.ne.s32.totalorder (!%p384_p9), %s1143_s17, 0 }
  0x30   : > { %s1448_s14 = smov (!%p437_p10, %s954_s14), 7  ;;  %s1450_s25 = smov (!%p446_p11, %s955_s25), 3 }
  0x31   : > { %s441_s29 = scalar_lea.vmem %s1430_s0, %s1448_s14  ;;  %s448_s15 = scalar_lea.vmem %s1432_s2, %s1450_s25 }
  0x32   : > { %s453_s18 = scalar_lea.vmem %s1433_s3, %s1450_s25  ;;  %s462_s10 = scalar_lea.vmem %s1434_s4, %s1450_s25 }
  0x33   : > { %467 = sbr.rel (%p958_p12) target bundleno = 58 (0x3a), region = 78 }
  0x38   : > { %v1161_v32 = vmov 0.0  }
  0x39   : > { %468 = vst [vmem:[#allocation2] sm:$0xf] %v1161_v32 }
  0x3a PF: > { %v1057_v33 = vld [vmem:[%s1342_s11 + $0x74] ss:$8 sps:$4 sm:$0xff]   ;;  %v1059_v34 = vld [vmem:[%s1342_s11 + $0x70] ss:$8 sps:$4 sm:$0xff]   ;;  %v1060_v35 = vld [vmem:[%s1342_s11 + $0x64] ss:$8 sps:$4 sm:$0xff]   ;;  %v515_v44 = vlaneseq }
  0x3b   : > { %688 = vmatprep.subr.bf16.mxu0 %v1057_v33  ;;  %v1062_v36 = vld [vmem:[%s1342_s11 + $0x60] ss:$8 sps:$4 sm:$0xff]   ;;  %v1063_v37 = vld [vmem:[%s1342_s11 + $0x54] ss:$8 sps:$4 sm:$0xff]   ;;  %v1065_v38 = vld [vmem:[%s1342_s11 + $0x50] ss:$8 sps:$4 sm:$0xff]  }
  0x3c   : > { %689 = vmatpush1.bf16.msra.mxu0 %v1059_v34  ;;  %v1066_v39 = vld [vmem:[%s1342_s11 + $0x44] ss:$8 sps:$4 sm:$0xff]   ;;  %v1068_v40 = vld [vmem:[%s1342_s11 + $0x40] ss:$8 sps:$4 sm:$0xff]   ;;  %v1069_v41 = vld [vmem:[%s1342_s11 + $0x34] ss:$8 sps:$4 sm:$0xff]  }
  0x3d   : > { %690 = vmatprep.subr.bf16.mxu0 %v1060_v35  ;;  %v1162_v42 = vmov 1966171168   ;;  %v1071_v45 = vld [vmem:[%s1342_s11 + $0x30] ss:$8 sps:$4 sm:$0xff]   ;;  %v1072_v46 = vld [vmem:[%s1342_s11 + $0x24] ss:$8 sps:$4 sm:$0xff]  }
  0x3e   : > { %v513_v43 = vunpack.c.l.s4 %v1162_v42  ;;  %v1356_v48 = vshrl.u32 %v515_v44, 7  ;;  %v1074_v49 = vld [vmem:[%s1342_s11 + $0x20] ss:$8 sps:$4 sm:$0xff]   ;;  %v1075_v50 = vld [vmem:[%s1342_s11 + $0x14] ss:$8 sps:$4 sm:$0xff]   ;;  %p992_p13 = scmp.ne.s32.totalorder %s1143_s17, 3 }
  0x3f   : > { %v959_v52 = vld.sshfl [vmem:[%s441_s29] sm:$0x11 pattern:$0x75316420]  ;;  %v1077_v54 = vld [vmem:[%s1342_s11 + $0x10] ss:$8 sps:$4 sm:$0xff]  }
  0x40   : > { %691 = vmatpush1.bf16.msra.mxu0 %v1062_v36  ;;  %v514_v47 = vunpack.c.0.s8 %v513_v43  ;;  %v511_v53 = vcombine.high %v959_v52, %v959_v52  ;;  %v1078_v55 = vld [vmem:[%s1342_s11 + $0x4] ss:$8 sps:$4 sm:$0xff]   ;;  %v1080_v57 = vld [vmem:[%s1342_s11] ss:$8 sps:$4 sm:$0xff]   ;;  %v1081_v58 = vld [vmem:[%s1342_s11 + $0xf4] ss:$8 sps:$4 sm:$0xff]  }
  0x41   : > { %692 = vmatprep.subr.bf16.mxu0 %v1063_v37  ;;  %v1083_v59 = vld [vmem:[%s1342_s11 + $0xf0] ss:$8 sps:$4 sm:$0xff]   ;;  %v1084_v60 = vld [vmem:[%s1342_s11 + $0xe4] ss:$8 sps:$4 sm:$0xff]   ;;  %v1086_v61 = vld [vmem:[%s1342_s11 + $0xe0] ss:$8 sps:$4 sm:$0xff]  }
  0x42   : > { %v1361_v51 = vsub.s32 %v514_v47, %v1356_v48  ;;  %v1087_v62 = vld [vmem:[%s1342_s11 + $0xd4] ss:$8 sps:$4 sm:$0xff]   ;;  %v1089_v63 = vld [vmem:[%s1342_s11 + $0xd0] ss:$8 sps:$4 sm:$0xff]   ;;  %v1090_v0 = vld [vmem:[%s1342_s11 + $0xc4] ss:$8 sps:$4 sm:$0xff]  }
  0x43   : > { %v1092_v1 = vld [vmem:[%s1342_s11 + $0xc0] ss:$8 sps:$4 sm:$0xff]   ;;  %v1093_v2 = vld [vmem:[%s1342_s11 + $0xb4] ss:$8 sps:$4 sm:$0xff]   ;;  %v1095_v3 = vld [vmem:[%s1342_s11 + $0xb0] ss:$8 sps:$4 sm:$0xff]  }
  0x44   : > { %693 = vmatpush1.bf16.msra.mxu0 %v1065_v38  ;;  %v525_v56 = vrot.slane %v511_v53, %v1361_v51  ;;  %v1096_v4 = vld [vmem:[%s1342_s11 + $0xa4] ss:$8 sps:$4 sm:$0xff]   ;;  %v1098_v5 = vld [vmem:[%s1342_s11 + $0xa0] ss:$8 sps:$4 sm:$0xff]   ;;  %v1099_v6 = vld [vmem:[%s1342_s11 + $0x94] ss:$8 sps:$4 sm:$0xff]   ;;  %v518_v10 = vrot.slane %v959_v52, %v1361_v51 }
  0x45   : > { %694 = vmatprep.subr.bf16.mxu0 %v1066_v39  ;;  %v1101_v7 = vld [vmem:[%s1342_s11 + $0x90] ss:$8 sps:$4 sm:$0xff]   ;;  %v1102_v8 = vld [vmem:[%s1342_s11 + $0x84] ss:$8 sps:$4 sm:$0xff]   ;;  %v1104_v9 = vld [vmem:[%s1342_s11 + $0x80] ss:$8 sps:$4 sm:$0xff]  }
  0x46   : > { %720 = vmatprep.mubr.bf16.mxu0 %v525_v56  ;;  %v1163_v11 = vmov 1983009808   ;;  %v469_v18 = vld [vmem:[#allocation2] sm:$0xf] }
  0x47   : > { %v733_v12 = vunpack.c.l.s4 %v1163_v11 }
  0x48   : > { %695 = vmatpush1.bf16.msra.mxu0 %v1068_v40 }
  0x49   : > { %696 = vmatprep.subr.bf16.mxu0 %v1069_v41  ;;  %v734_v13 = vunpack.c.0.s8 %v733_v12 }
  0x4b   : > { %v737_v15 = vsub.s32 %v734_v13, %v1356_v48 }
  0x4c   : > { %697 = vmatpush1.bf16.msra.mxu0 %v1071_v45 }
  0x4d   : > { %698 = vmatprep.subr.bf16.mxu0 %v1072_v46 }
  0x50   : > { %699 = vmatpush1.bf16.msra.mxu0 %v1074_v49 }
  0x51   : > { %700 = vmatprep.subr.bf16.mxu0 %v1075_v50 }
  0x54   : > { %701 = vmatpush1.bf16.msra.mxu0 %v1077_v54 }
  0x55   : > { %702 = vmatprep.subr.bf16.mxu0 %v1078_v55 }
  0x58   : > { %703 = vmatpush1.bf16.msra.mxu0 %v1080_v57 }
  0x59   : > { %704 = vmatprep.subr.bf16.mxu0 %v1081_v58 }
  0x5c   : > { %705 = vmatpush2.bf16.msra.mxu0 %v1083_v59 }
  0x5d   : > { %706 = vmatprep.subr.bf16.mxu0 %v1084_v60 }
  0x60   : > { %707 = vmatpush2.bf16.msra.mxu0 %v1086_v61 }
  0x61   : > { %708 = vmatprep.subr.bf16.mxu0 %v1087_v62 }
  0x64   : > { %709 = vmatpush2.bf16.msra.mxu0 %v1089_v63 }
  0x65   : > { %710 = vmatprep.subr.bf16.mxu0 %v1090_v0 }
  0x68   : > { %711 = vmatpush2.bf16.msra.mxu0 %v1092_v1 }
  0x69   : > { %712 = vmatprep.subr.bf16.mxu0 %v1093_v2 }
  0x6c   : > { %713 = vmatpush2.bf16.msra.mxu0 %v1095_v3 }
  0x6d   : > { %714 = vmatprep.subr.bf16.mxu0 %v1096_v4 }
  0x70   : > { %715 = vmatpush2.bf16.msra.mxu0 %v1098_v5 }
  0x71   : > { %716 = vmatprep.subr.bf16.mxu0 %v1099_v6 }
  0x74   : > { %717 = vmatpush2.bf16.msra.mxu0 %v1101_v7 }
  0x75   : > { %718 = vmatprep.subr.bf16.mxu0 %v1102_v8 }
  0x78   : > { %719 = vmatpush2.bf16.msra.mxu0 %v1104_v9 }
  0x7b   : > { %721 = vmatmul.mubr.bf16.vlgmr.msra.gmra.mxu0 %v518_v10 }
 0x13b   : > { %v722_v14 = vpop.f32.mrf.mxu0 }
 0x13d   : > { %v724_v16 = vpop.f32.mrf.mxu0 }
 0x13e   : > { %v731_v17 = vcombine.low %v722_v14, %v724_v16 }
 0x13f   : > { %v726_v19 = vpop.f32.mrf.mxu0 }
 0x140   : > { %v738_v20 = vrot.slane %v731_v17, %v737_v15  ;;  %745 = sbr.rel (%p992_p13) target bundleno = 348 (0x15c), region = 82 }
 0x141   : > { %v727_v21 = vpop.f32.mrf.mxu0 }
 0x142   : > { %v740_v22 = vadd.f32 %v738_v20, %v469_v18 }
 0x144   : > { %741 = vst [vmem:[#allocation2] sm:$0xf] %v740_v22 }
 0x145   : > { %v747_v23 = vld [vmem:[%s448_s15] sm:$0x3]  ;;  %v751_v24 = vsub.s32 0, %v1356_v48  ;;  %v755_v25 = vsub.s32 1, %v1356_v48 }
 0x146   : > { %v767_v26 = vld [vmem:[%s453_s18] sm:$0x3] }
 0x147   : > { %v752_v27 = vrot.slane %v747_v23, %v751_v24  ;;  %v756_v28 = vrot.slane %v747_v23, %v755_v25  ;;  %v772_v29 = vrot.slane %v767_v26, %v751_v24  ;;  %v776_v30 = vrot.slane %v767_v26, %v755_v25 }
 0x149   : > { %v757_v31 = vcombine.low %v752_v27, %v756_v28  ;;  %v777_v32 = vcombine.low %v772_v29, %v776_v30 }
 0x14b   : > { %v746_v33 = vld [vmem:[#allocation2] sm:$0xf]  ;;  %v764_v34 = vrot.slane %v757_v31, %v737_v15  ;;  %v784_v35 = vrot.slane %v777_v32, %v737_v15 }
 0x14d   : > { %v766_v36 = vmul.f32 %v764_v34, %v746_v33 }
 0x14f   : > { %v786_v37 = vadd.f32 %v784_v35, %v766_v36 }
 0x151   : > { %v787_v38 = vmax.f32 %v786_v37, 0.0 }
 0x153   : > { %v795_v39 = vrot.slane %v787_v38, %v737_v15 }
 0x155   : > { %v796_v40 = vcombine.high %v795_v39, %v795_v39 }
 0x157   : > { %v993_v41 = vpack.c.bf16 %v796_v40, %v795_v39 }
 0x159   : > { %v810_v42 = vrot.slane %v993_v41, %v1361_v51 }
 0x15b   : > { %994 = vst.sshfl [vmem:[%s462_s10] sm:$0x5 pattern:$0x73625140] %v810_v42 }
 0x15c PF: > { %s14_s21 = sadd.s32 1, %s1159_s21   ;;  %s1435_s15 = smov %s1139_s16 }
 0x15d   : > { %p11_p0 = scmp.ge.s32.totalorder %s14_s21, 10   ;;  %s1436_s16 = smov %s1240_s28 }
 0x15e   : > { %s1437_s17 = smov %s1151_s19  ;;  %s1438_s18 = smov %s1155_s20 }
 0x15f   : > { %s1439_s19 = smov %s1442_s22  ;;  %s1440_s20 = smov %s1446_s23 }
 0x160   :  { %13 = sbr.rel (!%p11_p0) target bundleno = 4 (0x4), region = 126 }

// kernel: cnn_model_forward.33
= control target key start
LH: loop header
LB: loop body
LE: loop exit
PB: predicated region body
PF: predicated region fallthrough
CT: control target
= control target key end

     0   :  { %v100_v30 = vlaneseq  ;;  %v554_v34 = vmov 1966171168   ;;  %s681_s0 = inlined_call_operand.vmem [shape: bf16[2,512], index: 0, kind: input, shape index: {}]   ;;  %s682_s1 = inlined_call_operand.vmem [shape: bf16[512,128], index: 1, kind: input, shape index: {}]   ;;  %s683_s2 = inlined_call_operand.vmem [shape: f32[1,128], index: 2, kind: input, shape index: {}]   ;;  %s684_s3 = inlined_call_operand.hbm [shape: f32[2,128], index: 3, kind: output, shape index: {}]  }
   0x1   :  { %v496_v0 = vld [vmem:[%s682_s1 + $0x78] sm:$0xff]   ;;  %v500_v4 = vld [vmem:[%s682_s1 + $0x70] sm:$0xff]   ;;  %v504_v8 = vld [vmem:[%s682_s1 + $0x68] sm:$0xff]   ;;  %v98_v35 = vunpack.c.l.s4 %v554_v34 }
   0x2   :  { %v497_v1 = vld [vmem:[%s682_s1 + $0xf8] sm:$0xff]   ;;  %450 = vmatprep.subr.bf16.mxu0 %v496_v0  ;;  %v501_v5 = vld [vmem:[%s682_s1 + $0xf0] sm:$0xff]   ;;  %v505_v9 = vld [vmem:[%s682_s1 + $0xe8] sm:$0xff]   ;;  %v101_v36 = vshrl.u32 %v100_v30, 7 }
   0x3   :  { %v498_v2 = vld [vmem:[%s682_s1 + $0x38] sm:$0xff]   ;;  %472 = vmatprep.subr.bf16.mxu1 %v497_v1  ;;  %v502_v6 = vld [vmem:[%s682_s1 + $0x30] sm:$0xff]   ;;  %v506_v10 = vld [vmem:[%s682_s1 + $0x28] sm:$0xff]  }
   0x4   :  { %v499_v3 = vld [vmem:[%s682_s1 + $0xb8] sm:$0xff]   ;;  %451 = vmatpush3.bf16.msra.mxu0 %v498_v2  ;;  %v503_v7 = vld [vmem:[%s682_s1 + $0xb0] sm:$0xff]   ;;  %v507_v11 = vld [vmem:[%s682_s1 + $0xa8] sm:$0xff]  }
   0x5   :  { %473 = vmatpush3.bf16.msra.mxu1 %v499_v3  ;;  %452 = vmatprep.subr.bf16.mxu0 %v500_v4  ;;  %v508_v12 = vld [vmem:[%s682_s1 + $0x60] sm:$0xff]   ;;  %v512_v16 = vld [vmem:[%s682_s1 + $0x58] sm:$0xff]   ;;  %v516_v20 = vld [vmem:[%s682_s1 + $0x50] sm:$0xff]  }
   0x6   :  { %474 = vmatprep.subr.bf16.mxu1 %v501_v5  ;;  %v509_v13 = vld [vmem:[%s682_s1 + $0xe0] sm:$0xff]   ;;  %v513_v17 = vld [vmem:[%s682_s1 + $0xd8] sm:$0xff]   ;;  %v517_v21 = vld [vmem:[%s682_s1 + $0xd0] sm:$0xff]  }
   0x7   :  { %v510_v14 = vld [vmem:[%s682_s1 + $0x20] sm:$0xff]   ;;  %v514_v18 = vld [vmem:[%s682_s1 + $0x18] sm:$0xff]   ;;  %v518_v22 = vld [vmem:[%s682_s1 + $0x10] sm:$0xff]  }
   0x8   :  { %453 = vmatpush3.bf16.msra.mxu0 %v502_v6  ;;  %v511_v15 = vld [vmem:[%s682_s1 + $0xa0] sm:$0xff]   ;;  %v515_v19 = vld [vmem:[%s682_s1 + $0x98] sm:$0xff]   ;;  %v519_v23 = vld [vmem:[%s682_s1 + $0x90] sm:$0xff]  }
   0x9   :  { %475 = vmatpush3.bf16.msra.mxu1 %v503_v7  ;;  %454 = vmatprep.subr.bf16.mxu0 %v504_v8  ;;  %v520_v24 = vld [vmem:[%s682_s1 + $0x48] sm:$0xff]   ;;  %v524_v28 = vld [vmem:[%s682_s1 + $0x40] sm:$0xff]  }
   0xa   :  { %476 = vmatprep.subr.bf16.mxu1 %v505_v9  ;;  %v521_v25 = vld [vmem:[%s682_s1 + $0xc8] sm:$0xff]   ;;  %v525_v29 = vld [vmem:[%s682_s1 + $0xc0] sm:$0xff]  }
   0xb   :  { %v522_v26 = vld [vmem:[%s682_s1 + $0x8] sm:$0xff]   ;;  %v526_v31 = vld [vmem:[%s682_s1] sm:$0xff]  }
   0xc   :  { %455 = vmatpush3.bf16.msra.mxu0 %v506_v10  ;;  %v523_v27 = vld [vmem:[%s682_s1 + $0x88] sm:$0xff]   ;;  %v527_v32 = vld [vmem:[%s682_s1 + $0x80] sm:$0xff]  }
   0xd   :  { %477 = vmatpush3.bf16.msra.mxu1 %v507_v11  ;;  %456 = vmatprep.subr.bf16.mxu0 %v508_v12  ;;  %v417_v33 = vld.sshfl [vmem:[%s681_s0] sm:$0x33 pattern:$0x75316420] }
   0xe   :  { %478 = vmatprep.subr.bf16.mxu1 %v509_v13 }
  0x10   :  { %457 = vmatpush3.bf16.msra.mxu0 %v510_v14 }
  0x11   :  { %479 = vmatpush3.bf16.msra.mxu1 %v511_v15  ;;  %458 = vmatprep.subr.bf16.mxu0 %v512_v16 }
  0x12   :  { %480 = vmatprep.subr.bf16.mxu1 %v513_v17 }
  0x14   :  { %459 = vmatpush3.bf16.msra.mxu0 %v514_v18 }
  0x15   :  { %481 = vmatpush3.bf16.msra.mxu1 %v515_v19  ;;  %460 = vmatprep.subr.bf16.mxu0 %v516_v20 }
  0x16   :  { %482 = vmatprep.subr.bf16.mxu1 %v517_v21 }
  0x18   :  { %461 = vmatpush3.bf16.msra.mxu0 %v518_v22 }
  0x19   :  { %483 = vmatpush3.bf16.msra.mxu1 %v519_v23  ;;  %462 = vmatprep.subr.bf16.mxu0 %v520_v24 }
  0x1a   :  { %484 = vmatprep.subr.bf16.mxu1 %v521_v25 }
  0x1c   :  { %463 = vmatpush3.bf16.msra.mxu0 %v522_v26 }
  0x1d   :  { %485 = vmatpush3.bf16.msra.mxu1 %v523_v27  ;;  %464 = vmatprep.subr.bf16.mxu0 %v524_v28 }
  0x1e   :  { %486 = vmatprep.subr.bf16.mxu1 %v525_v29 }
  0x20   :  { %465 = vmatpush3.bf16.msra.mxu0 %v526_v31 }
  0x21   :  { %487 = vmatpush3.bf16.msra.mxu1 %v527_v32 }
  0x22   :  { %8 = vsyncpa [#allocation3], 0  ;;  %v96_v37 = vcombine.high %v417_v33, %v417_v33  ;;  %v99_v38 = vunpack.c.0.s8 %v98_v35  ;;  %v416_v46 = vld [vmem:[%s683_s2] ss:$0 sm:$0xff]  ;;  %vm389_vm0 = vcmask 1041408   ;;  %s555_s2 = smov [#allocation2]  }
  0x23   :  { %s408_s24 = sshll.u32 %s555_s2, 4  ;;  %s409_s24 = int_to_ptr.vmem [resolvable:$true] %s408_s24 }
  0x24   :  { %v102_v39 = vsub.s32 %v99_v38, %v101_v36  ;;  %s532_s25 = scalar_lea.vmem %s409_s24, 32  ;;  %p537_p1 = scmp.lt.s32.totalorder %s409_s24, %s409_s24 }
  0x25   :  { %p533_p0 = scmp.ne.s32.totalorder %s409_s24, %s532_s25  ;;  %p538_p2 = scmp.lt.s32.totalorder %s532_s25, %s532_s25 }
  0x26   :  { %v110_v40 = vrot.slane %v96_v37, %v102_v39  ;;  %v103_v41 = vrot.slane %v417_v33, %v102_v39 }
  0x27   :  { %p539_p3 = por %p538_p2, %p537_p1 }
  0x28   :  { %341 = vmatprep.mubr.bf16.mxu0 %v110_v40  ;;  %v112_v42 = vcombine.high %v110_v40, %v110_v40  ;;  %v111_v43 = vcombine.high %v103_v41, %v103_v41 }
  0x29   :  { %342 = vmatmul.mubr.bf16.vlgmr.msra.gmra.mxu0 %v103_v41  ;;  %p540_p4 = pnand %p539_p3, %p533_p0 }
  0x2a   :  { %381 = vmatprep.mubr.bf16.mxu1 %v112_v42 }
  0x2b   :  { %382 = vmatmul.mubr.bf16.vlgmr.msra.gmra.mxu1 %v111_v43 }
  0xe9   :  { %v466_v44 = vpop.f32.mrf.mxu0 }
  0xeb   :  { %v488_v45 = vpop.f32.mrf.mxu1  ;;  %v467_v47 = vpop.f32.mrf.mxu0 }
  0xec   :  { %v468_v48 = vadd.f32 %v467_v47, %v466_v44 }
  0xed   :  { %v489_v49 = vpop.f32.mrf.mxu1  ;;  %v469_v50 = vpop.f32.mrf.mxu0 }
  0xee   :  { %v344_v51 = vadd.f32 %v468_v48, %v416_v46  ;;  %v490_v52 = vadd.f32 %v489_v49, %v488_v45 }
  0xef   :  { %v491_v53 = vpop.f32.mrf.mxu1  ;;  %v470_v54 = vpop.f32.mrf.mxu0 }
  0xf0   :  { %v384_v55 = vadd.f32 %v490_v52, %v344_v51 }
  0xf1   :  { %v492_v56 = vpop.f32.mrf.mxu1 }
  0xf2   :  { %v390_v57 = vsel %vm389_vm0, %v384_v55, -inf }
  0xf3   :  { %391 = vmax.xlane.f32.xlu0 %v390_v57 }
 0x17c   :  { %v392_v58 = vpop.xlane.xlu0 %391 }
 0x17d   :  { %v393_v59 = vsub.f32 %v384_v55, %v392_v58 }
 0x17f   :  { %v394_v60 = vmul.f32 1.442695, %v393_v59 }
 0x181   :  { %528 = vpow2.f32 %v394_v60 }
 0x18e   :  { %v529_v61 = vpop.eup %528 }
 0x18f   :  { %v396_v62 = vsel %vm389_vm0, %v529_v61, 0.0 }
 0x190   :  { %397 = vadd.xlane.f32.xlu0 %v396_v62 }
 0x219   :  { %v398_v63 = vpop.xlane.xlu0 %397 }
 0x21a   :  { %530 = vrcp.f32 %v398_v63 }
 0x227   :  { %v531_v0 = vpop.eup %530 }
 0x228   :  { %v400_v1 = vmul.f32 %v531_v0, %v529_v61 }
 0x22a   :  { %401 = vst [vmem:[#allocation2] sm:$0x3] %v400_v1 }
 0x22b   :  { %543 = shalt.err (!%p540_p4)
}
 0x22c   :  { %411 = dma.vmem_to_hbm [thread:$0]  %s409_s24, 32, %s684_s3, [#allocation3]  }
 0x22d   :  { %552 = dma.done.wait [#allocation3], 32  }
 0x22e   :  { %553 = vsyncadd [#allocation3], 4294967264 }
 0x22f   :  { %415 = vsyncpa [#allocation3], 1 }

</bundles_post_ra>
